<compile_context>
chip_gen: v6e
topology: v6e:2x2x1
jax: 0.10.0
libtpu: 0.0.40
codegen_flags: <defaults>
</compile_context>

<pallas_src>
import functools

import numpy as np

import jax
import jax.numpy as jnp
from jax.experimental import pallas as pl
from jax.experimental.pallas import tpu as pltpu

_BN_EPS = 1e-5


# ----------------------------------------------------------------------------
# Pallas kernel factory: the whole discriminator in one call
# ----------------------------------------------------------------------------
def _make_netjointD_kernel(local_cfg, global_cfg):
    """local_cfg / global_cfg: tuple of (use_bn, use_lrelu) flags, one entry
    per conv layer after the first conv of that branch (last entry is the
    final projection conv: (False, False))."""

    def lrelu(y):
        return jnp.where(y > 0, y, 0.2 * y)

    def batchnorm(y):
        # train-mode batch stats over N*H*W rows, one pass (sum / sumsq),
        # biased variance, eps=1e-5, default affine (gamma=1, beta=0) omitted.
        inv_m = 1.0 / y.shape[0]
        mean = jnp.sum(y, axis=0, keepdims=True) * inv_m
        msq = jnp.sum(y * y, axis=0, keepdims=True) * inv_m
        var = msq - mean * mean
        return (y - mean) * jax.lax.rsqrt(var + _BN_EPS)

    def conv_taps(a_bf16, s_ref, w_ref):
        # a_bf16: (M_in, C_in) bf16 activation, rows row-major over (n, h, w)
        # s_ref : (T, M_out, M_in) 0/1 gather matrices (one per kernel tap)
        # w_ref : (T, C_in, C_out) per-tap weight slices
        acc = None
        for t in range(s_ref.shape[0]):
            p = jnp.dot(s_ref[t], a_bf16, preferred_element_type=jnp.float32)
            y = jnp.dot(p.astype(jnp.bfloat16), w_ref[t],
                        preferred_element_type=jnp.float32)
            acc = y if acc is None else acc + y
        return acc  # (M_out, C_out) f32

    def branch(x_ref, w1_ref, tap_refs, cfg):
        # first conv: im2col'd patches (done JAX-side on the raw input) -> GEMM
        a = lrelu(jnp.dot(x_ref[...], w1_ref[...],
                          preferred_element_type=jnp.float32))
        for (s_ref, w_ref), (use_bn, use_act) in zip(tap_refs, cfg):
            y = conv_taps(a.astype(jnp.bfloat16), s_ref, w_ref)
            if use_bn:
                y = batchnorm(y)
            if use_act:
                y = lrelu(y)
            a = y
        return a  # (N, fullyconn) f32

    n_l, n_g = len(local_cfg), len(global_cfg)

    def kernel(*refs):
        o_ref = refs[-1]
        it = iter(refs[:-1])
        xl_ref, w1l_ref = next(it), next(it)
        local_taps = [(next(it), next(it)) for _ in range(n_l)]
        xg_ref, w1g_ref = next(it), next(it)
        global_taps = [(next(it), next(it)) for _ in range(n_g)]
        wjg_ref, wjl_ref = next(it), next(it)

        feat_l = branch(xl_ref, w1l_ref, local_taps, local_cfg)
        feat_g = branch(xg_ref, w1g_ref, global_taps, global_cfg)

        # joint head: cat((global, local), dim=1) @ Wj.T == g @ Wj_g + l @ Wj_l
        logit = (jnp.dot(feat_g.astype(jnp.bfloat16), wjg_ref[...],
                         preferred_element_type=jnp.float32)
                 + jnp.dot(feat_l.astype(jnp.bfloat16), wjl_ref[...],
                           preferred_element_type=jnp.float32))
        o_ref[...] = (0.5 * (jnp.tanh(0.5 * logit) + 1.0)).astype(o_ref.dtype)

    return kernel


# ----------------------------------------------------------------------------
# JAX glue: im2col (first layers only) + precomputed gather matrices
# ----------------------------------------------------------------------------
def _im2col(x, kh, kw, stride, pad):
    # x: (N, C, H, W) -> (N*Ho*Wo, C*kh*kw), K order (ci, di, dj) matching the
    # PyTorch (C_out, C_in, kh, kw) weight flattening.
    N, C, H, W = x.shape
    if pad > 0:
        x = jnp.pad(x, ((0, 0), (0, 0), (pad, pad), (pad, pad)))
    Hp, Wp = H + 2 * pad, W + 2 * pad
    Ho = (Hp - kh) // stride + 1
    Wo = (Wp - kw) // stride + 1
    cols = []
    for di in range(kh):
        for dj in range(kw):
            cols.append(
                x[:, :, di:di + stride * Ho:stride, dj:dj + stride * Wo:stride])
    p = jnp.stack(cols, axis=2)                       # (N, C, kh*kw, Ho, Wo)
    p = p.transpose(0, 3, 4, 1, 2).reshape(N * Ho * Wo, C * kh * kw)
    return p


def _gather_mats(N, H, W, kh, kw, stride, pad):
    # per-tap 0/1 row-gather matrices: S[t, m_out, m_in] (zero rows at padding)
    Ho = (H + 2 * pad - kh) // stride + 1
    Wo = (W + 2 * pad - kw) // stride + 1
    S = np.zeros((kh * kw, N * Ho * Wo, N * H * W), np.float32)
    for di in range(kh):
        for dj in range(kw):
            t = di * kw + dj
            for n in range(N):
                for oi in range(Ho):
                    hi = oi * stride + di - pad
                    if not (0 <= hi < H):
                        continue
                    for oj in range(Wo):
                        wi = oj * stride + dj - pad
                        if 0 <= wi < W:
                            S[t, (n * Ho + oi) * Wo + oj,
                              (n * H + hi) * W + wi] = 1.0
    return S, Ho


# ----------------------------------------------------------------------------
# Model construction: replicates the PyTorch __init__ layer logic
# ----------------------------------------------------------------------------
def _branch_layer_specs(in_size, nc, nef, fullyconn, k, s, p, shrink):
    layers = [dict(cin=nc, cout=nef, k=k, s=s, p=p, bn=False, act=True)]
    csize, cnef = in_size // shrink, nef
    while csize > 4:
        layers.append(dict(cin=cnef, cout=cnef * 2, k=k, s=s, p=p,
                           bn=True, act=True))
        cnef *= 2
        csize //= shrink
    layers.append(dict(cin=cnef, cout=fullyconn, k=int(csize), s=1, p=0,
                       bn=False, act=False))
    return layers


def build_netjointD(key, *, imageSize, patch_with_margin_size, nc, nef,
                    fullyconn_size, batch):
    local_specs = _branch_layer_specs(patch_with_margin_size, nc, nef,
                                      fullyconn_size, 4, 2, 1, 2)
    global_specs = _branch_layer_specs(imageSize, nc, nef,
                                       fullyconn_size, 8, 4, 2, 4)

    keys = iter(jax.random.split(key, len(local_specs) + len(global_specs) + 1))

    def conv_w(spec):
        return 0.02 * jax.random.normal(
            next(keys), (spec["cout"], spec["cin"], spec["k"], spec["k"]),
            jnp.float32)

    local_w = [conv_w(s) for s in local_specs]
    global_w = [conv_w(s) for s in global_specs]
    wj = 0.1 * jax.random.normal(next(keys), (2 * fullyconn_size, 1), jnp.float32)

    def pack_branch(specs, weights, in_size):
        # first layer: (k, s, p) for JAX-side im2col + (K, C_out) bf16 weight
        w0 = weights[0]
        c_out, c_in, kh, _ = w0.shape
        first = dict(k=kh, s=specs[0]["s"], p=specs[0]["p"],
                     w=w0.reshape(c_out, c_in * kh * kh).T.astype(jnp.bfloat16))
        H = (in_size + 2 * specs[0]["p"] - kh) // specs[0]["s"] + 1
        taps, cfg = [], []
        for spec, w in zip(specs[1:], weights[1:]):
            S, Ho = _gather_mats(batch, H, H, spec["k"], spec["k"],
                                 spec["s"], spec["p"])
            w_t = w.transpose(2, 3, 1, 0).reshape(
                spec["k"] * spec["k"], spec["cin"], spec["cout"])
            taps.append((jnp.asarray(S, jnp.bfloat16), w_t.astype(jnp.bfloat16)))
            cfg.append((spec["bn"], spec["act"]))
            H = Ho
        return first, taps, tuple(cfg)

    l_first, l_taps, l_cfg = pack_branch(local_specs, local_w,
                                         patch_with_margin_size)
    g_first, g_taps, g_cfg = pack_branch(global_specs, global_w, imageSize)

    return dict(
        batch=batch,
        local_first=l_first, local_taps=l_taps, local_cfg=l_cfg,
        global_first=g_first, global_taps=g_taps, global_cfg=g_cfg,
        wj_g=wj[:fullyconn_size].astype(jnp.bfloat16),
        wj_l=wj[fullyconn_size:].astype(jnp.bfloat16),
        ref=dict(local_specs=local_specs, local_w=local_w,
                 global_specs=global_specs, global_w=global_w, wj=wj),
    )


# ----------------------------------------------------------------------------
# Forward: one fused pallas_call
# ----------------------------------------------------------------------------
def netjointD_forward(model, input_center, input_real):
    N = model["batch"]
    lf, gf = model["local_first"], model["global_first"]
    xl = _im2col(input_center, lf["k"], lf["k"], lf["s"], lf["p"]).astype(jnp.bfloat16)
    xg = _im2col(input_real, gf["k"], gf["k"], gf["s"], gf["p"]).astype(jnp.bfloat16)

    args = [xl, lf["w"]]
    for S, W in model["local_taps"]:
        args += [S, W]
    args += [xg, gf["w"]]
    for S, W in model["global_taps"]:
        args += [S, W]
    args += [model["wj_g"], model["wj_l"]]

    kernel = _make_netjointD_kernel(model["local_cfg"], model["global_cfg"])

    def full_spec(a):
        return pl.BlockSpec(a.shape, lambda i, _nd=a.ndim: (0,) * _nd)

    return pl.pallas_call(
        kernel,
        out_shape=jax.ShapeDtypeStruct((N, 1), jnp.float32),
        grid=(1,),
        in_specs=[full_spec(a) for a in args],
        out_specs=pl.BlockSpec((N, 1), lambda i: (0, 0)),
        compiler_params=pltpu.CompilerParams(
            dimension_semantics=("arbitrary",)),
    )(*args)


# ----------------------------------------------------------------------------
# Pure-JAX f32 reference (lax.conv) for a correctness check
# ----------------------------------------------------------------------------
def _reference_forward(model, input_center, input_real):
    ref = model["ref"]

    def run_branch(x, specs, weights):
        for spec, w in zip(specs, weights):
            x = jax.lax.conv_general_dilated(
                x, w, window_strides=(spec["s"], spec["s"]),
                padding=((spec["p"], spec["p"]), (spec["p"], spec["p"])),
                dimension_numbers=("NCHW", "OIHW", "NCHW"))
            if spec["bn"]:
                mean = jnp.mean(x, axis=(0, 2, 3), keepdims=True)
                var = jnp.mean(jnp.square(x - mean), axis=(0, 2, 3), keepdims=True)
                x = (x - mean) * jax.lax.rsqrt(var + _BN_EPS)
            if spec["act"]:
                x = jnp.where(x > 0, x, 0.2 * x)
        return x.reshape(x.shape[0], -1)

    feat_l = run_branch(input_center, ref["local_specs"], ref["local_w"])
    feat_g = run_branch(input_real, ref["global_specs"], ref["global_w"])
    logit = jnp.concatenate([feat_g, feat_l], axis=1) @ ref["wj"]
    return jax.nn.sigmoid(logit)


if __name__ == "__main__":
    imageSize, patch_with_margin_size = 32, 16
    nc, nef, fullyconn_size, batch = 3, 8, 32, 2

    key = jax.random.PRNGKey(0)
    k_c, k_r, k_w = jax.random.split(key, 3)
    input_center = jax.random.normal(
        k_c, (batch, nc, patch_with_margin_size, patch_with_margin_size),
        jnp.float32)
    input_real = jax.random.normal(
        k_r, (batch, nc, imageSize, imageSize), jnp.float32)

    model = build_netjointD(
        k_w, imageSize=imageSize,
        patch_with_margin_size=patch_with_margin_size,
        nc=nc, nef=nef, fullyconn_size=fullyconn_size, batch=batch)

    fwd = jax.jit(functools.partial(netjointD_forward, model))
    out = jax.block_until_ready(fwd(input_center, input_real))

    assert out.shape == (batch, 1), out.shape
    assert bool(jnp.all(jnp.isfinite(out)))
    assert bool(jnp.all((out > 0.0) & (out < 1.0)))        # sigmoid range

    ref_out = _reference_forward(model, input_center, input_real)
    assert bool(jnp.max(jnp.abs(out - ref_out)) < 5e-2), (out, ref_out)

    print("KERNEL_OK")
</pallas_src>

<mosaic_0001>
module attributes {stable_mosaic.version = 11 : i64} {
  func.func @kernel(%arg0: i32, %arg1: memref<128x48xbf16, #tpu.memory_space<vmem>>, %arg2: memref<48x8xbf16, #tpu.memory_space<vmem>>, %arg3: memref<16x32x128xbf16, #tpu.memory_space<vmem>>, %arg4: memref<16x8x16xbf16, #tpu.memory_space<vmem>>, %arg5: memref<16x2x32xbf16, #tpu.memory_space<vmem>>, %arg6: memref<16x16x32xbf16, #tpu.memory_space<vmem>>, %arg7: memref<128x192xbf16, #tpu.memory_space<vmem>>, %arg8: memref<192x8xbf16, #tpu.memory_space<vmem>>, %arg9: memref<64x8x128xbf16, #tpu.memory_space<vmem>>, %arg10: memref<64x8x16xbf16, #tpu.memory_space<vmem>>, %arg11: memref<4x2x8xbf16, #tpu.memory_space<vmem>>, %arg12: memref<4x16x32xbf16, #tpu.memory_space<vmem>>, %arg13: memref<32x1xbf16, #tpu.memory_space<vmem>>, %arg14: memref<32x1xbf16, #tpu.memory_space<vmem>>, %arg15: memref<2x1xf32, #tpu.memory_space<vmem>>) attributes {dimension_semantics = [#tpu.dimension_semantics<arbitrary>], iteration_bounds = array<i64: 1>, scalar_prefetch = 0 : i64, scratch_operands = 0 : i64, tpu.core_type = #tpu.core_type<tc>, window_params = [{pipeline_mode = #tpu.pipeline_mode<synchronous>, transform_indices = @transform_0, window_bounds = array<i64: 128, 48>}, {pipeline_mode = #tpu.pipeline_mode<synchronous>, transform_indices = @transform_1, window_bounds = array<i64: 48, 8>}, {pipeline_mode = #tpu.pipeline_mode<synchronous>, transform_indices = @transform_2, window_bounds = array<i64: 16, 32, 128>}, {pipeline_mode = #tpu.pipeline_mode<synchronous>, transform_indices = @transform_3, window_bounds = array<i64: 16, 8, 16>}, {pipeline_mode = #tpu.pipeline_mode<synchronous>, transform_indices = @transform_4, window_bounds = array<i64: 16, 2, 32>}, {pipeline_mode = #tpu.pipeline_mode<synchronous>, transform_indices = @transform_5, window_bounds = array<i64: 16, 16, 32>}, {pipeline_mode = #tpu.pipeline_mode<synchronous>, transform_indices = @transform_6, window_bounds = array<i64: 128, 192>}, {pipeline_mode = #tpu.pipeline_mode<synchronous>, transform_indices = @transform_7, window_bounds = array<i64: 192, 8>}, {pipeline_mode = #tpu.pipeline_mode<synchronous>, transform_indices = @transform_8, window_bounds = array<i64: 64, 8, 128>}, {pipeline_mode = #tpu.pipeline_mode<synchronous>, transform_indices = @transform_9, window_bounds = array<i64: 64, 8, 16>}, {pipeline_mode = #tpu.pipeline_mode<synchronous>, transform_indices = @transform_10, window_bounds = array<i64: 4, 2, 8>}, {pipeline_mode = #tpu.pipeline_mode<synchronous>, transform_indices = @transform_11, window_bounds = array<i64: 4, 16, 32>}, {pipeline_mode = #tpu.pipeline_mode<synchronous>, transform_indices = @transform_12, window_bounds = array<i64: 32, 1>}, {pipeline_mode = #tpu.pipeline_mode<synchronous>, transform_indices = @transform_13, window_bounds = array<i64: 32, 1>}, {pipeline_mode = #tpu.pipeline_mode<synchronous>, transform_indices = @transform_14, window_bounds = array<i64: 2, 1>}]} {
    %c0 = arith.constant 0 : index
    %c0_0 = arith.constant 0 : index
    %0 = vector.load %arg1[%c0, %c0_0] : memref<128x48xbf16, #tpu.memory_space<vmem>>, vector<128x48xbf16>
    %c0_1 = arith.constant 0 : index
    %c0_2 = arith.constant 0 : index
    %1 = vector.load %arg2[%c0_1, %c0_2] : memref<48x8xbf16, #tpu.memory_space<vmem>>, vector<48x8xbf16>
    %cst = arith.constant dense<0.000000e+00> : vector<128x8xf32>
    %2 = tpu.matmul %0, %1, %cst {dimension_numbers = #tpu.dot_dimension_numbers<[1], [0], [0], [1], [0, 0, 1, 1], [], []>} : vector<128x48xbf16>, vector<48x8xbf16>, vector<128x8xf32> -> vector<128x8xf32>
    %cst_3 = arith.constant 0.000000e+00 : f32
    %3 = vector.broadcast %cst_3 : f32 to vector<128x8xf32>
    %4 = arith.cmpf ogt, %2, %3 : vector<128x8xf32>
    %cst_4 = arith.constant 2.000000e-01 : f32
    %5 = vector.broadcast %cst_4 : f32 to vector<128x8xf32>
    %6 = arith.mulf %5, %2 : vector<128x8xf32>
    %7 = arith.select %4, %2, %6 : vector<128x8xi1>, vector<128x8xf32>
    %8 = arith.truncf %7 : vector<128x8xf32> to vector<128x8xbf16>
    %c0_5 = arith.constant 0 : index
    %c0_6 = arith.constant 0 : index
    %c0_7 = arith.constant 0 : index
    %9 = vector.load %arg3[%c0_5, %c0_6, %c0_7] : memref<16x32x128xbf16, #tpu.memory_space<vmem>>, vector<1x32x128xbf16>
    %10 = vector.shape_cast %9 : vector<1x32x128xbf16> to vector<32x128xbf16>
    %cst_8 = arith.constant dense<0.000000e+00> : vector<32x8xf32>
    %11 = tpu.matmul %10, %8, %cst_8 {dimension_numbers = #tpu.dot_dimension_numbers<[1], [0], [0], [1], [0, 0, 1, 1], [], []>} : vector<32x128xbf16>, vector<128x8xbf16>, vector<32x8xf32> -> vector<32x8xf32>
    %12 = arith.truncf %11 : vector<32x8xf32> to vector<32x8xbf16>
    %c0_9 = arith.constant 0 : index
    %c0_10 = arith.constant 0 : index
    %c0_11 = arith.constant 0 : index
    %13 = vector.load %arg4[%c0_9, %c0_10, %c0_11] : memref<16x8x16xbf16, #tpu.memory_space<vmem>>, vector<1x8x16xbf16>
    %14 = vector.shape_cast %13 : vector<1x8x16xbf16> to vector<8x16xbf16>
    %cst_12 = arith.constant dense<0.000000e+00> : vector<32x16xf32>
    %15 = tpu.matmul %12, %14, %cst_12 {dimension_numbers = #tpu.dot_dimension_numbers<[1], [0], [0], [1], [0, 0, 1, 1], [], []>} : vector<32x8xbf16>, vector<8x16xbf16>, vector<32x16xf32> -> vector<32x16xf32>
    %c1 = arith.constant 1 : index
    %c0_13 = arith.constant 0 : index
    %c0_14 = arith.constant 0 : index
    %16 = vector.load %arg3[%c1, %c0_13, %c0_14] : memref<16x32x128xbf16, #tpu.memory_space<vmem>>, vector<1x32x128xbf16>
    %17 = vector.shape_cast %16 : vector<1x32x128xbf16> to vector<32x128xbf16>
    %cst_15 = arith.constant dense<0.000000e+00> : vector<32x8xf32>
    %18 = tpu.matmul %17, %8, %cst_15 {dimension_numbers = #tpu.dot_dimension_numbers<[1], [0], [0], [1], [0, 0, 1, 1], [], []>} : vector<32x128xbf16>, vector<128x8xbf16>, vector<32x8xf32> -> vector<32x8xf32>
    %19 = arith.truncf %18 : vector<32x8xf32> to vector<32x8xbf16>
    %c1_16 = arith.constant 1 : index
    %c0_17 = arith.constant 0 : index
    %c0_18 = arith.constant 0 : index
    %20 = vector.load %arg4[%c1_16, %c0_17, %c0_18] : memref<16x8x16xbf16, #tpu.memory_space<vmem>>, vector<1x8x16xbf16>
    %21 = vector.shape_cast %20 : vector<1x8x16xbf16> to vector<8x16xbf16>
    %cst_19 = arith.constant dense<0.000000e+00> : vector<32x16xf32>
    %22 = tpu.matmul %19, %21, %cst_19 {dimension_numbers = #tpu.dot_dimension_numbers<[1], [0], [0], [1], [0, 0, 1, 1], [], []>} : vector<32x8xbf16>, vector<8x16xbf16>, vector<32x16xf32> -> vector<32x16xf32>
    %23 = arith.addf %15, %22 : vector<32x16xf32>
    %c2 = arith.constant 2 : index
    %c0_20 = arith.constant 0 : index
    %c0_21 = arith.constant 0 : index
    %24 = vector.load %arg3[%c2, %c0_20, %c0_21] : memref<16x32x128xbf16, #tpu.memory_space<vmem>>, vector<1x32x128xbf16>
    %25 = vector.shape_cast %24 : vector<1x32x128xbf16> to vector<32x128xbf16>
    %cst_22 = arith.constant dense<0.000000e+00> : vector<32x8xf32>
    %26 = tpu.matmul %25, %8, %cst_22 {dimension_numbers = #tpu.dot_dimension_numbers<[1], [0], [0], [1], [0, 0, 1, 1], [], []>} : vector<32x128xbf16>, vector<128x8xbf16>, vector<32x8xf32> -> vector<32x8xf32>
    %27 = arith.truncf %26 : vector<32x8xf32> to vector<32x8xbf16>
    %c2_23 = arith.constant 2 : index
    %c0_24 = arith.constant 0 : index
    %c0_25 = arith.constant 0 : index
    %28 = vector.load %arg4[%c2_23, %c0_24, %c0_25] : memref<16x8x16xbf16, #tpu.memory_space<vmem>>, vector<1x8x16xbf16>
    %29 = vector.shape_cast %28 : vector<1x8x16xbf16> to vector<8x16xbf16>
    %cst_26 = arith.constant dense<0.000000e+00> : vector<32x16xf32>
    %30 = tpu.matmul %27, %29, %cst_26 {dimension_numbers = #tpu.dot_dimension_numbers<[1], [0], [0], [1], [0, 0, 1, 1], [], []>} : vector<32x8xbf16>, vector<8x16xbf16>, vector<32x16xf32> -> vector<32x16xf32>
    %31 = arith.addf %23, %30 : vector<32x16xf32>
    %c3 = arith.constant 3 : index
    %c0_27 = arith.constant 0 : index
    %c0_28 = arith.constant 0 : index
    %32 = vector.load %arg3[%c3, %c0_27, %c0_28] : memref<16x32x128xbf16, #tpu.memory_space<vmem>>, vector<1x32x128xbf16>
    %33 = vector.shape_cast %32 : vector<1x32x128xbf16> to vector<32x128xbf16>
    %cst_29 = arith.constant dense<0.000000e+00> : vector<32x8xf32>
    %34 = tpu.matmul %33, %8, %cst_29 {dimension_numbers = #tpu.dot_dimension_numbers<[1], [0], [0], [1], [0, 0, 1, 1], [], []>} : vector<32x128xbf16>, vector<128x8xbf16>, vector<32x8xf32> -> vector<32x8xf32>
    %35 = arith.truncf %34 : vector<32x8xf32> to vector<32x8xbf16>
    %c3_30 = arith.constant 3 : index
    %c0_31 = arith.constant 0 : index
    %c0_32 = arith.constant 0 : index
    %36 = vector.load %arg4[%c3_30, %c0_31, %c0_32] : memref<16x8x16xbf16, #tpu.memory_space<vmem>>, vector<1x8x16xbf16>
    %37 = vector.shape_cast %36 : vector<1x8x16xbf16> to vector<8x16xbf16>
    %cst_33 = arith.constant dense<0.000000e+00> : vector<32x16xf32>
    %38 = tpu.matmul %35, %37, %cst_33 {dimension_numbers = #tpu.dot_dimension_numbers<[1], [0], [0], [1], [0, 0, 1, 1], [], []>} : vector<32x8xbf16>, vector<8x16xbf16>, vector<32x16xf32> -> vector<32x16xf32>
    %39 = arith.addf %31, %38 : vector<32x16xf32>
    %c4 = arith.constant 4 : index
    %c0_34 = arith.constant 0 : index
    %c0_35 = arith.constant 0 : index
    %40 = vector.load %arg3[%c4, %c0_34, %c0_35] : memref<16x32x128xbf16, #tpu.memory_space<vmem>>, vector<1x32x128xbf16>
    %41 = vector.shape_cast %40 : vector<1x32x128xbf16> to vector<32x128xbf16>
    %cst_36 = arith.constant dense<0.000000e+00> : vector<32x8xf32>
    %42 = tpu.matmul %41, %8, %cst_36 {dimension_numbers = #tpu.dot_dimension_numbers<[1], [0], [0], [1], [0, 0, 1, 1], [], []>} : vector<32x128xbf16>, vector<128x8xbf16>, vector<32x8xf32> -> vector<32x8xf32>
    %43 = arith.truncf %42 : vector<32x8xf32> to vector<32x8xbf16>
    %c4_37 = arith.constant 4 : index
    %c0_38 = arith.constant 0 : index
    %c0_39 = arith.constant 0 : index
    %44 = vector.load %arg4[%c4_37, %c0_38, %c0_39] : memref<16x8x16xbf16, #tpu.memory_space<vmem>>, vector<1x8x16xbf16>
    %45 = vector.shape_cast %44 : vector<1x8x16xbf16> to vector<8x16xbf16>
    %cst_40 = arith.constant dense<0.000000e+00> : vector<32x16xf32>
    %46 = tpu.matmul %43, %45, %cst_40 {dimension_numbers = #tpu.dot_dimension_numbers<[1], [0], [0], [1], [0, 0, 1, 1], [], []>} : vector<32x8xbf16>, vector<8x16xbf16>, vector<32x16xf32> -> vector<32x16xf32>
    %47 = arith.addf %39, %46 : vector<32x16xf32>
    %c5 = arith.constant 5 : index
    %c0_41 = arith.constant 0 : index
    %c0_42 = arith.constant 0 : index
    %48 = vector.load %arg3[%c5, %c0_41, %c0_42] : memref<16x32x128xbf16, #tpu.memory_space<vmem>>, vector<1x32x128xbf16>
    %49 = vector.shape_cast %48 : vector<1x32x128xbf16> to vector<32x128xbf16>
    %cst_43 = arith.constant dense<0.000000e+00> : vector<32x8xf32>
    %50 = tpu.matmul %49, %8, %cst_43 {dimension_numbers = #tpu.dot_dimension_numbers<[1], [0], [0], [1], [0, 0, 1, 1], [], []>} : vector<32x128xbf16>, vector<128x8xbf16>, vector<32x8xf32> -> vector<32x8xf32>
    %51 = arith.truncf %50 : vector<32x8xf32> to vector<32x8xbf16>
    %c5_44 = arith.constant 5 : index
    %c0_45 = arith.constant 0 : index
    %c0_46 = arith.constant 0 : index
    %52 = vector.load %arg4[%c5_44, %c0_45, %c0_46] : memref<16x8x16xbf16, #tpu.memory_space<vmem>>, vector<1x8x16xbf16>
    %53 = vector.shape_cast %52 : vector<1x8x16xbf16> to vector<8x16xbf16>
    %cst_47 = arith.constant dense<0.000000e+00> : vector<32x16xf32>
    %54 = tpu.matmul %51, %53, %cst_47 {dimension_numbers = #tpu.dot_dimension_numbers<[1], [0], [0], [1], [0, 0, 1, 1], [], []>} : vector<32x8xbf16>, vector<8x16xbf16>, vector<32x16xf32> -> vector<32x16xf32>
    %55 = arith.addf %47, %54 : vector<32x16xf32>
    %c6 = arith.constant 6 : index
    %c0_48 = arith.constant 0 : index
    %c0_49 = arith.constant 0 : index
    %56 = vector.load %arg3[%c6, %c0_48, %c0_49] : memref<16x32x128xbf16, #tpu.memory_space<vmem>>, vector<1x32x128xbf16>
    %57 = vector.shape_cast %56 : vector<1x32x128xbf16> to vector<32x128xbf16>
    %cst_50 = arith.constant dense<0.000000e+00> : vector<32x8xf32>
    %58 = tpu.matmul %57, %8, %cst_50 {dimension_numbers = #tpu.dot_dimension_numbers<[1], [0], [0], [1], [0, 0, 1, 1], [], []>} : vector<32x128xbf16>, vector<128x8xbf16>, vector<32x8xf32> -> vector<32x8xf32>
    %59 = arith.truncf %58 : vector<32x8xf32> to vector<32x8xbf16>
    %c6_51 = arith.constant 6 : index
    %c0_52 = arith.constant 0 : index
    %c0_53 = arith.constant 0 : index
    %60 = vector.load %arg4[%c6_51, %c0_52, %c0_53] : memref<16x8x16xbf16, #tpu.memory_space<vmem>>, vector<1x8x16xbf16>
    %61 = vector.shape_cast %60 : vector<1x8x16xbf16> to vector<8x16xbf16>
    %cst_54 = arith.constant dense<0.000000e+00> : vector<32x16xf32>
    %62 = tpu.matmul %59, %61, %cst_54 {dimension_numbers = #tpu.dot_dimension_numbers<[1], [0], [0], [1], [0, 0, 1, 1], [], []>} : vector<32x8xbf16>, vector<8x16xbf16>, vector<32x16xf32> -> vector<32x16xf32>
    %63 = arith.addf %55, %62 : vector<32x16xf32>
    %c7 = arith.constant 7 : index
    %c0_55 = arith.constant 0 : index
    %c0_56 = arith.constant 0 : index
    %64 = vector.load %arg3[%c7, %c0_55, %c0_56] : memref<16x32x128xbf16, #tpu.memory_space<vmem>>, vector<1x32x128xbf16>
    %65 = vector.shape_cast %64 : vector<1x32x128xbf16> to vector<32x128xbf16>
    %cst_57 = arith.constant dense<0.000000e+00> : vector<32x8xf32>
    %66 = tpu.matmul %65, %8, %cst_57 {dimension_numbers = #tpu.dot_dimension_numbers<[1], [0], [0], [1], [0, 0, 1, 1], [], []>} : vector<32x128xbf16>, vector<128x8xbf16>, vector<32x8xf32> -> vector<32x8xf32>
    %67 = arith.truncf %66 : vector<32x8xf32> to vector<32x8xbf16>
    %c7_58 = arith.constant 7 : index
    %c0_59 = arith.constant 0 : index
    %c0_60 = arith.constant 0 : index
    %68 = vector.load %arg4[%c7_58, %c0_59, %c0_60] : memref<16x8x16xbf16, #tpu.memory_space<vmem>>, vector<1x8x16xbf16>
    %69 = vector.shape_cast %68 : vector<1x8x16xbf16> to vector<8x16xbf16>
    %cst_61 = arith.constant dense<0.000000e+00> : vector<32x16xf32>
    %70 = tpu.matmul %67, %69, %cst_61 {dimension_numbers = #tpu.dot_dimension_numbers<[1], [0], [0], [1], [0, 0, 1, 1], [], []>} : vector<32x8xbf16>, vector<8x16xbf16>, vector<32x16xf32> -> vector<32x16xf32>
    %71 = arith.addf %63, %70 : vector<32x16xf32>
    %c8 = arith.constant 8 : index
    %c0_62 = arith.constant 0 : index
    %c0_63 = arith.constant 0 : index
    %72 = vector.load %arg3[%c8, %c0_62, %c0_63] : memref<16x32x128xbf16, #tpu.memory_space<vmem>>, vector<1x32x128xbf16>
    %73 = vector.shape_cast %72 : vector<1x32x128xbf16> to vector<32x128xbf16>
    %cst_64 = arith.constant dense<0.000000e+00> : vector<32x8xf32>
    %74 = tpu.matmul %73, %8, %cst_64 {dimension_numbers = #tpu.dot_dimension_numbers<[1], [0], [0], [1], [0, 0, 1, 1], [], []>} : vector<32x128xbf16>, vector<128x8xbf16>, vector<32x8xf32> -> vector<32x8xf32>
    %75 = arith.truncf %74 : vector<32x8xf32> to vector<32x8xbf16>
    %c8_65 = arith.constant 8 : index
    %c0_66 = arith.constant 0 : index
    %c0_67 = arith.constant 0 : index
    %76 = vector.load %arg4[%c8_65, %c0_66, %c0_67] : memref<16x8x16xbf16, #tpu.memory_space<vmem>>, vector<1x8x16xbf16>
    %77 = vector.shape_cast %76 : vector<1x8x16xbf16> to vector<8x16xbf16>
    %cst_68 = arith.constant dense<0.000000e+00> : vector<32x16xf32>
    %78 = tpu.matmul %75, %77, %cst_68 {dimension_numbers = #tpu.dot_dimension_numbers<[1], [0], [0], [1], [0, 0, 1, 1], [], []>} : vector<32x8xbf16>, vector<8x16xbf16>, vector<32x16xf32> -> vector<32x16xf32>
    %79 = arith.addf %71, %78 : vector<32x16xf32>
    %c9 = arith.constant 9 : index
    %c0_69 = arith.constant 0 : index
    %c0_70 = arith.constant 0 : index
    %80 = vector.load %arg3[%c9, %c0_69, %c0_70] : memref<16x32x128xbf16, #tpu.memory_space<vmem>>, vector<1x32x128xbf16>
    %81 = vector.shape_cast %80 : vector<1x32x128xbf16> to vector<32x128xbf16>
    %cst_71 = arith.constant dense<0.000000e+00> : vector<32x8xf32>
    %82 = tpu.matmul %81, %8, %cst_71 {dimension_numbers = #tpu.dot_dimension_numbers<[1], [0], [0], [1], [0, 0, 1, 1], [], []>} : vector<32x128xbf16>, vector<128x8xbf16>, vector<32x8xf32> -> vector<32x8xf32>
    %83 = arith.truncf %82 : vector<32x8xf32> to vector<32x8xbf16>
    %c9_72 = arith.constant 9 : index
    %c0_73 = arith.constant 0 : index
    %c0_74 = arith.constant 0 : index
    %84 = vector.load %arg4[%c9_72, %c0_73, %c0_74] : memref<16x8x16xbf16, #tpu.memory_space<vmem>>, vector<1x8x16xbf16>
    %85 = vector.shape_cast %84 : vector<1x8x16xbf16> to vector<8x16xbf16>
    %cst_75 = arith.constant dense<0.000000e+00> : vector<32x16xf32>
    %86 = tpu.matmul %83, %85, %cst_75 {dimension_numbers = #tpu.dot_dimension_numbers<[1], [0], [0], [1], [0, 0, 1, 1], [], []>} : vector<32x8xbf16>, vector<8x16xbf16>, vector<32x16xf32> -> vector<32x16xf32>
    %87 = arith.addf %79, %86 : vector<32x16xf32>
    %c10 = arith.constant 10 : index
    %c0_76 = arith.constant 0 : index
    %c0_77 = arith.constant 0 : index
    %88 = vector.load %arg3[%c10, %c0_76, %c0_77] : memref<16x32x128xbf16, #tpu.memory_space<vmem>>, vector<1x32x128xbf16>
    %89 = vector.shape_cast %88 : vector<1x32x128xbf16> to vector<32x128xbf16>
    %cst_78 = arith.constant dense<0.000000e+00> : vector<32x8xf32>
    %90 = tpu.matmul %89, %8, %cst_78 {dimension_numbers = #tpu.dot_dimension_numbers<[1], [0], [0], [1], [0, 0, 1, 1], [], []>} : vector<32x128xbf16>, vector<128x8xbf16>, vector<32x8xf32> -> vector<32x8xf32>
    %91 = arith.truncf %90 : vector<32x8xf32> to vector<32x8xbf16>
    %c10_79 = arith.constant 10 : index
    %c0_80 = arith.constant 0 : index
    %c0_81 = arith.constant 0 : index
    %92 = vector.load %arg4[%c10_79, %c0_80, %c0_81] : memref<16x8x16xbf16, #tpu.memory_space<vmem>>, vector<1x8x16xbf16>
    %93 = vector.shape_cast %92 : vector<1x8x16xbf16> to vector<8x16xbf16>
    %cst_82 = arith.constant dense<0.000000e+00> : vector<32x16xf32>
    %94 = tpu.matmul %91, %93, %cst_82 {dimension_numbers = #tpu.dot_dimension_numbers<[1], [0], [0], [1], [0, 0, 1, 1], [], []>} : vector<32x8xbf16>, vector<8x16xbf16>, vector<32x16xf32> -> vector<32x16xf32>
    %95 = arith.addf %87, %94 : vector<32x16xf32>
    %c11 = arith.constant 11 : index
    %c0_83 = arith.constant 0 : index
    %c0_84 = arith.constant 0 : index
    %96 = vector.load %arg3[%c11, %c0_83, %c0_84] : memref<16x32x128xbf16, #tpu.memory_space<vmem>>, vector<1x32x128xbf16>
    %97 = vector.shape_cast %96 : vector<1x32x128xbf16> to vector<32x128xbf16>
    %cst_85 = arith.constant dense<0.000000e+00> : vector<32x8xf32>
    %98 = tpu.matmul %97, %8, %cst_85 {dimension_numbers = #tpu.dot_dimension_numbers<[1], [0], [0], [1], [0, 0, 1, 1], [], []>} : vector<32x128xbf16>, vector<128x8xbf16>, vector<32x8xf32> -> vector<32x8xf32>
    %99 = arith.truncf %98 : vector<32x8xf32> to vector<32x8xbf16>
    %c11_86 = arith.constant 11 : index
    %c0_87 = arith.constant 0 : index
    %c0_88 = arith.constant 0 : index
    %100 = vector.load %arg4[%c11_86, %c0_87, %c0_88] : memref<16x8x16xbf16, #tpu.memory_space<vmem>>, vector<1x8x16xbf16>
    %101 = vector.shape_cast %100 : vector<1x8x16xbf16> to vector<8x16xbf16>
    %cst_89 = arith.constant dense<0.000000e+00> : vector<32x16xf32>
    %102 = tpu.matmul %99, %101, %cst_89 {dimension_numbers = #tpu.dot_dimension_numbers<[1], [0], [0], [1], [0, 0, 1, 1], [], []>} : vector<32x8xbf16>, vector<8x16xbf16>, vector<32x16xf32> -> vector<32x16xf32>
    %103 = arith.addf %95, %102 : vector<32x16xf32>
    %c12 = arith.constant 12 : index
    %c0_90 = arith.constant 0 : index
    %c0_91 = arith.constant 0 : index
    %104 = vector.load %arg3[%c12, %c0_90, %c0_91] : memref<16x32x128xbf16, #tpu.memory_space<vmem>>, vector<1x32x128xbf16>
    %105 = vector.shape_cast %104 : vector<1x32x128xbf16> to vector<32x128xbf16>
    %cst_92 = arith.constant dense<0.000000e+00> : vector<32x8xf32>
    %106 = tpu.matmul %105, %8, %cst_92 {dimension_numbers = #tpu.dot_dimension_numbers<[1], [0], [0], [1], [0, 0, 1, 1], [], []>} : vector<32x128xbf16>, vector<128x8xbf16>, vector<32x8xf32> -> vector<32x8xf32>
    %107 = arith.truncf %106 : vector<32x8xf32> to vector<32x8xbf16>
    %c12_93 = arith.constant 12 : index
    %c0_94 = arith.constant 0 : index
    %c0_95 = arith.constant 0 : index
    %108 = vector.load %arg4[%c12_93, %c0_94, %c0_95] : memref<16x8x16xbf16, #tpu.memory_space<vmem>>, vector<1x8x16xbf16>
    %109 = vector.shape_cast %108 : vector<1x8x16xbf16> to vector<8x16xbf16>
    %cst_96 = arith.constant dense<0.000000e+00> : vector<32x16xf32>
    %110 = tpu.matmul %107, %109, %cst_96 {dimension_numbers = #tpu.dot_dimension_numbers<[1], [0], [0], [1], [0, 0, 1, 1], [], []>} : vector<32x8xbf16>, vector<8x16xbf16>, vector<32x16xf32> -> vector<32x16xf32>
    %111 = arith.addf %103, %110 : vector<32x16xf32>
    %c13 = arith.constant 13 : index
    %c0_97 = arith.constant 0 : index
    %c0_98 = arith.constant 0 : index
    %112 = vector.load %arg3[%c13, %c0_97, %c0_98] : memref<16x32x128xbf16, #tpu.memory_space<vmem>>, vector<1x32x128xbf16>
    %113 = vector.shape_cast %112 : vector<1x32x128xbf16> to vector<32x128xbf16>
    %cst_99 = arith.constant dense<0.000000e+00> : vector<32x8xf32>
    %114 = tpu.matmul %113, %8, %cst_99 {dimension_numbers = #tpu.dot_dimension_numbers<[1], [0], [0], [1], [0, 0, 1, 1], [], []>} : vector<32x128xbf16>, vector<128x8xbf16>, vector<32x8xf32> -> vector<32x8xf32>
    %115 = arith.truncf %114 : vector<32x8xf32> to vector<32x8xbf16>
    %c13_100 = arith.constant 13 : index
    %c0_101 = arith.constant 0 : index
    %c0_102 = arith.constant 0 : index
    %116 = vector.load %arg4[%c13_100, %c0_101, %c0_102] : memref<16x8x16xbf16, #tpu.memory_space<vmem>>, vector<1x8x16xbf16>
    %117 = vector.shape_cast %116 : vector<1x8x16xbf16> to vector<8x16xbf16>
    %cst_103 = arith.constant dense<0.000000e+00> : vector<32x16xf32>
    %118 = tpu.matmul %115, %117, %cst_103 {dimension_numbers = #tpu.dot_dimension_numbers<[1], [0], [0], [1], [0, 0, 1, 1], [], []>} : vector<32x8xbf16>, vector<8x16xbf16>, vector<32x16xf32> -> vector<32x16xf32>
    %119 = arith.addf %111, %118 : vector<32x16xf32>
    %c14 = arith.constant 14 : index
    %c0_104 = arith.constant 0 : index
    %c0_105 = arith.constant 0 : index
    %120 = vector.load %arg3[%c14, %c0_104, %c0_105] : memref<16x32x128xbf16, #tpu.memory_space<vmem>>, vector<1x32x128xbf16>
    %121 = vector.shape_cast %120 : vector<1x32x128xbf16> to vector<32x128xbf16>
    %cst_106 = arith.constant dense<0.000000e+00> : vector<32x8xf32>
    %122 = tpu.matmul %121, %8, %cst_106 {dimension_numbers = #tpu.dot_dimension_numbers<[1], [0], [0], [1], [0, 0, 1, 1], [], []>} : vector<32x128xbf16>, vector<128x8xbf16>, vector<32x8xf32> -> vector<32x8xf32>
    %123 = arith.truncf %122 : vector<32x8xf32> to vector<32x8xbf16>
    %c14_107 = arith.constant 14 : index
    %c0_108 = arith.constant 0 : index
    %c0_109 = arith.constant 0 : index
    %124 = vector.load %arg4[%c14_107, %c0_108, %c0_109] : memref<16x8x16xbf16, #tpu.memory_space<vmem>>, vector<1x8x16xbf16>
    %125 = vector.shape_cast %124 : vector<1x8x16xbf16> to vector<8x16xbf16>
    %cst_110 = arith.constant dense<0.000000e+00> : vector<32x16xf32>
    %126 = tpu.matmul %123, %125, %cst_110 {dimension_numbers = #tpu.dot_dimension_numbers<[1], [0], [0], [1], [0, 0, 1, 1], [], []>} : vector<32x8xbf16>, vector<8x16xbf16>, vector<32x16xf32> -> vector<32x16xf32>
    %127 = arith.addf %119, %126 : vector<32x16xf32>
    %c15 = arith.constant 15 : index
    %c0_111 = arith.constant 0 : index
    %c0_112 = arith.constant 0 : index
    %128 = vector.load %arg3[%c15, %c0_111, %c0_112] : memref<16x32x128xbf16, #tpu.memory_space<vmem>>, vector<1x32x128xbf16>
    %129 = vector.shape_cast %128 : vector<1x32x128xbf16> to vector<32x128xbf16>
    %cst_113 = arith.constant dense<0.000000e+00> : vector<32x8xf32>
    %130 = tpu.matmul %129, %8, %cst_113 {dimension_numbers = #tpu.dot_dimension_numbers<[1], [0], [0], [1], [0, 0, 1, 1], [], []>} : vector<32x128xbf16>, vector<128x8xbf16>, vector<32x8xf32> -> vector<32x8xf32>
    %131 = arith.truncf %130 : vector<32x8xf32> to vector<32x8xbf16>
    %c15_114 = arith.constant 15 : index
    %c0_115 = arith.constant 0 : index
    %c0_116 = arith.constant 0 : index
    %132 = vector.load %arg4[%c15_114, %c0_115, %c0_116] : memref<16x8x16xbf16, #tpu.memory_space<vmem>>, vector<1x8x16xbf16>
    %133 = vector.shape_cast %132 : vector<1x8x16xbf16> to vector<8x16xbf16>
    %cst_117 = arith.constant dense<0.000000e+00> : vector<32x16xf32>
    %134 = tpu.matmul %131, %133, %cst_117 {dimension_numbers = #tpu.dot_dimension_numbers<[1], [0], [0], [1], [0, 0, 1, 1], [], []>} : vector<32x8xbf16>, vector<8x16xbf16>, vector<32x16xf32> -> vector<32x16xf32>
    %135 = arith.addf %127, %134 : vector<32x16xf32>
    %cst_118 = arith.constant dense<0.000000e+00> : vector<16xf32>
    %136 = vector.multi_reduction <add>, %135, %cst_118 [0] : vector<32x16xf32> to vector<16xf32>
    %137 = vector.shape_cast %136 : vector<16xf32> to vector<1x16xf32>
    %cst_119 = arith.constant 3.125000e-02 : f32
    %138 = vector.broadcast %cst_119 : f32 to vector<1x16xf32>
    %139 = arith.mulf %137, %138 : vector<1x16xf32>
    %140 = arith.mulf %135, %135 : vector<32x16xf32>
    %cst_120 = arith.constant dense<0.000000e+00> : vector<16xf32>
    %141 = vector.multi_reduction <add>, %140, %cst_120 [0] : vector<32x16xf32> to vector<16xf32>
    %142 = vector.shape_cast %141 : vector<16xf32> to vector<1x16xf32>
    %cst_121 = arith.constant 3.125000e-02 : f32
    %143 = vector.broadcast %cst_121 : f32 to vector<1x16xf32>
    %144 = arith.mulf %142, %143 : vector<1x16xf32>
    %145 = arith.mulf %139, %139 : vector<1x16xf32>
    %146 = arith.subf %144, %145 : vector<1x16xf32>
    %147 = vector.broadcast %139 : vector<1x16xf32> to vector<32x16xf32>
    %148 = arith.subf %135, %147 : vector<32x16xf32>
    %cst_122 = arith.constant 9.99999974E-6 : f32
    %149 = vector.broadcast %cst_122 : f32 to vector<1x16xf32>
    %150 = arith.addf %146, %149 : vector<1x16xf32>
    %151 = math.rsqrt %150 : vector<1x16xf32>
    %152 = vector.broadcast %151 : vector<1x16xf32> to vector<32x16xf32>
    %153 = arith.mulf %148, %152 : vector<32x16xf32>
    %cst_123 = arith.constant 0.000000e+00 : f32
    %154 = vector.broadcast %cst_123 : f32 to vector<32x16xf32>
    %155 = arith.cmpf ogt, %153, %154 : vector<32x16xf32>
    %cst_124 = arith.constant 2.000000e-01 : f32
    %156 = vector.broadcast %cst_124 : f32 to vector<32x16xf32>
    %157 = arith.mulf %156, %153 : vector<32x16xf32>
    %158 = arith.select %155, %153, %157 : vector<32x16xi1>, vector<32x16xf32>
    %159 = arith.truncf %158 : vector<32x16xf32> to vector<32x16xbf16>
    %c0_125 = arith.constant 0 : index
    %c0_126 = arith.constant 0 : index
    %c0_127 = arith.constant 0 : index
    %160 = vector.load %arg5[%c0_125, %c0_126, %c0_127] : memref<16x2x32xbf16, #tpu.memory_space<vmem>>, vector<1x2x32xbf16>
    %161 = vector.shape_cast %160 : vector<1x2x32xbf16> to vector<2x32xbf16>
    %cst_128 = arith.constant dense<0.000000e+00> : vector<2x16xf32>
    %162 = tpu.matmul %161, %159, %cst_128 {dimension_numbers = #tpu.dot_dimension_numbers<[1], [0], [0], [1], [0, 0, 1, 1], [], []>} : vector<2x32xbf16>, vector<32x16xbf16>, vector<2x16xf32> -> vector<2x16xf32>
    %163 = arith.truncf %162 : vector<2x16xf32> to vector<2x16xbf16>
    %c0_129 = arith.constant 0 : index
    %c0_130 = arith.constant 0 : index
    %c0_131 = arith.constant 0 : index
    %164 = vector.load %arg6[%c0_129, %c0_130, %c0_131] : memref<16x16x32xbf16, #tpu.memory_space<vmem>>, vector<1x16x32xbf16>
    %165 = vector.shape_cast %164 : vector<1x16x32xbf16> to vector<16x32xbf16>
    %cst_132 = arith.constant dense<0.000000e+00> : vector<2x32xf32>
    %166 = tpu.matmul %163, %165, %cst_132 {dimension_numbers = #tpu.dot_dimension_numbers<[1], [0], [0], [1], [0, 0, 1, 1], [], []>} : vector<2x16xbf16>, vector<16x32xbf16>, vector<2x32xf32> -> vector<2x32xf32>
    %c1_133 = arith.constant 1 : index
    %c0_134 = arith.constant 0 : index
    %c0_135 = arith.constant 0 : index
    %167 = vector.load %arg5[%c1_133, %c0_134, %c0_135] : memref<16x2x32xbf16, #tpu.memory_space<vmem>>, vector<1x2x32xbf16>
    %168 = vector.shape_cast %167 : vector<1x2x32xbf16> to vector<2x32xbf16>
    %cst_136 = arith.constant dense<0.000000e+00> : vector<2x16xf32>
    %169 = tpu.matmul %168, %159, %cst_136 {dimension_numbers = #tpu.dot_dimension_numbers<[1], [0], [0], [1], [0, 0, 1, 1], [], []>} : vector<2x32xbf16>, vector<32x16xbf16>, vector<2x16xf32> -> vector<2x16xf32>
    %170 = arith.truncf %169 : vector<2x16xf32> to vector<2x16xbf16>
    %c1_137 = arith.constant 1 : index
    %c0_138 = arith.constant 0 : index
    %c0_139 = arith.constant 0 : index
    %171 = vector.load %arg6[%c1_137, %c0_138, %c0_139] : memref<16x16x32xbf16, #tpu.memory_space<vmem>>, vector<1x16x32xbf16>
    %172 = vector.shape_cast %171 : vector<1x16x32xbf16> to vector<16x32xbf16>
    %cst_140 = arith.constant dense<0.000000e+00> : vector<2x32xf32>
    %173 = tpu.matmul %170, %172, %cst_140 {dimension_numbers = #tpu.dot_dimension_numbers<[1], [0], [0], [1], [0, 0, 1, 1], [], []>} : vector<2x16xbf16>, vector<16x32xbf16>, vector<2x32xf32> -> vector<2x32xf32>
    %174 = arith.addf %166, %173 : vector<2x32xf32>
    %c2_141 = arith.constant 2 : index
    %c0_142 = arith.constant 0 : index
    %c0_143 = arith.constant 0 : index
    %175 = vector.load %arg5[%c2_141, %c0_142, %c0_143] : memref<16x2x32xbf16, #tpu.memory_space<vmem>>, vector<1x2x32xbf16>
    %176 = vector.shape_cast %175 : vector<1x2x32xbf16> to vector<2x32xbf16>
    %cst_144 = arith.constant dense<0.000000e+00> : vector<2x16xf32>
    %177 = tpu.matmul %176, %159, %cst_144 {dimension_numbers = #tpu.dot_dimension_numbers<[1], [0], [0], [1], [0, 0, 1, 1], [], []>} : vector<2x32xbf16>, vector<32x16xbf16>, vector<2x16xf32> -> vector<2x16xf32>
    %178 = arith.truncf %177 : vector<2x16xf32> to vector<2x16xbf16>
    %c2_145 = arith.constant 2 : index
    %c0_146 = arith.constant 0 : index
    %c0_147 = arith.constant 0 : index
    %179 = vector.load %arg6[%c2_145, %c0_146, %c0_147] : memref<16x16x32xbf16, #tpu.memory_space<vmem>>, vector<1x16x32xbf16>
    %180 = vector.shape_cast %179 : vector<1x16x32xbf16> to vector<16x32xbf16>
    %cst_148 = arith.constant dense<0.000000e+00> : vector<2x32xf32>
    %181 = tpu.matmul %178, %180, %cst_148 {dimension_numbers = #tpu.dot_dimension_numbers<[1], [0], [0], [1], [0, 0, 1, 1], [], []>} : vector<2x16xbf16>, vector<16x32xbf16>, vector<2x32xf32> -> vector<2x32xf32>
    %182 = arith.addf %174, %181 : vector<2x32xf32>
    %c3_149 = arith.constant 3 : index
    %c0_150 = arith.constant 0 : index
    %c0_151 = arith.constant 0 : index
    %183 = vector.load %arg5[%c3_149, %c0_150, %c0_151] : memref<16x2x32xbf16, #tpu.memory_space<vmem>>, vector<1x2x32xbf16>
    %184 = vector.shape_cast %183 : vector<1x2x32xbf16> to vector<2x32xbf16>
    %cst_152 = arith.constant dense<0.000000e+00> : vector<2x16xf32>
    %185 = tpu.matmul %184, %159, %cst_152 {dimension_numbers = #tpu.dot_dimension_numbers<[1], [0], [0], [1], [0, 0, 1, 1], [], []>} : vector<2x32xbf16>, vector<32x16xbf16>, vector<2x16xf32> -> vector<2x16xf32>
    %186 = arith.truncf %185 : vector<2x16xf32> to vector<2x16xbf16>
    %c3_153 = arith.constant 3 : index
    %c0_154 = arith.constant 0 : index
    %c0_155 = arith.constant 0 : index
    %187 = vector.load %arg6[%c3_153, %c0_154, %c0_155] : memref<16x16x32xbf16, #tpu.memory_space<vmem>>, vector<1x16x32xbf16>
    %188 = vector.shape_cast %187 : vector<1x16x32xbf16> to vector<16x32xbf16>
    %cst_156 = arith.constant dense<0.000000e+00> : vector<2x32xf32>
    %189 = tpu.matmul %186, %188, %cst_156 {dimension_numbers = #tpu.dot_dimension_numbers<[1], [0], [0], [1], [0, 0, 1, 1], [], []>} : vector<2x16xbf16>, vector<16x32xbf16>, vector<2x32xf32> -> vector<2x32xf32>
    %190 = arith.addf %182, %189 : vector<2x32xf32>
    %c4_157 = arith.constant 4 : index
    %c0_158 = arith.constant 0 : index
    %c0_159 = arith.constant 0 : index
    %191 = vector.load %arg5[%c4_157, %c0_158, %c0_159] : memref<16x2x32xbf16, #tpu.memory_space<vmem>>, vector<1x2x32xbf16>
    %192 = vector.shape_cast %191 : vector<1x2x32xbf16> to vector<2x32xbf16>
    %cst_160 = arith.constant dense<0.000000e+00> : vector<2x16xf32>
    %193 = tpu.matmul %192, %159, %cst_160 {dimension_numbers = #tpu.dot_dimension_numbers<[1], [0], [0], [1], [0, 0, 1, 1], [], []>} : vector<2x32xbf16>, vector<32x16xbf16>, vector<2x16xf32> -> vector<2x16xf32>
    %194 = arith.truncf %193 : vector<2x16xf32> to vector<2x16xbf16>
    %c4_161 = arith.constant 4 : index
    %c0_162 = arith.constant 0 : index
    %c0_163 = arith.constant 0 : index
    %195 = vector.load %arg6[%c4_161, %c0_162, %c0_163] : memref<16x16x32xbf16, #tpu.memory_space<vmem>>, vector<1x16x32xbf16>
    %196 = vector.shape_cast %195 : vector<1x16x32xbf16> to vector<16x32xbf16>
    %cst_164 = arith.constant dense<0.000000e+00> : vector<2x32xf32>
    %197 = tpu.matmul %194, %196, %cst_164 {dimension_numbers = #tpu.dot_dimension_numbers<[1], [0], [0], [1], [0, 0, 1, 1], [], []>} : vector<2x16xbf16>, vector<16x32xbf16>, vector<2x32xf32> -> vector<2x32xf32>
    %198 = arith.addf %190, %197 : vector<2x32xf32>
    %c5_165 = arith.constant 5 : index
    %c0_166 = arith.constant 0 : index
    %c0_167 = arith.constant 0 : index
    %199 = vector.load %arg5[%c5_165, %c0_166, %c0_167] : memref<16x2x32xbf16, #tpu.memory_space<vmem>>, vector<1x2x32xbf16>
    %200 = vector.shape_cast %199 : vector<1x2x32xbf16> to vector<2x32xbf16>
    %cst_168 = arith.constant dense<0.000000e+00> : vector<2x16xf32>
    %201 = tpu.matmul %200, %159, %cst_168 {dimension_numbers = #tpu.dot_dimension_numbers<[1], [0], [0], [1], [0, 0, 1, 1], [], []>} : vector<2x32xbf16>, vector<32x16xbf16>, vector<2x16xf32> -> vector<2x16xf32>
    %202 = arith.truncf %201 : vector<2x16xf32> to vector<2x16xbf16>
    %c5_169 = arith.constant 5 : index
    %c0_170 = arith.constant 0 : index
    %c0_171 = arith.constant 0 : index
    %203 = vector.load %arg6[%c5_169, %c0_170, %c0_171] : memref<16x16x32xbf16, #tpu.memory_space<vmem>>, vector<1x16x32xbf16>
    %204 = vector.shape_cast %203 : vector<1x16x32xbf16> to vector<16x32xbf16>
    %cst_172 = arith.constant dense<0.000000e+00> : vector<2x32xf32>
    %205 = tpu.matmul %202, %204, %cst_172 {dimension_numbers = #tpu.dot_dimension_numbers<[1], [0], [0], [1], [0, 0, 1, 1], [], []>} : vector<2x16xbf16>, vector<16x32xbf16>, vector<2x32xf32> -> vector<2x32xf32>
    %206 = arith.addf %198, %205 : vector<2x32xf32>
    %c6_173 = arith.constant 6 : index
    %c0_174 = arith.constant 0 : index
    %c0_175 = arith.constant 0 : index
    %207 = vector.load %arg5[%c6_173, %c0_174, %c0_175] : memref<16x2x32xbf16, #tpu.memory_space<vmem>>, vector<1x2x32xbf16>
    %208 = vector.shape_cast %207 : vector<1x2x32xbf16> to vector<2x32xbf16>
    %cst_176 = arith.constant dense<0.000000e+00> : vector<2x16xf32>
    %209 = tpu.matmul %208, %159, %cst_176 {dimension_numbers = #tpu.dot_dimension_numbers<[1], [0], [0], [1], [0, 0, 1, 1], [], []>} : vector<2x32xbf16>, vector<32x16xbf16>, vector<2x16xf32> -> vector<2x16xf32>
    %210 = arith.truncf %209 : vector<2x16xf32> to vector<2x16xbf16>
    %c6_177 = arith.constant 6 : index
    %c0_178 = arith.constant 0 : index
    %c0_179 = arith.constant 0 : index
    %211 = vector.load %arg6[%c6_177, %c0_178, %c0_179] : memref<16x16x32xbf16, #tpu.memory_space<vmem>>, vector<1x16x32xbf16>
    %212 = vector.shape_cast %211 : vector<1x16x32xbf16> to vector<16x32xbf16>
    %cst_180 = arith.constant dense<0.000000e+00> : vector<2x32xf32>
    %213 = tpu.matmul %210, %212, %cst_180 {dimension_numbers = #tpu.dot_dimension_numbers<[1], [0], [0], [1], [0, 0, 1, 1], [], []>} : vector<2x16xbf16>, vector<16x32xbf16>, vector<2x32xf32> -> vector<2x32xf32>
    %214 = arith.addf %206, %213 : vector<2x32xf32>
    %c7_181 = arith.constant 7 : index
    %c0_182 = arith.constant 0 : index
    %c0_183 = arith.constant 0 : index
    %215 = vector.load %arg5[%c7_181, %c0_182, %c0_183] : memref<16x2x32xbf16, #tpu.memory_space<vmem>>, vector<1x2x32xbf16>
    %216 = vector.shape_cast %215 : vector<1x2x32xbf16> to vector<2x32xbf16>
    %cst_184 = arith.constant dense<0.000000e+00> : vector<2x16xf32>
    %217 = tpu.matmul %216, %159, %cst_184 {dimension_numbers = #tpu.dot_dimension_numbers<[1], [0], [0], [1], [0, 0, 1, 1], [], []>} : vector<2x32xbf16>, vector<32x16xbf16>, vector<2x16xf32> -> vector<2x16xf32>
    %218 = arith.truncf %217 : vector<2x16xf32> to vector<2x16xbf16>
    %c7_185 = arith.constant 7 : index
    %c0_186 = arith.constant 0 : index
    %c0_187 = arith.constant 0 : index
    %219 = vector.load %arg6[%c7_185, %c0_186, %c0_187] : memref<16x16x32xbf16, #tpu.memory_space<vmem>>, vector<1x16x32xbf16>
    %220 = vector.shape_cast %219 : vector<1x16x32xbf16> to vector<16x32xbf16>
    %cst_188 = arith.constant dense<0.000000e+00> : vector<2x32xf32>
    %221 = tpu.matmul %218, %220, %cst_188 {dimension_numbers = #tpu.dot_dimension_numbers<[1], [0], [0], [1], [0, 0, 1, 1], [], []>} : vector<2x16xbf16>, vector<16x32xbf16>, vector<2x32xf32> -> vector<2x32xf32>
    %222 = arith.addf %214, %221 : vector<2x32xf32>
    %c8_189 = arith.constant 8 : index
    %c0_190 = arith.constant 0 : index
    %c0_191 = arith.constant 0 : index
    %223 = vector.load %arg5[%c8_189, %c0_190, %c0_191] : memref<16x2x32xbf16, #tpu.memory_space<vmem>>, vector<1x2x32xbf16>
    %224 = vector.shape_cast %223 : vector<1x2x32xbf16> to vector<2x32xbf16>
    %cst_192 = arith.constant dense<0.000000e+00> : vector<2x16xf32>
    %225 = tpu.matmul %224, %159, %cst_192 {dimension_numbers = #tpu.dot_dimension_numbers<[1], [0], [0], [1], [0, 0, 1, 1], [], []>} : vector<2x32xbf16>, vector<32x16xbf16>, vector<2x16xf32> -> vector<2x16xf32>
    %226 = arith.truncf %225 : vector<2x16xf32> to vector<2x16xbf16>
    %c8_193 = arith.constant 8 : index
    %c0_194 = arith.constant 0 : index
    %c0_195 = arith.constant 0 : index
    %227 = vector.load %arg6[%c8_193, %c0_194, %c0_195] : memref<16x16x32xbf16, #tpu.memory_space<vmem>>, vector<1x16x32xbf16>
    %228 = vector.shape_cast %227 : vector<1x16x32xbf16> to vector<16x32xbf16>
    %cst_196 = arith.constant dense<0.000000e+00> : vector<2x32xf32>
    %229 = tpu.matmul %226, %228, %cst_196 {dimension_numbers = #tpu.dot_dimension_numbers<[1], [0], [0], [1], [0, 0, 1, 1], [], []>} : vector<2x16xbf16>, vector<16x32xbf16>, vector<2x32xf32> -> vector<2x32xf32>
    %230 = arith.addf %222, %229 : vector<2x32xf32>
    %c9_197 = arith.constant 9 : index
    %c0_198 = arith.constant 0 : index
    %c0_199 = arith.constant 0 : index
    %231 = vector.load %arg5[%c9_197, %c0_198, %c0_199] : memref<16x2x32xbf16, #tpu.memory_space<vmem>>, vector<1x2x32xbf16>
    %232 = vector.shape_cast %231 : vector<1x2x32xbf16> to vector<2x32xbf16>
    %cst_200 = arith.constant dense<0.000000e+00> : vector<2x16xf32>
    %233 = tpu.matmul %232, %159, %cst_200 {dimension_numbers = #tpu.dot_dimension_numbers<[1], [0], [0], [1], [0, 0, 1, 1], [], []>} : vector<2x32xbf16>, vector<32x16xbf16>, vector<2x16xf32> -> vector<2x16xf32>
    %234 = arith.truncf %233 : vector<2x16xf32> to vector<2x16xbf16>
    %c9_201 = arith.constant 9 : index
    %c0_202 = arith.constant 0 : index
    %c0_203 = arith.constant 0 : index
    %235 = vector.load %arg6[%c9_201, %c0_202, %c0_203] : memref<16x16x32xbf16, #tpu.memory_space<vmem>>, vector<1x16x32xbf16>
    %236 = vector.shape_cast %235 : vector<1x16x32xbf16> to vector<16x32xbf16>
    %cst_204 = arith.constant dense<0.000000e+00> : vector<2x32xf32>
    %237 = tpu.matmul %234, %236, %cst_204 {dimension_numbers = #tpu.dot_dimension_numbers<[1], [0], [0], [1], [0, 0, 1, 1], [], []>} : vector<2x16xbf16>, vector<16x32xbf16>, vector<2x32xf32> -> vector<2x32xf32>
    %238 = arith.addf %230, %237 : vector<2x32xf32>
    %c10_205 = arith.constant 10 : index
    %c0_206 = arith.constant 0 : index
    %c0_207 = arith.constant 0 : index
    %239 = vector.load %arg5[%c10_205, %c0_206, %c0_207] : memref<16x2x32xbf16, #tpu.memory_space<vmem>>, vector<1x2x32xbf16>
    %240 = vector.shape_cast %239 : vector<1x2x32xbf16> to vector<2x32xbf16>
    %cst_208 = arith.constant dense<0.000000e+00> : vector<2x16xf32>
    %241 = tpu.matmul %240, %159, %cst_208 {dimension_numbers = #tpu.dot_dimension_numbers<[1], [0], [0], [1], [0, 0, 1, 1], [], []>} : vector<2x32xbf16>, vector<32x16xbf16>, vector<2x16xf32> -> vector<2x16xf32>
    %242 = arith.truncf %241 : vector<2x16xf32> to vector<2x16xbf16>
    %c10_209 = arith.constant 10 : index
    %c0_210 = arith.constant 0 : index
    %c0_211 = arith.constant 0 : index
    %243 = vector.load %arg6[%c10_209, %c0_210, %c0_211] : memref<16x16x32xbf16, #tpu.memory_space<vmem>>, vector<1x16x32xbf16>
    %244 = vector.shape_cast %243 : vector<1x16x32xbf16> to vector<16x32xbf16>
    %cst_212 = arith.constant dense<0.000000e+00> : vector<2x32xf32>
    %245 = tpu.matmul %242, %244, %cst_212 {dimension_numbers = #tpu.dot_dimension_numbers<[1], [0], [0], [1], [0, 0, 1, 1], [], []>} : vector<2x16xbf16>, vector<16x32xbf16>, vector<2x32xf32> -> vector<2x32xf32>
    %246 = arith.addf %238, %245 : vector<2x32xf32>
    %c11_213 = arith.constant 11 : index
    %c0_214 = arith.constant 0 : index
    %c0_215 = arith.constant 0 : index
    %247 = vector.load %arg5[%c11_213, %c0_214, %c0_215] : memref<16x2x32xbf16, #tpu.memory_space<vmem>>, vector<1x2x32xbf16>
    %248 = vector.shape_cast %247 : vector<1x2x32xbf16> to vector<2x32xbf16>
    %cst_216 = arith.constant dense<0.000000e+00> : vector<2x16xf32>
    %249 = tpu.matmul %248, %159, %cst_216 {dimension_numbers = #tpu.dot_dimension_numbers<[1], [0], [0], [1], [0, 0, 1, 1], [], []>} : vector<2x32xbf16>, vector<32x16xbf16>, vector<2x16xf32> -> vector<2x16xf32>
    %250 = arith.truncf %249 : vector<2x16xf32> to vector<2x16xbf16>
    %c11_217 = arith.constant 11 : index
    %c0_218 = arith.constant 0 : index
    %c0_219 = arith.constant 0 : index
    %251 = vector.load %arg6[%c11_217, %c0_218, %c0_219] : memref<16x16x32xbf16, #tpu.memory_space<vmem>>, vector<1x16x32xbf16>
    %252 = vector.shape_cast %251 : vector<1x16x32xbf16> to vector<16x32xbf16>
    %cst_220 = arith.constant dense<0.000000e+00> : vector<2x32xf32>
    %253 = tpu.matmul %250, %252, %cst_220 {dimension_numbers = #tpu.dot_dimension_numbers<[1], [0], [0], [1], [0, 0, 1, 1], [], []>} : vector<2x16xbf16>, vector<16x32xbf16>, vector<2x32xf32> -> vector<2x32xf32>
    %254 = arith.addf %246, %253 : vector<2x32xf32>
    %c12_221 = arith.constant 12 : index
    %c0_222 = arith.constant 0 : index
    %c0_223 = arith.constant 0 : index
    %255 = vector.load %arg5[%c12_221, %c0_222, %c0_223] : memref<16x2x32xbf16, #tpu.memory_space<vmem>>, vector<1x2x32xbf16>
    %256 = vector.shape_cast %255 : vector<1x2x32xbf16> to vector<2x32xbf16>
    %cst_224 = arith.constant dense<0.000000e+00> : vector<2x16xf32>
    %257 = tpu.matmul %256, %159, %cst_224 {dimension_numbers = #tpu.dot_dimension_numbers<[1], [0], [0], [1], [0, 0, 1, 1], [], []>} : vector<2x32xbf16>, vector<32x16xbf16>, vector<2x16xf32> -> vector<2x16xf32>
    %258 = arith.truncf %257 : vector<2x16xf32> to vector<2x16xbf16>
    %c12_225 = arith.constant 12 : index
    %c0_226 = arith.constant 0 : index
    %c0_227 = arith.constant 0 : index
    %259 = vector.load %arg6[%c12_225, %c0_226, %c0_227] : memref<16x16x32xbf16, #tpu.memory_space<vmem>>, vector<1x16x32xbf16>
    %260 = vector.shape_cast %259 : vector<1x16x32xbf16> to vector<16x32xbf16>
    %cst_228 = arith.constant dense<0.000000e+00> : vector<2x32xf32>
    %261 = tpu.matmul %258, %260, %cst_228 {dimension_numbers = #tpu.dot_dimension_numbers<[1], [0], [0], [1], [0, 0, 1, 1], [], []>} : vector<2x16xbf16>, vector<16x32xbf16>, vector<2x32xf32> -> vector<2x32xf32>
    %262 = arith.addf %254, %261 : vector<2x32xf32>
    %c13_229 = arith.constant 13 : index
    %c0_230 = arith.constant 0 : index
    %c0_231 = arith.constant 0 : index
    %263 = vector.load %arg5[%c13_229, %c0_230, %c0_231] : memref<16x2x32xbf16, #tpu.memory_space<vmem>>, vector<1x2x32xbf16>
    %264 = vector.shape_cast %263 : vector<1x2x32xbf16> to vector<2x32xbf16>
    %cst_232 = arith.constant dense<0.000000e+00> : vector<2x16xf32>
    %265 = tpu.matmul %264, %159, %cst_232 {dimension_numbers = #tpu.dot_dimension_numbers<[1], [0], [0], [1], [0, 0, 1, 1], [], []>} : vector<2x32xbf16>, vector<32x16xbf16>, vector<2x16xf32> -> vector<2x16xf32>
    %266 = arith.truncf %265 : vector<2x16xf32> to vector<2x16xbf16>
    %c13_233 = arith.constant 13 : index
    %c0_234 = arith.constant 0 : index
    %c0_235 = arith.constant 0 : index
    %267 = vector.load %arg6[%c13_233, %c0_234, %c0_235] : memref<16x16x32xbf16, #tpu.memory_space<vmem>>, vector<1x16x32xbf16>
    %268 = vector.shape_cast %267 : vector<1x16x32xbf16> to vector<16x32xbf16>
    %cst_236 = arith.constant dense<0.000000e+00> : vector<2x32xf32>
    %269 = tpu.matmul %266, %268, %cst_236 {dimension_numbers = #tpu.dot_dimension_numbers<[1], [0], [0], [1], [0, 0, 1, 1], [], []>} : vector<2x16xbf16>, vector<16x32xbf16>, vector<2x32xf32> -> vector<2x32xf32>
    %270 = arith.addf %262, %269 : vector<2x32xf32>
    %c14_237 = arith.constant 14 : index
    %c0_238 = arith.constant 0 : index
    %c0_239 = arith.constant 0 : index
    %271 = vector.load %arg5[%c14_237, %c0_238, %c0_239] : memref<16x2x32xbf16, #tpu.memory_space<vmem>>, vector<1x2x32xbf16>
    %272 = vector.shape_cast %271 : vector<1x2x32xbf16> to vector<2x32xbf16>
    %cst_240 = arith.constant dense<0.000000e+00> : vector<2x16xf32>
    %273 = tpu.matmul %272, %159, %cst_240 {dimension_numbers = #tpu.dot_dimension_numbers<[1], [0], [0], [1], [0, 0, 1, 1], [], []>} : vector<2x32xbf16>, vector<32x16xbf16>, vector<2x16xf32> -> vector<2x16xf32>
    %274 = arith.truncf %273 : vector<2x16xf32> to vector<2x16xbf16>
    %c14_241 = arith.constant 14 : index
    %c0_242 = arith.constant 0 : index
    %c0_243 = arith.constant 0 : index
    %275 = vector.load %arg6[%c14_241, %c0_242, %c0_243] : memref<16x16x32xbf16, #tpu.memory_space<vmem>>, vector<1x16x32xbf16>
    %276 = vector.shape_cast %275 : vector<1x16x32xbf16> to vector<16x32xbf16>
    %cst_244 = arith.constant dense<0.000000e+00> : vector<2x32xf32>
    %277 = tpu.matmul %274, %276, %cst_244 {dimension_numbers = #tpu.dot_dimension_numbers<[1], [0], [0], [1], [0, 0, 1, 1], [], []>} : vector<2x16xbf16>, vector<16x32xbf16>, vector<2x32xf32> -> vector<2x32xf32>
    %278 = arith.addf %270, %277 : vector<2x32xf32>
    %c15_245 = arith.constant 15 : index
    %c0_246 = arith.constant 0 : index
    %c0_247 = arith.constant 0 : index
    %279 = vector.load %arg5[%c15_245, %c0_246, %c0_247] : memref<16x2x32xbf16, #tpu.memory_space<vmem>>, vector<1x2x32xbf16>
    %280 = vector.shape_cast %279 : vector<1x2x32xbf16> to vector<2x32xbf16>
    %cst_248 = arith.constant dense<0.000000e+00> : vector<2x16xf32>
    %281 = tpu.matmul %280, %159, %cst_248 {dimension_numbers = #tpu.dot_dimension_numbers<[1], [0], [0], [1], [0, 0, 1, 1], [], []>} : vector<2x32xbf16>, vector<32x16xbf16>, vector<2x16xf32> -> vector<2x16xf32>
    %282 = arith.truncf %281 : vector<2x16xf32> to vector<2x16xbf16>
    %c15_249 = arith.constant 15 : index
    %c0_250 = arith.constant 0 : index
    %c0_251 = arith.constant 0 : index
    %283 = vector.load %arg6[%c15_249, %c0_250, %c0_251] : memref<16x16x32xbf16, #tpu.memory_space<vmem>>, vector<1x16x32xbf16>
    %284 = vector.shape_cast %283 : vector<1x16x32xbf16> to vector<16x32xbf16>
    %cst_252 = arith.constant dense<0.000000e+00> : vector<2x32xf32>
    %285 = tpu.matmul %282, %284, %cst_252 {dimension_numbers = #tpu.dot_dimension_numbers<[1], [0], [0], [1], [0, 0, 1, 1], [], []>} : vector<2x16xbf16>, vector<16x32xbf16>, vector<2x32xf32> -> vector<2x32xf32>
    %286 = arith.addf %278, %285 : vector<2x32xf32>
    %c0_253 = arith.constant 0 : index
    %c0_254 = arith.constant 0 : index
    %287 = vector.load %arg7[%c0_253, %c0_254] : memref<128x192xbf16, #tpu.memory_space<vmem>>, vector<128x192xbf16>
    %c0_255 = arith.constant 0 : index
    %c0_256 = arith.constant 0 : index
    %288 = vector.load %arg8[%c0_255, %c0_256] : memref<192x8xbf16, #tpu.memory_space<vmem>>, vector<192x8xbf16>
    %cst_257 = arith.constant dense<0.000000e+00> : vector<128x8xf32>
    %289 = tpu.matmul %287, %288, %cst_257 {dimension_numbers = #tpu.dot_dimension_numbers<[1], [0], [0], [1], [0, 0, 1, 1], [], []>} : vector<128x192xbf16>, vector<192x8xbf16>, vector<128x8xf32> -> vector<128x8xf32>
    %cst_258 = arith.constant 0.000000e+00 : f32
    %290 = vector.broadcast %cst_258 : f32 to vector<128x8xf32>
    %291 = arith.cmpf ogt, %289, %290 : vector<128x8xf32>
    %cst_259 = arith.constant 2.000000e-01 : f32
    %292 = vector.broadcast %cst_259 : f32 to vector<128x8xf32>
    %293 = arith.mulf %292, %289 : vector<128x8xf32>
    %294 = arith.select %291, %289, %293 : vector<128x8xi1>, vector<128x8xf32>
    %295 = arith.truncf %294 : vector<128x8xf32> to vector<128x8xbf16>
    %c0_260 = arith.constant 0 : index
    %c0_261 = arith.constant 0 : index
    %c0_262 = arith.constant 0 : index
    %296 = vector.load %arg9[%c0_260, %c0_261, %c0_262] : memref<64x8x128xbf16, #tpu.memory_space<vmem>>, vector<1x8x128xbf16>
    %297 = vector.shape_cast %296 : vector<1x8x128xbf16> to vector<8x128xbf16>
    %cst_263 = arith.constant dense<0.000000e+00> : vector<8x8xf32>
    %298 = tpu.matmul %297, %295, %cst_263 {dimension_numbers = #tpu.dot_dimension_numbers<[1], [0], [0], [1], [0, 0, 1, 1], [], []>} : vector<8x128xbf16>, vector<128x8xbf16>, vector<8x8xf32> -> vector<8x8xf32>
    %299 = arith.truncf %298 : vector<8x8xf32> to vector<8x8xbf16>
    %c0_264 = arith.constant 0 : index
    %c0_265 = arith.constant 0 : index
    %c0_266 = arith.constant 0 : index
    %300 = vector.load %arg10[%c0_264, %c0_265, %c0_266] : memref<64x8x16xbf16, #tpu.memory_space<vmem>>, vector<1x8x16xbf16>
    %301 = vector.shape_cast %300 : vector<1x8x16xbf16> to vector<8x16xbf16>
    %cst_267 = arith.constant dense<0.000000e+00> : vector<8x16xf32>
    %302 = tpu.matmul %299, %301, %cst_267 {dimension_numbers = #tpu.dot_dimension_numbers<[1], [0], [0], [1], [0, 0, 1, 1], [], []>} : vector<8x8xbf16>, vector<8x16xbf16>, vector<8x16xf32> -> vector<8x16xf32>
    %c1_268 = arith.constant 1 : index
    %c0_269 = arith.constant 0 : index
    %c0_270 = arith.constant 0 : index
    %303 = vector.load %arg9[%c1_268, %c0_269, %c0_270] : memref<64x8x128xbf16, #tpu.memory_space<vmem>>, vector<1x8x128xbf16>
    %304 = vector.shape_cast %303 : vector<1x8x128xbf16> to vector<8x128xbf16>
    %cst_271 = arith.constant dense<0.000000e+00> : vector<8x8xf32>
    %305 = tpu.matmul %304, %295, %cst_271 {dimension_numbers = #tpu.dot_dimension_numbers<[1], [0], [0], [1], [0, 0, 1, 1], [], []>} : vector<8x128xbf16>, vector<128x8xbf16>, vector<8x8xf32> -> vector<8x8xf32>
    %306 = arith.truncf %305 : vector<8x8xf32> to vector<8x8xbf16>
    %c1_272 = arith.constant 1 : index
    %c0_273 = arith.constant 0 : index
    %c0_274 = arith.constant 0 : index
    %307 = vector.load %arg10[%c1_272, %c0_273, %c0_274] : memref<64x8x16xbf16, #tpu.memory_space<vmem>>, vector<1x8x16xbf16>
    %308 = vector.shape_cast %307 : vector<1x8x16xbf16> to vector<8x16xbf16>
    %cst_275 = arith.constant dense<0.000000e+00> : vector<8x16xf32>
    %309 = tpu.matmul %306, %308, %cst_275 {dimension_numbers = #tpu.dot_dimension_numbers<[1], [0], [0], [1], [0, 0, 1, 1], [], []>} : vector<8x8xbf16>, vector<8x16xbf16>, vector<8x16xf32> -> vector<8x16xf32>
    %310 = arith.addf %302, %309 : vector<8x16xf32>
    %c2_276 = arith.constant 2 : index
    %c0_277 = arith.constant 0 : index
    %c0_278 = arith.constant 0 : index
    %311 = vector.load %arg9[%c2_276, %c0_277, %c0_278] : memref<64x8x128xbf16, #tpu.memory_space<vmem>>, vector<1x8x128xbf16>
    %312 = vector.shape_cast %311 : vector<1x8x128xbf16> to vector<8x128xbf16>
    %cst_279 = arith.constant dense<0.000000e+00> : vector<8x8xf32>
    %313 = tpu.matmul %312, %295, %cst_279 {dimension_numbers = #tpu.dot_dimension_numbers<[1], [0], [0], [1], [0, 0, 1, 1], [], []>} : vector<8x128xbf16>, vector<128x8xbf16>, vector<8x8xf32> -> vector<8x8xf32>
    %314 = arith.truncf %313 : vector<8x8xf32> to vector<8x8xbf16>
    %c2_280 = arith.constant 2 : index
    %c0_281 = arith.constant 0 : index
    %c0_282 = arith.constant 0 : index
    %315 = vector.load %arg10[%c2_280, %c0_281, %c0_282] : memref<64x8x16xbf16, #tpu.memory_space<vmem>>, vector<1x8x16xbf16>
    %316 = vector.shape_cast %315 : vector<1x8x16xbf16> to vector<8x16xbf16>
    %cst_283 = arith.constant dense<0.000000e+00> : vector<8x16xf32>
    %317 = tpu.matmul %314, %316, %cst_283 {dimension_numbers = #tpu.dot_dimension_numbers<[1], [0], [0], [1], [0, 0, 1, 1], [], []>} : vector<8x8xbf16>, vector<8x16xbf16>, vector<8x16xf32> -> vector<8x16xf32>
    %318 = arith.addf %310, %317 : vector<8x16xf32>
    %c3_284 = arith.constant 3 : index
    %c0_285 = arith.constant 0 : index
    %c0_286 = arith.constant 0 : index
    %319 = vector.load %arg9[%c3_284, %c0_285, %c0_286] : memref<64x8x128xbf16, #tpu.memory_space<vmem>>, vector<1x8x128xbf16>
    %320 = vector.shape_cast %319 : vector<1x8x128xbf16> to vector<8x128xbf16>
    %cst_287 = arith.constant dense<0.000000e+00> : vector<8x8xf32>
    %321 = tpu.matmul %320, %295, %cst_287 {dimension_numbers = #tpu.dot_dimension_numbers<[1], [0], [0], [1], [0, 0, 1, 1], [], []>} : vector<8x128xbf16>, vector<128x8xbf16>, vector<8x8xf32> -> vector<8x8xf32>
    %322 = arith.truncf %321 : vector<8x8xf32> to vector<8x8xbf16>
    %c3_288 = arith.constant 3 : index
    %c0_289 = arith.constant 0 : index
    %c0_290 = arith.constant 0 : index
    %323 = vector.load %arg10[%c3_288, %c0_289, %c0_290] : memref<64x8x16xbf16, #tpu.memory_space<vmem>>, vector<1x8x16xbf16>
    %324 = vector.shape_cast %323 : vector<1x8x16xbf16> to vector<8x16xbf16>
    %cst_291 = arith.constant dense<0.000000e+00> : vector<8x16xf32>
    %325 = tpu.matmul %322, %324, %cst_291 {dimension_numbers = #tpu.dot_dimension_numbers<[1], [0], [0], [1], [0, 0, 1, 1], [], []>} : vector<8x8xbf16>, vector<8x16xbf16>, vector<8x16xf32> -> vector<8x16xf32>
    %326 = arith.addf %318, %325 : vector<8x16xf32>
    %c4_292 = arith.constant 4 : index
    %c0_293 = arith.constant 0 : index
    %c0_294 = arith.constant 0 : index
    %327 = vector.load %arg9[%c4_292, %c0_293, %c0_294] : memref<64x8x128xbf16, #tpu.memory_space<vmem>>, vector<1x8x128xbf16>
    %328 = vector.shape_cast %327 : vector<1x8x128xbf16> to vector<8x128xbf16>
    %cst_295 = arith.constant dense<0.000000e+00> : vector<8x8xf32>
    %329 = tpu.matmul %328, %295, %cst_295 {dimension_numbers = #tpu.dot_dimension_numbers<[1], [0], [0], [1], [0, 0, 1, 1], [], []>} : vector<8x128xbf16>, vector<128x8xbf16>, vector<8x8xf32> -> vector<8x8xf32>
    %330 = arith.truncf %329 : vector<8x8xf32> to vector<8x8xbf16>
    %c4_296 = arith.constant 4 : index
    %c0_297 = arith.constant 0 : index
    %c0_298 = arith.constant 0 : index
    %331 = vector.load %arg10[%c4_296, %c0_297, %c0_298] : memref<64x8x16xbf16, #tpu.memory_space<vmem>>, vector<1x8x16xbf16>
    %332 = vector.shape_cast %331 : vector<1x8x16xbf16> to vector<8x16xbf16>
    %cst_299 = arith.constant dense<0.000000e+00> : vector<8x16xf32>
    %333 = tpu.matmul %330, %332, %cst_299 {dimension_numbers = #tpu.dot_dimension_numbers<[1], [0], [0], [1], [0, 0, 1, 1], [], []>} : vector<8x8xbf16>, vector<8x16xbf16>, vector<8x16xf32> -> vector<8x16xf32>
    %334 = arith.addf %326, %333 : vector<8x16xf32>
    %c5_300 = arith.constant 5 : index
    %c0_301 = arith.constant 0 : index
    %c0_302 = arith.constant 0 : index
    %335 = vector.load %arg9[%c5_300, %c0_301, %c0_302] : memref<64x8x128xbf16, #tpu.memory_space<vmem>>, vector<1x8x128xbf16>
    %336 = vector.shape_cast %335 : vector<1x8x128xbf16> to vector<8x128xbf16>
    %cst_303 = arith.constant dense<0.000000e+00> : vector<8x8xf32>
    %337 = tpu.matmul %336, %295, %cst_303 {dimension_numbers = #tpu.dot_dimension_numbers<[1], [0], [0], [1], [0, 0, 1, 1], [], []>} : vector<8x128xbf16>, vector<128x8xbf16>, vector<8x8xf32> -> vector<8x8xf32>
    %338 = arith.truncf %337 : vector<8x8xf32> to vector<8x8xbf16>
    %c5_304 = arith.constant 5 : index
    %c0_305 = arith.constant 0 : index
    %c0_306 = arith.constant 0 : index
    %339 = vector.load %arg10[%c5_304, %c0_305, %c0_306] : memref<64x8x16xbf16, #tpu.memory_space<vmem>>, vector<1x8x16xbf16>
    %340 = vector.shape_cast %339 : vector<1x8x16xbf16> to vector<8x16xbf16>
    %cst_307 = arith.constant dense<0.000000e+00> : vector<8x16xf32>
    %341 = tpu.matmul %338, %340, %cst_307 {dimension_numbers = #tpu.dot_dimension_numbers<[1], [0], [0], [1], [0, 0, 1, 1], [], []>} : vector<8x8xbf16>, vector<8x16xbf16>, vector<8x16xf32> -> vector<8x16xf32>
    %342 = arith.addf %334, %341 : vector<8x16xf32>
    %c6_308 = arith.constant 6 : index
    %c0_309 = arith.constant 0 : index
    %c0_310 = arith.constant 0 : index
    %343 = vector.load %arg9[%c6_308, %c0_309, %c0_310] : memref<64x8x128xbf16, #tpu.memory_space<vmem>>, vector<1x8x128xbf16>
    %344 = vector.shape_cast %343 : vector<1x8x128xbf16> to vector<8x128xbf16>
    %cst_311 = arith.constant dense<0.000000e+00> : vector<8x8xf32>
    %345 = tpu.matmul %344, %295, %cst_311 {dimension_numbers = #tpu.dot_dimension_numbers<[1], [0], [0], [1], [0, 0, 1, 1], [], []>} : vector<8x128xbf16>, vector<128x8xbf16>, vector<8x8xf32> -> vector<8x8xf32>
    %346 = arith.truncf %345 : vector<8x8xf32> to vector<8x8xbf16>
    %c6_312 = arith.constant 6 : index
    %c0_313 = arith.constant 0 : index
    %c0_314 = arith.constant 0 : index
    %347 = vector.load %arg10[%c6_312, %c0_313, %c0_314] : memref<64x8x16xbf16, #tpu.memory_space<vmem>>, vector<1x8x16xbf16>
    %348 = vector.shape_cast %347 : vector<1x8x16xbf16> to vector<8x16xbf16>
    %cst_315 = arith.constant dense<0.000000e+00> : vector<8x16xf32>
    %349 = tpu.matmul %346, %348, %cst_315 {dimension_numbers = #tpu.dot_dimension_numbers<[1], [0], [0], [1], [0, 0, 1, 1], [], []>} : vector<8x8xbf16>, vector<8x16xbf16>, vector<8x16xf32> -> vector<8x16xf32>
    %350 = arith.addf %342, %349 : vector<8x16xf32>
    %c7_316 = arith.constant 7 : index
    %c0_317 = arith.constant 0 : index
    %c0_318 = arith.constant 0 : index
    %351 = vector.load %arg9[%c7_316, %c0_317, %c0_318] : memref<64x8x128xbf16, #tpu.memory_space<vmem>>, vector<1x8x128xbf16>
    %352 = vector.shape_cast %351 : vector<1x8x128xbf16> to vector<8x128xbf16>
    %cst_319 = arith.constant dense<0.000000e+00> : vector<8x8xf32>
    %353 = tpu.matmul %352, %295, %cst_319 {dimension_numbers = #tpu.dot_dimension_numbers<[1], [0], [0], [1], [0, 0, 1, 1], [], []>} : vector<8x128xbf16>, vector<128x8xbf16>, vector<8x8xf32> -> vector<8x8xf32>
    %354 = arith.truncf %353 : vector<8x8xf32> to vector<8x8xbf16>
    %c7_320 = arith.constant 7 : index
    %c0_321 = arith.constant 0 : index
    %c0_322 = arith.constant 0 : index
    %355 = vector.load %arg10[%c7_320, %c0_321, %c0_322] : memref<64x8x16xbf16, #tpu.memory_space<vmem>>, vector<1x8x16xbf16>
    %356 = vector.shape_cast %355 : vector<1x8x16xbf16> to vector<8x16xbf16>
    %cst_323 = arith.constant dense<0.000000e+00> : vector<8x16xf32>
    %357 = tpu.matmul %354, %356, %cst_323 {dimension_numbers = #tpu.dot_dimension_numbers<[1], [0], [0], [1], [0, 0, 1, 1], [], []>} : vector<8x8xbf16>, vector<8x16xbf16>, vector<8x16xf32> -> vector<8x16xf32>
    %358 = arith.addf %350, %357 : vector<8x16xf32>
    %c8_324 = arith.constant 8 : index
    %c0_325 = arith.constant 0 : index
    %c0_326 = arith.constant 0 : index
    %359 = vector.load %arg9[%c8_324, %c0_325, %c0_326] : memref<64x8x128xbf16, #tpu.memory_space<vmem>>, vector<1x8x128xbf16>
    %360 = vector.shape_cast %359 : vector<1x8x128xbf16> to vector<8x128xbf16>
    %cst_327 = arith.constant dense<0.000000e+00> : vector<8x8xf32>
    %361 = tpu.matmul %360, %295, %cst_327 {dimension_numbers = #tpu.dot_dimension_numbers<[1], [0], [0], [1], [0, 0, 1, 1], [], []>} : vector<8x128xbf16>, vector<128x8xbf16>, vector<8x8xf32> -> vector<8x8xf32>
    %362 = arith.truncf %361 : vector<8x8xf32> to vector<8x8xbf16>
    %c8_328 = arith.constant 8 : index
    %c0_329 = arith.constant 0 : index
    %c0_330 = arith.constant 0 : index
    %363 = vector.load %arg10[%c8_328, %c0_329, %c0_330] : memref<64x8x16xbf16, #tpu.memory_space<vmem>>, vector<1x8x16xbf16>
    %364 = vector.shape_cast %363 : vector<1x8x16xbf16> to vector<8x16xbf16>
    %cst_331 = arith.constant dense<0.000000e+00> : vector<8x16xf32>
    %365 = tpu.matmul %362, %364, %cst_331 {dimension_numbers = #tpu.dot_dimension_numbers<[1], [0], [0], [1], [0, 0, 1, 1], [], []>} : vector<8x8xbf16>, vector<8x16xbf16>, vector<8x16xf32> -> vector<8x16xf32>
    %366 = arith.addf %358, %365 : vector<8x16xf32>
    %c9_332 = arith.constant 9 : index
    %c0_333 = arith.constant 0 : index
    %c0_334 = arith.constant 0 : index
    %367 = vector.load %arg9[%c9_332, %c0_333, %c0_334] : memref<64x8x128xbf16, #tpu.memory_space<vmem>>, vector<1x8x128xbf16>
    %368 = vector.shape_cast %367 : vector<1x8x128xbf16> to vector<8x128xbf16>
    %cst_335 = arith.constant dense<0.000000e+00> : vector<8x8xf32>
    %369 = tpu.matmul %368, %295, %cst_335 {dimension_numbers = #tpu.dot_dimension_numbers<[1], [0], [0], [1], [0, 0, 1, 1], [], []>} : vector<8x128xbf16>, vector<128x8xbf16>, vector<8x8xf32> -> vector<8x8xf32>
    %370 = arith.truncf %369 : vector<8x8xf32> to vector<8x8xbf16>
    %c9_336 = arith.constant 9 : index
    %c0_337 = arith.constant 0 : index
    %c0_338 = arith.constant 0 : index
    %371 = vector.load %arg10[%c9_336, %c0_337, %c0_338] : memref<64x8x16xbf16, #tpu.memory_space<vmem>>, vector<1x8x16xbf16>
    %372 = vector.shape_cast %371 : vector<1x8x16xbf16> to vector<8x16xbf16>
    %cst_339 = arith.constant dense<0.000000e+00> : vector<8x16xf32>
    %373 = tpu.matmul %370, %372, %cst_339 {dimension_numbers = #tpu.dot_dimension_numbers<[1], [0], [0], [1], [0, 0, 1, 1], [], []>} : vector<8x8xbf16>, vector<8x16xbf16>, vector<8x16xf32> -> vector<8x16xf32>
    %374 = arith.addf %366, %373 : vector<8x16xf32>
    %c10_340 = arith.constant 10 : index
    %c0_341 = arith.constant 0 : index
    %c0_342 = arith.constant 0 : index
    %375 = vector.load %arg9[%c10_340, %c0_341, %c0_342] : memref<64x8x128xbf16, #tpu.memory_space<vmem>>, vector<1x8x128xbf16>
    %376 = vector.shape_cast %375 : vector<1x8x128xbf16> to vector<8x128xbf16>
    %cst_343 = arith.constant dense<0.000000e+00> : vector<8x8xf32>
    %377 = tpu.matmul %376, %295, %cst_343 {dimension_numbers = #tpu.dot_dimension_numbers<[1], [0], [0], [1], [0, 0, 1, 1], [], []>} : vector<8x128xbf16>, vector<128x8xbf16>, vector<8x8xf32> -> vector<8x8xf32>
    %378 = arith.truncf %377 : vector<8x8xf32> to vector<8x8xbf16>
    %c10_344 = arith.constant 10 : index
    %c0_345 = arith.constant 0 : index
    %c0_346 = arith.constant 0 : index
    %379 = vector.load %arg10[%c10_344, %c0_345, %c0_346] : memref<64x8x16xbf16, #tpu.memory_space<vmem>>, vector<1x8x16xbf16>
    %380 = vector.shape_cast %379 : vector<1x8x16xbf16> to vector<8x16xbf16>
    %cst_347 = arith.constant dense<0.000000e+00> : vector<8x16xf32>
    %381 = tpu.matmul %378, %380, %cst_347 {dimension_numbers = #tpu.dot_dimension_numbers<[1], [0], [0], [1], [0, 0, 1, 1], [], []>} : vector<8x8xbf16>, vector<8x16xbf16>, vector<8x16xf32> -> vector<8x16xf32>
    %382 = arith.addf %374, %381 : vector<8x16xf32>
    %c11_348 = arith.constant 11 : index
    %c0_349 = arith.constant 0 : index
    %c0_350 = arith.constant 0 : index
    %383 = vector.load %arg9[%c11_348, %c0_349, %c0_350] : memref<64x8x128xbf16, #tpu.memory_space<vmem>>, vector<1x8x128xbf16>
    %384 = vector.shape_cast %383 : vector<1x8x128xbf16> to vector<8x128xbf16>
    %cst_351 = arith.constant dense<0.000000e+00> : vector<8x8xf32>
    %385 = tpu.matmul %384, %295, %cst_351 {dimension_numbers = #tpu.dot_dimension_numbers<[1], [0], [0], [1], [0, 0, 1, 1], [], []>} : vector<8x128xbf16>, vector<128x8xbf16>, vector<8x8xf32> -> vector<8x8xf32>
    %386 = arith.truncf %385 : vector<8x8xf32> to vector<8x8xbf16>
    %c11_352 = arith.constant 11 : index
    %c0_353 = arith.constant 0 : index
    %c0_354 = arith.constant 0 : index
    %387 = vector.load %arg10[%c11_352, %c0_353, %c0_354] : memref<64x8x16xbf16, #tpu.memory_space<vmem>>, vector<1x8x16xbf16>
    %388 = vector.shape_cast %387 : vector<1x8x16xbf16> to vector<8x16xbf16>
    %cst_355 = arith.constant dense<0.000000e+00> : vector<8x16xf32>
    %389 = tpu.matmul %386, %388, %cst_355 {dimension_numbers = #tpu.dot_dimension_numbers<[1], [0], [0], [1], [0, 0, 1, 1], [], []>} : vector<8x8xbf16>, vector<8x16xbf16>, vector<8x16xf32> -> vector<8x16xf32>
    %390 = arith.addf %382, %389 : vector<8x16xf32>
    %c12_356 = arith.constant 12 : index
    %c0_357 = arith.constant 0 : index
    %c0_358 = arith.constant 0 : index
    %391 = vector.load %arg9[%c12_356, %c0_357, %c0_358] : memref<64x8x128xbf16, #tpu.memory_space<vmem>>, vector<1x8x128xbf16>
    %392 = vector.shape_cast %391 : vector<1x8x128xbf16> to vector<8x128xbf16>
    %cst_359 = arith.constant dense<0.000000e+00> : vector<8x8xf32>
    %393 = tpu.matmul %392, %295, %cst_359 {dimension_numbers = #tpu.dot_dimension_numbers<[1], [0], [0], [1], [0, 0, 1, 1], [], []>} : vector<8x128xbf16>, vector<128x8xbf16>, vector<8x8xf32> -> vector<8x8xf32>
    %394 = arith.truncf %393 : vector<8x8xf32> to vector<8x8xbf16>
    %c12_360 = arith.constant 12 : index
    %c0_361 = arith.constant 0 : index
    %c0_362 = arith.constant 0 : index
    %395 = vector.load %arg10[%c12_360, %c0_361, %c0_362] : memref<64x8x16xbf16, #tpu.memory_space<vmem>>, vector<1x8x16xbf16>
    %396 = vector.shape_cast %395 : vector<1x8x16xbf16> to vector<8x16xbf16>
    %cst_363 = arith.constant dense<0.000000e+00> : vector<8x16xf32>
    %397 = tpu.matmul %394, %396, %cst_363 {dimension_numbers = #tpu.dot_dimension_numbers<[1], [0], [0], [1], [0, 0, 1, 1], [], []>} : vector<8x8xbf16>, vector<8x16xbf16>, vector<8x16xf32> -> vector<8x16xf32>
    %398 = arith.addf %390, %397 : vector<8x16xf32>
    %c13_364 = arith.constant 13 : index
    %c0_365 = arith.constant 0 : index
    %c0_366 = arith.constant 0 : index
    %399 = vector.load %arg9[%c13_364, %c0_365, %c0_366] : memref<64x8x128xbf16, #tpu.memory_space<vmem>>, vector<1x8x128xbf16>
    %400 = vector.shape_cast %399 : vector<1x8x128xbf16> to vector<8x128xbf16>
    %cst_367 = arith.constant dense<0.000000e+00> : vector<8x8xf32>
    %401 = tpu.matmul %400, %295, %cst_367 {dimension_numbers = #tpu.dot_dimension_numbers<[1], [0], [0], [1], [0, 0, 1, 1], [], []>} : vector<8x128xbf16>, vector<128x8xbf16>, vector<8x8xf32> -> vector<8x8xf32>
    %402 = arith.truncf %401 : vector<8x8xf32> to vector<8x8xbf16>
    %c13_368 = arith.constant 13 : index
    %c0_369 = arith.constant 0 : index
    %c0_370 = arith.constant 0 : index
    %403 = vector.load %arg10[%c13_368, %c0_369, %c0_370] : memref<64x8x16xbf16, #tpu.memory_space<vmem>>, vector<1x8x16xbf16>
    %404 = vector.shape_cast %403 : vector<1x8x16xbf16> to vector<8x16xbf16>
    %cst_371 = arith.constant dense<0.000000e+00> : vector<8x16xf32>
    %405 = tpu.matmul %402, %404, %cst_371 {dimension_numbers = #tpu.dot_dimension_numbers<[1], [0], [0], [1], [0, 0, 1, 1], [], []>} : vector<8x8xbf16>, vector<8x16xbf16>, vector<8x16xf32> -> vector<8x16xf32>
    %406 = arith.addf %398, %405 : vector<8x16xf32>
    %c14_372 = arith.constant 14 : index
    %c0_373 = arith.constant 0 : index
    %c0_374 = arith.constant 0 : index
    %407 = vector.load %arg9[%c14_372, %c0_373, %c0_374] : memref<64x8x128xbf16, #tpu.memory_space<vmem>>, vector<1x8x128xbf16>
    %408 = vector.shape_cast %407 : vector<1x8x128xbf16> to vector<8x128xbf16>
    %cst_375 = arith.constant dense<0.000000e+00> : vector<8x8xf32>
    %409 = tpu.matmul %408, %295, %cst_375 {dimension_numbers = #tpu.dot_dimension_numbers<[1], [0], [0], [1], [0, 0, 1, 1], [], []>} : vector<8x128xbf16>, vector<128x8xbf16>, vector<8x8xf32> -> vector<8x8xf32>
    %410 = arith.truncf %409 : vector<8x8xf32> to vector<8x8xbf16>
    %c14_376 = arith.constant 14 : index
    %c0_377 = arith.constant 0 : index
    %c0_378 = arith.constant 0 : index
    %411 = vector.load %arg10[%c14_376, %c0_377, %c0_378] : memref<64x8x16xbf16, #tpu.memory_space<vmem>>, vector<1x8x16xbf16>
    %412 = vector.shape_cast %411 : vector<1x8x16xbf16> to vector<8x16xbf16>
    %cst_379 = arith.constant dense<0.000000e+00> : vector<8x16xf32>
    %413 = tpu.matmul %410, %412, %cst_379 {dimension_numbers = #tpu.dot_dimension_numbers<[1], [0], [0], [1], [0, 0, 1, 1], [], []>} : vector<8x8xbf16>, vector<8x16xbf16>, vector<8x16xf32> -> vector<8x16xf32>
    %414 = arith.addf %406, %413 : vector<8x16xf32>
    %c15_380 = arith.constant 15 : index
    %c0_381 = arith.constant 0 : index
    %c0_382 = arith.constant 0 : index
    %415 = vector.load %arg9[%c15_380, %c0_381, %c0_382] : memref<64x8x128xbf16, #tpu.memory_space<vmem>>, vector<1x8x128xbf16>
    %416 = vector.shape_cast %415 : vector<1x8x128xbf16> to vector<8x128xbf16>
    %cst_383 = arith.constant dense<0.000000e+00> : vector<8x8xf32>
    %417 = tpu.matmul %416, %295, %cst_383 {dimension_numbers = #tpu.dot_dimension_numbers<[1], [0], [0], [1], [0, 0, 1, 1], [], []>} : vector<8x128xbf16>, vector<128x8xbf16>, vector<8x8xf32> -> vector<8x8xf32>
    %418 = arith.truncf %417 : vector<8x8xf32> to vector<8x8xbf16>
    %c15_384 = arith.constant 15 : index
    %c0_385 = arith.constant 0 : index
    %c0_386 = arith.constant 0 : index
    %419 = vector.load %arg10[%c15_384, %c0_385, %c0_386] : memref<64x8x16xbf16, #tpu.memory_space<vmem>>, vector<1x8x16xbf16>
    %420 = vector.shape_cast %419 : vector<1x8x16xbf16> to vector<8x16xbf16>
    %cst_387 = arith.constant dense<0.000000e+00> : vector<8x16xf32>
    %421 = tpu.matmul %418, %420, %cst_387 {dimension_numbers = #tpu.dot_dimension_numbers<[1], [0], [0], [1], [0, 0, 1, 1], [], []>} : vector<8x8xbf16>, vector<8x16xbf16>, vector<8x16xf32> -> vector<8x16xf32>
    %422 = arith.addf %414, %421 : vector<8x16xf32>
    %c16 = arith.constant 16 : index
    %c0_388 = arith.constant 0 : index
    %c0_389 = arith.constant 0 : index
    %423 = vector.load %arg9[%c16, %c0_388, %c0_389] : memref<64x8x128xbf16, #tpu.memory_space<vmem>>, vector<1x8x128xbf16>
    %424 = vector.shape_cast %423 : vector<1x8x128xbf16> to vector<8x128xbf16>
    %cst_390 = arith.constant dense<0.000000e+00> : vector<8x8xf32>
    %425 = tpu.matmul %424, %295, %cst_390 {dimension_numbers = #tpu.dot_dimension_numbers<[1], [0], [0], [1], [0, 0, 1, 1], [], []>} : vector<8x128xbf16>, vector<128x8xbf16>, vector<8x8xf32> -> vector<8x8xf32>
    %426 = arith.truncf %425 : vector<8x8xf32> to vector<8x8xbf16>
    %c16_391 = arith.constant 16 : index
    %c0_392 = arith.constant 0 : index
    %c0_393 = arith.constant 0 : index
    %427 = vector.load %arg10[%c16_391, %c0_392, %c0_393] : memref<64x8x16xbf16, #tpu.memory_space<vmem>>, vector<1x8x16xbf16>
    %428 = vector.shape_cast %427 : vector<1x8x16xbf16> to vector<8x16xbf16>
    %cst_394 = arith.constant dense<0.000000e+00> : vector<8x16xf32>
    %429 = tpu.matmul %426, %428, %cst_394 {dimension_numbers = #tpu.dot_dimension_numbers<[1], [0], [0], [1], [0, 0, 1, 1], [], []>} : vector<8x8xbf16>, vector<8x16xbf16>, vector<8x16xf32> -> vector<8x16xf32>
    %430 = arith.addf %422, %429 : vector<8x16xf32>
    %c17 = arith.constant 17 : index
    %c0_395 = arith.constant 0 : index
    %c0_396 = arith.constant 0 : index
    %431 = vector.load %arg9[%c17, %c0_395, %c0_396] : memref<64x8x128xbf16, #tpu.memory_space<vmem>>, vector<1x8x128xbf16>
    %432 = vector.shape_cast %431 : vector<1x8x128xbf16> to vector<8x128xbf16>
    %cst_397 = arith.constant dense<0.000000e+00> : vector<8x8xf32>
    %433 = tpu.matmul %432, %295, %cst_397 {dimension_numbers = #tpu.dot_dimension_numbers<[1], [0], [0], [1], [0, 0, 1, 1], [], []>} : vector<8x128xbf16>, vector<128x8xbf16>, vector<8x8xf32> -> vector<8x8xf32>
    %434 = arith.truncf %433 : vector<8x8xf32> to vector<8x8xbf16>
    %c17_398 = arith.constant 17 : index
    %c0_399 = arith.constant 0 : index
    %c0_400 = arith.constant 0 : index
    %435 = vector.load %arg10[%c17_398, %c0_399, %c0_400] : memref<64x8x16xbf16, #tpu.memory_space<vmem>>, vector<1x8x16xbf16>
    %436 = vector.shape_cast %435 : vector<1x8x16xbf16> to vector<8x16xbf16>
    %cst_401 = arith.constant dense<0.000000e+00> : vector<8x16xf32>
    %437 = tpu.matmul %434, %436, %cst_401 {dimension_numbers = #tpu.dot_dimension_numbers<[1], [0], [0], [1], [0, 0, 1, 1], [], []>} : vector<8x8xbf16>, vector<8x16xbf16>, vector<8x16xf32> -> vector<8x16xf32>
    %438 = arith.addf %430, %437 : vector<8x16xf32>
    %c18 = arith.constant 18 : index
    %c0_402 = arith.constant 0 : index
    %c0_403 = arith.constant 0 : index
    %439 = vector.load %arg9[%c18, %c0_402, %c0_403] : memref<64x8x128xbf16, #tpu.memory_space<vmem>>, vector<1x8x128xbf16>
    %440 = vector.shape_cast %439 : vector<1x8x128xbf16> to vector<8x128xbf16>
    %cst_404 = arith.constant dense<0.000000e+00> : vector<8x8xf32>
    %441 = tpu.matmul %440, %295, %cst_404 {dimension_numbers = #tpu.dot_dimension_numbers<[1], [0], [0], [1], [0, 0, 1, 1], [], []>} : vector<8x128xbf16>, vector<128x8xbf16>, vector<8x8xf32> -> vector<8x8xf32>
    %442 = arith.truncf %441 : vector<8x8xf32> to vector<8x8xbf16>
    %c18_405 = arith.constant 18 : index
    %c0_406 = arith.constant 0 : index
    %c0_407 = arith.constant 0 : index
    %443 = vector.load %arg10[%c18_405, %c0_406, %c0_407] : memref<64x8x16xbf16, #tpu.memory_space<vmem>>, vector<1x8x16xbf16>
    %444 = vector.shape_cast %443 : vector<1x8x16xbf16> to vector<8x16xbf16>
    %cst_408 = arith.constant dense<0.000000e+00> : vector<8x16xf32>
    %445 = tpu.matmul %442, %444, %cst_408 {dimension_numbers = #tpu.dot_dimension_numbers<[1], [0], [0], [1], [0, 0, 1, 1], [], []>} : vector<8x8xbf16>, vector<8x16xbf16>, vector<8x16xf32> -> vector<8x16xf32>
    %446 = arith.addf %438, %445 : vector<8x16xf32>
    %c19 = arith.constant 19 : index
    %c0_409 = arith.constant 0 : index
    %c0_410 = arith.constant 0 : index
    %447 = vector.load %arg9[%c19, %c0_409, %c0_410] : memref<64x8x128xbf16, #tpu.memory_space<vmem>>, vector<1x8x128xbf16>
    %448 = vector.shape_cast %447 : vector<1x8x128xbf16> to vector<8x128xbf16>
    %cst_411 = arith.constant dense<0.000000e+00> : vector<8x8xf32>
    %449 = tpu.matmul %448, %295, %cst_411 {dimension_numbers = #tpu.dot_dimension_numbers<[1], [0], [0], [1], [0, 0, 1, 1], [], []>} : vector<8x128xbf16>, vector<128x8xbf16>, vector<8x8xf32> -> vector<8x8xf32>
    %450 = arith.truncf %449 : vector<8x8xf32> to vector<8x8xbf16>
    %c19_412 = arith.constant 19 : index
    %c0_413 = arith.constant 0 : index
    %c0_414 = arith.constant 0 : index
    %451 = vector.load %arg10[%c19_412, %c0_413, %c0_414] : memref<64x8x16xbf16, #tpu.memory_space<vmem>>, vector<1x8x16xbf16>
    %452 = vector.shape_cast %451 : vector<1x8x16xbf16> to vector<8x16xbf16>
    %cst_415 = arith.constant dense<0.000000e+00> : vector<8x16xf32>
    %453 = tpu.matmul %450, %452, %cst_415 {dimension_numbers = #tpu.dot_dimension_numbers<[1], [0], [0], [1], [0, 0, 1, 1], [], []>} : vector<8x8xbf16>, vector<8x16xbf16>, vector<8x16xf32> -> vector<8x16xf32>
    %454 = arith.addf %446, %453 : vector<8x16xf32>
    %c20 = arith.constant 20 : index
    %c0_416 = arith.constant 0 : index
    %c0_417 = arith.constant 0 : index
    %455 = vector.load %arg9[%c20, %c0_416, %c0_417] : memref<64x8x128xbf16, #tpu.memory_space<vmem>>, vector<1x8x128xbf16>
    %456 = vector.shape_cast %455 : vector<1x8x128xbf16> to vector<8x128xbf16>
    %cst_418 = arith.constant dense<0.000000e+00> : vector<8x8xf32>
    %457 = tpu.matmul %456, %295, %cst_418 {dimension_numbers = #tpu.dot_dimension_numbers<[1], [0], [0], [1], [0, 0, 1, 1], [], []>} : vector<8x128xbf16>, vector<128x8xbf16>, vector<8x8xf32> -> vector<8x8xf32>
    %458 = arith.truncf %457 : vector<8x8xf32> to vector<8x8xbf16>
    %c20_419 = arith.constant 20 : index
    %c0_420 = arith.constant 0 : index
    %c0_421 = arith.constant 0 : index
    %459 = vector.load %arg10[%c20_419, %c0_420, %c0_421] : memref<64x8x16xbf16, #tpu.memory_space<vmem>>, vector<1x8x16xbf16>
    %460 = vector.shape_cast %459 : vector<1x8x16xbf16> to vector<8x16xbf16>
    %cst_422 = arith.constant dense<0.000000e+00> : vector<8x16xf32>
    %461 = tpu.matmul %458, %460, %cst_422 {dimension_numbers = #tpu.dot_dimension_numbers<[1], [0], [0], [1], [0, 0, 1, 1], [], []>} : vector<8x8xbf16>, vector<8x16xbf16>, vector<8x16xf32> -> vector<8x16xf32>
    %462 = arith.addf %454, %461 : vector<8x16xf32>
    %c21 = arith.constant 21 : index
    %c0_423 = arith.constant 0 : index
    %c0_424 = arith.constant 0 : index
    %463 = vector.load %arg9[%c21, %c0_423, %c0_424] : memref<64x8x128xbf16, #tpu.memory_space<vmem>>, vector<1x8x128xbf16>
    %464 = vector.shape_cast %463 : vector<1x8x128xbf16> to vector<8x128xbf16>
    %cst_425 = arith.constant dense<0.000000e+00> : vector<8x8xf32>
    %465 = tpu.matmul %464, %295, %cst_425 {dimension_numbers = #tpu.dot_dimension_numbers<[1], [0], [0], [1], [0, 0, 1, 1], [], []>} : vector<8x128xbf16>, vector<128x8xbf16>, vector<8x8xf32> -> vector<8x8xf32>
    %466 = arith.truncf %465 : vector<8x8xf32> to vector<8x8xbf16>
    %c21_426 = arith.constant 21 : index
    %c0_427 = arith.constant 0 : index
    %c0_428 = arith.constant 0 : index
    %467 = vector.load %arg10[%c21_426, %c0_427, %c0_428] : memref<64x8x16xbf16, #tpu.memory_space<vmem>>, vector<1x8x16xbf16>
    %468 = vector.shape_cast %467 : vector<1x8x16xbf16> to vector<8x16xbf16>
    %cst_429 = arith.constant dense<0.000000e+00> : vector<8x16xf32>
    %469 = tpu.matmul %466, %468, %cst_429 {dimension_numbers = #tpu.dot_dimension_numbers<[1], [0], [0], [1], [0, 0, 1, 1], [], []>} : vector<8x8xbf16>, vector<8x16xbf16>, vector<8x16xf32> -> vector<8x16xf32>
    %470 = arith.addf %462, %469 : vector<8x16xf32>
    %c22 = arith.constant 22 : index
    %c0_430 = arith.constant 0 : index
    %c0_431 = arith.constant 0 : index
    %471 = vector.load %arg9[%c22, %c0_430, %c0_431] : memref<64x8x128xbf16, #tpu.memory_space<vmem>>, vector<1x8x128xbf16>
    %472 = vector.shape_cast %471 : vector<1x8x128xbf16> to vector<8x128xbf16>
    %cst_432 = arith.constant dense<0.000000e+00> : vector<8x8xf32>
    %473 = tpu.matmul %472, %295, %cst_432 {dimension_numbers = #tpu.dot_dimension_numbers<[1], [0], [0], [1], [0, 0, 1, 1], [], []>} : vector<8x128xbf16>, vector<128x8xbf16>, vector<8x8xf32> -> vector<8x8xf32>
    %474 = arith.truncf %473 : vector<8x8xf32> to vector<8x8xbf16>
    %c22_433 = arith.constant 22 : index
    %c0_434 = arith.constant 0 : index
    %c0_435 = arith.constant 0 : index
    %475 = vector.load %arg10[%c22_433, %c0_434, %c0_435] : memref<64x8x16xbf16, #tpu.memory_space<vmem>>, vector<1x8x16xbf16>
    %476 = vector.shape_cast %475 : vector<1x8x16xbf16> to vector<8x16xbf16>
    %cst_436 = arith.constant dense<0.000000e+00> : vector<8x16xf32>
    %477 = tpu.matmul %474, %476, %cst_436 {dimension_numbers = #tpu.dot_dimension_numbers<[1], [0], [0], [1], [0, 0, 1, 1], [], []>} : vector<8x8xbf16>, vector<8x16xbf16>, vector<8x16xf32> -> vector<8x16xf32>
    %478 = arith.addf %470, %477 : vector<8x16xf32>
    %c23 = arith.constant 23 : index
    %c0_437 = arith.constant 0 : index
    %c0_438 = arith.constant 0 : index
    %479 = vector.load %arg9[%c23, %c0_437, %c0_438] : memref<64x8x128xbf16, #tpu.memory_space<vmem>>, vector<1x8x128xbf16>
    %480 = vector.shape_cast %479 : vector<1x8x128xbf16> to vector<8x128xbf16>
    %cst_439 = arith.constant dense<0.000000e+00> : vector<8x8xf32>
    %481 = tpu.matmul %480, %295, %cst_439 {dimension_numbers = #tpu.dot_dimension_numbers<[1], [0], [0], [1], [0, 0, 1, 1], [], []>} : vector<8x128xbf16>, vector<128x8xbf16>, vector<8x8xf32> -> vector<8x8xf32>
    %482 = arith.truncf %481 : vector<8x8xf32> to vector<8x8xbf16>
    %c23_440 = arith.constant 23 : index
    %c0_441 = arith.constant 0 : index
    %c0_442 = arith.constant 0 : index
    %483 = vector.load %arg10[%c23_440, %c0_441, %c0_442] : memref<64x8x16xbf16, #tpu.memory_space<vmem>>, vector<1x8x16xbf16>
    %484 = vector.shape_cast %483 : vector<1x8x16xbf16> to vector<8x16xbf16>
    %cst_443 = arith.constant dense<0.000000e+00> : vector<8x16xf32>
    %485 = tpu.matmul %482, %484, %cst_443 {dimension_numbers = #tpu.dot_dimension_numbers<[1], [0], [0], [1], [0, 0, 1, 1], [], []>} : vector<8x8xbf16>, vector<8x16xbf16>, vector<8x16xf32> -> vector<8x16xf32>
    %486 = arith.addf %478, %485 : vector<8x16xf32>
    %c24 = arith.constant 24 : index
    %c0_444 = arith.constant 0 : index
    %c0_445 = arith.constant 0 : index
    %487 = vector.load %arg9[%c24, %c0_444, %c0_445] : memref<64x8x128xbf16, #tpu.memory_space<vmem>>, vector<1x8x128xbf16>
    %488 = vector.shape_cast %487 : vector<1x8x128xbf16> to vector<8x128xbf16>
    %cst_446 = arith.constant dense<0.000000e+00> : vector<8x8xf32>
    %489 = tpu.matmul %488, %295, %cst_446 {dimension_numbers = #tpu.dot_dimension_numbers<[1], [0], [0], [1], [0, 0, 1, 1], [], []>} : vector<8x128xbf16>, vector<128x8xbf16>, vector<8x8xf32> -> vector<8x8xf32>
    %490 = arith.truncf %489 : vector<8x8xf32> to vector<8x8xbf16>
    %c24_447 = arith.constant 24 : index
    %c0_448 = arith.constant 0 : index
    %c0_449 = arith.constant 0 : index
    %491 = vector.load %arg10[%c24_447, %c0_448, %c0_449] : memref<64x8x16xbf16, #tpu.memory_space<vmem>>, vector<1x8x16xbf16>
    %492 = vector.shape_cast %491 : vector<1x8x16xbf16> to vector<8x16xbf16>
    %cst_450 = arith.constant dense<0.000000e+00> : vector<8x16xf32>
    %493 = tpu.matmul %490, %492, %cst_450 {dimension_numbers = #tpu.dot_dimension_numbers<[1], [0], [0], [1], [0, 0, 1, 1], [], []>} : vector<8x8xbf16>, vector<8x16xbf16>, vector<8x16xf32> -> vector<8x16xf32>
    %494 = arith.addf %486, %493 : vector<8x16xf32>
    %c25 = arith.constant 25 : index
    %c0_451 = arith.constant 0 : index
    %c0_452 = arith.constant 0 : index
    %495 = vector.load %arg9[%c25, %c0_451, %c0_452] : memref<64x8x128xbf16, #tpu.memory_space<vmem>>, vector<1x8x128xbf16>
    %496 = vector.shape_cast %495 : vector<1x8x128xbf16> to vector<8x128xbf16>
    %cst_453 = arith.constant dense<0.000000e+00> : vector<8x8xf32>
    %497 = tpu.matmul %496, %295, %cst_453 {dimension_numbers = #tpu.dot_dimension_numbers<[1], [0], [0], [1], [0, 0, 1, 1], [], []>} : vector<8x128xbf16>, vector<128x8xbf16>, vector<8x8xf32> -> vector<8x8xf32>
    %498 = arith.truncf %497 : vector<8x8xf32> to vector<8x8xbf16>
    %c25_454 = arith.constant 25 : index
    %c0_455 = arith.constant 0 : index
    %c0_456 = arith.constant 0 : index
    %499 = vector.load %arg10[%c25_454, %c0_455, %c0_456] : memref<64x8x16xbf16, #tpu.memory_space<vmem>>, vector<1x8x16xbf16>
    %500 = vector.shape_cast %499 : vector<1x8x16xbf16> to vector<8x16xbf16>
    %cst_457 = arith.constant dense<0.000000e+00> : vector<8x16xf32>
    %501 = tpu.matmul %498, %500, %cst_457 {dimension_numbers = #tpu.dot_dimension_numbers<[1], [0], [0], [1], [0, 0, 1, 1], [], []>} : vector<8x8xbf16>, vector<8x16xbf16>, vector<8x16xf32> -> vector<8x16xf32>
    %502 = arith.addf %494, %501 : vector<8x16xf32>
    %c26 = arith.constant 26 : index
    %c0_458 = arith.constant 0 : index
    %c0_459 = arith.constant 0 : index
    %503 = vector.load %arg9[%c26, %c0_458, %c0_459] : memref<64x8x128xbf16, #tpu.memory_space<vmem>>, vector<1x8x128xbf16>
    %504 = vector.shape_cast %503 : vector<1x8x128xbf16> to vector<8x128xbf16>
    %cst_460 = arith.constant dense<0.000000e+00> : vector<8x8xf32>
    %505 = tpu.matmul %504, %295, %cst_460 {dimension_numbers = #tpu.dot_dimension_numbers<[1], [0], [0], [1], [0, 0, 1, 1], [], []>} : vector<8x128xbf16>, vector<128x8xbf16>, vector<8x8xf32> -> vector<8x8xf32>
    %506 = arith.truncf %505 : vector<8x8xf32> to vector<8x8xbf16>
    %c26_461 = arith.constant 26 : index
    %c0_462 = arith.constant 0 : index
    %c0_463 = arith.constant 0 : index
    %507 = vector.load %arg10[%c26_461, %c0_462, %c0_463] : memref<64x8x16xbf16, #tpu.memory_space<vmem>>, vector<1x8x16xbf16>
    %508 = vector.shape_cast %507 : vector<1x8x16xbf16> to vector<8x16xbf16>
    %cst_464 = arith.constant dense<0.000000e+00> : vector<8x16xf32>
    %509 = tpu.matmul %506, %508, %cst_464 {dimension_numbers = #tpu.dot_dimension_numbers<[1], [0], [0], [1], [0, 0, 1, 1], [], []>} : vector<8x8xbf16>, vector<8x16xbf16>, vector<8x16xf32> -> vector<8x16xf32>
    %510 = arith.addf %502, %509 : vector<8x16xf32>
    %c27 = arith.constant 27 : index
    %c0_465 = arith.constant 0 : index
    %c0_466 = arith.constant 0 : index
    %511 = vector.load %arg9[%c27, %c0_465, %c0_466] : memref<64x8x128xbf16, #tpu.memory_space<vmem>>, vector<1x8x128xbf16>
    %512 = vector.shape_cast %511 : vector<1x8x128xbf16> to vector<8x128xbf16>
    %cst_467 = arith.constant dense<0.000000e+00> : vector<8x8xf32>
    %513 = tpu.matmul %512, %295, %cst_467 {dimension_numbers = #tpu.dot_dimension_numbers<[1], [0], [0], [1], [0, 0, 1, 1], [], []>} : vector<8x128xbf16>, vector<128x8xbf16>, vector<8x8xf32> -> vector<8x8xf32>
    %514 = arith.truncf %513 : vector<8x8xf32> to vector<8x8xbf16>
    %c27_468 = arith.constant 27 : index
    %c0_469 = arith.constant 0 : index
    %c0_470 = arith.constant 0 : index
    %515 = vector.load %arg10[%c27_468, %c0_469, %c0_470] : memref<64x8x16xbf16, #tpu.memory_space<vmem>>, vector<1x8x16xbf16>
    %516 = vector.shape_cast %515 : vector<1x8x16xbf16> to vector<8x16xbf16>
    %cst_471 = arith.constant dense<0.000000e+00> : vector<8x16xf32>
    %517 = tpu.matmul %514, %516, %cst_471 {dimension_numbers = #tpu.dot_dimension_numbers<[1], [0], [0], [1], [0, 0, 1, 1], [], []>} : vector<8x8xbf16>, vector<8x16xbf16>, vector<8x16xf32> -> vector<8x16xf32>
    %518 = arith.addf %510, %517 : vector<8x16xf32>
    %c28 = arith.constant 28 : index
    %c0_472 = arith.constant 0 : index
    %c0_473 = arith.constant 0 : index
    %519 = vector.load %arg9[%c28, %c0_472, %c0_473] : memref<64x8x128xbf16, #tpu.memory_space<vmem>>, vector<1x8x128xbf16>
    %520 = vector.shape_cast %519 : vector<1x8x128xbf16> to vector<8x128xbf16>
    %cst_474 = arith.constant dense<0.000000e+00> : vector<8x8xf32>
    %521 = tpu.matmul %520, %295, %cst_474 {dimension_numbers = #tpu.dot_dimension_numbers<[1], [0], [0], [1], [0, 0, 1, 1], [], []>} : vector<8x128xbf16>, vector<128x8xbf16>, vector<8x8xf32> -> vector<8x8xf32>
    %522 = arith.truncf %521 : vector<8x8xf32> to vector<8x8xbf16>
    %c28_475 = arith.constant 28 : index
    %c0_476 = arith.constant 0 : index
    %c0_477 = arith.constant 0 : index
    %523 = vector.load %arg10[%c28_475, %c0_476, %c0_477] : memref<64x8x16xbf16, #tpu.memory_space<vmem>>, vector<1x8x16xbf16>
    %524 = vector.shape_cast %523 : vector<1x8x16xbf16> to vector<8x16xbf16>
    %cst_478 = arith.constant dense<0.000000e+00> : vector<8x16xf32>
    %525 = tpu.matmul %522, %524, %cst_478 {dimension_numbers = #tpu.dot_dimension_numbers<[1], [0], [0], [1], [0, 0, 1, 1], [], []>} : vector<8x8xbf16>, vector<8x16xbf16>, vector<8x16xf32> -> vector<8x16xf32>
    %526 = arith.addf %518, %525 : vector<8x16xf32>
    %c29 = arith.constant 29 : index
    %c0_479 = arith.constant 0 : index
    %c0_480 = arith.constant 0 : index
    %527 = vector.load %arg9[%c29, %c0_479, %c0_480] : memref<64x8x128xbf16, #tpu.memory_space<vmem>>, vector<1x8x128xbf16>
    %528 = vector.shape_cast %527 : vector<1x8x128xbf16> to vector<8x128xbf16>
    %cst_481 = arith.constant dense<0.000000e+00> : vector<8x8xf32>
    %529 = tpu.matmul %528, %295, %cst_481 {dimension_numbers = #tpu.dot_dimension_numbers<[1], [0], [0], [1], [0, 0, 1, 1], [], []>} : vector<8x128xbf16>, vector<128x8xbf16>, vector<8x8xf32> -> vector<8x8xf32>
    %530 = arith.truncf %529 : vector<8x8xf32> to vector<8x8xbf16>
    %c29_482 = arith.constant 29 : index
    %c0_483 = arith.constant 0 : index
    %c0_484 = arith.constant 0 : index
    %531 = vector.load %arg10[%c29_482, %c0_483, %c0_484] : memref<64x8x16xbf16, #tpu.memory_space<vmem>>, vector<1x8x16xbf16>
    %532 = vector.shape_cast %531 : vector<1x8x16xbf16> to vector<8x16xbf16>
    %cst_485 = arith.constant dense<0.000000e+00> : vector<8x16xf32>
    %533 = tpu.matmul %530, %532, %cst_485 {dimension_numbers = #tpu.dot_dimension_numbers<[1], [0], [0], [1], [0, 0, 1, 1], [], []>} : vector<8x8xbf16>, vector<8x16xbf16>, vector<8x16xf32> -> vector<8x16xf32>
    %534 = arith.addf %526, %533 : vector<8x16xf32>
    %c30 = arith.constant 30 : index
    %c0_486 = arith.constant 0 : index
    %c0_487 = arith.constant 0 : index
    %535 = vector.load %arg9[%c30, %c0_486, %c0_487] : memref<64x8x128xbf16, #tpu.memory_space<vmem>>, vector<1x8x128xbf16>
    %536 = vector.shape_cast %535 : vector<1x8x128xbf16> to vector<8x128xbf16>
    %cst_488 = arith.constant dense<0.000000e+00> : vector<8x8xf32>
    %537 = tpu.matmul %536, %295, %cst_488 {dimension_numbers = #tpu.dot_dimension_numbers<[1], [0], [0], [1], [0, 0, 1, 1], [], []>} : vector<8x128xbf16>, vector<128x8xbf16>, vector<8x8xf32> -> vector<8x8xf32>
    %538 = arith.truncf %537 : vector<8x8xf32> to vector<8x8xbf16>
    %c30_489 = arith.constant 30 : index
    %c0_490 = arith.constant 0 : index
    %c0_491 = arith.constant 0 : index
    %539 = vector.load %arg10[%c30_489, %c0_490, %c0_491] : memref<64x8x16xbf16, #tpu.memory_space<vmem>>, vector<1x8x16xbf16>
    %540 = vector.shape_cast %539 : vector<1x8x16xbf16> to vector<8x16xbf16>
    %cst_492 = arith.constant dense<0.000000e+00> : vector<8x16xf32>
    %541 = tpu.matmul %538, %540, %cst_492 {dimension_numbers = #tpu.dot_dimension_numbers<[1], [0], [0], [1], [0, 0, 1, 1], [], []>} : vector<8x8xbf16>, vector<8x16xbf16>, vector<8x16xf32> -> vector<8x16xf32>
    %542 = arith.addf %534, %541 : vector<8x16xf32>
    %c31 = arith.constant 31 : index
    %c0_493 = arith.constant 0 : index
    %c0_494 = arith.constant 0 : index
    %543 = vector.load %arg9[%c31, %c0_493, %c0_494] : memref<64x8x128xbf16, #tpu.memory_space<vmem>>, vector<1x8x128xbf16>
    %544 = vector.shape_cast %543 : vector<1x8x128xbf16> to vector<8x128xbf16>
    %cst_495 = arith.constant dense<0.000000e+00> : vector<8x8xf32>
    %545 = tpu.matmul %544, %295, %cst_495 {dimension_numbers = #tpu.dot_dimension_numbers<[1], [0], [0], [1], [0, 0, 1, 1], [], []>} : vector<8x128xbf16>, vector<128x8xbf16>, vector<8x8xf32> -> vector<8x8xf32>
    %546 = arith.truncf %545 : vector<8x8xf32> to vector<8x8xbf16>
    %c31_496 = arith.constant 31 : index
    %c0_497 = arith.constant 0 : index
    %c0_498 = arith.constant 0 : index
    %547 = vector.load %arg10[%c31_496, %c0_497, %c0_498] : memref<64x8x16xbf16, #tpu.memory_space<vmem>>, vector<1x8x16xbf16>
    %548 = vector.shape_cast %547 : vector<1x8x16xbf16> to vector<8x16xbf16>
    %cst_499 = arith.constant dense<0.000000e+00> : vector<8x16xf32>
    %549 = tpu.matmul %546, %548, %cst_499 {dimension_numbers = #tpu.dot_dimension_numbers<[1], [0], [0], [1], [0, 0, 1, 1], [], []>} : vector<8x8xbf16>, vector<8x16xbf16>, vector<8x16xf32> -> vector<8x16xf32>
    %550 = arith.addf %542, %549 : vector<8x16xf32>
    %c32 = arith.constant 32 : index
    %c0_500 = arith.constant 0 : index
    %c0_501 = arith.constant 0 : index
    %551 = vector.load %arg9[%c32, %c0_500, %c0_501] : memref<64x8x128xbf16, #tpu.memory_space<vmem>>, vector<1x8x128xbf16>
    %552 = vector.shape_cast %551 : vector<1x8x128xbf16> to vector<8x128xbf16>
    %cst_502 = arith.constant dense<0.000000e+00> : vector<8x8xf32>
    %553 = tpu.matmul %552, %295, %cst_502 {dimension_numbers = #tpu.dot_dimension_numbers<[1], [0], [0], [1], [0, 0, 1, 1], [], []>} : vector<8x128xbf16>, vector<128x8xbf16>, vector<8x8xf32> -> vector<8x8xf32>
    %554 = arith.truncf %553 : vector<8x8xf32> to vector<8x8xbf16>
    %c32_503 = arith.constant 32 : index
    %c0_504 = arith.constant 0 : index
    %c0_505 = arith.constant 0 : index
    %555 = vector.load %arg10[%c32_503, %c0_504, %c0_505] : memref<64x8x16xbf16, #tpu.memory_space<vmem>>, vector<1x8x16xbf16>
    %556 = vector.shape_cast %555 : vector<1x8x16xbf16> to vector<8x16xbf16>
    %cst_506 = arith.constant dense<0.000000e+00> : vector<8x16xf32>
    %557 = tpu.matmul %554, %556, %cst_506 {dimension_numbers = #tpu.dot_dimension_numbers<[1], [0], [0], [1], [0, 0, 1, 1], [], []>} : vector<8x8xbf16>, vector<8x16xbf16>, vector<8x16xf32> -> vector<8x16xf32>
    %558 = arith.addf %550, %557 : vector<8x16xf32>
    %c33 = arith.constant 33 : index
    %c0_507 = arith.constant 0 : index
    %c0_508 = arith.constant 0 : index
    %559 = vector.load %arg9[%c33, %c0_507, %c0_508] : memref<64x8x128xbf16, #tpu.memory_space<vmem>>, vector<1x8x128xbf16>
    %560 = vector.shape_cast %559 : vector<1x8x128xbf16> to vector<8x128xbf16>
    %cst_509 = arith.constant dense<0.000000e+00> : vector<8x8xf32>
    %561 = tpu.matmul %560, %295, %cst_509 {dimension_numbers = #tpu.dot_dimension_numbers<[1], [0], [0], [1], [0, 0, 1, 1], [], []>} : vector<8x128xbf16>, vector<128x8xbf16>, vector<8x8xf32> -> vector<8x8xf32>
    %562 = arith.truncf %561 : vector<8x8xf32> to vector<8x8xbf16>
    %c33_510 = arith.constant 33 : index
    %c0_511 = arith.constant 0 : index
    %c0_512 = arith.constant 0 : index
    %563 = vector.load %arg10[%c33_510, %c0_511, %c0_512] : memref<64x8x16xbf16, #tpu.memory_space<vmem>>, vector<1x8x16xbf16>
    %564 = vector.shape_cast %563 : vector<1x8x16xbf16> to vector<8x16xbf16>
    %cst_513 = arith.constant dense<0.000000e+00> : vector<8x16xf32>
    %565 = tpu.matmul %562, %564, %cst_513 {dimension_numbers = #tpu.dot_dimension_numbers<[1], [0], [0], [1], [0, 0, 1, 1], [], []>} : vector<8x8xbf16>, vector<8x16xbf16>, vector<8x16xf32> -> vector<8x16xf32>
    %566 = arith.addf %558, %565 : vector<8x16xf32>
    %c34 = arith.constant 34 : index
    %c0_514 = arith.constant 0 : index
    %c0_515 = arith.constant 0 : index
    %567 = vector.load %arg9[%c34, %c0_514, %c0_515] : memref<64x8x128xbf16, #tpu.memory_space<vmem>>, vector<1x8x128xbf16>
    %568 = vector.shape_cast %567 : vector<1x8x128xbf16> to vector<8x128xbf16>
    %cst_516 = arith.constant dense<0.000000e+00> : vector<8x8xf32>
    %569 = tpu.matmul %568, %295, %cst_516 {dimension_numbers = #tpu.dot_dimension_numbers<[1], [0], [0], [1], [0, 0, 1, 1], [], []>} : vector<8x128xbf16>, vector<128x8xbf16>, vector<8x8xf32> -> vector<8x8xf32>
    %570 = arith.truncf %569 : vector<8x8xf32> to vector<8x8xbf16>
    %c34_517 = arith.constant 34 : index
    %c0_518 = arith.constant 0 : index
    %c0_519 = arith.constant 0 : index
    %571 = vector.load %arg10[%c34_517, %c0_518, %c0_519] : memref<64x8x16xbf16, #tpu.memory_space<vmem>>, vector<1x8x16xbf16>
    %572 = vector.shape_cast %571 : vector<1x8x16xbf16> to vector<8x16xbf16>
    %cst_520 = arith.constant dense<0.000000e+00> : vector<8x16xf32>
    %573 = tpu.matmul %570, %572, %cst_520 {dimension_numbers = #tpu.dot_dimension_numbers<[1], [0], [0], [1], [0, 0, 1, 1], [], []>} : vector<8x8xbf16>, vector<8x16xbf16>, vector<8x16xf32> -> vector<8x16xf32>
    %574 = arith.addf %566, %573 : vector<8x16xf32>
    %c35 = arith.constant 35 : index
    %c0_521 = arith.constant 0 : index
    %c0_522 = arith.constant 0 : index
    %575 = vector.load %arg9[%c35, %c0_521, %c0_522] : memref<64x8x128xbf16, #tpu.memory_space<vmem>>, vector<1x8x128xbf16>
    %576 = vector.shape_cast %575 : vector<1x8x128xbf16> to vector<8x128xbf16>
    %cst_523 = arith.constant dense<0.000000e+00> : vector<8x8xf32>
    %577 = tpu.matmul %576, %295, %cst_523 {dimension_numbers = #tpu.dot_dimension_numbers<[1], [0], [0], [1], [0, 0, 1, 1], [], []>} : vector<8x128xbf16>, vector<128x8xbf16>, vector<8x8xf32> -> vector<8x8xf32>
    %578 = arith.truncf %577 : vector<8x8xf32> to vector<8x8xbf16>
    %c35_524 = arith.constant 35 : index
    %c0_525 = arith.constant 0 : index
    %c0_526 = arith.constant 0 : index
    %579 = vector.load %arg10[%c35_524, %c0_525, %c0_526] : memref<64x8x16xbf16, #tpu.memory_space<vmem>>, vector<1x8x16xbf16>
    %580 = vector.shape_cast %579 : vector<1x8x16xbf16> to vector<8x16xbf16>
    %cst_527 = arith.constant dense<0.000000e+00> : vector<8x16xf32>
    %581 = tpu.matmul %578, %580, %cst_527 {dimension_numbers = #tpu.dot_dimension_numbers<[1], [0], [0], [1], [0, 0, 1, 1], [], []>} : vector<8x8xbf16>, vector<8x16xbf16>, vector<8x16xf32> -> vector<8x16xf32>
    %582 = arith.addf %574, %581 : vector<8x16xf32>
    %c36 = arith.constant 36 : index
    %c0_528 = arith.constant 0 : index
    %c0_529 = arith.constant 0 : index
    %583 = vector.load %arg9[%c36, %c0_528, %c0_529] : memref<64x8x128xbf16, #tpu.memory_space<vmem>>, vector<1x8x128xbf16>
    %584 = vector.shape_cast %583 : vector<1x8x128xbf16> to vector<8x128xbf16>
    %cst_530 = arith.constant dense<0.000000e+00> : vector<8x8xf32>
    %585 = tpu.matmul %584, %295, %cst_530 {dimension_numbers = #tpu.dot_dimension_numbers<[1], [0], [0], [1], [0, 0, 1, 1], [], []>} : vector<8x128xbf16>, vector<128x8xbf16>, vector<8x8xf32> -> vector<8x8xf32>
    %586 = arith.truncf %585 : vector<8x8xf32> to vector<8x8xbf16>
    %c36_531 = arith.constant 36 : index
    %c0_532 = arith.constant 0 : index
    %c0_533 = arith.constant 0 : index
    %587 = vector.load %arg10[%c36_531, %c0_532, %c0_533] : memref<64x8x16xbf16, #tpu.memory_space<vmem>>, vector<1x8x16xbf16>
    %588 = vector.shape_cast %587 : vector<1x8x16xbf16> to vector<8x16xbf16>
    %cst_534 = arith.constant dense<0.000000e+00> : vector<8x16xf32>
    %589 = tpu.matmul %586, %588, %cst_534 {dimension_numbers = #tpu.dot_dimension_numbers<[1], [0], [0], [1], [0, 0, 1, 1], [], []>} : vector<8x8xbf16>, vector<8x16xbf16>, vector<8x16xf32> -> vector<8x16xf32>
    %590 = arith.addf %582, %589 : vector<8x16xf32>
    %c37 = arith.constant 37 : index
    %c0_535 = arith.constant 0 : index
    %c0_536 = arith.constant 0 : index
    %591 = vector.load %arg9[%c37, %c0_535, %c0_536] : memref<64x8x128xbf16, #tpu.memory_space<vmem>>, vector<1x8x128xbf16>
    %592 = vector.shape_cast %591 : vector<1x8x128xbf16> to vector<8x128xbf16>
    %cst_537 = arith.constant dense<0.000000e+00> : vector<8x8xf32>
    %593 = tpu.matmul %592, %295, %cst_537 {dimension_numbers = #tpu.dot_dimension_numbers<[1], [0], [0], [1], [0, 0, 1, 1], [], []>} : vector<8x128xbf16>, vector<128x8xbf16>, vector<8x8xf32> -> vector<8x8xf32>
    %594 = arith.truncf %593 : vector<8x8xf32> to vector<8x8xbf16>
    %c37_538 = arith.constant 37 : index
    %c0_539 = arith.constant 0 : index
    %c0_540 = arith.constant 0 : index
    %595 = vector.load %arg10[%c37_538, %c0_539, %c0_540] : memref<64x8x16xbf16, #tpu.memory_space<vmem>>, vector<1x8x16xbf16>
    %596 = vector.shape_cast %595 : vector<1x8x16xbf16> to vector<8x16xbf16>
    %cst_541 = arith.constant dense<0.000000e+00> : vector<8x16xf32>
    %597 = tpu.matmul %594, %596, %cst_541 {dimension_numbers = #tpu.dot_dimension_numbers<[1], [0], [0], [1], [0, 0, 1, 1], [], []>} : vector<8x8xbf16>, vector<8x16xbf16>, vector<8x16xf32> -> vector<8x16xf32>
    %598 = arith.addf %590, %597 : vector<8x16xf32>
    %c38 = arith.constant 38 : index
    %c0_542 = arith.constant 0 : index
    %c0_543 = arith.constant 0 : index
    %599 = vector.load %arg9[%c38, %c0_542, %c0_543] : memref<64x8x128xbf16, #tpu.memory_space<vmem>>, vector<1x8x128xbf16>
    %600 = vector.shape_cast %599 : vector<1x8x128xbf16> to vector<8x128xbf16>
    %cst_544 = arith.constant dense<0.000000e+00> : vector<8x8xf32>
    %601 = tpu.matmul %600, %295, %cst_544 {dimension_numbers = #tpu.dot_dimension_numbers<[1], [0], [0], [1], [0, 0, 1, 1], [], []>} : vector<8x128xbf16>, vector<128x8xbf16>, vector<8x8xf32> -> vector<8x8xf32>
    %602 = arith.truncf %601 : vector<8x8xf32> to vector<8x8xbf16>
    %c38_545 = arith.constant 38 : index
    %c0_546 = arith.constant 0 : index
    %c0_547 = arith.constant 0 : index
    %603 = vector.load %arg10[%c38_545, %c0_546, %c0_547] : memref<64x8x16xbf16, #tpu.memory_space<vmem>>, vector<1x8x16xbf16>
    %604 = vector.shape_cast %603 : vector<1x8x16xbf16> to vector<8x16xbf16>
    %cst_548 = arith.constant dense<0.000000e+00> : vector<8x16xf32>
    %605 = tpu.matmul %602, %604, %cst_548 {dimension_numbers = #tpu.dot_dimension_numbers<[1], [0], [0], [1], [0, 0, 1, 1], [], []>} : vector<8x8xbf16>, vector<8x16xbf16>, vector<8x16xf32> -> vector<8x16xf32>
    %606 = arith.addf %598, %605 : vector<8x16xf32>
    %c39 = arith.constant 39 : index
    %c0_549 = arith.constant 0 : index
    %c0_550 = arith.constant 0 : index
    %607 = vector.load %arg9[%c39, %c0_549, %c0_550] : memref<64x8x128xbf16, #tpu.memory_space<vmem>>, vector<1x8x128xbf16>
    %608 = vector.shape_cast %607 : vector<1x8x128xbf16> to vector<8x128xbf16>
    %cst_551 = arith.constant dense<0.000000e+00> : vector<8x8xf32>
    %609 = tpu.matmul %608, %295, %cst_551 {dimension_numbers = #tpu.dot_dimension_numbers<[1], [0], [0], [1], [0, 0, 1, 1], [], []>} : vector<8x128xbf16>, vector<128x8xbf16>, vector<8x8xf32> -> vector<8x8xf32>
    %610 = arith.truncf %609 : vector<8x8xf32> to vector<8x8xbf16>
    %c39_552 = arith.constant 39 : index
    %c0_553 = arith.constant 0 : index
    %c0_554 = arith.constant 0 : index
    %611 = vector.load %arg10[%c39_552, %c0_553, %c0_554] : memref<64x8x16xbf16, #tpu.memory_space<vmem>>, vector<1x8x16xbf16>
    %612 = vector.shape_cast %611 : vector<1x8x16xbf16> to vector<8x16xbf16>
    %cst_555 = arith.constant dense<0.000000e+00> : vector<8x16xf32>
    %613 = tpu.matmul %610, %612, %cst_555 {dimension_numbers = #tpu.dot_dimension_numbers<[1], [0], [0], [1], [0, 0, 1, 1], [], []>} : vector<8x8xbf16>, vector<8x16xbf16>, vector<8x16xf32> -> vector<8x16xf32>
    %614 = arith.addf %606, %613 : vector<8x16xf32>
    %c40 = arith.constant 40 : index
    %c0_556 = arith.constant 0 : index
    %c0_557 = arith.constant 0 : index
    %615 = vector.load %arg9[%c40, %c0_556, %c0_557] : memref<64x8x128xbf16, #tpu.memory_space<vmem>>, vector<1x8x128xbf16>
    %616 = vector.shape_cast %615 : vector<1x8x128xbf16> to vector<8x128xbf16>
    %cst_558 = arith.constant dense<0.000000e+00> : vector<8x8xf32>
    %617 = tpu.matmul %616, %295, %cst_558 {dimension_numbers = #tpu.dot_dimension_numbers<[1], [0], [0], [1], [0, 0, 1, 1], [], []>} : vector<8x128xbf16>, vector<128x8xbf16>, vector<8x8xf32> -> vector<8x8xf32>
    %618 = arith.truncf %617 : vector<8x8xf32> to vector<8x8xbf16>
    %c40_559 = arith.constant 40 : index
    %c0_560 = arith.constant 0 : index
    %c0_561 = arith.constant 0 : index
    %619 = vector.load %arg10[%c40_559, %c0_560, %c0_561] : memref<64x8x16xbf16, #tpu.memory_space<vmem>>, vector<1x8x16xbf16>
    %620 = vector.shape_cast %619 : vector<1x8x16xbf16> to vector<8x16xbf16>
    %cst_562 = arith.constant dense<0.000000e+00> : vector<8x16xf32>
    %621 = tpu.matmul %618, %620, %cst_562 {dimension_numbers = #tpu.dot_dimension_numbers<[1], [0], [0], [1], [0, 0, 1, 1], [], []>} : vector<8x8xbf16>, vector<8x16xbf16>, vector<8x16xf32> -> vector<8x16xf32>
    %622 = arith.addf %614, %621 : vector<8x16xf32>
    %c41 = arith.constant 41 : index
    %c0_563 = arith.constant 0 : index
    %c0_564 = arith.constant 0 : index
    %623 = vector.load %arg9[%c41, %c0_563, %c0_564] : memref<64x8x128xbf16, #tpu.memory_space<vmem>>, vector<1x8x128xbf16>
    %624 = vector.shape_cast %623 : vector<1x8x128xbf16> to vector<8x128xbf16>
    %cst_565 = arith.constant dense<0.000000e+00> : vector<8x8xf32>
    %625 = tpu.matmul %624, %295, %cst_565 {dimension_numbers = #tpu.dot_dimension_numbers<[1], [0], [0], [1], [0, 0, 1, 1], [], []>} : vector<8x128xbf16>, vector<128x8xbf16>, vector<8x8xf32> -> vector<8x8xf32>
    %626 = arith.truncf %625 : vector<8x8xf32> to vector<8x8xbf16>
    %c41_566 = arith.constant 41 : index
    %c0_567 = arith.constant 0 : index
    %c0_568 = arith.constant 0 : index
    %627 = vector.load %arg10[%c41_566, %c0_567, %c0_568] : memref<64x8x16xbf16, #tpu.memory_space<vmem>>, vector<1x8x16xbf16>
    %628 = vector.shape_cast %627 : vector<1x8x16xbf16> to vector<8x16xbf16>
    %cst_569 = arith.constant dense<0.000000e+00> : vector<8x16xf32>
    %629 = tpu.matmul %626, %628, %cst_569 {dimension_numbers = #tpu.dot_dimension_numbers<[1], [0], [0], [1], [0, 0, 1, 1], [], []>} : vector<8x8xbf16>, vector<8x16xbf16>, vector<8x16xf32> -> vector<8x16xf32>
    %630 = arith.addf %622, %629 : vector<8x16xf32>
    %c42 = arith.constant 42 : index
    %c0_570 = arith.constant 0 : index
    %c0_571 = arith.constant 0 : index
    %631 = vector.load %arg9[%c42, %c0_570, %c0_571] : memref<64x8x128xbf16, #tpu.memory_space<vmem>>, vector<1x8x128xbf16>
    %632 = vector.shape_cast %631 : vector<1x8x128xbf16> to vector<8x128xbf16>
    %cst_572 = arith.constant dense<0.000000e+00> : vector<8x8xf32>
    %633 = tpu.matmul %632, %295, %cst_572 {dimension_numbers = #tpu.dot_dimension_numbers<[1], [0], [0], [1], [0, 0, 1, 1], [], []>} : vector<8x128xbf16>, vector<128x8xbf16>, vector<8x8xf32> -> vector<8x8xf32>
    %634 = arith.truncf %633 : vector<8x8xf32> to vector<8x8xbf16>
    %c42_573 = arith.constant 42 : index
    %c0_574 = arith.constant 0 : index
    %c0_575 = arith.constant 0 : index
    %635 = vector.load %arg10[%c42_573, %c0_574, %c0_575] : memref<64x8x16xbf16, #tpu.memory_space<vmem>>, vector<1x8x16xbf16>
    %636 = vector.shape_cast %635 : vector<1x8x16xbf16> to vector<8x16xbf16>
    %cst_576 = arith.constant dense<0.000000e+00> : vector<8x16xf32>
    %637 = tpu.matmul %634, %636, %cst_576 {dimension_numbers = #tpu.dot_dimension_numbers<[1], [0], [0], [1], [0, 0, 1, 1], [], []>} : vector<8x8xbf16>, vector<8x16xbf16>, vector<8x16xf32> -> vector<8x16xf32>
    %638 = arith.addf %630, %637 : vector<8x16xf32>
    %c43 = arith.constant 43 : index
    %c0_577 = arith.constant 0 : index
    %c0_578 = arith.constant 0 : index
    %639 = vector.load %arg9[%c43, %c0_577, %c0_578] : memref<64x8x128xbf16, #tpu.memory_space<vmem>>, vector<1x8x128xbf16>
    %640 = vector.shape_cast %639 : vector<1x8x128xbf16> to vector<8x128xbf16>
    %cst_579 = arith.constant dense<0.000000e+00> : vector<8x8xf32>
    %641 = tpu.matmul %640, %295, %cst_579 {dimension_numbers = #tpu.dot_dimension_numbers<[1], [0], [0], [1], [0, 0, 1, 1], [], []>} : vector<8x128xbf16>, vector<128x8xbf16>, vector<8x8xf32> -> vector<8x8xf32>
    %642 = arith.truncf %641 : vector<8x8xf32> to vector<8x8xbf16>
    %c43_580 = arith.constant 43 : index
    %c0_581 = arith.constant 0 : index
    %c0_582 = arith.constant 0 : index
    %643 = vector.load %arg10[%c43_580, %c0_581, %c0_582] : memref<64x8x16xbf16, #tpu.memory_space<vmem>>, vector<1x8x16xbf16>
    %644 = vector.shape_cast %643 : vector<1x8x16xbf16> to vector<8x16xbf16>
    %cst_583 = arith.constant dense<0.000000e+00> : vector<8x16xf32>
    %645 = tpu.matmul %642, %644, %cst_583 {dimension_numbers = #tpu.dot_dimension_numbers<[1], [0], [0], [1], [0, 0, 1, 1], [], []>} : vector<8x8xbf16>, vector<8x16xbf16>, vector<8x16xf32> -> vector<8x16xf32>
    %646 = arith.addf %638, %645 : vector<8x16xf32>
    %c44 = arith.constant 44 : index
    %c0_584 = arith.constant 0 : index
    %c0_585 = arith.constant 0 : index
    %647 = vector.load %arg9[%c44, %c0_584, %c0_585] : memref<64x8x128xbf16, #tpu.memory_space<vmem>>, vector<1x8x128xbf16>
    %648 = vector.shape_cast %647 : vector<1x8x128xbf16> to vector<8x128xbf16>
    %cst_586 = arith.constant dense<0.000000e+00> : vector<8x8xf32>
    %649 = tpu.matmul %648, %295, %cst_586 {dimension_numbers = #tpu.dot_dimension_numbers<[1], [0], [0], [1], [0, 0, 1, 1], [], []>} : vector<8x128xbf16>, vector<128x8xbf16>, vector<8x8xf32> -> vector<8x8xf32>
    %650 = arith.truncf %649 : vector<8x8xf32> to vector<8x8xbf16>
    %c44_587 = arith.constant 44 : index
    %c0_588 = arith.constant 0 : index
    %c0_589 = arith.constant 0 : index
    %651 = vector.load %arg10[%c44_587, %c0_588, %c0_589] : memref<64x8x16xbf16, #tpu.memory_space<vmem>>, vector<1x8x16xbf16>
    %652 = vector.shape_cast %651 : vector<1x8x16xbf16> to vector<8x16xbf16>
    %cst_590 = arith.constant dense<0.000000e+00> : vector<8x16xf32>
    %653 = tpu.matmul %650, %652, %cst_590 {dimension_numbers = #tpu.dot_dimension_numbers<[1], [0], [0], [1], [0, 0, 1, 1], [], []>} : vector<8x8xbf16>, vector<8x16xbf16>, vector<8x16xf32> -> vector<8x16xf32>
    %654 = arith.addf %646, %653 : vector<8x16xf32>
    %c45 = arith.constant 45 : index
    %c0_591 = arith.constant 0 : index
    %c0_592 = arith.constant 0 : index
    %655 = vector.load %arg9[%c45, %c0_591, %c0_592] : memref<64x8x128xbf16, #tpu.memory_space<vmem>>, vector<1x8x128xbf16>
    %656 = vector.shape_cast %655 : vector<1x8x128xbf16> to vector<8x128xbf16>
    %cst_593 = arith.constant dense<0.000000e+00> : vector<8x8xf32>
    %657 = tpu.matmul %656, %295, %cst_593 {dimension_numbers = #tpu.dot_dimension_numbers<[1], [0], [0], [1], [0, 0, 1, 1], [], []>} : vector<8x128xbf16>, vector<128x8xbf16>, vector<8x8xf32> -> vector<8x8xf32>
    %658 = arith.truncf %657 : vector<8x8xf32> to vector<8x8xbf16>
    %c45_594 = arith.constant 45 : index
    %c0_595 = arith.constant 0 : index
    %c0_596 = arith.constant 0 : index
    %659 = vector.load %arg10[%c45_594, %c0_595, %c0_596] : memref<64x8x16xbf16, #tpu.memory_space<vmem>>, vector<1x8x16xbf16>
    %660 = vector.shape_cast %659 : vector<1x8x16xbf16> to vector<8x16xbf16>
    %cst_597 = arith.constant dense<0.000000e+00> : vector<8x16xf32>
    %661 = tpu.matmul %658, %660, %cst_597 {dimension_numbers = #tpu.dot_dimension_numbers<[1], [0], [0], [1], [0, 0, 1, 1], [], []>} : vector<8x8xbf16>, vector<8x16xbf16>, vector<8x16xf32> -> vector<8x16xf32>
    %662 = arith.addf %654, %661 : vector<8x16xf32>
    %c46 = arith.constant 46 : index
    %c0_598 = arith.constant 0 : index
    %c0_599 = arith.constant 0 : index
    %663 = vector.load %arg9[%c46, %c0_598, %c0_599] : memref<64x8x128xbf16, #tpu.memory_space<vmem>>, vector<1x8x128xbf16>
    %664 = vector.shape_cast %663 : vector<1x8x128xbf16> to vector<8x128xbf16>
    %cst_600 = arith.constant dense<0.000000e+00> : vector<8x8xf32>
    %665 = tpu.matmul %664, %295, %cst_600 {dimension_numbers = #tpu.dot_dimension_numbers<[1], [0], [0], [1], [0, 0, 1, 1], [], []>} : vector<8x128xbf16>, vector<128x8xbf16>, vector<8x8xf32> -> vector<8x8xf32>
    %666 = arith.truncf %665 : vector<8x8xf32> to vector<8x8xbf16>
    %c46_601 = arith.constant 46 : index
    %c0_602 = arith.constant 0 : index
    %c0_603 = arith.constant 0 : index
    %667 = vector.load %arg10[%c46_601, %c0_602, %c0_603] : memref<64x8x16xbf16, #tpu.memory_space<vmem>>, vector<1x8x16xbf16>
    %668 = vector.shape_cast %667 : vector<1x8x16xbf16> to vector<8x16xbf16>
    %cst_604 = arith.constant dense<0.000000e+00> : vector<8x16xf32>
    %669 = tpu.matmul %666, %668, %cst_604 {dimension_numbers = #tpu.dot_dimension_numbers<[1], [0], [0], [1], [0, 0, 1, 1], [], []>} : vector<8x8xbf16>, vector<8x16xbf16>, vector<8x16xf32> -> vector<8x16xf32>
    %670 = arith.addf %662, %669 : vector<8x16xf32>
    %c47 = arith.constant 47 : index
    %c0_605 = arith.constant 0 : index
    %c0_606 = arith.constant 0 : index
    %671 = vector.load %arg9[%c47, %c0_605, %c0_606] : memref<64x8x128xbf16, #tpu.memory_space<vmem>>, vector<1x8x128xbf16>
    %672 = vector.shape_cast %671 : vector<1x8x128xbf16> to vector<8x128xbf16>
    %cst_607 = arith.constant dense<0.000000e+00> : vector<8x8xf32>
    %673 = tpu.matmul %672, %295, %cst_607 {dimension_numbers = #tpu.dot_dimension_numbers<[1], [0], [0], [1], [0, 0, 1, 1], [], []>} : vector<8x128xbf16>, vector<128x8xbf16>, vector<8x8xf32> -> vector<8x8xf32>
    %674 = arith.truncf %673 : vector<8x8xf32> to vector<8x8xbf16>
    %c47_608 = arith.constant 47 : index
    %c0_609 = arith.constant 0 : index
    %c0_610 = arith.constant 0 : index
    %675 = vector.load %arg10[%c47_608, %c0_609, %c0_610] : memref<64x8x16xbf16, #tpu.memory_space<vmem>>, vector<1x8x16xbf16>
    %676 = vector.shape_cast %675 : vector<1x8x16xbf16> to vector<8x16xbf16>
    %cst_611 = arith.constant dense<0.000000e+00> : vector<8x16xf32>
    %677 = tpu.matmul %674, %676, %cst_611 {dimension_numbers = #tpu.dot_dimension_numbers<[1], [0], [0], [1], [0, 0, 1, 1], [], []>} : vector<8x8xbf16>, vector<8x16xbf16>, vector<8x16xf32> -> vector<8x16xf32>
    %678 = arith.addf %670, %677 : vector<8x16xf32>
    %c48 = arith.constant 48 : index
    %c0_612 = arith.constant 0 : index
    %c0_613 = arith.constant 0 : index
    %679 = vector.load %arg9[%c48, %c0_612, %c0_613] : memref<64x8x128xbf16, #tpu.memory_space<vmem>>, vector<1x8x128xbf16>
    %680 = vector.shape_cast %679 : vector<1x8x128xbf16> to vector<8x128xbf16>
    %cst_614 = arith.constant dense<0.000000e+00> : vector<8x8xf32>
    %681 = tpu.matmul %680, %295, %cst_614 {dimension_numbers = #tpu.dot_dimension_numbers<[1], [0], [0], [1], [0, 0, 1, 1], [], []>} : vector<8x128xbf16>, vector<128x8xbf16>, vector<8x8xf32> -> vector<8x8xf32>
    %682 = arith.truncf %681 : vector<8x8xf32> to vector<8x8xbf16>
    %c48_615 = arith.constant 48 : index
    %c0_616 = arith.constant 0 : index
    %c0_617 = arith.constant 0 : index
    %683 = vector.load %arg10[%c48_615, %c0_616, %c0_617] : memref<64x8x16xbf16, #tpu.memory_space<vmem>>, vector<1x8x16xbf16>
    %684 = vector.shape_cast %683 : vector<1x8x16xbf16> to vector<8x16xbf16>
    %cst_618 = arith.constant dense<0.000000e+00> : vector<8x16xf32>
    %685 = tpu.matmul %682, %684, %cst_618 {dimension_numbers = #tpu.dot_dimension_numbers<[1], [0], [0], [1], [0, 0, 1, 1], [], []>} : vector<8x8xbf16>, vector<8x16xbf16>, vector<8x16xf32> -> vector<8x16xf32>
    %686 = arith.addf %678, %685 : vector<8x16xf32>
    %c49 = arith.constant 49 : index
    %c0_619 = arith.constant 0 : index
    %c0_620 = arith.constant 0 : index
    %687 = vector.load %arg9[%c49, %c0_619, %c0_620] : memref<64x8x128xbf16, #tpu.memory_space<vmem>>, vector<1x8x128xbf16>
    %688 = vector.shape_cast %687 : vector<1x8x128xbf16> to vector<8x128xbf16>
    %cst_621 = arith.constant dense<0.000000e+00> : vector<8x8xf32>
    %689 = tpu.matmul %688, %295, %cst_621 {dimension_numbers = #tpu.dot_dimension_numbers<[1], [0], [0], [1], [0, 0, 1, 1], [], []>} : vector<8x128xbf16>, vector<128x8xbf16>, vector<8x8xf32> -> vector<8x8xf32>
    %690 = arith.truncf %689 : vector<8x8xf32> to vector<8x8xbf16>
    %c49_622 = arith.constant 49 : index
    %c0_623 = arith.constant 0 : index
    %c0_624 = arith.constant 0 : index
    %691 = vector.load %arg10[%c49_622, %c0_623, %c0_624] : memref<64x8x16xbf16, #tpu.memory_space<vmem>>, vector<1x8x16xbf16>
    %692 = vector.shape_cast %691 : vector<1x8x16xbf16> to vector<8x16xbf16>
    %cst_625 = arith.constant dense<0.000000e+00> : vector<8x16xf32>
    %693 = tpu.matmul %690, %692, %cst_625 {dimension_numbers = #tpu.dot_dimension_numbers<[1], [0], [0], [1], [0, 0, 1, 1], [], []>} : vector<8x8xbf16>, vector<8x16xbf16>, vector<8x16xf32> -> vector<8x16xf32>
    %694 = arith.addf %686, %693 : vector<8x16xf32>
    %c50 = arith.constant 50 : index
    %c0_626 = arith.constant 0 : index
    %c0_627 = arith.constant 0 : index
    %695 = vector.load %arg9[%c50, %c0_626, %c0_627] : memref<64x8x128xbf16, #tpu.memory_space<vmem>>, vector<1x8x128xbf16>
    %696 = vector.shape_cast %695 : vector<1x8x128xbf16> to vector<8x128xbf16>
    %cst_628 = arith.constant dense<0.000000e+00> : vector<8x8xf32>
    %697 = tpu.matmul %696, %295, %cst_628 {dimension_numbers = #tpu.dot_dimension_numbers<[1], [0], [0], [1], [0, 0, 1, 1], [], []>} : vector<8x128xbf16>, vector<128x8xbf16>, vector<8x8xf32> -> vector<8x8xf32>
    %698 = arith.truncf %697 : vector<8x8xf32> to vector<8x8xbf16>
    %c50_629 = arith.constant 50 : index
    %c0_630 = arith.constant 0 : index
    %c0_631 = arith.constant 0 : index
    %699 = vector.load %arg10[%c50_629, %c0_630, %c0_631] : memref<64x8x16xbf16, #tpu.memory_space<vmem>>, vector<1x8x16xbf16>
    %700 = vector.shape_cast %699 : vector<1x8x16xbf16> to vector<8x16xbf16>
    %cst_632 = arith.constant dense<0.000000e+00> : vector<8x16xf32>
    %701 = tpu.matmul %698, %700, %cst_632 {dimension_numbers = #tpu.dot_dimension_numbers<[1], [0], [0], [1], [0, 0, 1, 1], [], []>} : vector<8x8xbf16>, vector<8x16xbf16>, vector<8x16xf32> -> vector<8x16xf32>
    %702 = arith.addf %694, %701 : vector<8x16xf32>
    %c51 = arith.constant 51 : index
    %c0_633 = arith.constant 0 : index
    %c0_634 = arith.constant 0 : index
    %703 = vector.load %arg9[%c51, %c0_633, %c0_634] : memref<64x8x128xbf16, #tpu.memory_space<vmem>>, vector<1x8x128xbf16>
    %704 = vector.shape_cast %703 : vector<1x8x128xbf16> to vector<8x128xbf16>
    %cst_635 = arith.constant dense<0.000000e+00> : vector<8x8xf32>
    %705 = tpu.matmul %704, %295, %cst_635 {dimension_numbers = #tpu.dot_dimension_numbers<[1], [0], [0], [1], [0, 0, 1, 1], [], []>} : vector<8x128xbf16>, vector<128x8xbf16>, vector<8x8xf32> -> vector<8x8xf32>
    %706 = arith.truncf %705 : vector<8x8xf32> to vector<8x8xbf16>
    %c51_636 = arith.constant 51 : index
    %c0_637 = arith.constant 0 : index
    %c0_638 = arith.constant 0 : index
    %707 = vector.load %arg10[%c51_636, %c0_637, %c0_638] : memref<64x8x16xbf16, #tpu.memory_space<vmem>>, vector<1x8x16xbf16>
    %708 = vector.shape_cast %707 : vector<1x8x16xbf16> to vector<8x16xbf16>
    %cst_639 = arith.constant dense<0.000000e+00> : vector<8x16xf32>
    %709 = tpu.matmul %706, %708, %cst_639 {dimension_numbers = #tpu.dot_dimension_numbers<[1], [0], [0], [1], [0, 0, 1, 1], [], []>} : vector<8x8xbf16>, vector<8x16xbf16>, vector<8x16xf32> -> vector<8x16xf32>
    %710 = arith.addf %702, %709 : vector<8x16xf32>
    %c52 = arith.constant 52 : index
    %c0_640 = arith.constant 0 : index
    %c0_641 = arith.constant 0 : index
    %711 = vector.load %arg9[%c52, %c0_640, %c0_641] : memref<64x8x128xbf16, #tpu.memory_space<vmem>>, vector<1x8x128xbf16>
    %712 = vector.shape_cast %711 : vector<1x8x128xbf16> to vector<8x128xbf16>
    %cst_642 = arith.constant dense<0.000000e+00> : vector<8x8xf32>
    %713 = tpu.matmul %712, %295, %cst_642 {dimension_numbers = #tpu.dot_dimension_numbers<[1], [0], [0], [1], [0, 0, 1, 1], [], []>} : vector<8x128xbf16>, vector<128x8xbf16>, vector<8x8xf32> -> vector<8x8xf32>
    %714 = arith.truncf %713 : vector<8x8xf32> to vector<8x8xbf16>
    %c52_643 = arith.constant 52 : index
    %c0_644 = arith.constant 0 : index
    %c0_645 = arith.constant 0 : index
    %715 = vector.load %arg10[%c52_643, %c0_644, %c0_645] : memref<64x8x16xbf16, #tpu.memory_space<vmem>>, vector<1x8x16xbf16>
    %716 = vector.shape_cast %715 : vector<1x8x16xbf16> to vector<8x16xbf16>
    %cst_646 = arith.constant dense<0.000000e+00> : vector<8x16xf32>
    %717 = tpu.matmul %714, %716, %cst_646 {dimension_numbers = #tpu.dot_dimension_numbers<[1], [0], [0], [1], [0, 0, 1, 1], [], []>} : vector<8x8xbf16>, vector<8x16xbf16>, vector<8x16xf32> -> vector<8x16xf32>
    %718 = arith.addf %710, %717 : vector<8x16xf32>
    %c53 = arith.constant 53 : index
    %c0_647 = arith.constant 0 : index
    %c0_648 = arith.constant 0 : index
    %719 = vector.load %arg9[%c53, %c0_647, %c0_648] : memref<64x8x128xbf16, #tpu.memory_space<vmem>>, vector<1x8x128xbf16>
    %720 = vector.shape_cast %719 : vector<1x8x128xbf16> to vector<8x128xbf16>
    %cst_649 = arith.constant dense<0.000000e+00> : vector<8x8xf32>
    %721 = tpu.matmul %720, %295, %cst_649 {dimension_numbers = #tpu.dot_dimension_numbers<[1], [0], [0], [1], [0, 0, 1, 1], [], []>} : vector<8x128xbf16>, vector<128x8xbf16>, vector<8x8xf32> -> vector<8x8xf32>
    %722 = arith.truncf %721 : vector<8x8xf32> to vector<8x8xbf16>
    %c53_650 = arith.constant 53 : index
    %c0_651 = arith.constant 0 : index
    %c0_652 = arith.constant 0 : index
    %723 = vector.load %arg10[%c53_650, %c0_651, %c0_652] : memref<64x8x16xbf16, #tpu.memory_space<vmem>>, vector<1x8x16xbf16>
    %724 = vector.shape_cast %723 : vector<1x8x16xbf16> to vector<8x16xbf16>
    %cst_653 = arith.constant dense<0.000000e+00> : vector<8x16xf32>
    %725 = tpu.matmul %722, %724, %cst_653 {dimension_numbers = #tpu.dot_dimension_numbers<[1], [0], [0], [1], [0, 0, 1, 1], [], []>} : vector<8x8xbf16>, vector<8x16xbf16>, vector<8x16xf32> -> vector<8x16xf32>
    %726 = arith.addf %718, %725 : vector<8x16xf32>
    %c54 = arith.constant 54 : index
    %c0_654 = arith.constant 0 : index
    %c0_655 = arith.constant 0 : index
    %727 = vector.load %arg9[%c54, %c0_654, %c0_655] : memref<64x8x128xbf16, #tpu.memory_space<vmem>>, vector<1x8x128xbf16>
    %728 = vector.shape_cast %727 : vector<1x8x128xbf16> to vector<8x128xbf16>
    %cst_656 = arith.constant dense<0.000000e+00> : vector<8x8xf32>
    %729 = tpu.matmul %728, %295, %cst_656 {dimension_numbers = #tpu.dot_dimension_numbers<[1], [0], [0], [1], [0, 0, 1, 1], [], []>} : vector<8x128xbf16>, vector<128x8xbf16>, vector<8x8xf32> -> vector<8x8xf32>
    %730 = arith.truncf %729 : vector<8x8xf32> to vector<8x8xbf16>
    %c54_657 = arith.constant 54 : index
    %c0_658 = arith.constant 0 : index
    %c0_659 = arith.constant 0 : index
    %731 = vector.load %arg10[%c54_657, %c0_658, %c0_659] : memref<64x8x16xbf16, #tpu.memory_space<vmem>>, vector<1x8x16xbf16>
    %732 = vector.shape_cast %731 : vector<1x8x16xbf16> to vector<8x16xbf16>
    %cst_660 = arith.constant dense<0.000000e+00> : vector<8x16xf32>
    %733 = tpu.matmul %730, %732, %cst_660 {dimension_numbers = #tpu.dot_dimension_numbers<[1], [0], [0], [1], [0, 0, 1, 1], [], []>} : vector<8x8xbf16>, vector<8x16xbf16>, vector<8x16xf32> -> vector<8x16xf32>
    %734 = arith.addf %726, %733 : vector<8x16xf32>
    %c55 = arith.constant 55 : index
    %c0_661 = arith.constant 0 : index
    %c0_662 = arith.constant 0 : index
    %735 = vector.load %arg9[%c55, %c0_661, %c0_662] : memref<64x8x128xbf16, #tpu.memory_space<vmem>>, vector<1x8x128xbf16>
    %736 = vector.shape_cast %735 : vector<1x8x128xbf16> to vector<8x128xbf16>
    %cst_663 = arith.constant dense<0.000000e+00> : vector<8x8xf32>
    %737 = tpu.matmul %736, %295, %cst_663 {dimension_numbers = #tpu.dot_dimension_numbers<[1], [0], [0], [1], [0, 0, 1, 1], [], []>} : vector<8x128xbf16>, vector<128x8xbf16>, vector<8x8xf32> -> vector<8x8xf32>
    %738 = arith.truncf %737 : vector<8x8xf32> to vector<8x8xbf16>
    %c55_664 = arith.constant 55 : index
    %c0_665 = arith.constant 0 : index
    %c0_666 = arith.constant 0 : index
    %739 = vector.load %arg10[%c55_664, %c0_665, %c0_666] : memref<64x8x16xbf16, #tpu.memory_space<vmem>>, vector<1x8x16xbf16>
    %740 = vector.shape_cast %739 : vector<1x8x16xbf16> to vector<8x16xbf16>
    %cst_667 = arith.constant dense<0.000000e+00> : vector<8x16xf32>
    %741 = tpu.matmul %738, %740, %cst_667 {dimension_numbers = #tpu.dot_dimension_numbers<[1], [0], [0], [1], [0, 0, 1, 1], [], []>} : vector<8x8xbf16>, vector<8x16xbf16>, vector<8x16xf32> -> vector<8x16xf32>
    %742 = arith.addf %734, %741 : vector<8x16xf32>
    %c56 = arith.constant 56 : index
    %c0_668 = arith.constant 0 : index
    %c0_669 = arith.constant 0 : index
    %743 = vector.load %arg9[%c56, %c0_668, %c0_669] : memref<64x8x128xbf16, #tpu.memory_space<vmem>>, vector<1x8x128xbf16>
    %744 = vector.shape_cast %743 : vector<1x8x128xbf16> to vector<8x128xbf16>
    %cst_670 = arith.constant dense<0.000000e+00> : vector<8x8xf32>
    %745 = tpu.matmul %744, %295, %cst_670 {dimension_numbers = #tpu.dot_dimension_numbers<[1], [0], [0], [1], [0, 0, 1, 1], [], []>} : vector<8x128xbf16>, vector<128x8xbf16>, vector<8x8xf32> -> vector<8x8xf32>
    %746 = arith.truncf %745 : vector<8x8xf32> to vector<8x8xbf16>
    %c56_671 = arith.constant 56 : index
    %c0_672 = arith.constant 0 : index
    %c0_673 = arith.constant 0 : index
    %747 = vector.load %arg10[%c56_671, %c0_672, %c0_673] : memref<64x8x16xbf16, #tpu.memory_space<vmem>>, vector<1x8x16xbf16>
    %748 = vector.shape_cast %747 : vector<1x8x16xbf16> to vector<8x16xbf16>
    %cst_674 = arith.constant dense<0.000000e+00> : vector<8x16xf32>
    %749 = tpu.matmul %746, %748, %cst_674 {dimension_numbers = #tpu.dot_dimension_numbers<[1], [0], [0], [1], [0, 0, 1, 1], [], []>} : vector<8x8xbf16>, vector<8x16xbf16>, vector<8x16xf32> -> vector<8x16xf32>
    %750 = arith.addf %742, %749 : vector<8x16xf32>
    %c57 = arith.constant 57 : index
    %c0_675 = arith.constant 0 : index
    %c0_676 = arith.constant 0 : index
    %751 = vector.load %arg9[%c57, %c0_675, %c0_676] : memref<64x8x128xbf16, #tpu.memory_space<vmem>>, vector<1x8x128xbf16>
    %752 = vector.shape_cast %751 : vector<1x8x128xbf16> to vector<8x128xbf16>
    %cst_677 = arith.constant dense<0.000000e+00> : vector<8x8xf32>
    %753 = tpu.matmul %752, %295, %cst_677 {dimension_numbers = #tpu.dot_dimension_numbers<[1], [0], [0], [1], [0, 0, 1, 1], [], []>} : vector<8x128xbf16>, vector<128x8xbf16>, vector<8x8xf32> -> vector<8x8xf32>
    %754 = arith.truncf %753 : vector<8x8xf32> to vector<8x8xbf16>
    %c57_678 = arith.constant 57 : index
    %c0_679 = arith.constant 0 : index
    %c0_680 = arith.constant 0 : index
    %755 = vector.load %arg10[%c57_678, %c0_679, %c0_680] : memref<64x8x16xbf16, #tpu.memory_space<vmem>>, vector<1x8x16xbf16>
    %756 = vector.shape_cast %755 : vector<1x8x16xbf16> to vector<8x16xbf16>
    %cst_681 = arith.constant dense<0.000000e+00> : vector<8x16xf32>
    %757 = tpu.matmul %754, %756, %cst_681 {dimension_numbers = #tpu.dot_dimension_numbers<[1], [0], [0], [1], [0, 0, 1, 1], [], []>} : vector<8x8xbf16>, vector<8x16xbf16>, vector<8x16xf32> -> vector<8x16xf32>
    %758 = arith.addf %750, %757 : vector<8x16xf32>
    %c58 = arith.constant 58 : index
    %c0_682 = arith.constant 0 : index
    %c0_683 = arith.constant 0 : index
    %759 = vector.load %arg9[%c58, %c0_682, %c0_683] : memref<64x8x128xbf16, #tpu.memory_space<vmem>>, vector<1x8x128xbf16>
    %760 = vector.shape_cast %759 : vector<1x8x128xbf16> to vector<8x128xbf16>
    %cst_684 = arith.constant dense<0.000000e+00> : vector<8x8xf32>
    %761 = tpu.matmul %760, %295, %cst_684 {dimension_numbers = #tpu.dot_dimension_numbers<[1], [0], [0], [1], [0, 0, 1, 1], [], []>} : vector<8x128xbf16>, vector<128x8xbf16>, vector<8x8xf32> -> vector<8x8xf32>
    %762 = arith.truncf %761 : vector<8x8xf32> to vector<8x8xbf16>
    %c58_685 = arith.constant 58 : index
    %c0_686 = arith.constant 0 : index
    %c0_687 = arith.constant 0 : index
    %763 = vector.load %arg10[%c58_685, %c0_686, %c0_687] : memref<64x8x16xbf16, #tpu.memory_space<vmem>>, vector<1x8x16xbf16>
    %764 = vector.shape_cast %763 : vector<1x8x16xbf16> to vector<8x16xbf16>
    %cst_688 = arith.constant dense<0.000000e+00> : vector<8x16xf32>
    %765 = tpu.matmul %762, %764, %cst_688 {dimension_numbers = #tpu.dot_dimension_numbers<[1], [0], [0], [1], [0, 0, 1, 1], [], []>} : vector<8x8xbf16>, vector<8x16xbf16>, vector<8x16xf32> -> vector<8x16xf32>
    %766 = arith.addf %758, %765 : vector<8x16xf32>
    %c59 = arith.constant 59 : index
    %c0_689 = arith.constant 0 : index
    %c0_690 = arith.constant 0 : index
    %767 = vector.load %arg9[%c59, %c0_689, %c0_690] : memref<64x8x128xbf16, #tpu.memory_space<vmem>>, vector<1x8x128xbf16>
    %768 = vector.shape_cast %767 : vector<1x8x128xbf16> to vector<8x128xbf16>
    %cst_691 = arith.constant dense<0.000000e+00> : vector<8x8xf32>
    %769 = tpu.matmul %768, %295, %cst_691 {dimension_numbers = #tpu.dot_dimension_numbers<[1], [0], [0], [1], [0, 0, 1, 1], [], []>} : vector<8x128xbf16>, vector<128x8xbf16>, vector<8x8xf32> -> vector<8x8xf32>
    %770 = arith.truncf %769 : vector<8x8xf32> to vector<8x8xbf16>
    %c59_692 = arith.constant 59 : index
    %c0_693 = arith.constant 0 : index
    %c0_694 = arith.constant 0 : index
    %771 = vector.load %arg10[%c59_692, %c0_693, %c0_694] : memref<64x8x16xbf16, #tpu.memory_space<vmem>>, vector<1x8x16xbf16>
    %772 = vector.shape_cast %771 : vector<1x8x16xbf16> to vector<8x16xbf16>
    %cst_695 = arith.constant dense<0.000000e+00> : vector<8x16xf32>
    %773 = tpu.matmul %770, %772, %cst_695 {dimension_numbers = #tpu.dot_dimension_numbers<[1], [0], [0], [1], [0, 0, 1, 1], [], []>} : vector<8x8xbf16>, vector<8x16xbf16>, vector<8x16xf32> -> vector<8x16xf32>
    %774 = arith.addf %766, %773 : vector<8x16xf32>
    %c60 = arith.constant 60 : index
    %c0_696 = arith.constant 0 : index
    %c0_697 = arith.constant 0 : index
    %775 = vector.load %arg9[%c60, %c0_696, %c0_697] : memref<64x8x128xbf16, #tpu.memory_space<vmem>>, vector<1x8x128xbf16>
    %776 = vector.shape_cast %775 : vector<1x8x128xbf16> to vector<8x128xbf16>
    %cst_698 = arith.constant dense<0.000000e+00> : vector<8x8xf32>
    %777 = tpu.matmul %776, %295, %cst_698 {dimension_numbers = #tpu.dot_dimension_numbers<[1], [0], [0], [1], [0, 0, 1, 1], [], []>} : vector<8x128xbf16>, vector<128x8xbf16>, vector<8x8xf32> -> vector<8x8xf32>
    %778 = arith.truncf %777 : vector<8x8xf32> to vector<8x8xbf16>
    %c60_699 = arith.constant 60 : index
    %c0_700 = arith.constant 0 : index
    %c0_701 = arith.constant 0 : index
    %779 = vector.load %arg10[%c60_699, %c0_700, %c0_701] : memref<64x8x16xbf16, #tpu.memory_space<vmem>>, vector<1x8x16xbf16>
    %780 = vector.shape_cast %779 : vector<1x8x16xbf16> to vector<8x16xbf16>
    %cst_702 = arith.constant dense<0.000000e+00> : vector<8x16xf32>
    %781 = tpu.matmul %778, %780, %cst_702 {dimension_numbers = #tpu.dot_dimension_numbers<[1], [0], [0], [1], [0, 0, 1, 1], [], []>} : vector<8x8xbf16>, vector<8x16xbf16>, vector<8x16xf32> -> vector<8x16xf32>
    %782 = arith.addf %774, %781 : vector<8x16xf32>
    %c61 = arith.constant 61 : index
    %c0_703 = arith.constant 0 : index
    %c0_704 = arith.constant 0 : index
    %783 = vector.load %arg9[%c61, %c0_703, %c0_704] : memref<64x8x128xbf16, #tpu.memory_space<vmem>>, vector<1x8x128xbf16>
    %784 = vector.shape_cast %783 : vector<1x8x128xbf16> to vector<8x128xbf16>
    %cst_705 = arith.constant dense<0.000000e+00> : vector<8x8xf32>
    %785 = tpu.matmul %784, %295, %cst_705 {dimension_numbers = #tpu.dot_dimension_numbers<[1], [0], [0], [1], [0, 0, 1, 1], [], []>} : vector<8x128xbf16>, vector<128x8xbf16>, vector<8x8xf32> -> vector<8x8xf32>
    %786 = arith.truncf %785 : vector<8x8xf32> to vector<8x8xbf16>
    %c61_706 = arith.constant 61 : index
    %c0_707 = arith.constant 0 : index
    %c0_708 = arith.constant 0 : index
    %787 = vector.load %arg10[%c61_706, %c0_707, %c0_708] : memref<64x8x16xbf16, #tpu.memory_space<vmem>>, vector<1x8x16xbf16>
    %788 = vector.shape_cast %787 : vector<1x8x16xbf16> to vector<8x16xbf16>
    %cst_709 = arith.constant dense<0.000000e+00> : vector<8x16xf32>
    %789 = tpu.matmul %786, %788, %cst_709 {dimension_numbers = #tpu.dot_dimension_numbers<[1], [0], [0], [1], [0, 0, 1, 1], [], []>} : vector<8x8xbf16>, vector<8x16xbf16>, vector<8x16xf32> -> vector<8x16xf32>
    %790 = arith.addf %782, %789 : vector<8x16xf32>
    %c62 = arith.constant 62 : index
    %c0_710 = arith.constant 0 : index
    %c0_711 = arith.constant 0 : index
    %791 = vector.load %arg9[%c62, %c0_710, %c0_711] : memref<64x8x128xbf16, #tpu.memory_space<vmem>>, vector<1x8x128xbf16>
    %792 = vector.shape_cast %791 : vector<1x8x128xbf16> to vector<8x128xbf16>
    %cst_712 = arith.constant dense<0.000000e+00> : vector<8x8xf32>
    %793 = tpu.matmul %792, %295, %cst_712 {dimension_numbers = #tpu.dot_dimension_numbers<[1], [0], [0], [1], [0, 0, 1, 1], [], []>} : vector<8x128xbf16>, vector<128x8xbf16>, vector<8x8xf32> -> vector<8x8xf32>
    %794 = arith.truncf %793 : vector<8x8xf32> to vector<8x8xbf16>
    %c62_713 = arith.constant 62 : index
    %c0_714 = arith.constant 0 : index
    %c0_715 = arith.constant 0 : index
    %795 = vector.load %arg10[%c62_713, %c0_714, %c0_715] : memref<64x8x16xbf16, #tpu.memory_space<vmem>>, vector<1x8x16xbf16>
    %796 = vector.shape_cast %795 : vector<1x8x16xbf16> to vector<8x16xbf16>
    %cst_716 = arith.constant dense<0.000000e+00> : vector<8x16xf32>
    %797 = tpu.matmul %794, %796, %cst_716 {dimension_numbers = #tpu.dot_dimension_numbers<[1], [0], [0], [1], [0, 0, 1, 1], [], []>} : vector<8x8xbf16>, vector<8x16xbf16>, vector<8x16xf32> -> vector<8x16xf32>
    %798 = arith.addf %790, %797 : vector<8x16xf32>
    %c63 = arith.constant 63 : index
    %c0_717 = arith.constant 0 : index
    %c0_718 = arith.constant 0 : index
    %799 = vector.load %arg9[%c63, %c0_717, %c0_718] : memref<64x8x128xbf16, #tpu.memory_space<vmem>>, vector<1x8x128xbf16>
    %800 = vector.shape_cast %799 : vector<1x8x128xbf16> to vector<8x128xbf16>
    %cst_719 = arith.constant dense<0.000000e+00> : vector<8x8xf32>
    %801 = tpu.matmul %800, %295, %cst_719 {dimension_numbers = #tpu.dot_dimension_numbers<[1], [0], [0], [1], [0, 0, 1, 1], [], []>} : vector<8x128xbf16>, vector<128x8xbf16>, vector<8x8xf32> -> vector<8x8xf32>
    %802 = arith.truncf %801 : vector<8x8xf32> to vector<8x8xbf16>
    %c63_720 = arith.constant 63 : index
    %c0_721 = arith.constant 0 : index
    %c0_722 = arith.constant 0 : index
    %803 = vector.load %arg10[%c63_720, %c0_721, %c0_722] : memref<64x8x16xbf16, #tpu.memory_space<vmem>>, vector<1x8x16xbf16>
    %804 = vector.shape_cast %803 : vector<1x8x16xbf16> to vector<8x16xbf16>
    %cst_723 = arith.constant dense<0.000000e+00> : vector<8x16xf32>
    %805 = tpu.matmul %802, %804, %cst_723 {dimension_numbers = #tpu.dot_dimension_numbers<[1], [0], [0], [1], [0, 0, 1, 1], [], []>} : vector<8x8xbf16>, vector<8x16xbf16>, vector<8x16xf32> -> vector<8x16xf32>
    %806 = arith.addf %798, %805 : vector<8x16xf32>
    %cst_724 = arith.constant dense<0.000000e+00> : vector<16xf32>
    %807 = vector.multi_reduction <add>, %806, %cst_724 [0] : vector<8x16xf32> to vector<16xf32>
    %808 = vector.shape_cast %807 : vector<16xf32> to vector<1x16xf32>
    %cst_725 = arith.constant 1.250000e-01 : f32
    %809 = vector.broadcast %cst_725 : f32 to vector<1x16xf32>
    %810 = arith.mulf %808, %809 : vector<1x16xf32>
    %811 = arith.mulf %806, %806 : vector<8x16xf32>
    %cst_726 = arith.constant dense<0.000000e+00> : vector<16xf32>
    %812 = vector.multi_reduction <add>, %811, %cst_726 [0] : vector<8x16xf32> to vector<16xf32>
    %813 = vector.shape_cast %812 : vector<16xf32> to vector<1x16xf32>
    %cst_727 = arith.constant 1.250000e-01 : f32
    %814 = vector.broadcast %cst_727 : f32 to vector<1x16xf32>
    %815 = arith.mulf %813, %814 : vector<1x16xf32>
    %816 = arith.mulf %810, %810 : vector<1x16xf32>
    %817 = arith.subf %815, %816 : vector<1x16xf32>
    %818 = vector.broadcast %810 : vector<1x16xf32> to vector<8x16xf32>
    %819 = arith.subf %806, %818 : vector<8x16xf32>
    %cst_728 = arith.constant 9.99999974E-6 : f32
    %820 = vector.broadcast %cst_728 : f32 to vector<1x16xf32>
    %821 = arith.addf %817, %820 : vector<1x16xf32>
    %822 = math.rsqrt %821 : vector<1x16xf32>
    %823 = vector.broadcast %822 : vector<1x16xf32> to vector<8x16xf32>
    %824 = arith.mulf %819, %823 : vector<8x16xf32>
    %cst_729 = arith.constant 0.000000e+00 : f32
    %825 = vector.broadcast %cst_729 : f32 to vector<8x16xf32>
    %826 = arith.cmpf ogt, %824, %825 : vector<8x16xf32>
    %cst_730 = arith.constant 2.000000e-01 : f32
    %827 = vector.broadcast %cst_730 : f32 to vector<8x16xf32>
    %828 = arith.mulf %827, %824 : vector<8x16xf32>
    %829 = arith.select %826, %824, %828 : vector<8x16xi1>, vector<8x16xf32>
    %830 = arith.truncf %829 : vector<8x16xf32> to vector<8x16xbf16>
    %c0_731 = arith.constant 0 : index
    %c0_732 = arith.constant 0 : index
    %c0_733 = arith.constant 0 : index
    %831 = vector.load %arg11[%c0_731, %c0_732, %c0_733] : memref<4x2x8xbf16, #tpu.memory_space<vmem>>, vector<1x2x8xbf16>
    %832 = vector.shape_cast %831 : vector<1x2x8xbf16> to vector<2x8xbf16>
    %cst_734 = arith.constant dense<0.000000e+00> : vector<2x16xf32>
    %833 = tpu.matmul %832, %830, %cst_734 {dimension_numbers = #tpu.dot_dimension_numbers<[1], [0], [0], [1], [0, 0, 1, 1], [], []>} : vector<2x8xbf16>, vector<8x16xbf16>, vector<2x16xf32> -> vector<2x16xf32>
    %834 = arith.truncf %833 : vector<2x16xf32> to vector<2x16xbf16>
    %c0_735 = arith.constant 0 : index
    %c0_736 = arith.constant 0 : index
    %c0_737 = arith.constant 0 : index
    %835 = vector.load %arg12[%c0_735, %c0_736, %c0_737] : memref<4x16x32xbf16, #tpu.memory_space<vmem>>, vector<1x16x32xbf16>
    %836 = vector.shape_cast %835 : vector<1x16x32xbf16> to vector<16x32xbf16>
    %cst_738 = arith.constant dense<0.000000e+00> : vector<2x32xf32>
    %837 = tpu.matmul %834, %836, %cst_738 {dimension_numbers = #tpu.dot_dimension_numbers<[1], [0], [0], [1], [0, 0, 1, 1], [], []>} : vector<2x16xbf16>, vector<16x32xbf16>, vector<2x32xf32> -> vector<2x32xf32>
    %c1_739 = arith.constant 1 : index
    %c0_740 = arith.constant 0 : index
    %c0_741 = arith.constant 0 : index
    %838 = vector.load %arg11[%c1_739, %c0_740, %c0_741] : memref<4x2x8xbf16, #tpu.memory_space<vmem>>, vector<1x2x8xbf16>
    %839 = vector.shape_cast %838 : vector<1x2x8xbf16> to vector<2x8xbf16>
    %cst_742 = arith.constant dense<0.000000e+00> : vector<2x16xf32>
    %840 = tpu.matmul %839, %830, %cst_742 {dimension_numbers = #tpu.dot_dimension_numbers<[1], [0], [0], [1], [0, 0, 1, 1], [], []>} : vector<2x8xbf16>, vector<8x16xbf16>, vector<2x16xf32> -> vector<2x16xf32>
    %841 = arith.truncf %840 : vector<2x16xf32> to vector<2x16xbf16>
    %c1_743 = arith.constant 1 : index
    %c0_744 = arith.constant 0 : index
    %c0_745 = arith.constant 0 : index
    %842 = vector.load %arg12[%c1_743, %c0_744, %c0_745] : memref<4x16x32xbf16, #tpu.memory_space<vmem>>, vector<1x16x32xbf16>
    %843 = vector.shape_cast %842 : vector<1x16x32xbf16> to vector<16x32xbf16>
    %cst_746 = arith.constant dense<0.000000e+00> : vector<2x32xf32>
    %844 = tpu.matmul %841, %843, %cst_746 {dimension_numbers = #tpu.dot_dimension_numbers<[1], [0], [0], [1], [0, 0, 1, 1], [], []>} : vector<2x16xbf16>, vector<16x32xbf16>, vector<2x32xf32> -> vector<2x32xf32>
    %845 = arith.addf %837, %844 : vector<2x32xf32>
    %c2_747 = arith.constant 2 : index
    %c0_748 = arith.constant 0 : index
    %c0_749 = arith.constant 0 : index
    %846 = vector.load %arg11[%c2_747, %c0_748, %c0_749] : memref<4x2x8xbf16, #tpu.memory_space<vmem>>, vector<1x2x8xbf16>
    %847 = vector.shape_cast %846 : vector<1x2x8xbf16> to vector<2x8xbf16>
    %cst_750 = arith.constant dense<0.000000e+00> : vector<2x16xf32>
    %848 = tpu.matmul %847, %830, %cst_750 {dimension_numbers = #tpu.dot_dimension_numbers<[1], [0], [0], [1], [0, 0, 1, 1], [], []>} : vector<2x8xbf16>, vector<8x16xbf16>, vector<2x16xf32> -> vector<2x16xf32>
    %849 = arith.truncf %848 : vector<2x16xf32> to vector<2x16xbf16>
    %c2_751 = arith.constant 2 : index
    %c0_752 = arith.constant 0 : index
    %c0_753 = arith.constant 0 : index
    %850 = vector.load %arg12[%c2_751, %c0_752, %c0_753] : memref<4x16x32xbf16, #tpu.memory_space<vmem>>, vector<1x16x32xbf16>
    %851 = vector.shape_cast %850 : vector<1x16x32xbf16> to vector<16x32xbf16>
    %cst_754 = arith.constant dense<0.000000e+00> : vector<2x32xf32>
    %852 = tpu.matmul %849, %851, %cst_754 {dimension_numbers = #tpu.dot_dimension_numbers<[1], [0], [0], [1], [0, 0, 1, 1], [], []>} : vector<2x16xbf16>, vector<16x32xbf16>, vector<2x32xf32> -> vector<2x32xf32>
    %853 = arith.addf %845, %852 : vector<2x32xf32>
    %c3_755 = arith.constant 3 : index
    %c0_756 = arith.constant 0 : index
    %c0_757 = arith.constant 0 : index
    %854 = vector.load %arg11[%c3_755, %c0_756, %c0_757] : memref<4x2x8xbf16, #tpu.memory_space<vmem>>, vector<1x2x8xbf16>
    %855 = vector.shape_cast %854 : vector<1x2x8xbf16> to vector<2x8xbf16>
    %cst_758 = arith.constant dense<0.000000e+00> : vector<2x16xf32>
    %856 = tpu.matmul %855, %830, %cst_758 {dimension_numbers = #tpu.dot_dimension_numbers<[1], [0], [0], [1], [0, 0, 1, 1], [], []>} : vector<2x8xbf16>, vector<8x16xbf16>, vector<2x16xf32> -> vector<2x16xf32>
    %857 = arith.truncf %856 : vector<2x16xf32> to vector<2x16xbf16>
    %c3_759 = arith.constant 3 : index
    %c0_760 = arith.constant 0 : index
    %c0_761 = arith.constant 0 : index
    %858 = vector.load %arg12[%c3_759, %c0_760, %c0_761] : memref<4x16x32xbf16, #tpu.memory_space<vmem>>, vector<1x16x32xbf16>
    %859 = vector.shape_cast %858 : vector<1x16x32xbf16> to vector<16x32xbf16>
    %cst_762 = arith.constant dense<0.000000e+00> : vector<2x32xf32>
    %860 = tpu.matmul %857, %859, %cst_762 {dimension_numbers = #tpu.dot_dimension_numbers<[1], [0], [0], [1], [0, 0, 1, 1], [], []>} : vector<2x16xbf16>, vector<16x32xbf16>, vector<2x32xf32> -> vector<2x32xf32>
    %861 = arith.addf %853, %860 : vector<2x32xf32>
    %862 = arith.truncf %861 : vector<2x32xf32> to vector<2x32xbf16>
    %c0_763 = arith.constant 0 : index
    %c0_764 = arith.constant 0 : index
    %863 = vector.load %arg13[%c0_763, %c0_764] : memref<32x1xbf16, #tpu.memory_space<vmem>>, vector<32x1xbf16>
    %cst_765 = arith.constant dense<0.000000e+00> : vector<2x1xf32>
    %864 = tpu.matmul %862, %863, %cst_765 {dimension_numbers = #tpu.dot_dimension_numbers<[1], [0], [0], [1], [0, 0, 1, 1], [], []>} : vector<2x32xbf16>, vector<32x1xbf16>, vector<2x1xf32> -> vector<2x1xf32>
    %865 = arith.truncf %286 : vector<2x32xf32> to vector<2x32xbf16>
    %c0_766 = arith.constant 0 : index
    %c0_767 = arith.constant 0 : index
    %866 = vector.load %arg14[%c0_766, %c0_767] : memref<32x1xbf16, #tpu.memory_space<vmem>>, vector<32x1xbf16>
    %cst_768 = arith.constant dense<0.000000e+00> : vector<2x1xf32>
    %867 = tpu.matmul %865, %866, %cst_768 {dimension_numbers = #tpu.dot_dimension_numbers<[1], [0], [0], [1], [0, 0, 1, 1], [], []>} : vector<2x32xbf16>, vector<32x1xbf16>, vector<2x1xf32> -> vector<2x1xf32>
    %868 = arith.addf %864, %867 : vector<2x1xf32>
    %cst_769 = arith.constant 5.000000e-01 : f32
    %869 = vector.broadcast %cst_769 : f32 to vector<2x1xf32>
    %870 = arith.mulf %869, %868 : vector<2x1xf32>
    %871 = math.tanh %870 : vector<2x1xf32>
    %cst_770 = arith.constant 1.000000e+00 : f32
    %872 = vector.broadcast %cst_770 : f32 to vector<2x1xf32>
    %873 = arith.addf %871, %872 : vector<2x1xf32>
    %cst_771 = arith.constant 5.000000e-01 : f32
    %874 = vector.broadcast %cst_771 : f32 to vector<2x1xf32>
    %875 = arith.mulf %874, %873 : vector<2x1xf32>
    %c0_772 = arith.constant 0 : index
    %c0_773 = arith.constant 0 : index
    %876 = vector.load %arg15[%c0_772, %c0_773] : memref<2x1xf32, #tpu.memory_space<vmem>>, vector<2x1xf32>
    tpu.vector_store %arg15[%c0_772, %c0_773], %875 {strides = array<i32>} : memref<2x1xf32, #tpu.memory_space<vmem>>, vector<2x1xf32>,
    return
  }
  func.func @transform_0(%arg0: i32) -> (i32, i32) {
    %c0_i32 = arith.constant 0 : i32
    %c0_i32_0 = arith.constant 0 : i32
    %c0_i32_1 = arith.constant 0 : i32
    return %c0_i32, %c0_i32_0 : i32, i32
  }
  func.func @transform_1(%arg0: i32) -> (i32, i32) {
    %c0_i32 = arith.constant 0 : i32
    %c0_i32_0 = arith.constant 0 : i32
    %c0_i32_1 = arith.constant 0 : i32
    return %c0_i32, %c0_i32_0 : i32, i32
  }
  func.func @transform_2(%arg0: i32) -> (i32, i32, i32) {
    %c0_i32 = arith.constant 0 : i32
    %c0_i32_0 = arith.constant 0 : i32
    %c0_i32_1 = arith.constant 0 : i32
    %c0_i32_2 = arith.constant 0 : i32
    return %c0_i32, %c0_i32_0, %c0_i32_1 : i32, i32, i32
  }
  func.func @transform_3(%arg0: i32) -> (i32, i32, i32) {
    %c0_i32 = arith.constant 0 : i32
    %c0_i32_0 = arith.constant 0 : i32
    %c0_i32_1 = arith.constant 0 : i32
    %c0_i32_2 = arith.constant 0 : i32
    return %c0_i32, %c0_i32_0, %c0_i32_1 : i32, i32, i32
  }
  func.func @transform_4(%arg0: i32) -> (i32, i32, i32) {
    %c0_i32 = arith.constant 0 : i32
    %c0_i32_0 = arith.constant 0 : i32
    %c0_i32_1 = arith.constant 0 : i32
    %c0_i32_2 = arith.constant 0 : i32
    return %c0_i32, %c0_i32_0, %c0_i32_1 : i32, i32, i32
  }
  func.func @transform_5(%arg0: i32) -> (i32, i32, i32) {
    %c0_i32 = arith.constant 0 : i32
    %c0_i32_0 = arith.constant 0 : i32
    %c0_i32_1 = arith.constant 0 : i32
    %c0_i32_2 = arith.constant 0 : i32
    return %c0_i32, %c0_i32_0, %c0_i32_1 : i32, i32, i32
  }
  func.func @transform_6(%arg0: i32) -> (i32, i32) {
    %c0_i32 = arith.constant 0 : i32
    %c0_i32_0 = arith.constant 0 : i32
    %c0_i32_1 = arith.constant 0 : i32
    return %c0_i32, %c0_i32_0 : i32, i32
  }
  func.func @transform_7(%arg0: i32) -> (i32, i32) {
    %c0_i32 = arith.constant 0 : i32
    %c0_i32_0 = arith.constant 0 : i32
    %c0_i32_1 = arith.constant 0 : i32
    return %c0_i32, %c0_i32_0 : i32, i32
  }
  func.func @transform_8(%arg0: i32) -> (i32, i32, i32) {
    %c0_i32 = arith.constant 0 : i32
    %c0_i32_0 = arith.constant 0 : i32
    %c0_i32_1 = arith.constant 0 : i32
    %c0_i32_2 = arith.constant 0 : i32
    return %c0_i32, %c0_i32_0, %c0_i32_1 : i32, i32, i32
  }
  func.func @transform_9(%arg0: i32) -> (i32, i32, i32) {
    %c0_i32 = arith.constant 0 : i32
    %c0_i32_0 = arith.constant 0 : i32
    %c0_i32_1 = arith.constant 0 : i32
    %c0_i32_2 = arith.constant 0 : i32
    return %c0_i32, %c0_i32_0, %c0_i32_1 : i32, i32, i32
  }
  func.func @transform_10(%arg0: i32) -> (i32, i32, i32) {
    %c0_i32 = arith.constant 0 : i32
    %c0_i32_0 = arith.constant 0 : i32
    %c0_i32_1 = arith.constant 0 : i32
    %c0_i32_2 = arith.constant 0 : i32
    return %c0_i32, %c0_i32_0, %c0_i32_1 : i32, i32, i32
  }
  func.func @transform_11(%arg0: i32) -> (i32, i32, i32) {
    %c0_i32 = arith.constant 0 : i32
    %c0_i32_0 = arith.constant 0 : i32
    %c0_i32_1 = arith.constant 0 : i32
    %c0_i32_2 = arith.constant 0 : i32
    return %c0_i32, %c0_i32_0, %c0_i32_1 : i32, i32, i32
  }
  func.func @transform_12(%arg0: i32) -> (i32, i32) {
    %c0_i32 = arith.constant 0 : i32
    %c0_i32_0 = arith.constant 0 : i32
    %c0_i32_1 = arith.constant 0 : i32
    return %c0_i32, %c0_i32_0 : i32, i32
  }
  func.func @transform_13(%arg0: i32) -> (i32, i32) {
    %c0_i32 = arith.constant 0 : i32
    %c0_i32_0 = arith.constant 0 : i32
    %c0_i32_1 = arith.constant 0 : i32
    return %c0_i32, %c0_i32_0 : i32, i32
  }
  func.func @transform_14(%arg0: i32) -> (i32, i32) {
    %c0_i32 = arith.constant 0 : i32
    %c0_i32_0 = arith.constant 0 : i32
    %c0_i32_1 = arith.constant 0 : i32
    return %c0_i32, %c0_i32_0 : i32, i32
  }
}

</mosaic_0001>

<bundles_post_ra>
// kernel: netjointD_forward.1
= control target key start
LH: loop header
LB: loop body
LE: loop exit
PB: predicated region body
PF: predicated region fallthrough
CT: control target
= control target key end

     0   :  { %vm128_vm0 = vcmask 392192   ;;  %s17935_s1 = inlined_call_operand.vmem [shape: bf16[48,8], index: 1, kind: input, shape index: {}]   ;;  %s17936_s0 = inlined_call_operand.vmem [shape: bf16[128,48], index: 0, kind: input, shape index: {}]   ;;  %s17937_s2 = inlined_call_operand.vmem [shape: bf16[16,32,128], index: 2, kind: input, shape index: {}]   ;;  %s17938_s3 = inlined_call_operand.vmem [shape: bf16[16,8,16], index: 3, kind: input, shape index: {}]   ;;  %s17939_s5 = inlined_call_operand.vmem [shape: bf16[16,16,32], index: 5, kind: input, shape index: {}]   ;;  %s17940_s4 = inlined_call_operand.vmem [shape: bf16[16,2,32], index: 4, kind: input, shape index: {}]   ;;  %s17941_s7 = inlined_call_operand.vmem [shape: bf16[192,8], index: 7, kind: input, shape index: {}]   ;;  %s17942_s6 = inlined_call_operand.vmem [shape: bf16[128,192], index: 6, kind: input, shape index: {}]   ;;  %s17943_s8 = inlined_call_operand.vmem [shape: bf16[64,8,128], index: 8, kind: input, shape index: {}]   ;;  %s17944_s9 = inlined_call_operand.vmem [shape: bf16[64,8,16], index: 9, kind: input, shape index: {}]   ;;  %s17945_s11 = inlined_call_operand.vmem [shape: bf16[4,16,32], index: 11, kind: input, shape index: {}]   ;;  %s17946_s10 = inlined_call_operand.vmem [shape: bf16[4,2,8], index: 10, kind: input, shape index: {}]   ;;  %s17947_s13 = inlined_call_operand.vmem [shape: bf16[32,1], index: 13, kind: input, shape index: {}]   ;;  %s17948_s12 = inlined_call_operand.vmem [shape: bf16[32,1], index: 12, kind: input, shape index: {}]   ;;  %s17949_s14 = inlined_call_operand.vmem [shape: f32[2,1], index: 14, kind: output, shape index: {}]  }
   0x1   :  { %v14786_v0 = vld [vmem:[%s17935_s1 + $0x10] sm:$0xff]   ;;  %v14787_v1 = vld [vmem:[%s17935_s1 + $0x8] sm:$0xff]   ;;  %v14789_v2 = vld [vmem:[%s17936_s0] sm:$0xff]  }
   0x2   :  { %12377 = vmatprep.subr.bf16.mxu0 %v14786_v0  ;;  %v14788_v3 = vld [vmem:[%s17935_s1] sm:$0xff]   ;;  %12383 = vmatprep.mubr.msk.bf16.mxu0 %vm128_vm0, %v14789_v2  ;;  %v14790_v4 = vld [vmem:[%s17936_s0 + $0x8] sm:$0xff]   ;;  %v14791_v5 = vld [vmem:[%s17936_s0 + $0x10] sm:$0xff]  }
   0x3   :  { %12378 = vmatpush3.bf16.msra.mxu0 %v14786_v0  ;;  %v14792_v6 = vld [vmem:[%s17936_s0 + $0x18] sm:$0xff]   ;;  %v14793_v7 = vld [vmem:[%s17936_s0 + $0x20] sm:$0xff]   ;;  %v14794_v8 = vld [vmem:[%s17936_s0 + $0x28] sm:$0xff]  }
   0x4   :  { %12379 = vmatprep.subr.bf16.mxu0 %v14787_v1  ;;  %v14795_v9 = vld [vmem:[%s17936_s0 + $0x30] sm:$0xff]   ;;  %v14796_v10 = vld [vmem:[%s17936_s0 + $0x38] sm:$0xff]   ;;  %v14799_v12 = vld [vmem:[%s17937_s2] sm:$0xff]  }
   0x5   :  { %v14797_v11 = vld [vmem:[%s17937_s2 + $0x10] sm:$0xff]   ;;  %12415 = vmatprep.mubr.bf16.mxu1 %v14799_v12 }
   0x7   :  { %12380 = vmatpush3.bf16.msra.mxu0 %v14787_v1 }
   0x8   :  { %12381 = vmatprep.subr.bf16.mxu0 %v14788_v3 }
   0xb   :  { %12382 = vmatpush3.bf16.msra.mxu0 %v14788_v3 }
   0xe   :  { %12384 = vmatmul.mubr.msk.bf16.vlgmr.msra.gmra.mxu0 %vm128_vm0, %v14790_v4 }
   0xf   :  { %12387 = vmatprep.mubr.msk.bf16.mxu0 %vm128_vm0, %v14791_v5  ;;  %v14798_v5 = vld [vmem:[%s17937_s2 + $0x18] sm:$0xff]  }
  0x16   :  { %12388 = vmatmul.mubr.msk.bf16.gmra.mxu0 %vm128_vm0, %v14792_v6  ;;  %v14800_v6 = vld [vmem:[%s17937_s2 + $0x8] sm:$0xff]  }
  0x17   :  { %12391 = vmatprep.mubr.msk.bf16.mxu0 %vm128_vm0, %v14793_v7  ;;  %v14801_v7 = vld [vmem:[%s17937_s2 + $0x20] sm:$0xff]  }
  0x1e   :  { %12392 = vmatmul.mubr.msk.bf16.gmra.mxu0 %vm128_vm0, %v14794_v8  ;;  %v10895_v8 = vld [vmem:[%s17938_s3 + $0xc] sm:$0xf] }
  0x1f   :  { %12395 = vmatprep.mubr.msk.bf16.mxu0 %vm128_vm0, %v14795_v9  ;;  %v14802_v9 = vld [vmem:[%s17937_s2 + $0x28] sm:$0xff]  }
  0x26   :  { %12396 = vmatmul.mubr.msk.bf16.gmra.mxu0 %vm128_vm0, %v14796_v10 }
  0x27   :  { %12435 = vmatprep.mubr.bf16.mxu0 %v14797_v11  ;;  %v10875_v11 = vld [vmem:[%s17938_s3 + $0x4] sm:$0xf] }
  0xce   :  { %v15020_v13 = vpop.f32.mrf.mxu0 }
  0xcf   :  { %v268_v58 = vmul.f32 0.2, %v15020_v13  ;;  %vm252_vm14 = vcmp.gt.f32.partialorder %v15020_v13, 0.0 }
  0xd0   :  { %v15022_v14 = vpop.f32.mrf.mxu0 }
  0xd1   :  { %v284_v63 = vsel %vm252_vm14, %v15020_v13, %v268_v58  ;;  %v266_v0 = vmul.f32 0.2, %v15022_v14  ;;  %vm250_vm0 = vcmp.gt.f32.partialorder %v15022_v14, 0.0  ;;  %v373_v13 = vld [vmem:[%s17938_s3] sm:$0xf] }
  0xd2   :  { %v15024_v15 = vpop.f32.mrf.mxu0 }
  0xd3   :  { %v269_v56 = vmul.f32 0.2, %v15024_v15  ;;  %vm253_vm13 = vcmp.gt.f32.partialorder %v15024_v15, 0.0  ;;  %v282_v3 = vsel %vm250_vm0, %v15022_v14, %v266_v0 }
  0xd4   :  { %v15026_v16 = vpop.f32.mrf.mxu0 }
  0xd5   :  { %v285_v61 = vsel %vm253_vm13, %v15024_v15, %v269_v56  ;;  %v267_v62 = vmul.f32 0.2, %v15026_v16  ;;  %vm251_vm15 = vcmp.gt.f32.partialorder %v15026_v16, 0.0 }
  0xd6   :  { %v12389_v17 = vpop.f32.mrf.mxu0  ;;  %v15082_v1 = vpack.c.bf16 %v285_v61, %v284_v63 }
  0xd7   :  { %v272_v48 = vmul.f32 0.2, %v12389_v17  ;;  %vm256_vm10 = vcmp.gt.f32.partialorder %v12389_v17, 0.0  ;;  %v283_v2 = vsel %vm251_vm15, %v15026_v16, %v267_v62 }
  0xd8   :  { %v15028_v18 = vpop.f32.mrf.mxu0  ;;  %v15090_v4 = vpack.c.bf16 %v283_v2, %v282_v3 }
  0xd9   :  { %v288_v53 = vsel %vm256_vm10, %v12389_v17, %v272_v48  ;;  %v270_v54 = vmul.f32 0.2, %v15028_v18  ;;  %vm254_vm12 = vcmp.gt.f32.partialorder %v15028_v18, 0.0  ;;  %vm4234_vm10 = vcmask 523264  }
  0xda   :  { %v12390_v19 = vpop.f32.mrf.mxu0 }
  0xdb   :  { %v273_v46 = vmul.f32 0.2, %v12390_v19  ;;  %vm257_vm9 = vcmp.gt.f32.partialorder %v12390_v19, 0.0  ;;  %v286_v59 = vsel %vm254_vm12, %v15028_v18, %v270_v54 }
  0xdc   :  { %v15030_v20 = vpop.f32.mrf.mxu0 }
  0xdd   :  { %v289_v51 = vsel %vm257_vm9, %v12390_v19, %v273_v46  ;;  %v271_v52 = vmul.f32 0.2, %v15030_v20  ;;  %vm255_vm11 = vcmp.gt.f32.partialorder %v15030_v20, 0.0  ;;  %vm2470_vm9 = vcmask 261120  }
  0xde   :  { %v12393_v21 = vpop.f32.mrf.mxu0  ;;  %v15058_v55 = vpack.c.bf16 %v289_v51, %v288_v53 }
  0xdf   :  { %v276_v37 = vmul.f32 0.2, %v12393_v21  ;;  %vm260_vm6 = vcmp.gt.f32.partialorder %v12393_v21, 0.0  ;;  %v287_v57 = vsel %vm255_vm11, %v15030_v20, %v271_v52 }
  0xe0   :  { %v219_v22 = vpop.f32.mrf.mxu0  ;;  %v15070_v60 = vpack.c.bf16 %v287_v57, %v286_v59 }
  0xe1   :  { %v292_v43 = vsel %vm260_vm6, %v12393_v21, %v276_v37  ;;  %v274_v44 = vmul.f32 0.2, %v219_v22  ;;  %vm258_vm8 = vcmp.gt.f32.partialorder %v219_v22, 0.0  ;;  %v10904_v37 = vld [vmem:[%s17938_s3 + $0x10] sm:$0xf] }
  0xe2   :  { %v12394_v23 = vpop.f32.mrf.mxu0 }
  0xe3   :  { %v277_v31 = vmul.f32 0.2, %v12394_v23  ;;  %vm261_vm5 = vcmp.gt.f32.partialorder %v12394_v23, 0.0  ;;  %v290_v49 = vsel %vm258_vm8, %v219_v22, %v274_v44 }
  0xe4   :  { %v222_v24 = vpop.f32.mrf.mxu0 }
  0xe5   :  { %v293_v41 = vsel %vm261_vm5, %v12394_v23, %v277_v31  ;;  %v275_v42 = vmul.f32 0.2, %v222_v24  ;;  %vm259_vm7 = vcmp.gt.f32.partialorder %v222_v24, 0.0 }
  0xe6   :  { %v12397_v25 = vpop.f32.mrf.mxu0  ;;  %v15042_v45 = vpack.c.bf16 %v293_v41, %v292_v43 }
  0xe7   :  { %v280_v27 = vmul.f32 0.2, %v12397_v25  ;;  %vm264_vm1 = vcmp.gt.f32.partialorder %v12397_v25, 0.0  ;;  %v291_v47 = vsel %vm259_vm7, %v222_v24, %v275_v42 }
  0xe8   :  { %v235_v26 = vpop.f32.mrf.mxu0  ;;  %v15048_v50 = vpack.c.bf16 %v291_v47, %v290_v49 }
  0xe9   :  { %v278_v29 = vmul.f32 0.2, %v235_v26  ;;  %vm262_vm3 = vcmp.gt.f32.partialorder %v235_v26, 0.0  ;;  %v296_v33 = vsel %vm264_vm1, %v12397_v25, %v280_v27  ;;  %vm451_vm1 = vcmask 1043456  }
  0xea   :  { %v12398_v28 = vpop.f32.mrf.mxu0  ;;  %v771_v10 = vsel %vm451_vm1, %v10895_v8, 0  ;;  %v453_v12 = vsel %vm451_vm1, %v10875_v11, 0  ;;  %v511_v25 = vsel %vm451_vm1, %v373_v13, 0 }
  0xeb   :  { %vm265_vm2 = vcmp.gt.f32.partialorder %v12398_v28, 0.0  ;;  %v281_v30 = vmul.f32 0.2, %v12398_v28  ;;  %v294_v38 = vsel %vm262_vm3, %v235_v26, %v278_v29  ;;  %v10886_v26 = vld [vmem:[%s17938_s3 + $0x8] sm:$0xf]  ;;  %vm14896_vm3 = vmmov 0  }
  0xec   :  { %v238_v32 = vpop.f32.mrf.mxu0 }
  0xed   :  { %v297_v34 = vsel %vm265_vm2, %v12398_v28, %v281_v30  ;;  %vm263_vm4 = vcmp.gt.f32.partialorder %v238_v32, 0.0  ;;  %v279_v35 = vmul.f32 0.2, %v238_v32  ;;  %vm444_vm2 = vcmask 64512  }
  0xee   :  { %v15032_v36 = vpack.c.bf16 %v297_v34, %v296_v33  ;;  %v639_v28 = vsel %vm451_vm1, %v10886_v26, 0  ;;  %v14803_v34 = vld [vmem:[%s17937_s2 + $0x30] sm:$0xff]  }
  0xef   :  { %v295_v39 = vsel %vm263_vm4, %v238_v32, %v279_v35  ;;  %vm2410_vm4 = vcmask 130048  }
  0xf0   :  { %v15034_v40 = vpack.c.bf16 %v295_v39, %v294_v38  ;;  %12399 = vmatprep.subr.bf16.mxu1 %v15032_v36  ;;  %12419 = vmatprep.subr.bf16.mxu0 %v15032_v36  ;;  %v14804_v38 = vld [vmem:[%s17937_s2 + $0x38] sm:$0xff]   ;;  %v903_v39 = vsel %vm451_vm1, %v10904_v37, 0 }
  0xf1   :  { %12400 = vmatpush3.bf16.msra.mxu1 %v15032_v36  ;;  %12420 = vmatpush3.bf16.msra.mxu0 %v15032_v36 }
  0xf2   :  { %12401 = vmatprep.subr.bf16.mxu1 %v15034_v40  ;;  %12421 = vmatprep.subr.bf16.mxu0 %v15034_v40 }
  0xf5   :  { %12402 = vmatpush3.bf16.msra.mxu1 %v15034_v40  ;;  %12422 = vmatpush3.bf16.msra.mxu0 %v15034_v40 }
  0xf6   :  { %12403 = vmatprep.subr.bf16.mxu1 %v15042_v45  ;;  %12423 = vmatprep.subr.bf16.mxu0 %v15042_v45 }
  0xf9   :  { %12404 = vmatpush3.bf16.msra.mxu1 %v15042_v45  ;;  %12424 = vmatpush3.bf16.msra.mxu0 %v15042_v45 }
  0xfa   :  { %12405 = vmatprep.subr.bf16.mxu1 %v15048_v50  ;;  %12425 = vmatprep.subr.bf16.mxu0 %v15048_v50 }
  0xfd   :  { %12406 = vmatpush3.bf16.msra.mxu1 %v15048_v50  ;;  %12426 = vmatpush3.bf16.msra.mxu0 %v15048_v50 }
  0xfe   :  { %12407 = vmatprep.subr.bf16.mxu1 %v15058_v55  ;;  %12427 = vmatprep.subr.bf16.mxu0 %v15058_v55 }
 0x101   :  { %12408 = vmatpush3.bf16.msra.mxu1 %v15058_v55  ;;  %12428 = vmatpush3.bf16.msra.mxu0 %v15058_v55 }
 0x102   :  { %12409 = vmatprep.subr.bf16.mxu1 %v15070_v60  ;;  %12429 = vmatprep.subr.bf16.mxu0 %v15070_v60 }
 0x105   :  { %12410 = vmatpush3.bf16.msra.mxu1 %v15070_v60  ;;  %12430 = vmatpush3.bf16.msra.mxu0 %v15070_v60 }
 0x106   :  { %12411 = vmatprep.subr.bf16.mxu1 %v15082_v1  ;;  %12431 = vmatprep.subr.bf16.mxu0 %v15082_v1 }
 0x109   :  { %12412 = vmatpush3.bf16.msra.mxu1 %v15082_v1  ;;  %12432 = vmatpush3.bf16.msra.mxu0 %v15082_v1 }
 0x10a   :  { %12413 = vmatprep.subr.bf16.mxu1 %v15090_v4  ;;  %12433 = vmatprep.subr.bf16.mxu0 %v15090_v4 }
 0x10d   :  { %12414 = vmatpush3.bf16.msra.mxu1 %v15090_v4  ;;  %12434 = vmatpush3.bf16.msra.mxu0 %v15090_v4 }
 0x10e   :  { %12451 = vmatprep.subr.bf16.mxu0 %v15032_v36  ;;  %14767 = vmatprep.subr.msk.bf16.mxu1 %vm451_vm1, %v10875_v11 }
 0x110   :  { %12436 = vmatmul.mubr.bf16.vlgmr.msra.gmra.mxu0 %v14798_v5  ;;  %12416 = vmatmul.mubr.bf16.vlgmr.msra.gmra.mxu1 %v14800_v6  ;;  %v14805_v6 = vld [vmem:[%s17937_s2 + $0x40] sm:$0xff]  }
 0x111   :  { %12452 = vmatpush3.bf16.msra.mxu0 %v15032_v36  ;;  %12467 = vmatprep.mubr.bf16.mxu0 %v14801_v7 }
 0x112   :  { %12453 = vmatprep.subr.bf16.mxu0 %v15034_v40  ;;  %12440 = vmatpush3.bf16.msra.mxu1 %v453_v12 }
 0x113   :  { %14768 = vmatprep.subr.msk.bf16.mxu1 %vm451_vm1, %v373_v13 }
 0x115   :  { %12454 = vmatpush3.bf16.msra.mxu0 %v15034_v40 }
 0x116   :  { %12455 = vmatprep.subr.bf16.mxu0 %v15042_v45 }
 0x119   :  { %12456 = vmatpush3.bf16.msra.mxu0 %v15042_v45 }
 0x11a   :  { %12457 = vmatprep.subr.bf16.mxu0 %v15048_v50 }
 0x11d   :  { %12458 = vmatpush3.bf16.msra.mxu0 %v15048_v50 }
 0x11e   :  { %12459 = vmatprep.subr.bf16.mxu0 %v15058_v55 }
 0x121   :  { %12460 = vmatpush3.bf16.msra.mxu0 %v15058_v55 }
 0x122   :  { %12461 = vmatprep.subr.bf16.mxu0 %v15070_v60 }
 0x125   :  { %12462 = vmatpush3.bf16.msra.mxu0 %v15070_v60 }
 0x126   :  { %12463 = vmatprep.subr.bf16.mxu0 %v15082_v1 }
 0x129   :  { %12464 = vmatpush3.bf16.msra.mxu0 %v15082_v1 }
 0x12a   :  { %12465 = vmatprep.subr.bf16.mxu0 %v15090_v4 }
 0x12d   :  { %12466 = vmatpush3.bf16.msra.mxu0 %v15090_v4 }
 0x12e   :  { %14770 = vmatprep.subr.msk.bf16.mxu0 %vm451_vm1, %v10895_v8  ;;  %v10913_v8 = vld [vmem:[%s17938_s3 + $0x14] sm:$0xf] }
 0x130   :  { %12468 = vmatmul.mubr.bf16.vlgmr.msra.gmra.mxu0 %v14802_v9  ;;  %v14806_v9 = vld [vmem:[%s17937_s2 + $0x48] sm:$0xff]  }
 0x131   :  { %12498 = vmatpush3.bf16.msra.mxu0 %v771_v10  ;;  %v1035_v10 = vsel %vm451_vm1, %v10913_v8, 0 }
 0x132   :  { %12503 = vmatprep.subr.bf16.mxu0 %v15032_v36 }
 0x1d0   :  { %v12437_v14 = vpop.f32.mrf.mxu0  ;;  %v12417_v15 = vpop.f32.mrf.mxu1 }
 0x1d2   :  { %v425_v16 = vpop.f32.mrf.mxu0  ;;  %v356_v17 = vpop.f32.mrf.mxu1 }
 0x1d4   :  { %v12438_v18 = vpop.f32.mrf.mxu0  ;;  %v12418_v19 = vpop.f32.mrf.mxu1 }
 0x1d5   :  { %v441_v24 = vpack.c.bf16 %v12438_v18, %v12437_v14  ;;  %v372_v27 = vpack.c.bf16 %v12418_v19, %v12417_v15 }
 0x1d6   :  { %v428_v20 = vpop.f32.mrf.mxu0  ;;  %v359_v21 = vpop.f32.mrf.mxu1 }
 0x1d7   :  { %v440_v22 = vpack.c.bf16 %v428_v20, %v425_v16  ;;  %v371_v23 = vpack.c.bf16 %v359_v21, %v356_v17 }
 0x1d9   :  { %12441 = vmatprep.mubr.msk.bf16.mxu1 %vm444_vm2, %v440_v22 }
 0x1da   :  { %12442 = vmatmul.mubr.msk.bf16.vlgmr.msra.gmra.mxu1 %vm444_vm2, %v441_v24 }
 0x1db   :  { %12446 = vmatpush3.bf16.msra.mxu1 %v511_v25  ;;  %12447 = vmatprep.mubr.msk.bf16.mxu1 %vm444_vm2, %v371_v23  ;;  %v14807_v23 = vld [vmem:[%s17937_s2 + $0x50] sm:$0xff]   ;;  %v10922_v25 = vld [vmem:[%s17938_s3 + $0x18] sm:$0xf] }
 0x1dc   :  { %14769 = vmatprep.subr.msk.bf16.mxu1 %vm451_vm1, %v10886_v26  ;;  %v14808_v26 = vld [vmem:[%s17937_s2 + $0x58] sm:$0xff]  }
 0x1e2   :  { %12448 = vmatmul.mubr.msk.bf16.vlgmr.msra.gmra.mxu1 %vm444_vm2, %v372_v27  ;;  %v1167_v27 = vsel %vm451_vm1, %v10922_v25, 0 }
 0x1e3   :  { %12472 = vmatpush3.bf16.msra.mxu1 %v639_v28 }
 0x1e4   :  { %12477 = vmatprep.subr.bf16.mxu1 %v15032_v36 }
 0x1f0   :  { %v12469_v29 = vpop.f32.mrf.mxu0 }
 0x1f2   :  { %v613_v30 = vpop.f32.mrf.mxu0 }
 0x1f4   :  { %v12470_v31 = vpop.f32.mrf.mxu0 }
 0x1f5   :  { %v629_v35 = vpack.c.bf16 %v12470_v31, %v12469_v29 }
 0x1f6   :  { %v616_v32 = vpop.f32.mrf.mxu0 }
 0x1f7   :  { %v628_v33 = vpack.c.bf16 %v616_v32, %v613_v30 }
 0x1f9   :  { %12473 = vmatprep.mubr.msk.bf16.mxu1 %vm444_vm2, %v628_v33 }
 0x1fa   :  { %12474 = vmatmul.mubr.msk.bf16.vlgmr.msra.gmra.mxu1 %vm444_vm2, %v629_v35 }
 0x1fb   :  { %12478 = vmatpush3.bf16.msra.mxu1 %v15032_v36  ;;  %12493 = vmatprep.mubr.bf16.mxu1 %v14803_v34 }
 0x1fc   :  { %12479 = vmatprep.subr.bf16.mxu1 %v15034_v40 }
 0x1ff   :  { %12480 = vmatpush3.bf16.msra.mxu1 %v15034_v40 }
 0x200   :  { %12481 = vmatprep.subr.bf16.mxu1 %v15042_v45 }
 0x203   :  { %12482 = vmatpush3.bf16.msra.mxu1 %v15042_v45 }
 0x204   :  { %12483 = vmatprep.subr.bf16.mxu1 %v15048_v50 }
 0x207   :  { %12484 = vmatpush3.bf16.msra.mxu1 %v15048_v50 }
 0x208   :  { %12485 = vmatprep.subr.bf16.mxu1 %v15058_v55 }
 0x20b   :  { %12486 = vmatpush3.bf16.msra.mxu1 %v15058_v55 }
 0x20c   :  { %12487 = vmatprep.subr.bf16.mxu1 %v15070_v60 }
 0x20f   :  { %12488 = vmatpush3.bf16.msra.mxu1 %v15070_v60 }
 0x210   :  { %12489 = vmatprep.subr.bf16.mxu1 %v15082_v1 }
 0x213   :  { %12490 = vmatpush3.bf16.msra.mxu1 %v15082_v1 }
 0x214   :  { %12491 = vmatprep.subr.bf16.mxu1 %v15090_v4 }
 0x217   :  { %12492 = vmatpush3.bf16.msra.mxu1 %v15090_v4 }
 0x218   :  { %14771 = vmatprep.subr.msk.bf16.mxu1 %vm451_vm1, %v10904_v37 }
 0x21a   :  { %12494 = vmatmul.mubr.bf16.vlgmr.msra.gmra.mxu1 %v14804_v38 }
 0x21b   :  { %12524 = vmatpush3.bf16.msra.mxu1 %v903_v39 }
 0x21c   :  { %12529 = vmatprep.subr.bf16.mxu1 %v15032_v36 }
 0x29a   :  { %v12443_v41 = vpop.f32.mrf.mxu1 }
 0x29c   :  { %v489_v42 = vpop.f32.mrf.mxu1 }
 0x29e   :  { %v12444_v43 = vpop.f32.mrf.mxu1 }
 0x2a0   :  { %v15181_v44 = vpop.f32.mrf.mxu1 }
 0x2a2   :  { %v12449_v46 = vpop.f32.mrf.mxu1 }
 0x2a3   :  { %v556_v47 = vadd.f32 %v12449_v46, %v12443_v41  ;;  %v10931_v46 = vld [vmem:[%s17938_s3 + $0x1c] sm:$0xf] }
 0x2a4   :  { %v547_v48 = vpop.f32.mrf.mxu1 }
 0x2a5   :  { %v548_v49 = vadd.f32 %v547_v48, %v489_v42  ;;  %v14809_v42 = vld [vmem:[%s17937_s2 + $0x60] sm:$0xff]   ;;  %v1299_v48 = vsel %vm451_vm1, %v10931_v46, 0 }
 0x2a6   :  { %v12450_v51 = vpop.f32.mrf.mxu1 }
 0x2a7   :  { %v559_v52 = vadd.f32 %v12450_v51, %v12444_v43 }
 0x2a8   :  { %v15183_v53 = vpop.f32.mrf.mxu1 }
 0x2ba   :  { %v12475_v54 = vpop.f32.mrf.mxu1 }
 0x2bb   :  { %v692_v56 = vadd.f32 %v12475_v54, %v556_v47  ;;  %v14810_v47 = vld [vmem:[%s17937_s2 + $0x68] sm:$0xff]  }
 0x2bc   :  { %v675_v57 = vpop.f32.mrf.mxu1 }
 0x2bd   :  { %v690_v58 = vadd.f32 %v675_v57, %v548_v49 }
 0x2be   :  { %v12476_v59 = vpop.f32.mrf.mxu1 }
 0x2bf   :  { %v693_v61 = vadd.f32 %v12476_v59, %v559_v52 }
 0x2c0   :  { %v15185_v62 = vpop.f32.mrf.mxu1 }
 0x2da   :  { %v12495_v63 = vpop.f32.mrf.mxu1 }
 0x2dc   :  { %v745_v0 = vpop.f32.mrf.mxu1 }
 0x2de   :  { %v12496_v2 = vpop.f32.mrf.mxu1 }
 0x2df   :  { %v761_v7 = vpack.c.bf16 %v12496_v2, %v12495_v63 }
 0x2e0   :  { %v748_v3 = vpop.f32.mrf.mxu1 }
 0x2e1   :  { %v760_v5 = vpack.c.bf16 %v748_v3, %v745_v0  ;;  %v14811_v3 = vld [vmem:[%s17937_s2 + $0x70] sm:$0xff]  }
 0x2e3   :  { %12499 = vmatprep.mubr.msk.bf16.mxu0 %vm444_vm2, %v760_v5 }
 0x2e4   :  { %12500 = vmatmul.mubr.msk.bf16.vlgmr.msra.gmra.mxu0 %vm444_vm2, %v761_v7  ;;  %v14812_v7 = vld [vmem:[%s17937_s2 + $0x78] sm:$0xff]  }
 0x2e5   :  { %12504 = vmatpush3.bf16.msra.mxu0 %v15032_v36  ;;  %12519 = vmatprep.mubr.bf16.mxu0 %v14805_v6  ;;  %v10940_v6 = vld [vmem:[%s17938_s3 + $0x20] sm:$0xf] }
 0x2e6   :  { %12505 = vmatprep.subr.bf16.mxu0 %v15034_v40 }
 0x2e9   :  { %12506 = vmatpush3.bf16.msra.mxu0 %v15034_v40 }
 0x2ea   :  { %12507 = vmatprep.subr.bf16.mxu0 %v15042_v45 }
 0x2ed   :  { %12508 = vmatpush3.bf16.msra.mxu0 %v15042_v45 }
 0x2ee   :  { %12509 = vmatprep.subr.bf16.mxu0 %v15048_v50 }
 0x2f1   :  { %12510 = vmatpush3.bf16.msra.mxu0 %v15048_v50 }
 0x2f2   :  { %12511 = vmatprep.subr.bf16.mxu0 %v15058_v55 }
 0x2f5   :  { %12512 = vmatpush3.bf16.msra.mxu0 %v15058_v55 }
 0x2f6   :  { %12513 = vmatprep.subr.bf16.mxu0 %v15070_v60 }
 0x2f9   :  { %12514 = vmatpush3.bf16.msra.mxu0 %v15070_v60 }
 0x2fa   :  { %12515 = vmatprep.subr.bf16.mxu0 %v15082_v1 }
 0x2fd   :  { %12516 = vmatpush3.bf16.msra.mxu0 %v15082_v1 }
 0x2fe   :  { %12517 = vmatprep.subr.bf16.mxu0 %v15090_v4 }
 0x301   :  { %12518 = vmatpush3.bf16.msra.mxu0 %v15090_v4 }
 0x302   :  { %14772 = vmatprep.subr.msk.bf16.mxu0 %vm451_vm1, %v10913_v8  ;;  %v1431_v8 = vsel %vm451_vm1, %v10940_v6, 0 }
 0x304   :  { %12520 = vmatmul.mubr.bf16.vlgmr.msra.gmra.mxu0 %v14806_v9 }
 0x305   :  { %12550 = vmatpush3.bf16.msra.mxu0 %v1035_v10 }
 0x306   :  { %12555 = vmatprep.subr.bf16.mxu0 %v15032_v36 }
 0x3a4   :  { %v12501_v11 = vpop.f32.mrf.mxu0 }
 0x3a5   :  { %v824_v12 = vadd.f32 %v12501_v11, %v692_v56 }
 0x3a6   :  { %v807_v13 = vpop.f32.mrf.mxu0 }
 0x3a7   :  { %v822_v14 = vadd.f32 %v807_v13, %v690_v58 }
 0x3a8   :  { %v12502_v15 = vpop.f32.mrf.mxu0 }
 0x3a9   :  { %v825_v16 = vadd.f32 %v12502_v15, %v693_v61 }
 0x3aa   :  { %v15216_v17 = vpop.f32.mrf.mxu0 }
 0x3c4   :  { %v12521_v18 = vpop.f32.mrf.mxu0 }
 0x3c6   :  { %v877_v19 = vpop.f32.mrf.mxu0 }
 0x3c8   :  { %v12522_v20 = vpop.f32.mrf.mxu0 }
 0x3c9   :  { %v893_v24 = vpack.c.bf16 %v12522_v20, %v12521_v18 }
 0x3ca   :  { %v880_v21 = vpop.f32.mrf.mxu0 }
 0x3cb   :  { %v892_v22 = vpack.c.bf16 %v880_v21, %v877_v19 }
 0x3cd   :  { %12525 = vmatprep.mubr.msk.bf16.mxu1 %vm444_vm2, %v892_v22  ;;  %v14813_v22 = vld [vmem:[%s17937_s2 + $0x80] sm:$0xff]  }
 0x3ce   :  { %12526 = vmatmul.mubr.msk.bf16.vlgmr.msra.gmra.mxu1 %vm444_vm2, %v893_v24  ;;  %v10949_v24 = vld [vmem:[%s17938_s3 + $0x24] sm:$0xf] }
 0x3cf   :  { %12530 = vmatpush3.bf16.msra.mxu1 %v15032_v36  ;;  %12545 = vmatprep.mubr.bf16.mxu1 %v14807_v23 }
 0x3d0   :  { %12531 = vmatprep.subr.bf16.mxu1 %v15034_v40 }
 0x3d3   :  { %12532 = vmatpush3.bf16.msra.mxu1 %v15034_v40 }
 0x3d4   :  { %12533 = vmatprep.subr.bf16.mxu1 %v15042_v45 }
 0x3d7   :  { %12534 = vmatpush3.bf16.msra.mxu1 %v15042_v45 }
 0x3d8   :  { %12535 = vmatprep.subr.bf16.mxu1 %v15048_v50 }
 0x3db   :  { %12536 = vmatpush3.bf16.msra.mxu1 %v15048_v50 }
 0x3dc   :  { %12537 = vmatprep.subr.bf16.mxu1 %v15058_v55 }
 0x3df   :  { %12538 = vmatpush3.bf16.msra.mxu1 %v15058_v55 }
 0x3e0   :  { %12539 = vmatprep.subr.bf16.mxu1 %v15070_v60 }
 0x3e3   :  { %12540 = vmatpush3.bf16.msra.mxu1 %v15070_v60 }
 0x3e4   :  { %12541 = vmatprep.subr.bf16.mxu1 %v15082_v1 }
 0x3e7   :  { %12542 = vmatpush3.bf16.msra.mxu1 %v15082_v1 }
 0x3e8   :  { %12543 = vmatprep.subr.bf16.mxu1 %v15090_v4 }
 0x3eb   :  { %12544 = vmatpush3.bf16.msra.mxu1 %v15090_v4 }
 0x3ec   :  { %14773 = vmatprep.subr.msk.bf16.mxu1 %vm451_vm1, %v10922_v25  ;;  %v14814_v25 = vld [vmem:[%s17937_s2 + $0x88] sm:$0xff]  }
 0x3ee   :  { %12546 = vmatmul.mubr.bf16.vlgmr.msra.gmra.mxu1 %v14808_v26  ;;  %v1563_v26 = vsel %vm451_vm1, %v10949_v24, 0 }
 0x3ef   :  { %12576 = vmatpush3.bf16.msra.mxu1 %v1167_v27 }
 0x3f0   :  { %12581 = vmatprep.subr.bf16.mxu1 %v15032_v36 }
 0x48e   :  { %v12527_v28 = vpop.f32.mrf.mxu1 }
 0x48f   :  { %v956_v29 = vadd.f32 %v12527_v28, %v824_v12 }
 0x490   :  { %v939_v30 = vpop.f32.mrf.mxu1 }
 0x491   :  { %v954_v31 = vadd.f32 %v939_v30, %v822_v14 }
 0x492   :  { %v12528_v32 = vpop.f32.mrf.mxu1 }
 0x493   :  { %v957_v33 = vadd.f32 %v12528_v32, %v825_v16 }
 0x494   :  { %v15247_v34 = vpop.f32.mrf.mxu1 }
 0x4ae   :  { %v12547_v35 = vpop.f32.mrf.mxu1 }
 0x4b0   :  { %v1009_v37 = vpop.f32.mrf.mxu1 }
 0x4b2   :  { %v12548_v38 = vpop.f32.mrf.mxu1 }
 0x4b3   :  { %v1025_v43 = vpack.c.bf16 %v12548_v38, %v12547_v35 }
 0x4b4   :  { %v1012_v39 = vpop.f32.mrf.mxu1 }
 0x4b5   :  { %v1024_v41 = vpack.c.bf16 %v1012_v39, %v1009_v37 }
 0x4b7   :  { %12551 = vmatprep.mubr.msk.bf16.mxu0 %vm444_vm2, %v1024_v41 }
 0x4b8   :  { %12552 = vmatmul.mubr.msk.bf16.vlgmr.msra.gmra.mxu0 %vm444_vm2, %v1025_v43 }
 0x4b9   :  { %12556 = vmatpush3.bf16.msra.mxu0 %v15032_v36  ;;  %12571 = vmatprep.mubr.bf16.mxu0 %v14809_v42  ;;  %v14815_v42 = vld [vmem:[%s17937_s2 + $0x90] sm:$0xff]  }
 0x4ba   :  { %12557 = vmatprep.subr.bf16.mxu0 %v15034_v40 }
 0x4bd   :  { %12558 = vmatpush3.bf16.msra.mxu0 %v15034_v40 }
 0x4be   :  { %12559 = vmatprep.subr.bf16.mxu0 %v15042_v45 }
 0x4c1   :  { %12560 = vmatpush3.bf16.msra.mxu0 %v15042_v45 }
 0x4c2   :  { %12561 = vmatprep.subr.bf16.mxu0 %v15048_v50 }
 0x4c5   :  { %12562 = vmatpush3.bf16.msra.mxu0 %v15048_v50 }
 0x4c6   :  { %12563 = vmatprep.subr.bf16.mxu0 %v15058_v55 }
 0x4c9   :  { %12564 = vmatpush3.bf16.msra.mxu0 %v15058_v55 }
 0x4ca   :  { %12565 = vmatprep.subr.bf16.mxu0 %v15070_v60 }
 0x4cd   :  { %12566 = vmatpush3.bf16.msra.mxu0 %v15070_v60 }
 0x4ce   :  { %12567 = vmatprep.subr.bf16.mxu0 %v15082_v1 }
 0x4d1   :  { %12568 = vmatpush3.bf16.msra.mxu0 %v15082_v1 }
 0x4d2   :  { %12569 = vmatprep.subr.bf16.mxu0 %v15090_v4 }
 0x4d5   :  { %12570 = vmatpush3.bf16.msra.mxu0 %v15090_v4 }
 0x4d6   :  { %14774 = vmatprep.subr.msk.bf16.mxu0 %vm451_vm1, %v10931_v46  ;;  %v10958_v46 = vld [vmem:[%s17938_s3 + $0x28] sm:$0xf] }
 0x4d8   :  { %12572 = vmatmul.mubr.bf16.vlgmr.msra.gmra.mxu0 %v14810_v47  ;;  %v14816_v47 = vld [vmem:[%s17937_s2 + $0x98] sm:$0xff]  }
 0x4d9   :  { %12602 = vmatpush3.bf16.msra.mxu0 %v1299_v48  ;;  %v1695_v48 = vsel %vm451_vm1, %v10958_v46, 0 }
 0x4da   :  { %12607 = vmatprep.subr.bf16.mxu0 %v15032_v36 }
 0x578   :  { %v12553_v49 = vpop.f32.mrf.mxu0 }
 0x579   :  { %v1088_v51 = vadd.f32 %v12553_v49, %v956_v29 }
 0x57a   :  { %v1071_v52 = vpop.f32.mrf.mxu0 }
 0x57b   :  { %v1086_v54 = vadd.f32 %v1071_v52, %v954_v31 }
 0x57c   :  { %v12554_v56 = vpop.f32.mrf.mxu0 }
 0x57d   :  { %v1089_v57 = vadd.f32 %v12554_v56, %v957_v33 }
 0x57e   :  { %v15278_v58 = vpop.f32.mrf.mxu0 }
 0x598   :  { %v12573_v59 = vpop.f32.mrf.mxu0 }
 0x59a   :  { %v1141_v61 = vpop.f32.mrf.mxu0 }
 0x59c   :  { %v12574_v63 = vpop.f32.mrf.mxu0 }
 0x59d   :  { %v1157_v5 = vpack.c.bf16 %v12574_v63, %v12573_v59 }
 0x59e   :  { %v1144_v0 = vpop.f32.mrf.mxu0 }
 0x59f   :  { %v1156_v2 = vpack.c.bf16 %v1144_v0, %v1141_v61 }
 0x5a1   :  { %12577 = vmatprep.mubr.msk.bf16.mxu1 %vm444_vm2, %v1156_v2 }
 0x5a2   :  { %12578 = vmatmul.mubr.msk.bf16.vlgmr.msra.gmra.mxu1 %vm444_vm2, %v1157_v5  ;;  %v14817_v5 = vld [vmem:[%s17937_s2 + $0xa0] sm:$0xff]  }
 0x5a3   :  { %12582 = vmatpush3.bf16.msra.mxu1 %v15032_v36  ;;  %12597 = vmatprep.mubr.bf16.mxu1 %v14811_v3 }
 0x5a4   :  { %12583 = vmatprep.subr.bf16.mxu1 %v15034_v40 }
 0x5a7   :  { %12584 = vmatpush3.bf16.msra.mxu1 %v15034_v40 }
 0x5a8   :  { %12585 = vmatprep.subr.bf16.mxu1 %v15042_v45 }
 0x5ab   :  { %12586 = vmatpush3.bf16.msra.mxu1 %v15042_v45 }
 0x5ac   :  { %12587 = vmatprep.subr.bf16.mxu1 %v15048_v50 }
 0x5af   :  { %12588 = vmatpush3.bf16.msra.mxu1 %v15048_v50 }
 0x5b0   :  { %12589 = vmatprep.subr.bf16.mxu1 %v15058_v55 }
 0x5b3   :  { %12590 = vmatpush3.bf16.msra.mxu1 %v15058_v55 }
 0x5b4   :  { %12591 = vmatprep.subr.bf16.mxu1 %v15070_v60 }
 0x5b7   :  { %12592 = vmatpush3.bf16.msra.mxu1 %v15070_v60 }
 0x5b8   :  { %12593 = vmatprep.subr.bf16.mxu1 %v15082_v1 }
 0x5bb   :  { %12594 = vmatpush3.bf16.msra.mxu1 %v15082_v1 }
 0x5bc   :  { %12595 = vmatprep.subr.bf16.mxu1 %v15090_v4 }
 0x5bf   :  { %12596 = vmatpush3.bf16.msra.mxu1 %v15090_v4 }
 0x5c0   :  { %14775 = vmatprep.subr.msk.bf16.mxu1 %vm451_vm1, %v10940_v6 }
 0x5c2   :  { %12598 = vmatmul.mubr.bf16.vlgmr.msra.gmra.mxu1 %v14812_v7  ;;  %v10967_v7 = vld [vmem:[%s17938_s3 + $0x2c] sm:$0xf] }
 0x5c3   :  { %12628 = vmatpush3.bf16.msra.mxu1 %v1431_v8  ;;  %v14818_v8 = vld [vmem:[%s17937_s2 + $0xa8] sm:$0xff]  }
 0x5c4   :  { %12633 = vmatprep.subr.bf16.mxu1 %v15032_v36 }
 0x662   :  { %v12579_v9 = vpop.f32.mrf.mxu1 }
 0x663   :  { %v1220_v10 = vadd.f32 %v12579_v9, %v1088_v51  ;;  %v1827_v9 = vsel %vm451_vm1, %v10967_v7, 0 }
 0x664   :  { %v1203_v11 = vpop.f32.mrf.mxu1 }
 0x665   :  { %v1218_v12 = vadd.f32 %v1203_v11, %v1086_v54 }
 0x666   :  { %v12580_v13 = vpop.f32.mrf.mxu1 }
 0x667   :  { %v1221_v14 = vadd.f32 %v12580_v13, %v1089_v57 }
 0x668   :  { %v15309_v15 = vpop.f32.mrf.mxu1 }
 0x682   :  { %v12599_v16 = vpop.f32.mrf.mxu1 }
 0x684   :  { %v1273_v18 = vpop.f32.mrf.mxu1 }
 0x686   :  { %v12600_v19 = vpop.f32.mrf.mxu1 }
 0x687   :  { %v1289_v23 = vpack.c.bf16 %v12600_v19, %v12599_v16 }
 0x688   :  { %v1276_v20 = vpop.f32.mrf.mxu1 }
 0x689   :  { %v1288_v21 = vpack.c.bf16 %v1276_v20, %v1273_v18 }
 0x68b   :  { %12603 = vmatprep.mubr.msk.bf16.mxu0 %vm444_vm2, %v1288_v21 }
 0x68c   :  { %12604 = vmatmul.mubr.msk.bf16.vlgmr.msra.gmra.mxu0 %vm444_vm2, %v1289_v23 }
 0x68d   :  { %12608 = vmatpush3.bf16.msra.mxu0 %v15032_v36  ;;  %12623 = vmatprep.mubr.bf16.mxu0 %v14813_v22 }
 0x68e   :  { %12609 = vmatprep.subr.bf16.mxu0 %v15034_v40 }
 0x691   :  { %12610 = vmatpush3.bf16.msra.mxu0 %v15034_v40 }
 0x692   :  { %12611 = vmatprep.subr.bf16.mxu0 %v15042_v45 }
 0x695   :  { %12612 = vmatpush3.bf16.msra.mxu0 %v15042_v45 }
 0x696   :  { %12613 = vmatprep.subr.bf16.mxu0 %v15048_v50 }
 0x699   :  { %12614 = vmatpush3.bf16.msra.mxu0 %v15048_v50 }
 0x69a   :  { %12615 = vmatprep.subr.bf16.mxu0 %v15058_v55 }
 0x69d   :  { %12616 = vmatpush3.bf16.msra.mxu0 %v15058_v55 }
 0x69e   :  { %12617 = vmatprep.subr.bf16.mxu0 %v15070_v60 }
 0x6a1   :  { %12618 = vmatpush3.bf16.msra.mxu0 %v15070_v60 }
 0x6a2   :  { %12619 = vmatprep.subr.bf16.mxu0 %v15082_v1 }
 0x6a5   :  { %12620 = vmatpush3.bf16.msra.mxu0 %v15082_v1 }
 0x6a6   :  { %12621 = vmatprep.subr.bf16.mxu0 %v15090_v4 }
 0x6a9   :  { %12622 = vmatpush3.bf16.msra.mxu0 %v15090_v4 }
 0x6aa   :  { %14776 = vmatprep.subr.msk.bf16.mxu0 %vm451_vm1, %v10949_v24  ;;  %v14819_v24 = vld [vmem:[%s17937_s2 + $0xb0] sm:$0xff]  }
 0x6ac   :  { %12624 = vmatmul.mubr.bf16.vlgmr.msra.gmra.mxu0 %v14814_v25 }
 0x6ad   :  { %12654 = vmatpush3.bf16.msra.mxu0 %v1563_v26  ;;  %v10976_v26 = vld [vmem:[%s17938_s3 + $0x30] sm:$0xf] }
 0x6ae   :  { %12659 = vmatprep.subr.bf16.mxu0 %v15032_v36 }
 0x74c   :  { %v12605_v27 = vpop.f32.mrf.mxu0 }
 0x74d   :  { %v1352_v28 = vadd.f32 %v12605_v27, %v1220_v10  ;;  %v14820_v27 = vld [vmem:[%s17937_s2 + $0xb8] sm:$0xff]  }
 0x74e   :  { %v1335_v29 = vpop.f32.mrf.mxu0 }
 0x74f   :  { %v1350_v30 = vadd.f32 %v1335_v29, %v1218_v12 }
 0x750   :  { %v12606_v31 = vpop.f32.mrf.mxu0 }
 0x751   :  { %v1353_v32 = vadd.f32 %v12606_v31, %v1221_v14 }
 0x752   :  { %v15340_v33 = vpop.f32.mrf.mxu0 }
 0x76c   :  { %v12625_v35 = vpop.f32.mrf.mxu0 }
 0x76e   :  { %v1405_v37 = vpop.f32.mrf.mxu0 }
 0x770   :  { %v12626_v38 = vpop.f32.mrf.mxu0 }
 0x771   :  { %v1421_v43 = vpack.c.bf16 %v12626_v38, %v12625_v35 }
 0x772   :  { %v1408_v39 = vpop.f32.mrf.mxu0 }
 0x773   :  { %v1420_v41 = vpack.c.bf16 %v1408_v39, %v1405_v37 }
 0x775   :  { %12629 = vmatprep.mubr.msk.bf16.mxu1 %vm444_vm2, %v1420_v41 }
 0x776   :  { %12630 = vmatmul.mubr.msk.bf16.vlgmr.msra.gmra.mxu1 %vm444_vm2, %v1421_v43 }
 0x777   :  { %12634 = vmatpush3.bf16.msra.mxu1 %v15032_v36  ;;  %12649 = vmatprep.mubr.bf16.mxu1 %v14815_v42 }
 0x778   :  { %12635 = vmatprep.subr.bf16.mxu1 %v15034_v40 }
 0x77b   :  { %12636 = vmatpush3.bf16.msra.mxu1 %v15034_v40 }
 0x77c   :  { %12637 = vmatprep.subr.bf16.mxu1 %v15042_v45 }
 0x77f   :  { %12638 = vmatpush3.bf16.msra.mxu1 %v15042_v45 }
 0x780   :  { %12639 = vmatprep.subr.bf16.mxu1 %v15048_v50 }
 0x783   :  { %12640 = vmatpush3.bf16.msra.mxu1 %v15048_v50 }
 0x784   :  { %12641 = vmatprep.subr.bf16.mxu1 %v15058_v55 }
 0x787   :  { %12642 = vmatpush3.bf16.msra.mxu1 %v15058_v55 }
 0x788   :  { %12643 = vmatprep.subr.bf16.mxu1 %v15070_v60 }
 0x78b   :  { %12644 = vmatpush3.bf16.msra.mxu1 %v15070_v60 }
 0x78c   :  { %12645 = vmatprep.subr.bf16.mxu1 %v15082_v1 }
 0x78f   :  { %12646 = vmatpush3.bf16.msra.mxu1 %v15082_v1 }
 0x790   :  { %12647 = vmatprep.subr.bf16.mxu1 %v15090_v4 }
 0x793   :  { %12648 = vmatpush3.bf16.msra.mxu1 %v15090_v4 }
 0x794   :  { %14777 = vmatprep.subr.msk.bf16.mxu1 %vm451_vm1, %v10958_v46 }
 0x796   :  { %12650 = vmatmul.mubr.bf16.vlgmr.msra.gmra.mxu1 %v14816_v47  ;;  %v14821_v47 = vld [vmem:[%s17937_s2 + $0xc0] sm:$0xff]  }
 0x797   :  { %12680 = vmatpush3.bf16.msra.mxu1 %v1695_v48 }
 0x798   :  { %12685 = vmatprep.subr.bf16.mxu1 %v15032_v36 }
 0x836   :  { %v12631_v49 = vpop.f32.mrf.mxu1 }
 0x837   :  { %v1484_v51 = vadd.f32 %v12631_v49, %v1352_v28  ;;  %v1959_v28 = vsel %vm451_vm1, %v10976_v26, 0  ;;  %v10985_v49 = vld [vmem:[%s17938_s3 + $0x34] sm:$0xf] }
 0x838   :  { %v1467_v52 = vpop.f32.mrf.mxu1 }
 0x839   :  { %v1482_v54 = vadd.f32 %v1467_v52, %v1350_v30  ;;  %v2091_v52 = vsel %vm451_vm1, %v10985_v49, 0 }
 0x83a   :  { %v12632_v56 = vpop.f32.mrf.mxu1 }
 0x83b   :  { %v1485_v57 = vadd.f32 %v12632_v56, %v1353_v32 }
 0x83c   :  { %v15371_v59 = vpop.f32.mrf.mxu1 }
 0x856   :  { %v12651_v61 = vpop.f32.mrf.mxu1 }
 0x858   :  { %v1537_v63 = vpop.f32.mrf.mxu1 }
 0x85a   :  { %v12652_v0 = vpop.f32.mrf.mxu1 }
 0x85b   :  { %v1553_v6 = vpack.c.bf16 %v12652_v0, %v12651_v61 }
 0x85c   :  { %v1540_v2 = vpop.f32.mrf.mxu1 }
 0x85d   :  { %v1552_v3 = vpack.c.bf16 %v1540_v2, %v1537_v63 }
 0x85f   :  { %12655 = vmatprep.mubr.msk.bf16.mxu0 %vm444_vm2, %v1552_v3 }
 0x860   :  { %12656 = vmatmul.mubr.msk.bf16.vlgmr.msra.gmra.mxu0 %vm444_vm2, %v1553_v6 }
 0x861   :  { %12660 = vmatpush3.bf16.msra.mxu0 %v15032_v36  ;;  %12675 = vmatprep.mubr.bf16.mxu0 %v14817_v5 }
 0x862   :  { %12661 = vmatprep.subr.bf16.mxu0 %v15034_v40 }
 0x865   :  { %12662 = vmatpush3.bf16.msra.mxu0 %v15034_v40 }
 0x866   :  { %12663 = vmatprep.subr.bf16.mxu0 %v15042_v45 }
 0x869   :  { %12664 = vmatpush3.bf16.msra.mxu0 %v15042_v45 }
 0x86a   :  { %12665 = vmatprep.subr.bf16.mxu0 %v15048_v50 }
 0x86d   :  { %12666 = vmatpush3.bf16.msra.mxu0 %v15048_v50 }
 0x86e   :  { %12667 = vmatprep.subr.bf16.mxu0 %v15058_v55 }
 0x871   :  { %12668 = vmatpush3.bf16.msra.mxu0 %v15058_v55 }
 0x872   :  { %12669 = vmatprep.subr.bf16.mxu0 %v15070_v60 }
 0x875   :  { %12670 = vmatpush3.bf16.msra.mxu0 %v15070_v60 }
 0x876   :  { %12671 = vmatprep.subr.bf16.mxu0 %v15082_v1 }
 0x879   :  { %12672 = vmatpush3.bf16.msra.mxu0 %v15082_v1 }
 0x87a   :  { %12673 = vmatprep.subr.bf16.mxu0 %v15090_v4 }
 0x87d   :  { %12674 = vmatpush3.bf16.msra.mxu0 %v15090_v4 }
 0x87e   :  { %14778 = vmatprep.subr.msk.bf16.mxu0 %vm451_vm1, %v10967_v7 }
 0x880   :  { %12676 = vmatmul.mubr.bf16.vlgmr.msra.gmra.mxu0 %v14818_v8 }
 0x881   :  { %12706 = vmatpush3.bf16.msra.mxu0 %v1827_v9  ;;  %v14823_v9 = vld [vmem:[%s17937_s2 + $0xd0] sm:$0xff]  }
 0x882   :  { %12711 = vmatprep.subr.bf16.mxu0 %v15032_v36 }
 0x920   :  { %v12657_v10 = vpop.f32.mrf.mxu0 }
 0x921   :  { %v1616_v11 = vadd.f32 %v12657_v10, %v1484_v51  ;;  %v14822_v51 = vld [vmem:[%s17937_s2 + $0xc8] sm:$0xff]  }
 0x922   :  { %v1599_v12 = vpop.f32.mrf.mxu0 }
 0x923   :  { %v1614_v13 = vadd.f32 %v1599_v12, %v1482_v54  ;;  %v14824_v12 = vld [vmem:[%s17937_s2 + $0xd8] sm:$0xff]  }
 0x924   :  { %v12658_v14 = vpop.f32.mrf.mxu0 }
 0x925   :  { %v1617_v16 = vadd.f32 %v12658_v14, %v1485_v57 }
 0x926   :  { %v15402_v18 = vpop.f32.mrf.mxu0 }
 0x940   :  { %v12677_v19 = vpop.f32.mrf.mxu0 }
 0x942   :  { %v1669_v20 = vpop.f32.mrf.mxu0 }
 0x944   :  { %v12678_v21 = vpop.f32.mrf.mxu0 }
 0x945   :  { %v1685_v25 = vpack.c.bf16 %v12678_v21, %v12677_v19 }
 0x946   :  { %v1672_v22 = vpop.f32.mrf.mxu0 }
 0x947   :  { %v1684_v23 = vpack.c.bf16 %v1672_v22, %v1669_v20 }
 0x949   :  { %12681 = vmatprep.mubr.msk.bf16.mxu1 %vm444_vm2, %v1684_v23 }
 0x94a   :  { %12682 = vmatmul.mubr.msk.bf16.vlgmr.msra.gmra.mxu1 %vm444_vm2, %v1685_v25 }
 0x94b   :  { %12686 = vmatpush3.bf16.msra.mxu1 %v15032_v36  ;;  %12701 = vmatprep.mubr.bf16.mxu1 %v14819_v24 }
 0x94c   :  { %12687 = vmatprep.subr.bf16.mxu1 %v15034_v40 }
 0x94f   :  { %12688 = vmatpush3.bf16.msra.mxu1 %v15034_v40 }
 0x950   :  { %12689 = vmatprep.subr.bf16.mxu1 %v15042_v45 }
 0x953   :  { %12690 = vmatpush3.bf16.msra.mxu1 %v15042_v45 }
 0x954   :  { %12691 = vmatprep.subr.bf16.mxu1 %v15048_v50 }
 0x957   :  { %12692 = vmatpush3.bf16.msra.mxu1 %v15048_v50 }
 0x958   :  { %12693 = vmatprep.subr.bf16.mxu1 %v15058_v55 }
 0x95b   :  { %12694 = vmatpush3.bf16.msra.mxu1 %v15058_v55 }
 0x95c   :  { %12695 = vmatprep.subr.bf16.mxu1 %v15070_v60 }
 0x95f   :  { %12696 = vmatpush3.bf16.msra.mxu1 %v15070_v60 }
 0x960   :  { %12697 = vmatprep.subr.bf16.mxu1 %v15082_v1 }
 0x963   :  { %12698 = vmatpush3.bf16.msra.mxu1 %v15082_v1 }
 0x964   :  { %12699 = vmatprep.subr.bf16.mxu1 %v15090_v4 }
 0x967   :  { %12700 = vmatpush3.bf16.msra.mxu1 %v15090_v4 }
 0x968   :  { %14779 = vmatprep.subr.msk.bf16.mxu1 %vm451_vm1, %v10976_v26 }
 0x96a   :  { %12702 = vmatmul.mubr.bf16.vlgmr.msra.gmra.mxu1 %v14820_v27 }
 0x96b   :  { %12732 = vmatpush3.bf16.msra.mxu1 %v1959_v28 }
 0x96c   :  { %12737 = vmatprep.subr.bf16.mxu1 %v15032_v36 }
 0xa0a   :  { %v12683_v29 = vpop.f32.mrf.mxu1 }
 0xa0b   :  { %v1748_v30 = vadd.f32 %v12683_v29, %v1616_v11  ;;  %v10994_v11 = vld [vmem:[%s17938_s3 + $0x38] sm:$0xf]  ;;  %v14825_v29 = vld [vmem:[%s17937_s2 + $0xe0] sm:$0xff]  }
 0xa0c   :  { %v1731_v31 = vpop.f32.mrf.mxu1 }
 0xa0d   :  { %v1746_v32 = vadd.f32 %v1731_v31, %v1614_v13  ;;  %v2223_v13 = vsel %vm451_vm1, %v10994_v11, 0  ;;  %v14826_v31 = vld [vmem:[%s17937_s2 + $0xe8] sm:$0xff]  }
 0xa0e   :  { %v12684_v35 = vpop.f32.mrf.mxu1 }
 0xa0f   :  { %v1749_v37 = vadd.f32 %v12684_v35, %v1617_v16 }
 0xa10   :  { %v15433_v38 = vpop.f32.mrf.mxu1 }
 0xa2a   :  { %v12703_v39 = vpop.f32.mrf.mxu1 }
 0xa2c   :  { %v1801_v41 = vpop.f32.mrf.mxu1 }
 0xa2e   :  { %v12704_v42 = vpop.f32.mrf.mxu1 }
 0xa2f   :  { %v1817_v48 = vpack.c.bf16 %v12704_v42, %v12703_v39 }
 0xa30   :  { %v1804_v43 = vpop.f32.mrf.mxu1 }
 0xa31   :  { %v1816_v46 = vpack.c.bf16 %v1804_v43, %v1801_v41 }
 0xa33   :  { %12707 = vmatprep.mubr.msk.bf16.mxu0 %vm444_vm2, %v1816_v46 }
 0xa34   :  { %12708 = vmatmul.mubr.msk.bf16.vlgmr.msra.gmra.mxu0 %vm444_vm2, %v1817_v48 }
 0xa35   :  { %12712 = vmatpush3.bf16.msra.mxu0 %v15032_v36  ;;  %12727 = vmatprep.mubr.bf16.mxu0 %v14821_v47 }
 0xa36   :  { %12713 = vmatprep.subr.bf16.mxu0 %v15034_v40 }
 0xa39   :  { %12714 = vmatpush3.bf16.msra.mxu0 %v15034_v40 }
 0xa3a   :  { %12715 = vmatprep.subr.bf16.mxu0 %v15042_v45 }
 0xa3d   :  { %12716 = vmatpush3.bf16.msra.mxu0 %v15042_v45 }
 0xa3e   :  { %12717 = vmatprep.subr.bf16.mxu0 %v15048_v50 }
 0xa41   :  { %12718 = vmatpush3.bf16.msra.mxu0 %v15048_v50 }
 0xa42   :  { %12719 = vmatprep.subr.bf16.mxu0 %v15058_v55 }
 0xa45   :  { %12720 = vmatpush3.bf16.msra.mxu0 %v15058_v55 }
 0xa46   :  { %12721 = vmatprep.subr.bf16.mxu0 %v15070_v60 }
 0xa49   :  { %12722 = vmatpush3.bf16.msra.mxu0 %v15070_v60 }
 0xa4a   :  { %12723 = vmatprep.subr.bf16.mxu0 %v15082_v1 }
 0xa4d   :  { %12724 = vmatpush3.bf16.msra.mxu0 %v15082_v1 }
 0xa4e   :  { %12725 = vmatprep.subr.bf16.mxu0 %v15090_v4 }
 0xa51   :  { %12726 = vmatpush3.bf16.msra.mxu0 %v15090_v4 }
 0xa52   :  { %14780 = vmatprep.subr.msk.bf16.mxu0 %vm451_vm1, %v10985_v49 }
 0xa54   :  { %12728 = vmatmul.mubr.bf16.vlgmr.msra.gmra.mxu0 %v14822_v51 }
 0xa55   :  { %12758 = vmatpush3.bf16.msra.mxu0 %v2091_v52  ;;  %v14827_v52 = vld [vmem:[%s17937_s2 + $0xf0] sm:$0xff]  }
 0xa56   :  { %12763 = vmatprep.subr.bf16.mxu0 %v15032_v36 }
 0xaf4   :  { %v12709_v54 = vpop.f32.mrf.mxu0 }
 0xaf5   :  { %v1880_v56 = vadd.f32 %v12709_v54, %v1748_v30 }
 0xaf6   :  { %v1863_v57 = vpop.f32.mrf.mxu0 }
 0xaf7   :  { %v1878_v61 = vadd.f32 %v1863_v57, %v1746_v32 }
 0xaf8   :  { %v12710_v63 = vpop.f32.mrf.mxu0 }
 0xaf9   :  { %v1881_v0 = vadd.f32 %v12710_v63, %v1749_v37 }
 0xafa   :  { %v15464_v2 = vpop.f32.mrf.mxu0 }
 0xb14   :  { %v12729_v3 = vpop.f32.mrf.mxu0 }
 0xb16   :  { %v1933_v5 = vpop.f32.mrf.mxu0 }
 0xb18   :  { %v12730_v6 = vpop.f32.mrf.mxu0 }
 0xb19   :  { %v1949_v10 = vpack.c.bf16 %v12730_v6, %v12729_v3 }
 0xb1a   :  { %v1936_v7 = vpop.f32.mrf.mxu0 }
 0xb1b   :  { %v1948_v8 = vpack.c.bf16 %v1936_v7, %v1933_v5  ;;  %v14895_v7 = vmov 0.0  }
 0xb1d   :  { %12733 = vmatprep.mubr.msk.bf16.mxu1 %vm444_vm2, %v1948_v8  ;;  %v551_v8 = vadd.f32 %v15183_v53, %v15181_v44 }
 0xb1e   :  { %12734 = vmatmul.mubr.msk.bf16.vlgmr.msra.gmra.mxu1 %vm444_vm2, %v1949_v10 }
 0xb1f   :  { %12738 = vmatpush3.bf16.msra.mxu1 %v15032_v36  ;;  %12753 = vmatprep.mubr.bf16.mxu1 %v14823_v9  ;;  %v691_v9 = vadd.f32 %v15185_v62, %v551_v8 }
 0xb20   :  { %12739 = vmatprep.subr.bf16.mxu1 %v15034_v40 }
 0xb21   :  { %v823_v10 = vadd.f32 %v15216_v17, %v691_v9 }
 0xb23   :  { %12740 = vmatpush3.bf16.msra.mxu1 %v15034_v40 }
 0xb24   :  { %12741 = vmatprep.subr.bf16.mxu1 %v15042_v45 }
 0xb27   :  { %12742 = vmatpush3.bf16.msra.mxu1 %v15042_v45 }
 0xb28   :  { %12743 = vmatprep.subr.bf16.mxu1 %v15048_v50 }
 0xb2b   :  { %12744 = vmatpush3.bf16.msra.mxu1 %v15048_v50 }
 0xb2c   :  { %12745 = vmatprep.subr.bf16.mxu1 %v15058_v55 }
 0xb2f   :  { %12746 = vmatpush3.bf16.msra.mxu1 %v15058_v55 }
 0xb30   :  { %12747 = vmatprep.subr.bf16.mxu1 %v15070_v60 }
 0xb33   :  { %12748 = vmatpush3.bf16.msra.mxu1 %v15070_v60 }
 0xb34   :  { %12749 = vmatprep.subr.bf16.mxu1 %v15082_v1 }
 0xb37   :  { %12750 = vmatpush3.bf16.msra.mxu1 %v15082_v1 }
 0xb38   :  { %12751 = vmatprep.subr.bf16.mxu1 %v15090_v4 }
 0xb3b   :  { %12752 = vmatpush3.bf16.msra.mxu1 %v15090_v4 }
 0xb3c   :  { %14781 = vmatprep.subr.msk.bf16.mxu1 %vm451_vm1, %v10994_v11  ;;  %v955_v11 = vadd.f32 %v15247_v34, %v823_v10 }
 0xb3e   :  { %12754 = vmatmul.mubr.bf16.vlgmr.msra.gmra.mxu1 %v14824_v12  ;;  %v1087_v12 = vadd.f32 %v15278_v58, %v955_v11 }
 0xb3f   :  { %12784 = vmatpush3.bf16.msra.mxu1 %v2223_v13 }
 0xb40   :  { %12789 = vmatprep.subr.bf16.mxu1 %v15032_v36  ;;  %v1219_v13 = vadd.f32 %v15309_v15, %v1087_v12 }
 0xbde   :  { %v12735_v14 = vpop.f32.mrf.mxu1 }
 0xbdf   :  { %v2012_v16 = vadd.f32 %v12735_v14, %v1880_v56  ;;  %v1351_v14 = vadd.f32 %v15340_v33, %v1219_v13 }
 0xbe0   :  { %v1995_v19 = vpop.f32.mrf.mxu1 }
 0xbe1   :  { %v2010_v20 = vadd.f32 %v1995_v19, %v1878_v61 }
 0xbe2   :  { %v12736_v21 = vpop.f32.mrf.mxu1 }
 0xbe3   :  { %v2013_v22 = vadd.f32 %v12736_v21, %v1881_v0 }
 0xbe4   :  { %v15495_v23 = vpop.f32.mrf.mxu1 }
 0xbfe   :  { %v12755_v24 = vpop.f32.mrf.mxu1 }
 0xc00   :  { %v2065_v25 = vpop.f32.mrf.mxu1 }
 0xc02   :  { %v12756_v26 = vpop.f32.mrf.mxu1 }
 0xc03   :  { %v2081_v30 = vpack.c.bf16 %v12756_v26, %v12755_v24 }
 0xc04   :  { %v2068_v27 = vpop.f32.mrf.mxu1 }
 0xc05   :  { %v2080_v28 = vpack.c.bf16 %v2068_v27, %v2065_v25 }
 0xc07   :  { %12759 = vmatprep.mubr.msk.bf16.mxu0 %vm444_vm2, %v2080_v28 }
 0xc08   :  { %12760 = vmatmul.mubr.msk.bf16.vlgmr.msra.gmra.mxu0 %vm444_vm2, %v2081_v30 }
 0xc09   :  { %12764 = vmatpush3.bf16.msra.mxu0 %v15032_v36  ;;  %12779 = vmatprep.mubr.bf16.mxu0 %v14825_v29 }
 0xc0a   :  { %12765 = vmatprep.subr.bf16.mxu0 %v15034_v40 }
 0xc0d   :  { %12766 = vmatpush3.bf16.msra.mxu0 %v15034_v40 }
 0xc0e   :  { %12767 = vmatprep.subr.bf16.mxu0 %v15042_v45 }
 0xc11   :  { %12768 = vmatpush3.bf16.msra.mxu0 %v15042_v45 }
 0xc12   :  { %12769 = vmatprep.subr.bf16.mxu0 %v15048_v50 }
 0xc15   :  { %12770 = vmatpush3.bf16.msra.mxu0 %v15048_v50 }
 0xc16   :  { %12771 = vmatprep.subr.bf16.mxu0 %v15058_v55 }
 0xc19   :  { %12772 = vmatpush3.bf16.msra.mxu0 %v15058_v55 }
 0xc1a   :  { %12773 = vmatprep.subr.bf16.mxu0 %v15070_v60 }
 0xc1d   :  { %12774 = vmatpush3.bf16.msra.mxu0 %v15070_v60 }
 0xc1e   :  { %12775 = vmatprep.subr.bf16.mxu0 %v15082_v1 }
 0xc21   :  { %12776 = vmatpush3.bf16.msra.mxu0 %v15082_v1 }
 0xc22   :  { %12777 = vmatprep.subr.bf16.mxu0 %v15090_v4 }
 0xc25   :  { %12778 = vmatpush3.bf16.msra.mxu0 %v15090_v4 }
 0xc28   :  { %12780 = vmatmul.mubr.bf16.vlgmr.msra.gmra.mxu0 %v14826_v31 }
 0xcc8   :  { %v12761_v32 = vpop.f32.mrf.mxu0 }
 0xcc9   :  { %v2144_v35 = vadd.f32 %v12761_v32, %v2012_v16  ;;  %v1483_v16 = vadd.f32 %v15371_v59, %v1351_v14 }
 0xcca   :  { %v2127_v37 = vpop.f32.mrf.mxu0 }
 0xccb   :  { %v2142_v39 = vadd.f32 %v2127_v37, %v2010_v20  ;;  %v1615_v19 = vadd.f32 %v15402_v18, %v1483_v16 }
 0xccc   :  { %v12762_v41 = vpop.f32.mrf.mxu0 }
 0xccd   :  { %v2145_v42 = vadd.f32 %v12762_v41, %v2013_v22  ;;  %v1747_v20 = vadd.f32 %v15433_v38, %v1615_v19 }
 0xcce   :  { %v15520_v43 = vpop.f32.mrf.mxu0 }
 0xccf   :  { %v1879_v44 = vadd.f32 %v15464_v2, %v1747_v20 }
 0xcd1   :  { %v2011_v62 = vadd.f32 %v15495_v23, %v1879_v44 }
 0xcd3   :  { %v2143_v34 = vadd.f32 %v15520_v43, %v2011_v62 }
 0xce8   :  { %v12781_v46 = vpop.f32.mrf.mxu0 }
 0xcea   :  { %v2197_v47 = vpop.f32.mrf.mxu0 }
 0xcec   :  { %v12782_v48 = vpop.f32.mrf.mxu0 }
 0xced   :  { %v2213_v54 = vpack.c.bf16 %v12782_v48, %v12781_v46 }
 0xcee   :  { %v2200_v49 = vpop.f32.mrf.mxu0 }
 0xcef   :  { %v2212_v51 = vpack.c.bf16 %v2200_v49, %v2197_v47 }
 0xcf1   :  { %12785 = vmatprep.mubr.msk.bf16.mxu1 %vm444_vm2, %v2212_v51 }
 0xcf2   :  { %12786 = vmatmul.mubr.msk.bf16.vlgmr.msra.gmra.mxu1 %vm444_vm2, %v2213_v54 }
 0xcf3   :  { %12790 = vmatpush3.bf16.msra.mxu1 %v15032_v36  ;;  %12805 = vmatprep.mubr.bf16.mxu1 %v14827_v52  ;;  %v14828_v36 = vld [vmem:[%s17937_s2 + $0xf8] sm:$0xff]  }
 0xcf4   :  { %12791 = vmatprep.subr.bf16.mxu1 %v15034_v40 }
 0xcf7   :  { %12792 = vmatpush3.bf16.msra.mxu1 %v15034_v40  ;;  %v11003_v40 = vld [vmem:[%s17938_s3 + $0x3c] sm:$0xf] }
 0xcf8   :  { %12793 = vmatprep.subr.bf16.mxu1 %v15042_v45  ;;  %14782 = vmatprep.subr.msk.bf16.mxu0 %vm451_vm1, %v11003_v40 }
 0xcfb   :  { %12794 = vmatpush3.bf16.msra.mxu1 %v15042_v45  ;;  %v2355_v45 = vsel %vm451_vm1, %v11003_v40, 0 }
 0xcfc   :  { %12795 = vmatprep.subr.bf16.mxu1 %v15048_v50  ;;  %12810 = vmatpush3.bf16.msra.mxu0 %v2355_v45 }
 0xcfd   :  { %12815 = vmatprep.subr.bf16.mxu0 %v14895_v7 }
 0xcff   :  { %12796 = vmatpush3.bf16.msra.mxu1 %v15048_v50 }
 0xd00   :  { %12797 = vmatprep.subr.bf16.mxu1 %v15058_v55 }
 0xd03   :  { %12798 = vmatpush3.bf16.msra.mxu1 %v15058_v55 }
 0xd04   :  { %12799 = vmatprep.subr.bf16.mxu1 %v15070_v60 }
 0xd07   :  { %12800 = vmatpush3.bf16.msra.mxu1 %v15070_v60 }
 0xd08   :  { %12801 = vmatprep.subr.bf16.mxu1 %v15082_v1 }
 0xd0b   :  { %12802 = vmatpush3.bf16.msra.mxu1 %v15082_v1 }
 0xd0c   :  { %12803 = vmatprep.subr.bf16.mxu1 %v15090_v4 }
 0xd0f   :  { %12804 = vmatpush3.bf16.msra.mxu1 %v15090_v4 }
 0xd10   :  { %12823 = vmatprep.subr.bf16.mxu1 %v14895_v7 }
 0xd12   :  { %12806 = vmatmul.mubr.bf16.vlgmr.msra.gmra.mxu1 %v14828_v36 }
 0xd13   :  { %12827 = vmatprep.mubr.msk.bf16.mxu1 %vm14896_vm3, %v14895_v7 }
 0xdb2   :  { %v12787_v50 = vpop.f32.mrf.mxu1 }
 0xdb3   :  { %v2276_v55 = vadd.f32 %v12787_v50, %v2144_v35 }
 0xdb4   :  { %v2259_v60 = vpop.f32.mrf.mxu1 }
 0xdb5   :  { %v2274_v1 = vadd.f32 %v2259_v60, %v2142_v39 }
 0xdb6   :  { %v12788_v56 = vpop.f32.mrf.mxu1 }
 0xdb7   :  { %v2277_v57 = vadd.f32 %v12788_v56, %v2145_v42 }
 0xdb8   :  { %v2262_v61 = vpop.f32.mrf.mxu1 }
 0xdb9   :  { %v2275_v22 = vadd.f32 %v2262_v61, %v2143_v34  ;;  %v11007_v34 = vld [vmem:[%s17940_s4 + $0x1] sm:$0x1] }
 0xdd2   :  { %v12807_v63 = vpop.f32.mrf.mxu1 }
 0xdd4   :  { %v2329_v0 = vpop.f32.mrf.mxu1 }
 0xdd6   :  { %v12808_v4 = vpop.f32.mrf.mxu1 }
 0xdd7   :  { %v2345_v6 = vpack.c.bf16 %v12808_v4, %v12807_v63 }
 0xdd8   :  { %v2332_v3 = vpop.f32.mrf.mxu1 }
 0xdd9   :  { %v2344_v5 = vpack.c.bf16 %v2332_v3, %v2329_v0 }
 0xddb   :  { %12811 = vmatprep.mubr.msk.bf16.mxu0 %vm444_vm2, %v2344_v5 }
 0xddc   :  { %12812 = vmatmul.mubr.msk.bf16.vlgmr.msra.gmra.mxu0 %vm444_vm2, %v2345_v6 }
 0xddd   :  { %12819 = vmatprep.mubr.msk.bf16.mxu0 %vm14896_vm3, %v14895_v7 }
 0xe9c   :  { %v12813_v53 = vpop.f32.mrf.mxu0 }
 0xe9d   :  { %v2408_v15 = vadd.f32 %v12813_v53, %v2276_v55 }
 0xe9e   :  { %v2391_v17 = vpop.f32.mrf.mxu0 }
 0xe9f   :  { %v2406_v21 = vadd.f32 %v2391_v17, %v2274_v1  ;;  %v2427_v18 = vmul.f32 %v2408_v15, %v2408_v15  ;;  %v2414_v23 = vsel %vm2410_vm4, %v2408_v15, 0.0  ;;  %v2469_v17 = vld [vmem:[%s17940_s4] sm:$0x1] }
 0xea0   :  { %v12814_v58 = vpop.f32.mrf.mxu0 }
 0xea1   :  { %v2425_v33 = vmul.f32 %v2406_v21, %v2406_v21  ;;  %v2409_v25 = vadd.f32 %v12814_v58, %v2277_v57  ;;  %v2411_v38 = vsel %vm2410_vm4, %v2406_v21, 0.0  ;;  %v2432_v35 = vsel %vm2410_vm4, %v2427_v18, 0.0  ;;  %v14830_v58 = vld [vmem:[%s17939_s5] sm:$0xff]  }
 0xea2   :  { %v2394_v24 = vpop.f32.mrf.mxu0 }
 0xea3   :  { %v2407_v59 = vadd.f32 %v2394_v24, %v2275_v22  ;;  %v2429_v28 = vsel %vm2410_vm4, %v2425_v33, 0.0  ;;  %v2428_v29 = vmul.f32 %v2409_v25, %v2409_v25  ;;  %v2416_v37 = vsel %vm2410_vm4, %v2409_v25, 0.0 }
 0xea5   :  { %v2412_v2 = vsel %vm2410_vm4, %v2407_v59, 0.0  ;;  %v2426_v26 = vmul.f32 %v2407_v59, %v2407_v59  ;;  %v2434_v42 = vsel %vm2410_vm4, %v2428_v29, 0.0  ;;  %v11033_v29 = vld [vmem:[%s17940_s4 + $0x5] sm:$0x1] }
 0xea6   :  { %v2413_v27 = vadd.f32 %v2412_v2, %v2411_v38 }
 0xea7   :  { %v2430_v30 = vsel %vm2410_vm4, %v2426_v26, 0.0 }
 0xea8   :  { %v2415_v31 = vadd.f32 %v2414_v23, %v2413_v27  ;;  %v2431_v32 = vadd.f32 %v2430_v30, %v2429_v28  ;;  %v11015_v27 = vld [vmem:[%s17940_s4 + $0x2] sm:$0x1]  ;;  %v11021_v23 = vld [vmem:[%s17940_s4 + $0x3] sm:$0x1]  ;;  %v11027_v28 = vld [vmem:[%s17940_s4 + $0x4] sm:$0x1] }
 0xea9   :  { %v11039_v30 = vld [vmem:[%s17940_s4 + $0x6] sm:$0x1] }
 0xeaa   :  { %v2417_v39 = vadd.f32 %v2416_v37, %v2415_v31  ;;  %v2433_v41 = vadd.f32 %v2432_v35, %v2431_v32  ;;  %v11045_v31 = vld [vmem:[%s17940_s4 + $0x7] sm:$0x1]  ;;  %v11051_v32 = vld [vmem:[%s17940_s4 + $0x8] sm:$0x1]  ;;  %v11057_v35 = vld [vmem:[%s17940_s4 + $0x9] sm:$0x1] }
 0xeab   :  { %v11063_v37 = vld [vmem:[%s17940_s4 + $0xa] sm:$0x1] }
 0xeac   :  { %v2418_v43 = vrot.slane %v2417_v39, 4  ;;  %v2435_v46 = vadd.f32 %v2434_v42, %v2433_v41  ;;  %v11069_v41 = vld [vmem:[%s17940_s4 + $0xb] sm:$0x1]  ;;  %v11075_v42 = vld [vmem:[%s17940_s4 + $0xc] sm:$0x1] }
 0xeae   :  { %v2419_v47 = vadd.f32 %v2418_v43, %v2417_v39  ;;  %v2436_v48 = vrot.slane %v2435_v46, 4  ;;  %v14861_v39 = vld [vmem:[%s17939_s5 + $0x10] sm:$0xff]   ;;  %v11081_v43 = vld [vmem:[%s17940_s4 + $0xd] sm:$0x1] }
 0xeb0   :  { %v2420_v49 = vrot.slane %v2419_v47, 2  ;;  %v2437_v51 = vadd.f32 %v2436_v48, %v2435_v46  ;;  %v11087_v46 = vld [vmem:[%s17940_s4 + $0xe] sm:$0x1]  ;;  %v14831_v48 = vld [vmem:[%s17941_s7 + $0x38] sm:$0xff]  }
 0xeb2   :  { %v2421_v52 = vadd.f32 %v2420_v49, %v2419_v47  ;;  %v2438_v54 = vrot.slane %v2437_v51, 2  ;;  %v11093_v47 = vld [vmem:[%s17940_s4 + $0xf] sm:$0x1] }
 0xeb3   :  { %v14845_v49 = vld [vmem:[%s17942_s6 + $0x4] ss:$8 sps:$4 sm:$0xff]  }
 0xeb4   :  { %v2422_v36 = vrot.slane %v2421_v52, 1  ;;  %v2439_v40 = vadd.f32 %v2438_v54, %v2437_v51  ;;  %v14897_v51 = vmov 0   ;;  %v14833_v54 = vld [vmem:[%s17941_s7 + $0x28] sm:$0xff]  }
 0xeb6   :  { %v2423_v45 = vadd.f32 %v2422_v36, %v2421_v52  ;;  %v2440_v50 = vrot.slane %v2439_v40, 1  ;;  %v14832_v52 = vld [vmem:[%s17941_s7 + $0x30] sm:$0xff]   ;;  %v14834_v36 = vld [vmem:[%s17941_s7 + $0x20] sm:$0xff]  }
 0xeb8   :  { %v2424_v55 = vmul.f32 0.03125, %v2423_v45  ;;  %v2441_v60 = vadd.f32 %v2440_v50, %v2439_v40  ;;  %v14835_v40 = vld [vmem:[%s17941_s7 + $0x18] sm:$0xff]   ;;  %v14836_v45 = vld [vmem:[%s17941_s7 + $0x10] sm:$0xff]   ;;  %v14837_v50 = vld [vmem:[%s17941_s7 + $0x8] sm:$0xff]  }
 0xeba   :  { %v2442_v1 = vmul.f32 0.03125, %v2441_v60  ;;  %v2443_v56 = vmul.f32 %v2424_v55, %v2424_v55  ;;  %v2445_v57 = vsub.f32 %v2406_v21, %v2424_v55  ;;  %v2447_v61 = vsub.f32 %v2408_v15, %v2424_v55  ;;  %v14829_v21 = vld [vmem:[%s17939_s5 + $0x8] sm:$0xff]   ;;  %v14839_v60 = vld [vmem:[%s17941_s7 + $0x58] sm:$0xff]  }
 0xebb   :  { %v2448_v63 = vsub.f32 %v2409_v25, %v2424_v55  ;;  %v2446_v3 = vsub.f32 %v2407_v59, %v2424_v55  ;;  %v14838_v55 = vld [vmem:[%s17941_s7] sm:$0xff]  }
 0xebc   :  { %v2444_v0 = vsub.f32 %v2442_v1, %v2443_v56  ;;  %v14840_v1 = vld [vmem:[%s17941_s7 + $0x50] sm:$0xff]   ;;  %v14841_v56 = vld [vmem:[%s17941_s7 + $0x48] sm:$0xff]  }
 0xebe   :  { %v2449_v4 = vadd.f32 1e-05, %v2444_v0  ;;  %v14848_v0 = vld [vmem:[%s17942_s6 + $0x10] ss:$8 sps:$4 sm:$0xff]  }
 0xec0   :  { %14889 = vrsqrt.f32 %v2449_v4  ;;  %v14849_v4 = vld [vmem:[%s17942_s6 + $0x24] ss:$8 sps:$4 sm:$0xff]  }
 0xecd   :  { %v14890_v5 = vpop.eup %14889 }
 0xece   :  { %v2451_v6 = vmul.f32 %v14890_v5, %v2445_v57  ;;  %v2452_v8 = vmul.f32 %v14890_v5, %v2446_v3  ;;  %v2453_v9 = vmul.f32 %v14890_v5, %v2447_v61  ;;  %v2454_v10 = vmul.f32 %v14890_v5, %v2448_v63  ;;  %v14842_v57 = vld [vmem:[%s17941_s7 + $0x40] sm:$0xff]   ;;  %v14846_v63 = vld [vmem:[%s17942_s6 + $0x14] ss:$8 sps:$4 sm:$0xff]  }
 0xecf   :  { %v14843_v61 = vld [vmem:[%s17942_s6] ss:$8 sps:$4 sm:$0xff]   ;;  %v14852_v5 = vld [vmem:[%s17942_s6 + $0x34] ss:$8 sps:$4 sm:$0xff]  }
 0xed0   :  { %vm2455_vm5 = vcmp.gt.f32.partialorder %v2451_v6, 0.0  ;;  %vm2456_vm6 = vcmp.gt.f32.partialorder %v2452_v8, 0.0  ;;  %vm2457_vm7 = vcmp.gt.f32.partialorder %v2453_v9, 0.0  ;;  %vm2458_vm8 = vcmp.gt.f32.partialorder %v2454_v10, 0.0  ;;  %v14851_v3 = vld [vmem:[%s17942_s6 + $0x20] ss:$8 sps:$4 sm:$0xff]  }
 0xed1   :  { %v2459_v11 = vmul.f32 0.2, %v2451_v6  ;;  %v2460_v12 = vmul.f32 0.2, %v2452_v8  ;;  %v2461_v13 = vmul.f32 0.2, %v2453_v9 }
 0xed2   :  { %v2462_v14 = vmul.f32 0.2, %v2454_v10 }
 0xed3   :  { %v2463_v16 = vsel %vm2455_vm5, %v2451_v6, %v2459_v11  ;;  %v2464_v19 = vsel %vm2456_vm6, %v2452_v8, %v2460_v12  ;;  %v2465_v20 = vsel %vm2457_vm7, %v2453_v9, %v2461_v13  ;;  %v14854_v6 = vld [vmem:[%s17942_s6 + $0x30] ss:$8 sps:$4 sm:$0xff]   ;;  %v14855_v8 = vld [vmem:[%s17942_s6 + $0x44] ss:$8 sps:$4 sm:$0xff]   ;;  %v14857_v9 = vld [vmem:[%s17942_s6 + $0x40] ss:$8 sps:$4 sm:$0xff]  }
 0xed4   :  { %v2466_v44 = vsel %vm2458_vm8, %v2454_v10, %v2462_v14  ;;  %v15580_v53 = vpack.c.bf16 %v2464_v19, %v2463_v16  ;;  %v14858_v10 = vld [vmem:[%s17942_s6 + $0x54] ss:$8 sps:$4 sm:$0xff]  }
 0xed5   :  { %v15582_v62 = vpack.c.bf16 %v2466_v44, %v2465_v20  ;;  %v14860_v20 = vld [vmem:[%s17942_s6 + $0x50] ss:$8 sps:$4 sm:$0xff]  }
 0xed7   :  { %12816 = vmatpush3.bf16.msra.mxu0 %v15582_v62  ;;  %12824 = vmatpush3.bf16.msra.mxu1 %v15582_v62 }
 0xed8   :  { %12817 = vmatprep.subr.bf16.mxu0 %v14895_v7  ;;  %12825 = vmatprep.subr.bf16.mxu1 %v14895_v7 }
 0xedb   :  { %12818 = vmatpush3.bf16.msra.mxu0 %v15580_v53  ;;  %12826 = vmatpush3.bf16.msra.mxu1 %v15580_v53 }
 0xedc   :  { %12831 = vmatprep.subr.bf16.mxu0 %v14895_v7  ;;  %12837 = vmatprep.subr.bf16.mxu1 %v14895_v7 }
 0xede   :  { %12820 = vmatmul.mubr.msk.bf16.vlgmr.msra.gmra.mxu0 %vm2470_vm9, %v2469_v17  ;;  %12828 = vmatmul.mubr.msk.bf16.vlgmr.msra.gmra.mxu1 %vm2470_vm9, %v11007_v34 }
 0xedf   :  { %12832 = vmatpush3.bf16.msra.mxu0 %v14829_v21  ;;  %12833 = vmatprep.mubr.msk.bf16.mxu0 %vm14896_vm3, %v14895_v7  ;;  %v14865_v21 = vld [vmem:[%s17939_s5 + $0x18] sm:$0xff]  }
 0xee0   :  { %12839 = vmatprep.mubr.msk.bf16.mxu1 %vm14896_vm3, %v14895_v7  ;;  %12843 = vmatprep.subr.bf16.mxu0 %v14895_v7 }
 0xee1   :  { %12838 = vmatpush3.bf16.msra.mxu1 %v14830_v58 }
 0xee2   :  { %12851 = vmatprep.subr.bf16.mxu1 %v14895_v7 }
 0xf9e   :  { %v2508_v22 = vpop.f32.mrf.mxu0  ;;  %v2556_v15 = vpop.f32.mrf.mxu1 }
 0xf9f   :  { %v2514_v24 = vpack.c.bf16 %v2508_v22, %v2508_v22  ;;  %v2562_v33 = vpack.c.bf16 %v2556_v15, %v2556_v15 }
 0xfa0   :  { %v12829_v25 = vpop.f32.mrf.mxu1  ;;  %v12821_v59 = vpop.f32.mrf.mxu0 }
 0xfa1   :  { %12834 = vmatmul.mubr.msk.bf16.vlgmr.msra.gmra.mxu0 %vm2410_vm4, %v2562_v33  ;;  %12840 = vmatmul.mubr.msk.bf16.vlgmr.msra.gmra.mxu1 %vm2410_vm4, %v2514_v24  ;;  %v14864_v24 = vld [vmem:[%s17942_s6 + $0x60] ss:$8 sps:$4 sm:$0xff]   ;;  %v14866_v33 = vld [vmem:[%s17942_s6 + $0x74] ss:$8 sps:$4 sm:$0xff]  }
 0xfa2   :  { %12844 = vmatpush3.bf16.msra.mxu0 %v15582_v62  ;;  %v2559_v18 = vpop.f32.mrf.mxu1  ;;  %12847 = vmatprep.mubr.msk.bf16.mxu0 %vm14896_vm3, %v14895_v7  ;;  %v2511_v38 = vpop.f32.mrf.mxu0 }
 0xfa3   :  { %12845 = vmatprep.subr.bf16.mxu0 %v14895_v7  ;;  %12853 = vmatprep.mubr.msk.bf16.mxu1 %vm14896_vm3, %v14895_v7  ;;  %v14869_v18 = vld [vmem:[%s17939_s5 + $0x20] sm:$0xff]  }
 0xfa4   :  { %v12830_v2 = vpop.f32.mrf.mxu1  ;;  %v12822_v26 = vpop.f32.mrf.mxu0  ;;  %12852 = vmatpush3.bf16.msra.mxu1 %v14861_v39  ;;  %v14871_v39 = vld [vmem:[%s17939_s5 + $0x30] sm:$0xff]  }
 0xfa5   :  { %12865 = vmatprep.subr.bf16.mxu1 %v14895_v7 }
 0xfa6   :  { %12846 = vmatpush3.bf16.msra.mxu0 %v15580_v53 }
 0xfa7   :  { %12857 = vmatprep.subr.bf16.mxu0 %v14895_v7 }
 0xfa9   :  { %12848 = vmatmul.mubr.msk.bf16.vlgmr.msra.gmra.mxu0 %vm2470_vm9, %v11015_v27  ;;  %v14868_v27 = vld [vmem:[%s17942_s6 + $0x70] ss:$8 sps:$4 sm:$0xff]  }
 0xfaa   :  { %12858 = vmatpush3.bf16.msra.mxu0 %v15582_v62  ;;  %12861 = vmatprep.mubr.msk.bf16.mxu0 %vm14896_vm3, %v14895_v7 }
 0xfab   :  { %12859 = vmatprep.subr.bf16.mxu0 %v14895_v7 }
 0xfae   :  { %12860 = vmatpush3.bf16.msra.mxu0 %v15580_v53 }
 0xfaf   :  { %12871 = vmatprep.subr.bf16.mxu0 %v14895_v7 }
 0xfb1   :  { %12862 = vmatmul.mubr.msk.bf16.vlgmr.msra.gmra.mxu0 %vm2470_vm9, %v11021_v23 }
 0xfb2   :  { %12872 = vmatpush3.bf16.msra.mxu0 %v15582_v62  ;;  %12875 = vmatprep.mubr.msk.bf16.mxu0 %vm14896_vm3, %v14895_v7 }
 0xfb3   :  { %12873 = vmatprep.subr.bf16.mxu0 %v14895_v7 }
 0xfb6   :  { %12874 = vmatpush3.bf16.msra.mxu0 %v15580_v53 }
 0xfb7   :  { %12885 = vmatprep.subr.bf16.mxu0 %v14895_v7 }
 0xfb9   :  { %12876 = vmatmul.mubr.msk.bf16.vlgmr.msra.gmra.mxu0 %vm2470_vm9, %v11027_v28 }
 0xfba   :  { %12886 = vmatpush3.bf16.msra.mxu0 %v15582_v62  ;;  %12889 = vmatprep.mubr.msk.bf16.mxu0 %vm14896_vm3, %v14895_v7 }
 0xfbb   :  { %12887 = vmatprep.subr.bf16.mxu0 %v14895_v7 }
 0xfbe   :  { %12888 = vmatpush3.bf16.msra.mxu0 %v15580_v53 }
 0xfbf   :  { %12899 = vmatprep.subr.bf16.mxu0 %v14895_v7 }
 0xfc1   :  { %12890 = vmatmul.mubr.msk.bf16.vlgmr.msra.gmra.mxu0 %vm2470_vm9, %v11033_v29  ;;  %v14870_v29 = vld [vmem:[%s17939_s5 + $0x28] sm:$0xff]  }
 0xfc2   :  { %12900 = vmatpush3.bf16.msra.mxu0 %v15582_v62  ;;  %12903 = vmatprep.mubr.msk.bf16.mxu0 %vm14896_vm3, %v14895_v7 }
 0xfc3   :  { %12901 = vmatprep.subr.bf16.mxu0 %v14895_v7 }
 0xfc6   :  { %12902 = vmatpush3.bf16.msra.mxu0 %v15580_v53 }
 0xfc7   :  { %12913 = vmatprep.subr.bf16.mxu0 %v14895_v7 }
 0xfc9   :  { %12904 = vmatmul.mubr.msk.bf16.vlgmr.msra.gmra.mxu0 %vm2470_vm9, %v11039_v30 }
 0xfca   :  { %12914 = vmatpush3.bf16.msra.mxu0 %v15582_v62  ;;  %12917 = vmatprep.mubr.msk.bf16.mxu0 %vm14896_vm3, %v14895_v7 }
 0xfcb   :  { %12915 = vmatprep.subr.bf16.mxu0 %v14895_v7 }
 0xfce   :  { %12916 = vmatpush3.bf16.msra.mxu0 %v15580_v53 }
 0xfcf   :  { %12927 = vmatprep.subr.bf16.mxu0 %v14895_v7 }
 0xfd1   :  { %12918 = vmatmul.mubr.msk.bf16.vlgmr.msra.gmra.mxu0 %vm2470_vm9, %v11045_v31 }
 0xfd2   :  { %12928 = vmatpush3.bf16.msra.mxu0 %v15582_v62  ;;  %12931 = vmatprep.mubr.msk.bf16.mxu0 %vm14896_vm3, %v14895_v7 }
 0xfd3   :  { %12929 = vmatprep.subr.bf16.mxu0 %v14895_v7 }
 0xfd6   :  { %12930 = vmatpush3.bf16.msra.mxu0 %v15580_v53 }
 0xfd7   :  { %12941 = vmatprep.subr.bf16.mxu0 %v14895_v7 }
 0xfd9   :  { %12932 = vmatmul.mubr.msk.bf16.vlgmr.msra.gmra.mxu0 %vm2470_vm9, %v11051_v32 }
 0xfda   :  { %12942 = vmatpush3.bf16.msra.mxu0 %v15582_v62  ;;  %12945 = vmatprep.mubr.msk.bf16.mxu0 %vm14896_vm3, %v14895_v7 }
 0xfdb   :  { %12943 = vmatprep.subr.bf16.mxu0 %v14895_v7 }
 0xfde   :  { %12944 = vmatpush3.bf16.msra.mxu0 %v15580_v53 }
 0xfdf   :  { %12955 = vmatprep.subr.bf16.mxu0 %v14895_v7 }
 0xfe1   :  { %12946 = vmatmul.mubr.msk.bf16.vlgmr.msra.gmra.mxu0 %vm2470_vm9, %v11057_v35 }
 0xfe2   :  { %12956 = vmatpush3.bf16.msra.mxu0 %v15582_v62  ;;  %12959 = vmatprep.mubr.msk.bf16.mxu0 %vm14896_vm3, %v14895_v7 }
 0xfe3   :  { %12957 = vmatprep.subr.bf16.mxu0 %v14895_v7 }
 0xfe6   :  { %12958 = vmatpush3.bf16.msra.mxu0 %v15580_v53 }
 0xfe7   :  { %12969 = vmatprep.subr.bf16.mxu0 %v14895_v7 }
 0xfe9   :  { %12960 = vmatmul.mubr.msk.bf16.vlgmr.msra.gmra.mxu0 %vm2470_vm9, %v11063_v37 }
 0xfea   :  { %12970 = vmatpush3.bf16.msra.mxu0 %v15582_v62  ;;  %12973 = vmatprep.mubr.msk.bf16.mxu0 %vm14896_vm3, %v14895_v7 }
 0xfeb   :  { %12971 = vmatprep.subr.bf16.mxu0 %v14895_v7 }
 0xfee   :  { %12972 = vmatpush3.bf16.msra.mxu0 %v15580_v53 }
 0xfef   :  { %12983 = vmatprep.subr.bf16.mxu0 %v14895_v7 }
 0xff1   :  { %12974 = vmatmul.mubr.msk.bf16.vlgmr.msra.gmra.mxu0 %vm2470_vm9, %v11069_v41 }
 0xff2   :  { %12984 = vmatpush3.bf16.msra.mxu0 %v15582_v62  ;;  %12987 = vmatprep.mubr.msk.bf16.mxu0 %vm14896_vm3, %v14895_v7 }
 0xff3   :  { %12985 = vmatprep.subr.bf16.mxu0 %v14895_v7 }
 0xff6   :  { %12986 = vmatpush3.bf16.msra.mxu0 %v15580_v53 }
 0xff7   :  { %12997 = vmatprep.subr.bf16.mxu0 %v14895_v7 }
 0xff9   :  { %12988 = vmatmul.mubr.msk.bf16.vlgmr.msra.gmra.mxu0 %vm2470_vm9, %v11075_v42 }
 0xffa   :  { %12998 = vmatpush3.bf16.msra.mxu0 %v15582_v62  ;;  %13001 = vmatprep.mubr.msk.bf16.mxu0 %vm14896_vm3, %v14895_v7 }
 0xffb   :  { %12999 = vmatprep.subr.bf16.mxu0 %v14895_v7 }
 0xffe   :  { %13000 = vmatpush3.bf16.msra.mxu0 %v15580_v53 }
 0xfff   :  { %13011 = vmatprep.subr.bf16.mxu0 %v14895_v7 }
0x1001   :  { %13002 = vmatmul.mubr.msk.bf16.vlgmr.msra.gmra.mxu0 %vm2470_vm9, %v11081_v43 }
0x1002   :  { %13012 = vmatpush3.bf16.msra.mxu0 %v15582_v62  ;;  %13015 = vmatprep.mubr.msk.bf16.mxu0 %vm14896_vm3, %v14895_v7 }
0x1003   :  { %13013 = vmatprep.subr.bf16.mxu0 %v14895_v7 }
0x1006   :  { %13014 = vmatpush3.bf16.msra.mxu0 %v15580_v53 }
0x1007   :  { %13025 = vmatprep.subr.bf16.mxu0 %v14895_v7 }
0x1009   :  { %13016 = vmatmul.mubr.msk.bf16.vlgmr.msra.gmra.mxu0 %vm2470_vm9, %v11087_v46 }
0x100a   :  { %13026 = vmatpush3.bf16.msra.mxu0 %v15582_v62  ;;  %13029 = vmatprep.mubr.msk.bf16.mxu0 %vm14896_vm3, %v14895_v7 }
0x100b   :  { %13027 = vmatprep.subr.bf16.mxu0 %v14895_v7 }
0x100e   :  { %13028 = vmatpush3.bf16.msra.mxu0 %v15580_v53  ;;  %v14862_v53 = vld [vmem:[%s17942_s6 + $0x64] ss:$8 sps:$4 sm:$0xff]  }
0x100f   :  { %4259 = vmatprep.subr.bf16.mxu0 %v14897_v51 }
0x1011   :  { %13030 = vmatmul.mubr.msk.bf16.vlgmr.msra.gmra.mxu0 %vm2470_vm9, %v11093_v47 }
0x1012   :  { %4260 = vmatpush1.bf16.msra.mxu0 %v14831_v48  ;;  %11127 = vmatprep.mubr.msk.bf16.mxu0 %vm4234_vm10, %v14845_v49  ;;  %v14872_v48 = vld [vmem:[%s17939_s5 + $0x38] sm:$0xff]  }
0x1013   :  { %4261 = vmatprep.subr.bf16.mxu0 %v14897_v51 }
0x1016   :  { %4262 = vmatpush1.bf16.msra.mxu0 %v14832_v52 }
0x1017   :  { %4263 = vmatprep.subr.bf16.mxu0 %v14897_v51 }
0x101a   :  { %4264 = vmatpush1.bf16.msra.mxu0 %v14833_v54 }
0x101b   :  { %4265 = vmatprep.subr.bf16.mxu0 %v14897_v51 }
0x101e   :  { %4266 = vmatpush1.bf16.msra.mxu0 %v14834_v36 }
0x101f   :  { %4267 = vmatprep.subr.bf16.mxu0 %v14897_v51 }
0x1022   :  { %4268 = vmatpush1.bf16.msra.mxu0 %v14835_v40  ;;  %v14873_v40 = vld [vmem:[%s17939_s5 + $0x40] sm:$0xff]  }
0x1023   :  { %4269 = vmatprep.subr.bf16.mxu0 %v14897_v51 }
0x1026   :  { %4270 = vmatpush1.bf16.msra.mxu0 %v14836_v45 }
0x1027   :  { %4271 = vmatprep.subr.bf16.mxu0 %v14897_v51 }
0x102a   :  { %4272 = vmatpush1.bf16.msra.mxu0 %v14837_v50 }
0x102b   :  { %4273 = vmatprep.subr.bf16.mxu0 %v14897_v51 }
0x102e   :  { %4274 = vmatpush1.bf16.msra.mxu0 %v14838_v55 }
0x102f   :  { %4283 = vmatprep.subr.bf16.mxu0 %v14897_v51 }
0x1032   :  { %4284 = vmatpush2.bf16.msra.mxu0 %v14839_v60 }
0x1033   :  { %4285 = vmatprep.subr.bf16.mxu0 %v14897_v51 }
0x1036   :  { %4286 = vmatpush2.bf16.msra.mxu0 %v14840_v1 }
0x1037   :  { %4287 = vmatprep.subr.bf16.mxu0 %v14897_v51 }
0x103a   :  { %4288 = vmatpush2.bf16.msra.mxu0 %v14841_v56  ;;  %v14874_v56 = vld [vmem:[%s17939_s5 + $0x48] sm:$0xff]  }
0x103b   :  { %4289 = vmatprep.subr.bf16.mxu0 %v14897_v51 }
0x103e   :  { %4290 = vmatpush2.bf16.msra.mxu0 %v14842_v57 }
0x103f   :  { %13091 = vmatprep.subr.bf16.mxu0 %v14895_v7 }
0x1041   :  { %4292 = vmatmul.mubr.bf16.vlgmr.msra.gmra.mxu0 %v14843_v61 }
0x1042   :  { %11128 = vmatprep.mubr.msk.bf16.mxu0 %vm4234_vm10, %v14846_v63 }
0x1049   :  { %4300 = vmatmul.mubr.bf16.gmra.mxu0 %v14848_v0 }
0x104a   :  { %11129 = vmatprep.mubr.msk.bf16.mxu0 %vm4234_vm10, %v14849_v4 }
0x1051   :  { %4308 = vmatmul.mubr.bf16.gmra.mxu0 %v14851_v3  ;;  %v14875_v3 = vld [vmem:[%s17939_s5 + $0x50] sm:$0xff]  }
0x1052   :  { %11130 = vmatprep.mubr.msk.bf16.mxu0 %vm4234_vm10, %v14852_v5 }
0x1059   :  { %4316 = vmatmul.mubr.bf16.gmra.mxu0 %v14854_v6 }
0x105a   :  { %11131 = vmatprep.mubr.msk.bf16.mxu0 %vm4234_vm10, %v14855_v8 }
0x1061   :  { %4324 = vmatmul.mubr.bf16.gmra.mxu0 %v14857_v9  ;;  %v2609_v11 = vpop.f32.mrf.mxu0  ;;  %v2658_v12 = vpop.f32.mrf.mxu1 }
0x1062   :  { %v15834_v13 = vadd.f32 %v2658_v12, %v2609_v11  ;;  %11132 = vmatprep.mubr.msk.bf16.mxu0 %vm4234_vm10, %v14858_v10  ;;  %v14876_v11 = vld [vmem:[%s17939_s5 + $0x58] sm:$0xff]  }
0x1063   :  { %v12835_v14 = vpop.f32.mrf.mxu0  ;;  %v12841_v16 = vpop.f32.mrf.mxu1 }
0x1065   :  { %v2612_v19 = vpop.f32.mrf.mxu0  ;;  %v2661_v44 = vpop.f32.mrf.mxu1 }
0x1066   :  { %v14877_v44 = vld [vmem:[%s17939_s5 + $0x60] sm:$0xff]  }
0x1067   :  { %v12836_v62 = vpop.f32.mrf.mxu0  ;;  %v12842_v17 = vpop.f32.mrf.mxu1 }
0x1069   :  { %4332 = vmatmul.mubr.bf16.gmra.mxu0 %v14860_v20  ;;  %v2703_v34 = vpop.f32.mrf.mxu0 }
0x106a   :  { %v2709_v58 = vpack.c.bf16 %v2703_v34, %v2703_v34  ;;  %11133 = vmatprep.mubr.msk.bf16.mxu0 %vm4234_vm10, %v14862_v53 }
0x106b   :  { %v12849_v22 = vpop.f32.mrf.mxu0 }
0x106c   :  { %12854 = vmatmul.mubr.msk.bf16.vlgmr.msra.gmra.mxu1 %vm2410_vm4, %v2709_v58  ;;  %v14878_v58 = vld [vmem:[%s17939_s5 + $0x68] sm:$0xff]  }
0x106d   :  { %v2706_v15 = vpop.f32.mrf.mxu0  ;;  %12866 = vmatpush3.bf16.msra.mxu1 %v14865_v21  ;;  %12867 = vmatprep.mubr.msk.bf16.mxu1 %vm14896_vm3, %v14895_v7 }
0x106e   :  { %12879 = vmatprep.subr.bf16.mxu1 %v14895_v7 }
0x106f   :  { %v12850_v25 = vpop.f32.mrf.mxu0 }
0x1071   :  { %4340 = vmatmul.mubr.bf16.gmra.mxu0 %v14864_v24  ;;  %v2802_v59 = vpop.f32.mrf.mxu0 }
0x1072   :  { %v2808_v38 = vpack.c.bf16 %v2802_v59, %v2802_v59  ;;  %11134 = vmatprep.mubr.msk.bf16.mxu0 %vm4234_vm10, %v14866_v33  ;;  %v14879_v59 = vld [vmem:[%s17939_s5 + $0x70] sm:$0xff]  }
0x1073   :  { %v12863_v2 = vpop.f32.mrf.mxu0 }
0x1074   :  { %12868 = vmatmul.mubr.msk.bf16.vlgmr.msra.gmra.mxu1 %vm2410_vm4, %v2808_v38 }
0x1075   :  { %v2805_v26 = vpop.f32.mrf.mxu0  ;;  %12880 = vmatpush3.bf16.msra.mxu1 %v14869_v18  ;;  %12881 = vmatprep.mubr.msk.bf16.mxu1 %vm14896_vm3, %v14895_v7 }
0x1076   :  { %12893 = vmatprep.subr.bf16.mxu1 %v14895_v7 }
0x1077   :  { %v12864_v23 = vpop.f32.mrf.mxu0 }
0x1078   :  { %v14880_v23 = vld [vmem:[%s17939_s5 + $0x78] sm:$0xff]  }
0x1079   :  { %4348 = vmatmul.mubr.bf16.gmra.mxu0 %v14868_v27  ;;  %v2901_v28 = vpop.f32.mrf.mxu0 }
0x107a   :  { %v2907_v30 = vpack.c.bf16 %v2901_v28, %v2901_v28  ;;  %13107 = vmatprep.mubr.msk.bf16.mxu0 %vm14896_vm3, %v14895_v7 }
0x107b   :  { %v12877_v31 = vpop.f32.mrf.mxu0 }
0x107c   :  { %12882 = vmatmul.mubr.msk.bf16.vlgmr.msra.gmra.mxu1 %vm2410_vm4, %v2907_v30 }
0x107d   :  { %v2904_v32 = vpop.f32.mrf.mxu0  ;;  %12894 = vmatpush3.bf16.msra.mxu1 %v14870_v29  ;;  %12895 = vmatprep.mubr.msk.bf16.mxu1 %vm14896_vm3, %v14895_v7 }
0x107e   :  { %12907 = vmatprep.subr.bf16.mxu1 %v14895_v7 }
0x107f   :  { %v12878_v35 = vpop.f32.mrf.mxu0 }
0x1081   :  { %v3000_v37 = vpop.f32.mrf.mxu0 }
0x1082   :  { %v3006_v41 = vpack.c.bf16 %v3000_v37, %v3000_v37 }
0x1083   :  { %v12891_v42 = vpop.f32.mrf.mxu0 }
0x1084   :  { %12896 = vmatmul.mubr.msk.bf16.vlgmr.msra.gmra.mxu1 %vm2410_vm4, %v3006_v41 }
0x1085   :  { %v3003_v43 = vpop.f32.mrf.mxu0  ;;  %12908 = vmatpush3.bf16.msra.mxu1 %v14871_v39  ;;  %12909 = vmatprep.mubr.msk.bf16.mxu1 %vm14896_vm3, %v14895_v7 }
0x1086   :  { %12921 = vmatprep.subr.bf16.mxu1 %v14895_v7 }
0x1087   :  { %v12892_v46 = vpop.f32.mrf.mxu0 }
0x1089   :  { %v3099_v47 = vpop.f32.mrf.mxu0 }
0x108a   :  { %v3105_v49 = vpack.c.bf16 %v3099_v47, %v3099_v47 }
0x108b   :  { %v12905_v51 = vpop.f32.mrf.mxu0 }
0x108c   :  { %12910 = vmatmul.mubr.msk.bf16.vlgmr.msra.gmra.mxu1 %vm2410_vm4, %v3105_v49 }
0x108d   :  { %v3102_v52 = vpop.f32.mrf.mxu0  ;;  %12922 = vmatpush3.bf16.msra.mxu1 %v14872_v48  ;;  %12923 = vmatprep.mubr.msk.bf16.mxu1 %vm14896_vm3, %v14895_v7 }
0x108e   :  { %12935 = vmatprep.subr.bf16.mxu1 %v14895_v7 }
0x108f   :  { %v12906_v54 = vpop.f32.mrf.mxu0 }
0x1091   :  { %v3198_v36 = vpop.f32.mrf.mxu0 }
0x1092   :  { %v3204_v45 = vpack.c.bf16 %v3198_v36, %v3198_v36 }
0x1093   :  { %v12919_v50 = vpop.f32.mrf.mxu0 }
0x1094   :  { %12924 = vmatmul.mubr.msk.bf16.vlgmr.msra.gmra.mxu1 %vm2410_vm4, %v3204_v45 }
0x1095   :  { %v3201_v55 = vpop.f32.mrf.mxu0  ;;  %12936 = vmatpush3.bf16.msra.mxu1 %v14873_v40  ;;  %12937 = vmatprep.mubr.msk.bf16.mxu1 %vm14896_vm3, %v14895_v7 }
0x1096   :  { %12949 = vmatprep.subr.bf16.mxu1 %v14895_v7 }
0x1097   :  { %v12920_v60 = vpop.f32.mrf.mxu0 }
0x1099   :  { %v3297_v1 = vpop.f32.mrf.mxu0 }
0x109a   :  { %v3303_v57 = vpack.c.bf16 %v3297_v1, %v3297_v1 }
0x109b   :  { %v12933_v61 = vpop.f32.mrf.mxu0 }
0x109c   :  { %12938 = vmatmul.mubr.msk.bf16.vlgmr.msra.gmra.mxu1 %vm2410_vm4, %v3303_v57 }
0x109d   :  { %v3300_v63 = vpop.f32.mrf.mxu0  ;;  %12950 = vmatpush3.bf16.msra.mxu1 %v14874_v56  ;;  %12951 = vmatprep.mubr.msk.bf16.mxu1 %vm14896_vm3, %v14895_v7 }
0x109e   :  { %12963 = vmatprep.subr.bf16.mxu1 %v14895_v7 }
0x109f   :  { %v12934_v0 = vpop.f32.mrf.mxu0 }
0x10a1   :  { %v3396_v4 = vpop.f32.mrf.mxu0 }
0x10a2   :  { %v3402_v5 = vpack.c.bf16 %v3396_v4, %v3396_v4 }
0x10a3   :  { %v12947_v6 = vpop.f32.mrf.mxu0 }
0x10a4   :  { %12952 = vmatmul.mubr.msk.bf16.vlgmr.msra.gmra.mxu1 %vm2410_vm4, %v3402_v5 }
0x10a5   :  { %v3399_v8 = vpop.f32.mrf.mxu0  ;;  %12964 = vmatpush3.bf16.msra.mxu1 %v14875_v3  ;;  %12965 = vmatprep.mubr.msk.bf16.mxu1 %vm14896_vm3, %v14895_v7 }
0x10a6   :  { %12977 = vmatprep.subr.bf16.mxu1 %v14895_v7 }
0x10a7   :  { %v12948_v9 = vpop.f32.mrf.mxu0 }
0x10a9   :  { %v3495_v10 = vpop.f32.mrf.mxu0 }
0x10aa   :  { %v3501_v12 = vpack.c.bf16 %v3495_v10, %v3495_v10 }
0x10ab   :  { %v12961_v14 = vpop.f32.mrf.mxu0 }
0x10ac   :  { %12966 = vmatmul.mubr.msk.bf16.vlgmr.msra.gmra.mxu1 %vm2410_vm4, %v3501_v12 }
0x10ad   :  { %v3498_v16 = vpop.f32.mrf.mxu0  ;;  %12978 = vmatpush3.bf16.msra.mxu1 %v14876_v11  ;;  %12979 = vmatprep.mubr.msk.bf16.mxu1 %vm14896_vm3, %v14895_v7 }
0x10ae   :  { %12991 = vmatprep.subr.bf16.mxu1 %v14895_v7 }
0x10af   :  { %v12962_v19 = vpop.f32.mrf.mxu0 }
0x10b1   :  { %v3594_v20 = vpop.f32.mrf.mxu0 }
0x10b2   :  { %v3600_v53 = vpack.c.bf16 %v3594_v20, %v3594_v20 }
0x10b3   :  { %v12975_v62 = vpop.f32.mrf.mxu0 }
0x10b4   :  { %12980 = vmatmul.mubr.msk.bf16.vlgmr.msra.gmra.mxu1 %vm2410_vm4, %v3600_v53 }
0x10b5   :  { %v3597_v17 = vpop.f32.mrf.mxu0  ;;  %12992 = vmatpush3.bf16.msra.mxu1 %v14877_v44  ;;  %12993 = vmatprep.mubr.msk.bf16.mxu1 %vm14896_vm3, %v14895_v7 }
0x10b6   :  { %13005 = vmatprep.subr.bf16.mxu1 %v14895_v7 }
0x10b7   :  { %v12976_v34 = vpop.f32.mrf.mxu0 }
0x10b9   :  { %v3693_v21 = vpop.f32.mrf.mxu0 }
0x10ba   :  { %v3699_v22 = vpack.c.bf16 %v3693_v21, %v3693_v21 }
0x10bb   :  { %v12989_v15 = vpop.f32.mrf.mxu0 }
0x10bc   :  { %12994 = vmatmul.mubr.msk.bf16.vlgmr.msra.gmra.mxu1 %vm2410_vm4, %v3699_v22 }
0x10bd   :  { %v3696_v24 = vpop.f32.mrf.mxu0  ;;  %13006 = vmatpush3.bf16.msra.mxu1 %v14878_v58  ;;  %13007 = vmatprep.mubr.msk.bf16.mxu1 %vm14896_vm3, %v14895_v7 }
0x10be   :  { %13019 = vmatprep.subr.bf16.mxu1 %v14895_v7 }
0x10bf   :  { %v12990_v33 = vpop.f32.mrf.mxu0 }
0x10c1   :  { %v3792_v25 = vpop.f32.mrf.mxu0 }
0x10c2   :  { %v3798_v18 = vpack.c.bf16 %v3792_v25, %v3792_v25 }
0x10c3   :  { %v13003_v38 = vpop.f32.mrf.mxu0 }
0x10c4   :  { %13008 = vmatmul.mubr.msk.bf16.vlgmr.msra.gmra.mxu1 %vm2410_vm4, %v3798_v18 }
0x10c5   :  { %v3795_v2 = vpop.f32.mrf.mxu0  ;;  %13020 = vmatpush3.bf16.msra.mxu1 %v14879_v59  ;;  %13021 = vmatprep.mubr.msk.bf16.mxu1 %vm14896_vm3, %v14895_v7 }
0x10c6   :  { %13033 = vmatprep.subr.bf16.mxu1 %v14895_v7 }
0x10c7   :  { %v13004_v26 = vpop.f32.mrf.mxu0 }
0x10c9   :  { %v3891_v27 = vpop.f32.mrf.mxu0 }
0x10ca   :  { %v3897_v28 = vpack.c.bf16 %v3891_v27, %v3891_v27 }
0x10cb   :  { %v13017_v29 = vpop.f32.mrf.mxu0 }
0x10cc   :  { %13022 = vmatmul.mubr.msk.bf16.vlgmr.msra.gmra.mxu1 %vm2410_vm4, %v3897_v28 }
0x10cd   :  { %v3894_v30 = vpop.f32.mrf.mxu0  ;;  %13034 = vmatpush3.bf16.msra.mxu1 %v14880_v23  ;;  %13035 = vmatprep.mubr.msk.bf16.mxu1 %vm14896_vm3, %v14895_v7 }
0x10ce   :  { %13039 = vmatprep.subr.bf16.mxu1 %v14895_v7 }
0x10cf   :  { %v13018_v31 = vpop.f32.mrf.mxu0 }
0x10d1   :  { %v3990_v32 = vpop.f32.mrf.mxu0 }
0x10d2   :  { %v3996_v35 = vpack.c.bf16 %v3990_v32, %v3990_v32 }
0x10d3   :  { %v13031_v37 = vpop.f32.mrf.mxu0 }
0x10d4   :  { %13036 = vmatmul.mubr.msk.bf16.vlgmr.msra.gmra.mxu1 %vm2410_vm4, %v3996_v35 }
0x10d5   :  { %v3993_v39 = vpop.f32.mrf.mxu0  ;;  %13055 = vmatprep.mubr.msk.bf16.mxu1 %vm14896_vm3, %v14895_v7 }
0x10d7   :  { %v13032_v41 = vpop.f32.mrf.mxu0 }
0x1101   :  { %v4293_v42 = vpop.f32.mrf.mxu0 }
0x1102   :  { %v4372_v46 = vmul.f32 0.2, %v4293_v42  ;;  %vm4356_vm11 = vcmp.gt.f32.partialorder %v4293_v42, 0.0 }
0x1103   :  { %v4295_v43 = vpop.f32.mrf.mxu0 }
0x1104   :  { %v4388_v51 = vsel %vm4356_vm11, %v4293_v42, %v4372_v46 }
0x1105   :  { %v4296_v47 = vpop.f32.mrf.mxu0 }
0x1106   :  { %vm4357_vm12 = vcmp.gt.f32.partialorder %v4296_v47, 0.0  ;;  %v4373_v48 = vmul.f32 0.2, %v4296_v47 }
0x1107   :  { %v4298_v49 = vpop.f32.mrf.mxu0 }
0x1108   :  { %v4389_v52 = vsel %vm4357_vm12, %v4296_v47, %v4373_v48 }
0x1109   :  { %v15950_v54 = vpack.c.bf16 %v4389_v52, %v4388_v51  ;;  %v4301_v36 = vpop.f32.mrf.mxu0 }
0x110a   :  { %v4374_v45 = vmul.f32 0.2, %v4301_v36  ;;  %vm4358_vm13 = vcmp.gt.f32.partialorder %v4301_v36, 0.0 }
0x110b   :  { %v4303_v40 = vpop.f32.mrf.mxu0 }
0x110c   :  { %v4390_v1 = vsel %vm4358_vm13, %v4301_v36, %v4374_v45 }
0x110d   :  { %v4304_v50 = vpop.f32.mrf.mxu0 }
0x110e   :  { %vm4359_vm14 = vcmp.gt.f32.partialorder %v4304_v50, 0.0  ;;  %v4375_v55 = vmul.f32 0.2, %v4304_v50 }
0x110f   :  { %v4306_v60 = vpop.f32.mrf.mxu0 }
0x1110   :  { %v4391_v56 = vsel %vm4359_vm14, %v4304_v50, %v4375_v55 }
0x1111   :  { %v15952_v57 = vpack.c.bf16 %v4391_v56, %v4390_v1  ;;  %v15954_v61 = vpop.f32.mrf.mxu0 }
0x1113   :  { %v4311_v63 = vpop.f32.mrf.mxu0 }
0x1115   :  { %v15956_v0 = vpop.f32.mrf.mxu0 }
0x1116   :  { %vm4361_vm14 = vcmp.gt.f32.partialorder %v15956_v0, 0.0 }
0x1117   :  { %v4314_v4 = vpop.f32.mrf.mxu0 }
0x1119   :  { %v15958_v3 = vpop.f32.mrf.mxu0 }
0x111a   :  { %vm4362_vm13 = vcmp.gt.f32.partialorder %v15958_v3, 0.0 }
0x111b   :  { %v4319_v5 = vpop.f32.mrf.mxu0 }
0x111c   :  { %v4378_v5 = vmul.f32 0.2, %v15958_v3 }
0x111d   :  { %v15960_v6 = vpop.f32.mrf.mxu0 }
0x111e   :  { %v4379_v56 = vmul.f32 0.2, %v15960_v6  ;;  %vm4363_vm12 = vcmp.gt.f32.partialorder %v15960_v6, 0.0 }
0x111f   :  { %v4322_v8 = vpop.f32.mrf.mxu0 }
0x1121   :  { %v15962_v9 = vpop.f32.mrf.mxu0 }
0x1122   :  { %v4380_v50 = vmul.f32 0.2, %v15962_v9  ;;  %vm4364_vm11 = vcmp.gt.f32.partialorder %v15962_v9, 0.0 }
0x1123   :  { %v4327_v10 = vpop.f32.mrf.mxu0 }
0x1124   :  { %v4396_v8 = vsel %vm4364_vm11, %v15962_v9, %v4380_v50  ;;  %v4376_v9 = vmul.f32 0.2, %v15954_v61 }
0x1125   :  { %v15964_v11 = vpop.f32.mrf.mxu0 }
0x1126   :  { %v4381_v36 = vmul.f32 0.2, %v15964_v11  ;;  %vm4365_vm10 = vcmp.gt.f32.partialorder %v15964_v11, 0.0 }
0x1127   :  { %v4330_v12 = vpop.f32.mrf.mxu0 }
0x1128   :  { %v4397_v63 = vsel %vm4365_vm10, %v15964_v11, %v4381_v36 }
0x1129   :  { %v4333_v14 = vpop.f32.mrf.mxu0  ;;  %v15995_v12 = vpack.c.bf16 %v4397_v63, %v4396_v8 }
0x112a   :  { %v4382_v47 = vmul.f32 0.2, %v4333_v14  ;;  %vm4366_vm8 = vcmp.gt.f32.partialorder %v4333_v14, 0.0 }
0x112b   :  { %v4335_v16 = vpop.f32.mrf.mxu0 }
0x112c   :  { %v2756_v19 = vpop.f32.mrf.mxu1  ;;  %v4398_v55 = vsel %vm4366_vm8, %v4333_v14, %v4382_v47  ;;  %v4377_v14 = vmul.f32 0.2, %v15956_v0  ;;  %v4395_v16 = vsel %vm4363_vm12, %v15960_v6, %v4379_v56 }
0x112d   :  { %v2762_v20 = vadd.f32 %v2756_v19, %v15834_v13  ;;  %v4336_v44 = vpop.f32.mrf.mxu0 }
0x112e   :  { %v12855_v53 = vpop.f32.mrf.mxu1  ;;  %v4383_v42 = vmul.f32 0.2, %v4336_v44  ;;  %vm4367_vm7 = vcmp.gt.f32.partialorder %v4336_v44, 0.0  ;;  %v4393_v6 = vsel %vm4361_vm14, %v15956_v0, %v4377_v14 }
0x112f   :  { %v4338_v62 = vpop.f32.mrf.mxu0 }
0x1130   :  { %v2759_v17 = vpop.f32.mrf.mxu1  ;;  %v4399_v40 = vsel %vm4367_vm7, %v4336_v44, %v4383_v42 }
0x1131   :  { %v4341_v34 = vpop.f32.mrf.mxu0  ;;  %v15983_v1 = vpack.c.bf16 %v4399_v40, %v4398_v55 }
0x1132   :  { %v12856_v21 = vpop.f32.mrf.mxu1  ;;  %v4384_v32 = vmul.f32 0.2, %v4341_v34  ;;  %vm4368_vm6 = vcmp.gt.f32.partialorder %v4341_v34, 0.0 }
0x1133   :  { %v4343_v58 = vpop.f32.mrf.mxu0 }
0x1134   :  { %v2855_v22 = vpop.f32.mrf.mxu1  ;;  %v4400_v48 = vsel %vm4368_vm6, %v4341_v34, %v4384_v32 }
0x1135   :  { %v2861_v15 = vadd.f32 %v2855_v22, %v2762_v20  ;;  %v4344_v24 = vpop.f32.mrf.mxu0  ;;  %v4394_v20 = vsel %vm4362_vm13, %v15958_v3, %v4378_v5 }
0x1136   :  { %v12869_v33 = vpop.f32.mrf.mxu1  ;;  %v4385_v28 = vmul.f32 0.2, %v4344_v24  ;;  %vm4369_vm5 = vcmp.gt.f32.partialorder %v4344_v24, 0.0  ;;  %v16007_v53 = vpack.c.bf16 %v4395_v16, %v4394_v20 }
0x1137   :  { %v4346_v25 = vpop.f32.mrf.mxu0  ;;  %v4412_v33 = vld [vmem:[%s17943_s8] sm:$0xf] }
0x1138   :  { %v2858_v59 = vpop.f32.mrf.mxu1  ;;  %v4401_v43 = vsel %vm4369_vm5, %v4344_v24, %v4385_v28  ;;  %v11139_v25 = vld [vmem:[%s17943_s8 + $0x8] sm:$0xf] }
0x1139   :  { %v4349_v18 = vpop.f32.mrf.mxu0  ;;  %v15973_v51 = vpack.c.bf16 %v4401_v43, %v4400_v48  ;;  %v11135_v48 = vld [vmem:[%s17943_s8 + $0x4] sm:$0xf] }
0x113a   :  { %v12870_v38 = vpop.f32.mrf.mxu1  ;;  %v4386_v26 = vmul.f32 0.2, %v4349_v18  ;;  %vm4370_vm15 = vcmp.gt.f32.partialorder %v4349_v18, 0.0 }
0x113b   :  { %v4351_v2 = vpop.f32.mrf.mxu0 }
0x113c   :  { %v2954_v27 = vpop.f32.mrf.mxu1  ;;  %v4402_v35 = vsel %vm4370_vm15, %v4349_v18, %v4386_v26  ;;  %vm4360_vm15 = vcmp.gt.f32.partialorder %v15954_v61, 0.0 }
0x113d   :  { %v2960_v13 = vadd.f32 %v2954_v27, %v2861_v15  ;;  %v4352_v23 = vpop.f32.mrf.mxu0  ;;  %v4392_v17 = vsel %vm4360_vm15, %v15954_v61, %v4376_v9 }
0x113e   :  { %vm4371_vm0 = vcmp.gt.f32.partialorder %v4352_v23, 0.0  ;;  %v4387_v29 = vmul.f32 0.2, %v4352_v23  ;;  %v12883_v30 = vpop.f32.mrf.mxu1  ;;  %v16015_v3 = vpack.c.bf16 %v4393_v6, %v4392_v17 }
0x113f   :  { %v4354_v31 = vpop.f32.mrf.mxu0 }
0x1140   :  { %v4403_v37 = vsel %vm4371_vm0, %v4352_v23, %v4387_v29  ;;  %v2957_v39 = vpop.f32.mrf.mxu1 }
0x1141   :  { %v15967_v41 = vpack.c.bf16 %v4403_v37, %v4402_v35 }
0x1142   :  { %v12884_v46 = vpop.f32.mrf.mxu1 }
0x1143   :  { %13040 = vmatpush3.bf16.msra.mxu1 %v15967_v41  ;;  %13092 = vmatpush3.bf16.msra.mxu0 %v15967_v41 }
0x1144   :  { %v3053_v49 = vpop.f32.mrf.mxu1  ;;  %13041 = vmatprep.subr.bf16.mxu1 %v14895_v7  ;;  %13093 = vmatprep.subr.bf16.mxu0 %v14895_v7 }
0x1145   :  { %v3059_v52 = vadd.f32 %v3053_v49, %v2960_v13 }
0x1146   :  { %v12897_v45 = vpop.f32.mrf.mxu1 }
0x1147   :  { %13042 = vmatpush3.bf16.msra.mxu1 %v15973_v51  ;;  %13094 = vmatpush3.bf16.msra.mxu0 %v15973_v51 }
0x1148   :  { %v3056_v60 = vpop.f32.mrf.mxu1  ;;  %13043 = vmatprep.subr.bf16.mxu1 %v14895_v7  ;;  %13095 = vmatprep.subr.bf16.mxu0 %v14895_v7 }
0x114a   :  { %v12898_v4 = vpop.f32.mrf.mxu1 }
0x114b   :  { %13044 = vmatpush3.bf16.msra.mxu1 %v15983_v1  ;;  %13096 = vmatpush3.bf16.msra.mxu0 %v15983_v1 }
0x114c   :  { %v3152_v10 = vpop.f32.mrf.mxu1  ;;  %13045 = vmatprep.subr.bf16.mxu1 %v14895_v7  ;;  %13097 = vmatprep.subr.bf16.mxu0 %v14895_v7 }
0x114d   :  { %v3158_v11 = vadd.f32 %v3152_v10, %v3059_v52 }
0x114e   :  { %v12911_v19 = vpop.f32.mrf.mxu1 }
0x114f   :  { %13046 = vmatpush3.bf16.msra.mxu1 %v15995_v12  ;;  %13098 = vmatpush3.bf16.msra.mxu0 %v15995_v12  ;;  %v11136_v19 = vld [vmem:[%s17944_s9 + $0x4] sm:$0xf] }
0x1150   :  { %v3155_v44 = vpop.f32.mrf.mxu1  ;;  %13047 = vmatprep.subr.bf16.mxu1 %v14895_v7  ;;  %13099 = vmatprep.subr.bf16.mxu0 %v14895_v7  ;;  %v4504_v9 = vsel %vm451_vm1, %v11136_v19, 0 }
0x1152   :  { %v12912_v62 = vpop.f32.mrf.mxu1 }
0x1153   :  { %13048 = vmatpush3.bf16.msra.mxu1 %v16007_v53  ;;  %13100 = vmatpush3.bf16.msra.mxu0 %v16007_v53 }
0x1154   :  { %v3251_v34 = vpop.f32.mrf.mxu1  ;;  %13049 = vmatprep.subr.bf16.mxu1 %v14895_v7  ;;  %13101 = vmatprep.subr.bf16.mxu0 %v14895_v7 }
0x1155   :  { %v3257_v21 = vadd.f32 %v3251_v34, %v3158_v11 }
0x1156   :  { %v12925_v58 = vpop.f32.mrf.mxu1 }
0x1157   :  { %13050 = vmatpush3.bf16.msra.mxu1 %v16015_v3  ;;  %13102 = vmatpush3.bf16.msra.mxu0 %v16015_v3 }
0x1158   :  { %v3254_v0 = vpop.f32.mrf.mxu1  ;;  %13051 = vmatprep.subr.bf16.mxu1 %v14895_v7  ;;  %13103 = vmatprep.subr.bf16.mxu0 %v14895_v7 }
0x1159   :  { %v4454_v0 = vld [vmem:[%s17944_s9] sm:$0xf] }
0x115a   :  { %v12926_v22 = vpop.f32.mrf.mxu1 }
0x115b   :  { %13052 = vmatpush3.bf16.msra.mxu1 %v15952_v57  ;;  %13104 = vmatpush3.bf16.msra.mxu0 %v15952_v57 }
0x115c   :  { %v3350_v61 = vpop.f32.mrf.mxu1  ;;  %13053 = vmatprep.subr.bf16.mxu1 %v14895_v7  ;;  %13105 = vmatprep.subr.bf16.mxu0 %v14895_v7 }
0x115d   :  { %v3356_v15 = vadd.f32 %v3350_v61, %v3257_v21 }
0x115e   :  { %v12939_v24 = vpop.f32.mrf.mxu1 }
0x115f   :  { %13054 = vmatpush3.bf16.msra.mxu1 %v15950_v54  ;;  %13106 = vmatpush3.bf16.msra.mxu0 %v15950_v54 }
0x1160   :  { %v3353_v59 = vpop.f32.mrf.mxu1  ;;  %13059 = vmatprep.subr.bf16.mxu1 %v14895_v7  ;;  %13137 = vmatprep.subr.bf16.mxu0 %v14895_v7 }
0x1161   :  { %v11140_v59 = vld [vmem:[%s17944_s9 + $0x8] sm:$0xf] }
0x1162   :  { %13056 = vmatmul.mubr.bf16.vlgmr.msra.gmra.mxu1 %v4412_v33  ;;  %v12940_v18 = vpop.f32.mrf.mxu1  ;;  %13108 = vmatmul.mubr.bf16.vlgmr.msra.gmra.mxu0 %v11139_v25 }
0x1163   :  { %13060 = vmatpush3.bf16.msra.mxu1 %v15967_v41  ;;  %13075 = vmatprep.mubr.msk.bf16.mxu1 %vm14896_vm3, %v14895_v7 }
0x1164   :  { %v3449_v38 = vpop.f32.mrf.mxu1  ;;  %13061 = vmatprep.subr.bf16.mxu1 %v14895_v7  ;;  %13139 = vmatprep.mubr.msk.bf16.mxu0 %vm14896_vm3, %v14895_v7 }
0x1165   :  { %v3455_v2 = vadd.f32 %v3449_v38, %v3356_v15  ;;  %v4550_v15 = vsel %vm451_vm1, %v4454_v0, 0  ;;  %v4641_v38 = vsel %vm451_vm1, %v11140_v59, 0 }
0x1166   :  { %v12953_v26 = vpop.f32.mrf.mxu1 }
0x1167   :  { %13062 = vmatpush3.bf16.msra.mxu1 %v15973_v51  ;;  %v11142_v26 = vld [vmem:[%s17943_s8 + $0xc] sm:$0xf] }
0x1168   :  { %v3452_v27 = vpop.f32.mrf.mxu1  ;;  %13063 = vmatprep.subr.bf16.mxu1 %v14895_v7 }
0x1169   :  { %v11143_v27 = vld [vmem:[%s17944_s9 + $0xc] sm:$0xf] }
0x116a   :  { %v12954_v13 = vpop.f32.mrf.mxu1 }
0x116b   :  { %13064 = vmatpush3.bf16.msra.mxu1 %v15983_v1  ;;  %v4733_v13 = vsel %vm451_vm1, %v11143_v27, 0 }
0x116c   :  { %v3548_v23 = vpop.f32.mrf.mxu1  ;;  %13065 = vmatprep.subr.bf16.mxu1 %v14895_v7  ;;  %13138 = vmatpush3.bf16.msra.mxu0 %v4733_v13 }
0x116d   :  { %v3554_v28 = vadd.f32 %v3548_v23, %v3455_v2  ;;  %13143 = vmatprep.subr.bf16.mxu0 %v14895_v7 }
0x116e   :  { %v12967_v29 = vpop.f32.mrf.mxu1 }
0x116f   :  { %13066 = vmatpush3.bf16.msra.mxu1 %v15995_v12 }
0x1170   :  { %v3551_v30 = vpop.f32.mrf.mxu1  ;;  %13067 = vmatprep.subr.bf16.mxu1 %v14895_v7 }
0x1172   :  { %v12968_v31 = vpop.f32.mrf.mxu1 }
0x1173   :  { %13068 = vmatpush3.bf16.msra.mxu1 %v16007_v53 }
0x1174   :  { %v3647_v32 = vpop.f32.mrf.mxu1  ;;  %13069 = vmatprep.subr.bf16.mxu1 %v14895_v7 }
0x1175   :  { %v3653_v35 = vadd.f32 %v3647_v32, %v3554_v28 }
0x1176   :  { %v12981_v37 = vpop.f32.mrf.mxu1 }
0x1177   :  { %13070 = vmatpush3.bf16.msra.mxu1 %v16015_v3 }
0x1178   :  { %v3650_v39 = vpop.f32.mrf.mxu1  ;;  %13071 = vmatprep.subr.bf16.mxu1 %v14895_v7 }
0x117a   :  { %v12982_v42 = vpop.f32.mrf.mxu1 }
0x117b   :  { %13072 = vmatpush3.bf16.msra.mxu1 %v15952_v57 }
0x117c   :  { %v3746_v43 = vpop.f32.mrf.mxu1  ;;  %13073 = vmatprep.subr.bf16.mxu1 %v14895_v7 }
0x117d   :  { %v3752_v46 = vadd.f32 %v3746_v43, %v3653_v35 }
0x117e   :  { %v12995_v47 = vpop.f32.mrf.mxu1 }
0x117f   :  { %13074 = vmatpush3.bf16.msra.mxu1 %v15950_v54 }
0x1180   :  { %v3749_v49 = vpop.f32.mrf.mxu1  ;;  %13079 = vmatprep.subr.bf16.mxu1 %v14895_v7 }
0x1182   :  { %13076 = vmatmul.mubr.bf16.vlgmr.msra.gmra.mxu1 %v11135_v48  ;;  %v12996_v52 = vpop.f32.mrf.mxu1 }
0x1183   :  { %13081 = vmatprep.mubr.msk.bf16.mxu1 %vm14896_vm3, %v14895_v7  ;;  %13080 = vmatpush3.bf16.msra.mxu1 %v4504_v9 }
0x1184   :  { %v3845_v36 = vpop.f32.mrf.mxu1  ;;  %13085 = vmatprep.subr.bf16.mxu1 %v14895_v7 }
0x1185   :  { %v3851_v40 = vadd.f32 %v3845_v36, %v3752_v46 }
0x1186   :  { %v13009_v45 = vpop.f32.mrf.mxu1 }
0x1188   :  { %v3848_v50 = vpop.f32.mrf.mxu1 }
0x1189   :  { %v11145_v50 = vld [vmem:[%s17943_s8 + $0x10] sm:$0xf] }
0x118a   :  { %v13010_v55 = vpop.f32.mrf.mxu1 }
0x118b   :  { %v11146_v55 = vld [vmem:[%s17944_s9 + $0x10] sm:$0xf] }
0x118c   :  { %v3944_v60 = vpop.f32.mrf.mxu1 }
0x118d   :  { %v3950_v56 = vadd.f32 %v3944_v60, %v3851_v40  ;;  %v4825_v60 = vsel %vm451_vm1, %v11146_v55, 0 }
0x118e   :  { %v13023_v63 = vpop.f32.mrf.mxu1 }
0x1190   :  { %v3947_v4 = vpop.f32.mrf.mxu1 }
0x1192   :  { %v13024_v5 = vpop.f32.mrf.mxu1 }
0x1194   :  { %v4043_v8 = vpop.f32.mrf.mxu1 }
0x1195   :  { %v16060_v10 = vadd.f32 %v4043_v8, %v3950_v56 }
0x1196   :  { %v13037_v11 = vpop.f32.mrf.mxu1 }
0x1198   :  { %v4046_v14 = vpop.f32.mrf.mxu1 }
0x119a   :  { %v13038_v16 = vpop.f32.mrf.mxu1 }
0x1222   :  { %v4447_v20 = vpop.f32.mrf.mxu1  ;;  %v4628_v44 = vpop.f32.mrf.mxu0 }
0x1223   :  { %v4453_v18 = vpack.c.bf16 %v4447_v20, %v4447_v20  ;;  %v4634_v2 = vpack.c.bf16 %v4628_v44, %v4628_v44  ;;  %v11148_v20 = vld [vmem:[%s17943_s8 + $0x14] sm:$0xf] }
0x1224   :  { %v13057_v6 = vpop.f32.mrf.mxu1  ;;  %v13109_v62 = vpop.f32.mrf.mxu0  ;;  %v11149_v44 = vld [vmem:[%s17944_s9 + $0x14] sm:$0xf] }
0x1225   :  { %v4917_v6 = vsel %vm451_vm1, %v11149_v44, 0 }
0x1226   :  { %v4450_v17 = vpop.f32.mrf.mxu1  ;;  %v4631_v34 = vpop.f32.mrf.mxu0 }
0x1228   :  { %v13058_v21 = vpop.f32.mrf.mxu1  ;;  %v13110_v58 = vpop.f32.mrf.mxu0 }
0x1242   :  { %v4491_v22 = vpop.f32.mrf.mxu1 }
0x1243   :  { %v4497_v61 = vpack.c.bf16 %v4491_v22, %v4491_v22 }
0x1244   :  { %v13077_v24 = vpop.f32.mrf.mxu1 }
0x1245   :  { %13082 = vmatmul.mubr.msk.bf16.vlgmr.msra.gmra.mxu1 %vm444_vm2, %v4497_v61 }
0x1246   :  { %v4494_v33 = vpop.f32.mrf.mxu1  ;;  %13086 = vmatpush3.bf16.msra.mxu1 %v4550_v15  ;;  %13087 = vmatprep.mubr.msk.bf16.mxu1 %vm14896_vm3, %v14895_v7 }
0x1247   :  { %13111 = vmatprep.subr.bf16.mxu1 %v14895_v7  ;;  %v11151_v33 = vld [vmem:[%s17943_s8 + $0x18] sm:$0xf] }
0x1248   :  { %v13078_v25 = vpop.f32.mrf.mxu1 }
0x1249   :  { %v11152_v25 = vld [vmem:[%s17944_s9 + $0x18] sm:$0xf] }
0x124a   :  { %v5009_v59 = vsel %vm451_vm1, %v11152_v25, 0 }
0x124d   :  { %13088 = vmatmul.mubr.msk.bf16.vlgmr.msra.gmra.mxu1 %vm444_vm2, %v4453_v18 }
0x124e   :  { %13112 = vmatpush3.bf16.msra.mxu1 %v4641_v38  ;;  %13113 = vmatprep.mubr.msk.bf16.mxu1 %vm14896_vm3, %v14895_v7 }
0x124f   :  { %13117 = vmatprep.subr.bf16.mxu1 %v14895_v7 }
0x1255   :  { %13114 = vmatmul.mubr.msk.bf16.vlgmr.msra.gmra.mxu1 %vm444_vm2, %v4634_v2 }
0x1256   :  { %13118 = vmatpush3.bf16.msra.mxu1 %v15967_v41  ;;  %13133 = vmatprep.mubr.msk.bf16.mxu1 %vm14896_vm3, %v14895_v7 }
0x1257   :  { %13119 = vmatprep.subr.bf16.mxu1 %v14895_v7 }
0x125a   :  { %13120 = vmatpush3.bf16.msra.mxu1 %v15973_v51 }
0x125b   :  { %13121 = vmatprep.subr.bf16.mxu1 %v14895_v7 }
0x125e   :  { %13122 = vmatpush3.bf16.msra.mxu1 %v15983_v1 }
0x125f   :  { %13123 = vmatprep.subr.bf16.mxu1 %v14895_v7 }
0x1262   :  { %13124 = vmatpush3.bf16.msra.mxu1 %v15995_v12 }
0x1263   :  { %13125 = vmatprep.subr.bf16.mxu1 %v14895_v7 }
0x1266   :  { %13126 = vmatpush3.bf16.msra.mxu1 %v16007_v53 }
0x1267   :  { %13127 = vmatprep.subr.bf16.mxu1 %v14895_v7 }
0x126a   :  { %13128 = vmatpush3.bf16.msra.mxu1 %v16015_v3 }
0x126b   :  { %13129 = vmatprep.subr.bf16.mxu1 %v14895_v7 }
0x126e   :  { %13130 = vmatpush3.bf16.msra.mxu1 %v15952_v57 }
0x126f   :  { %13131 = vmatprep.subr.bf16.mxu1 %v14895_v7 }
0x1272   :  { %13132 = vmatpush3.bf16.msra.mxu1 %v15950_v54 }
0x1273   :  { %13163 = vmatprep.subr.bf16.mxu1 %v14895_v7 }
0x1275   :  { %13134 = vmatmul.mubr.bf16.vlgmr.msra.gmra.mxu1 %v11142_v26 }
0x1276   :  { %13165 = vmatprep.mubr.msk.bf16.mxu1 %vm14896_vm3, %v14895_v7  ;;  %13164 = vmatpush3.bf16.msra.mxu1 %v4825_v60 }
0x1277   :  { %13169 = vmatprep.subr.bf16.mxu1 %v14895_v7 }
0x1305   :  { %v4540_v23 = vpop.f32.mrf.mxu1 }
0x1307   :  { %v13083_v28 = vpop.f32.mrf.mxu1 }
0x1309   :  { %v4543_v29 = vpop.f32.mrf.mxu1 }
0x130b   :  { %v13084_v30 = vpop.f32.mrf.mxu1 }
0x130d   :  { %v4586_v31 = vpop.f32.mrf.mxu1 }
0x130e   :  { %v4587_v32 = vadd.f32 %v4586_v31, %v4540_v23  ;;  %v11154_v31 = vld [vmem:[%s17943_s8 + $0x1c] sm:$0xf] }
0x130f   :  { %v13089_v35 = vpop.f32.mrf.mxu1 }
0x1311   :  { %v4589_v37 = vpop.f32.mrf.mxu1 }
0x1313   :  { %v13090_v39 = vpop.f32.mrf.mxu1 }
0x1315   :  { %v4677_v42 = vpop.f32.mrf.mxu1 }
0x1316   :  { %v4683_v43 = vadd.f32 %v4677_v42, %v4587_v32  ;;  %v11155_v32 = vld [vmem:[%s17944_s9 + $0x1c] sm:$0xf] }
0x1317   :  { %v13115_v46 = vpop.f32.mrf.mxu1  ;;  %v5101_v35 = vsel %vm451_vm1, %v11155_v32, 0 }
0x1319   :  { %v4680_v47 = vpop.f32.mrf.mxu1 }
0x131b   :  { %v13116_v48 = vpop.f32.mrf.mxu1 }
0x1335   :  { %v4720_v49 = vpop.f32.mrf.mxu1 }
0x1336   :  { %v4726_v52 = vpack.c.bf16 %v4720_v49, %v4720_v49 }
0x1337   :  { %v13135_v36 = vpop.f32.mrf.mxu1 }
0x1338   :  { %13140 = vmatmul.mubr.msk.bf16.vlgmr.msra.gmra.mxu0 %vm444_vm2, %v4726_v52 }
0x1339   :  { %13144 = vmatpush3.bf16.msra.mxu0 %v15967_v41  ;;  %v4723_v40 = vpop.f32.mrf.mxu1  ;;  %13159 = vmatprep.mubr.msk.bf16.mxu0 %vm14896_vm3, %v14895_v7 }
0x133a   :  { %13145 = vmatprep.subr.bf16.mxu0 %v14895_v7  ;;  %v11157_v40 = vld [vmem:[%s17943_s8 + $0x20] sm:$0xf] }
0x133b   :  { %v13136_v45 = vpop.f32.mrf.mxu1 }
0x133c   :  { %v11158_v45 = vld [vmem:[%s17944_s9 + $0x20] sm:$0xf] }
0x133d   :  { %13146 = vmatpush3.bf16.msra.mxu0 %v15973_v51 }
0x133e   :  { %13147 = vmatprep.subr.bf16.mxu0 %v14895_v7 }
0x1341   :  { %13148 = vmatpush3.bf16.msra.mxu0 %v15983_v1 }
0x1342   :  { %13149 = vmatprep.subr.bf16.mxu0 %v14895_v7 }
0x1345   :  { %13150 = vmatpush3.bf16.msra.mxu0 %v15995_v12 }
0x1346   :  { %13151 = vmatprep.subr.bf16.mxu0 %v14895_v7 }
0x1349   :  { %13152 = vmatpush3.bf16.msra.mxu0 %v16007_v53 }
0x134a   :  { %13153 = vmatprep.subr.bf16.mxu0 %v14895_v7 }
0x134d   :  { %13154 = vmatpush3.bf16.msra.mxu0 %v16015_v3 }
0x134e   :  { %13155 = vmatprep.subr.bf16.mxu0 %v14895_v7 }
0x1351   :  { %13156 = vmatpush3.bf16.msra.mxu0 %v15952_v57 }
0x1352   :  { %13157 = vmatprep.subr.bf16.mxu0 %v14895_v7 }
0x1355   :  { %13158 = vmatpush3.bf16.msra.mxu0 %v15950_v54 }
0x1356   :  { %13189 = vmatprep.subr.bf16.mxu0 %v14895_v7 }
0x1358   :  { %13160 = vmatmul.mubr.bf16.vlgmr.msra.gmra.mxu0 %v11145_v50  ;;  %v5193_v50 = vsel %vm451_vm1, %v11158_v45, 0 }
0x1359   :  { %13191 = vmatprep.mubr.msk.bf16.mxu0 %vm14896_vm3, %v14895_v7  ;;  %13190 = vmatpush3.bf16.msra.mxu0 %v4917_v6 }
0x135a   :  { %13195 = vmatprep.subr.bf16.mxu0 %v14895_v7 }
0x13f8   :  { %v4769_v56 = vpop.f32.mrf.mxu0 }
0x13f9   :  { %v4775_v63 = vadd.f32 %v4769_v56, %v4683_v43 }
0x13fa   :  { %v13141_v4 = vpop.f32.mrf.mxu0 }
0x13fc   :  { %v4772_v5 = vpop.f32.mrf.mxu0 }
0x13fe   :  { %v13142_v8 = vpop.f32.mrf.mxu0 }
0x1418   :  { %v4812_v11 = vpop.f32.mrf.mxu0 }
0x1419   :  { %v4818_v14 = vpack.c.bf16 %v4812_v11, %v4812_v11 }
0x141a   :  { %v13161_v16 = vpop.f32.mrf.mxu0 }
0x141b   :  { %13166 = vmatmul.mubr.msk.bf16.vlgmr.msra.gmra.mxu1 %vm444_vm2, %v4818_v14 }
0x141c   :  { %13170 = vmatpush3.bf16.msra.mxu1 %v15967_v41  ;;  %v4815_v19 = vpop.f32.mrf.mxu0  ;;  %13185 = vmatprep.mubr.msk.bf16.mxu1 %vm14896_vm3, %v14895_v7 }
0x141d   :  { %13171 = vmatprep.subr.bf16.mxu1 %v14895_v7  ;;  %v11160_v19 = vld [vmem:[%s17943_s8 + $0x24] sm:$0xf] }
0x141e   :  { %v13162_v9 = vpop.f32.mrf.mxu0 }
0x141f   :  { %v11161_v9 = vld [vmem:[%s17944_s9 + $0x24] sm:$0xf] }
0x1420   :  { %13172 = vmatpush3.bf16.msra.mxu1 %v15973_v51 }
0x1421   :  { %13173 = vmatprep.subr.bf16.mxu1 %v14895_v7 }
0x1424   :  { %13174 = vmatpush3.bf16.msra.mxu1 %v15983_v1 }
0x1425   :  { %13175 = vmatprep.subr.bf16.mxu1 %v14895_v7 }
0x1428   :  { %13176 = vmatpush3.bf16.msra.mxu1 %v15995_v12 }
0x1429   :  { %13177 = vmatprep.subr.bf16.mxu1 %v14895_v7 }
0x142c   :  { %13178 = vmatpush3.bf16.msra.mxu1 %v16007_v53 }
0x142d   :  { %13179 = vmatprep.subr.bf16.mxu1 %v14895_v7 }
0x1430   :  { %13180 = vmatpush3.bf16.msra.mxu1 %v16015_v3 }
0x1431   :  { %13181 = vmatprep.subr.bf16.mxu1 %v14895_v7 }
0x1434   :  { %13182 = vmatpush3.bf16.msra.mxu1 %v15952_v57 }
0x1435   :  { %13183 = vmatprep.subr.bf16.mxu1 %v14895_v7 }
0x1438   :  { %13184 = vmatpush3.bf16.msra.mxu1 %v15950_v54 }
0x1439   :  { %13215 = vmatprep.subr.bf16.mxu1 %v14895_v7 }
0x143b   :  { %13186 = vmatmul.mubr.bf16.vlgmr.msra.gmra.mxu1 %v11148_v20  ;;  %v5285_v20 = vsel %vm451_vm1, %v11161_v9, 0 }
0x143c   :  { %13217 = vmatprep.mubr.msk.bf16.mxu1 %vm14896_vm3, %v14895_v7  ;;  %13216 = vmatpush3.bf16.msra.mxu1 %v5009_v59 }
0x143d   :  { %13221 = vmatprep.subr.bf16.mxu1 %v14895_v7 }
0x14db   :  { %v4861_v62 = vpop.f32.mrf.mxu1 }
0x14dc   :  { %v4867_v17 = vadd.f32 %v4861_v62, %v4775_v63 }
0x14dd   :  { %v13167_v34 = vpop.f32.mrf.mxu1 }
0x14df   :  { %v4864_v21 = vpop.f32.mrf.mxu1 }
0x14e1   :  { %v13168_v58 = vpop.f32.mrf.mxu1 }
0x14fb   :  { %v4904_v0 = vpop.f32.mrf.mxu1 }
0x14fc   :  { %v4910_v22 = vpack.c.bf16 %v4904_v0, %v4904_v0 }
0x14fd   :  { %v13187_v61 = vpop.f32.mrf.mxu1 }
0x14fe   :  { %13192 = vmatmul.mubr.msk.bf16.vlgmr.msra.gmra.mxu0 %vm444_vm2, %v4910_v22 }
0x14ff   :  { %13196 = vmatpush3.bf16.msra.mxu0 %v15967_v41  ;;  %v4907_v15 = vpop.f32.mrf.mxu1  ;;  %13211 = vmatprep.mubr.msk.bf16.mxu0 %vm14896_vm3, %v14895_v7 }
0x1500   :  { %13197 = vmatprep.subr.bf16.mxu0 %v14895_v7  ;;  %v11163_v15 = vld [vmem:[%s17943_s8 + $0x28] sm:$0xf] }
0x1501   :  { %v13188_v24 = vpop.f32.mrf.mxu1 }
0x1502   :  { %v11164_v24 = vld [vmem:[%s17944_s9 + $0x28] sm:$0xf] }
0x1503   :  { %13198 = vmatpush3.bf16.msra.mxu0 %v15973_v51 }
0x1504   :  { %13199 = vmatprep.subr.bf16.mxu0 %v14895_v7 }
0x1507   :  { %13200 = vmatpush3.bf16.msra.mxu0 %v15983_v1 }
0x1508   :  { %13201 = vmatprep.subr.bf16.mxu0 %v14895_v7 }
0x150b   :  { %13202 = vmatpush3.bf16.msra.mxu0 %v15995_v12 }
0x150c   :  { %13203 = vmatprep.subr.bf16.mxu0 %v14895_v7 }
0x150f   :  { %13204 = vmatpush3.bf16.msra.mxu0 %v16007_v53 }
0x1510   :  { %13205 = vmatprep.subr.bf16.mxu0 %v14895_v7 }
0x1513   :  { %13206 = vmatpush3.bf16.msra.mxu0 %v16015_v3 }
0x1514   :  { %13207 = vmatprep.subr.bf16.mxu0 %v14895_v7 }
0x1517   :  { %13208 = vmatpush3.bf16.msra.mxu0 %v15952_v57 }
0x1518   :  { %13209 = vmatprep.subr.bf16.mxu0 %v14895_v7 }
0x151b   :  { %13210 = vmatpush3.bf16.msra.mxu0 %v15950_v54 }
0x151c   :  { %13241 = vmatprep.subr.bf16.mxu0 %v14895_v7 }
0x151e   :  { %13212 = vmatmul.mubr.bf16.vlgmr.msra.gmra.mxu0 %v11151_v33  ;;  %v5377_v33 = vsel %vm451_vm1, %v11164_v24, 0 }
0x151f   :  { %13243 = vmatprep.mubr.msk.bf16.mxu0 %vm14896_vm3, %v14895_v7  ;;  %13242 = vmatpush3.bf16.msra.mxu0 %v5101_v35 }
0x1520   :  { %13247 = vmatprep.subr.bf16.mxu0 %v14895_v7 }
0x15be   :  { %v4953_v18 = vpop.f32.mrf.mxu0 }
0x15bf   :  { %v4959_v38 = vadd.f32 %v4953_v18, %v4867_v17 }
0x15c0   :  { %v13193_v2 = vpop.f32.mrf.mxu0 }
0x15c2   :  { %v4956_v26 = vpop.f32.mrf.mxu0 }
0x15c4   :  { %v13194_v27 = vpop.f32.mrf.mxu0 }
0x15de   :  { %v4996_v13 = vpop.f32.mrf.mxu0 }
0x15df   :  { %v5002_v23 = vpack.c.bf16 %v4996_v13, %v4996_v13 }
0x15e0   :  { %v13213_v28 = vpop.f32.mrf.mxu0 }
0x15e1   :  { %13218 = vmatmul.mubr.msk.bf16.vlgmr.msra.gmra.mxu1 %vm444_vm2, %v5002_v23 }
0x15e2   :  { %13222 = vmatpush3.bf16.msra.mxu1 %v15967_v41  ;;  %v4999_v29 = vpop.f32.mrf.mxu0  ;;  %13237 = vmatprep.mubr.msk.bf16.mxu1 %vm14896_vm3, %v14895_v7 }
0x15e3   :  { %13223 = vmatprep.subr.bf16.mxu1 %v14895_v7  ;;  %v11166_v29 = vld [vmem:[%s17943_s8 + $0x2c] sm:$0xf] }
0x15e4   :  { %v13214_v30 = vpop.f32.mrf.mxu0 }
0x15e5   :  { %v11167_v30 = vld [vmem:[%s17944_s9 + $0x2c] sm:$0xf] }
0x15e6   :  { %13224 = vmatpush3.bf16.msra.mxu1 %v15973_v51 }
0x15e7   :  { %13225 = vmatprep.subr.bf16.mxu1 %v14895_v7 }
0x15ea   :  { %13226 = vmatpush3.bf16.msra.mxu1 %v15983_v1 }
0x15eb   :  { %13227 = vmatprep.subr.bf16.mxu1 %v14895_v7 }
0x15ee   :  { %13228 = vmatpush3.bf16.msra.mxu1 %v15995_v12 }
0x15ef   :  { %13229 = vmatprep.subr.bf16.mxu1 %v14895_v7 }
0x15f2   :  { %13230 = vmatpush3.bf16.msra.mxu1 %v16007_v53 }
0x15f3   :  { %13231 = vmatprep.subr.bf16.mxu1 %v14895_v7 }
0x15f6   :  { %13232 = vmatpush3.bf16.msra.mxu1 %v16015_v3 }
0x15f7   :  { %13233 = vmatprep.subr.bf16.mxu1 %v14895_v7 }
0x15fa   :  { %13234 = vmatpush3.bf16.msra.mxu1 %v15952_v57 }
0x15fb   :  { %13235 = vmatprep.subr.bf16.mxu1 %v14895_v7 }
0x15fe   :  { %13236 = vmatpush3.bf16.msra.mxu1 %v15950_v54 }
0x15ff   :  { %13267 = vmatprep.subr.bf16.mxu1 %v14895_v7 }
0x1601   :  { %13238 = vmatmul.mubr.bf16.vlgmr.msra.gmra.mxu1 %v11154_v31  ;;  %v5469_v31 = vsel %vm451_vm1, %v11167_v30, 0 }
0x1602   :  { %13269 = vmatprep.mubr.msk.bf16.mxu1 %vm14896_vm3, %v14895_v7  ;;  %13268 = vmatpush3.bf16.msra.mxu1 %v5193_v50 }
0x1603   :  { %13273 = vmatprep.subr.bf16.mxu1 %v14895_v7 }
0x16a1   :  { %v5045_v37 = vpop.f32.mrf.mxu1 }
0x16a2   :  { %v5051_v39 = vadd.f32 %v5045_v37, %v4959_v38 }
0x16a3   :  { %v13219_v42 = vpop.f32.mrf.mxu1 }
0x16a5   :  { %v5048_v43 = vpop.f32.mrf.mxu1 }
0x16a7   :  { %v13220_v46 = vpop.f32.mrf.mxu1 }
0x16c1   :  { %v5088_v47 = vpop.f32.mrf.mxu1 }
0x16c2   :  { %v5094_v48 = vpack.c.bf16 %v5088_v47, %v5088_v47 }
0x16c3   :  { %v13239_v49 = vpop.f32.mrf.mxu1 }
0x16c4   :  { %13244 = vmatmul.mubr.msk.bf16.vlgmr.msra.gmra.mxu0 %vm444_vm2, %v5094_v48 }
0x16c5   :  { %13248 = vmatpush3.bf16.msra.mxu0 %v15967_v41  ;;  %v5091_v52 = vpop.f32.mrf.mxu1  ;;  %13263 = vmatprep.mubr.msk.bf16.mxu0 %vm14896_vm3, %v14895_v7 }
0x16c6   :  { %13249 = vmatprep.subr.bf16.mxu0 %v14895_v7  ;;  %v11169_v52 = vld [vmem:[%s17943_s8 + $0x30] sm:$0xf] }
0x16c7   :  { %v13240_v36 = vpop.f32.mrf.mxu1 }
0x16c8   :  { %v11170_v36 = vld [vmem:[%s17944_s9 + $0x30] sm:$0xf] }
0x16c9   :  { %13250 = vmatpush3.bf16.msra.mxu0 %v15973_v51 }
0x16ca   :  { %13251 = vmatprep.subr.bf16.mxu0 %v14895_v7 }
0x16cd   :  { %13252 = vmatpush3.bf16.msra.mxu0 %v15983_v1 }
0x16ce   :  { %13253 = vmatprep.subr.bf16.mxu0 %v14895_v7 }
0x16d1   :  { %13254 = vmatpush3.bf16.msra.mxu0 %v15995_v12 }
0x16d2   :  { %13255 = vmatprep.subr.bf16.mxu0 %v14895_v7 }
0x16d5   :  { %13256 = vmatpush3.bf16.msra.mxu0 %v16007_v53 }
0x16d6   :  { %13257 = vmatprep.subr.bf16.mxu0 %v14895_v7 }
0x16d9   :  { %13258 = vmatpush3.bf16.msra.mxu0 %v16015_v3 }
0x16da   :  { %13259 = vmatprep.subr.bf16.mxu0 %v14895_v7 }
0x16dd   :  { %13260 = vmatpush3.bf16.msra.mxu0 %v15952_v57 }
0x16de   :  { %13261 = vmatprep.subr.bf16.mxu0 %v14895_v7 }
0x16e1   :  { %13262 = vmatpush3.bf16.msra.mxu0 %v15950_v54 }
0x16e2   :  { %13293 = vmatprep.subr.bf16.mxu0 %v14895_v7 }
0x16e4   :  { %13264 = vmatmul.mubr.bf16.vlgmr.msra.gmra.mxu0 %v11157_v40  ;;  %v5561_v40 = vsel %vm451_vm1, %v11170_v36, 0 }
0x16e5   :  { %13295 = vmatprep.mubr.msk.bf16.mxu0 %vm14896_vm3, %v14895_v7  ;;  %13294 = vmatpush3.bf16.msra.mxu0 %v5285_v20 }
0x16e6   :  { %13299 = vmatprep.subr.bf16.mxu0 %v14895_v7 }
0x1784   :  { %v5137_v55 = vpop.f32.mrf.mxu0 }
0x1785   :  { %v5143_v60 = vadd.f32 %v5137_v55, %v5051_v39 }
0x1786   :  { %v13245_v56 = vpop.f32.mrf.mxu0 }
0x1788   :  { %v5140_v63 = vpop.f32.mrf.mxu0 }
0x178a   :  { %v13246_v4 = vpop.f32.mrf.mxu0 }
0x17a4   :  { %v5180_v5 = vpop.f32.mrf.mxu0 }
0x17a5   :  { %v5186_v8 = vpack.c.bf16 %v5180_v5, %v5180_v5 }
0x17a6   :  { %v13265_v11 = vpop.f32.mrf.mxu0 }
0x17a7   :  { %13270 = vmatmul.mubr.msk.bf16.vlgmr.msra.gmra.mxu1 %vm444_vm2, %v5186_v8 }
0x17a8   :  { %13274 = vmatpush3.bf16.msra.mxu1 %v15967_v41  ;;  %v5183_v14 = vpop.f32.mrf.mxu0  ;;  %13289 = vmatprep.mubr.msk.bf16.mxu1 %vm14896_vm3, %v14895_v7 }
0x17a9   :  { %13275 = vmatprep.subr.bf16.mxu1 %v14895_v7  ;;  %v11172_v14 = vld [vmem:[%s17943_s8 + $0x34] sm:$0xf] }
0x17aa   :  { %v13266_v16 = vpop.f32.mrf.mxu0 }
0x17ab   :  { %v11173_v16 = vld [vmem:[%s17944_s9 + $0x34] sm:$0xf] }
0x17ac   :  { %13276 = vmatpush3.bf16.msra.mxu1 %v15973_v51 }
0x17ad   :  { %13277 = vmatprep.subr.bf16.mxu1 %v14895_v7 }
0x17b0   :  { %13278 = vmatpush3.bf16.msra.mxu1 %v15983_v1 }
0x17b1   :  { %13279 = vmatprep.subr.bf16.mxu1 %v14895_v7 }
0x17b4   :  { %13280 = vmatpush3.bf16.msra.mxu1 %v15995_v12 }
0x17b5   :  { %13281 = vmatprep.subr.bf16.mxu1 %v14895_v7 }
0x17b8   :  { %13282 = vmatpush3.bf16.msra.mxu1 %v16007_v53 }
0x17b9   :  { %13283 = vmatprep.subr.bf16.mxu1 %v14895_v7 }
0x17bc   :  { %13284 = vmatpush3.bf16.msra.mxu1 %v16015_v3 }
0x17bd   :  { %13285 = vmatprep.subr.bf16.mxu1 %v14895_v7 }
0x17c0   :  { %13286 = vmatpush3.bf16.msra.mxu1 %v15952_v57 }
0x17c1   :  { %13287 = vmatprep.subr.bf16.mxu1 %v14895_v7 }
0x17c4   :  { %13288 = vmatpush3.bf16.msra.mxu1 %v15950_v54 }
0x17c5   :  { %13319 = vmatprep.subr.bf16.mxu1 %v14895_v7 }
0x17c7   :  { %13290 = vmatmul.mubr.bf16.vlgmr.msra.gmra.mxu1 %v11160_v19  ;;  %v5653_v19 = vsel %vm451_vm1, %v11173_v16, 0 }
0x17c8   :  { %13321 = vmatprep.mubr.msk.bf16.mxu1 %vm14896_vm3, %v14895_v7  ;;  %13320 = vmatpush3.bf16.msra.mxu1 %v5377_v33 }
0x17c9   :  { %13325 = vmatprep.subr.bf16.mxu1 %v14895_v7 }
0x1867   :  { %v5229_v44 = vpop.f32.mrf.mxu1 }
0x1868   :  { %v5235_v6 = vadd.f32 %v5229_v44, %v5143_v60 }
0x1869   :  { %v13271_v62 = vpop.f32.mrf.mxu1 }
0x186b   :  { %v5232_v17 = vpop.f32.mrf.mxu1 }
0x186d   :  { %v13272_v34 = vpop.f32.mrf.mxu1 }
0x1887   :  { %v5272_v21 = vpop.f32.mrf.mxu1 }
0x1888   :  { %v5278_v58 = vpack.c.bf16 %v5272_v21, %v5272_v21 }
0x1889   :  { %v13291_v0 = vpop.f32.mrf.mxu1 }
0x188a   :  { %13296 = vmatmul.mubr.msk.bf16.vlgmr.msra.gmra.mxu0 %vm444_vm2, %v5278_v58 }
0x188b   :  { %13300 = vmatpush3.bf16.msra.mxu0 %v15967_v41  ;;  %v5275_v22 = vpop.f32.mrf.mxu1  ;;  %13315 = vmatprep.mubr.msk.bf16.mxu0 %vm14896_vm3, %v14895_v7 }
0x188c   :  { %13301 = vmatprep.subr.bf16.mxu0 %v14895_v7  ;;  %v11175_v22 = vld [vmem:[%s17943_s8 + $0x38] sm:$0xf] }
0x188d   :  { %v13292_v61 = vpop.f32.mrf.mxu1 }
0x188e   :  { %v11176_v61 = vld [vmem:[%s17944_s9 + $0x38] sm:$0xf] }
0x188f   :  { %13302 = vmatpush3.bf16.msra.mxu0 %v15973_v51 }
0x1890   :  { %13303 = vmatprep.subr.bf16.mxu0 %v14895_v7 }
0x1893   :  { %13304 = vmatpush3.bf16.msra.mxu0 %v15983_v1 }
0x1894   :  { %13305 = vmatprep.subr.bf16.mxu0 %v14895_v7 }
0x1897   :  { %13306 = vmatpush3.bf16.msra.mxu0 %v15995_v12 }
0x1898   :  { %13307 = vmatprep.subr.bf16.mxu0 %v14895_v7 }
0x189b   :  { %13308 = vmatpush3.bf16.msra.mxu0 %v16007_v53 }
0x189c   :  { %13309 = vmatprep.subr.bf16.mxu0 %v14895_v7 }
0x189f   :  { %13310 = vmatpush3.bf16.msra.mxu0 %v16015_v3 }
0x18a0   :  { %13311 = vmatprep.subr.bf16.mxu0 %v14895_v7 }
0x18a3   :  { %13312 = vmatpush3.bf16.msra.mxu0 %v15952_v57 }
0x18a4   :  { %13313 = vmatprep.subr.bf16.mxu0 %v14895_v7 }
0x18a7   :  { %13314 = vmatpush3.bf16.msra.mxu0 %v15950_v54 }
0x18a8   :  { %13345 = vmatprep.subr.bf16.mxu0 %v14895_v7 }
0x18aa   :  { %13316 = vmatmul.mubr.bf16.vlgmr.msra.gmra.mxu0 %v11163_v15  ;;  %v5745_v15 = vsel %vm451_vm1, %v11176_v61, 0 }
0x18ab   :  { %13347 = vmatprep.mubr.msk.bf16.mxu0 %vm14896_vm3, %v14895_v7  ;;  %13346 = vmatpush3.bf16.msra.mxu0 %v5469_v31 }
0x18ac   :  { %13351 = vmatprep.subr.bf16.mxu0 %v14895_v7 }
0x194a   :  { %v5321_v25 = vpop.f32.mrf.mxu0 }
0x194b   :  { %v5327_v59 = vadd.f32 %v5321_v25, %v5235_v6 }
0x194c   :  { %v13297_v18 = vpop.f32.mrf.mxu0 }
0x194e   :  { %v5324_v38 = vpop.f32.mrf.mxu0 }
0x1950   :  { %v13298_v2 = vpop.f32.mrf.mxu0 }
0x196a   :  { %v5364_v26 = vpop.f32.mrf.mxu0 }
0x196b   :  { %v5370_v27 = vpack.c.bf16 %v5364_v26, %v5364_v26 }
0x196c   :  { %v13317_v13 = vpop.f32.mrf.mxu0 }
0x196d   :  { %13322 = vmatmul.mubr.msk.bf16.vlgmr.msra.gmra.mxu1 %vm444_vm2, %v5370_v27 }
0x196e   :  { %13326 = vmatpush3.bf16.msra.mxu1 %v15967_v41  ;;  %v5367_v23 = vpop.f32.mrf.mxu0  ;;  %13341 = vmatprep.mubr.msk.bf16.mxu1 %vm14896_vm3, %v14895_v7 }
0x196f   :  { %13327 = vmatprep.subr.bf16.mxu1 %v14895_v7  ;;  %v11178_v23 = vld [vmem:[%s17943_s8 + $0x3c] sm:$0xf] }
0x1970   :  { %v13318_v28 = vpop.f32.mrf.mxu0 }
0x1971   :  { %v11179_v28 = vld [vmem:[%s17944_s9 + $0x3c] sm:$0xf] }
0x1972   :  { %13328 = vmatpush3.bf16.msra.mxu1 %v15973_v51 }
0x1973   :  { %13329 = vmatprep.subr.bf16.mxu1 %v14895_v7 }
0x1976   :  { %13330 = vmatpush3.bf16.msra.mxu1 %v15983_v1 }
0x1977   :  { %13331 = vmatprep.subr.bf16.mxu1 %v14895_v7 }
0x197a   :  { %13332 = vmatpush3.bf16.msra.mxu1 %v15995_v12 }
0x197b   :  { %13333 = vmatprep.subr.bf16.mxu1 %v14895_v7 }
0x197e   :  { %13334 = vmatpush3.bf16.msra.mxu1 %v16007_v53 }
0x197f   :  { %13335 = vmatprep.subr.bf16.mxu1 %v14895_v7 }
0x1982   :  { %13336 = vmatpush3.bf16.msra.mxu1 %v16015_v3 }
0x1983   :  { %13337 = vmatprep.subr.bf16.mxu1 %v14895_v7 }
0x1986   :  { %13338 = vmatpush3.bf16.msra.mxu1 %v15952_v57 }
0x1987   :  { %13339 = vmatprep.subr.bf16.mxu1 %v14895_v7 }
0x198a   :  { %13340 = vmatpush3.bf16.msra.mxu1 %v15950_v54 }
0x198b   :  { %13371 = vmatprep.subr.bf16.mxu1 %v14895_v7 }
0x198d   :  { %13342 = vmatmul.mubr.bf16.vlgmr.msra.gmra.mxu1 %v11166_v29  ;;  %v5837_v29 = vsel %vm451_vm1, %v11179_v28, 0 }
0x198e   :  { %13373 = vmatprep.mubr.msk.bf16.mxu1 %vm14896_vm3, %v14895_v7  ;;  %13372 = vmatpush3.bf16.msra.mxu1 %v5561_v40 }
0x198f   :  { %13377 = vmatprep.subr.bf16.mxu1 %v14895_v7 }
0x1a2d   :  { %v5413_v32 = vpop.f32.mrf.mxu1 }
0x1a2e   :  { %v5419_v35 = vadd.f32 %v5413_v32, %v5327_v59 }
0x1a2f   :  { %v13323_v37 = vpop.f32.mrf.mxu1 }
0x1a31   :  { %v5416_v39 = vpop.f32.mrf.mxu1 }
0x1a33   :  { %v13324_v42 = vpop.f32.mrf.mxu1 }
0x1a4d   :  { %v5456_v43 = vpop.f32.mrf.mxu1 }
0x1a4e   :  { %v5462_v46 = vpack.c.bf16 %v5456_v43, %v5456_v43 }
0x1a4f   :  { %v13343_v47 = vpop.f32.mrf.mxu1 }
0x1a50   :  { %13348 = vmatmul.mubr.msk.bf16.vlgmr.msra.gmra.mxu0 %vm444_vm2, %v5462_v46 }
0x1a51   :  { %13352 = vmatpush3.bf16.msra.mxu0 %v15967_v41  ;;  %v5459_v48 = vpop.f32.mrf.mxu1  ;;  %13367 = vmatprep.mubr.msk.bf16.mxu0 %vm14896_vm3, %v14895_v7 }
0x1a52   :  { %13353 = vmatprep.subr.bf16.mxu0 %v14895_v7  ;;  %v11181_v48 = vld [vmem:[%s17943_s8 + $0x40] sm:$0xf] }
0x1a53   :  { %v13344_v49 = vpop.f32.mrf.mxu1 }
0x1a54   :  { %v11182_v49 = vld [vmem:[%s17944_s9 + $0x40] sm:$0xf] }
0x1a55   :  { %13354 = vmatpush3.bf16.msra.mxu0 %v15973_v51 }
0x1a56   :  { %13355 = vmatprep.subr.bf16.mxu0 %v14895_v7 }
0x1a59   :  { %13356 = vmatpush3.bf16.msra.mxu0 %v15983_v1 }
0x1a5a   :  { %13357 = vmatprep.subr.bf16.mxu0 %v14895_v7 }
0x1a5d   :  { %13358 = vmatpush3.bf16.msra.mxu0 %v15995_v12 }
0x1a5e   :  { %13359 = vmatprep.subr.bf16.mxu0 %v14895_v7 }
0x1a61   :  { %13360 = vmatpush3.bf16.msra.mxu0 %v16007_v53 }
0x1a62   :  { %13361 = vmatprep.subr.bf16.mxu0 %v14895_v7 }
0x1a65   :  { %13362 = vmatpush3.bf16.msra.mxu0 %v16015_v3 }
0x1a66   :  { %13363 = vmatprep.subr.bf16.mxu0 %v14895_v7 }
0x1a69   :  { %13364 = vmatpush3.bf16.msra.mxu0 %v15952_v57 }
0x1a6a   :  { %13365 = vmatprep.subr.bf16.mxu0 %v14895_v7 }
0x1a6d   :  { %13366 = vmatpush3.bf16.msra.mxu0 %v15950_v54 }
0x1a6e   :  { %13397 = vmatprep.subr.bf16.mxu0 %v14895_v7 }
0x1a70   :  { %13368 = vmatmul.mubr.bf16.vlgmr.msra.gmra.mxu0 %v11169_v52  ;;  %v5929_v52 = vsel %vm451_vm1, %v11182_v49, 0 }
0x1a71   :  { %13399 = vmatprep.mubr.msk.bf16.mxu0 %vm14896_vm3, %v14895_v7  ;;  %13398 = vmatpush3.bf16.msra.mxu0 %v5653_v19 }
0x1a72   :  { %13403 = vmatprep.subr.bf16.mxu0 %v14895_v7 }
0x1b10   :  { %v5505_v45 = vpop.f32.mrf.mxu0 }
0x1b11   :  { %v5511_v50 = vadd.f32 %v5505_v45, %v5419_v35 }
0x1b12   :  { %v13349_v55 = vpop.f32.mrf.mxu0 }
0x1b14   :  { %v5508_v60 = vpop.f32.mrf.mxu0 }
0x1b16   :  { %v13350_v56 = vpop.f32.mrf.mxu0 }
0x1b30   :  { %v5548_v63 = vpop.f32.mrf.mxu0 }
0x1b31   :  { %v5554_v4 = vpack.c.bf16 %v5548_v63, %v5548_v63 }
0x1b32   :  { %v13369_v5 = vpop.f32.mrf.mxu0 }
0x1b33   :  { %13374 = vmatmul.mubr.msk.bf16.vlgmr.msra.gmra.mxu1 %vm444_vm2, %v5554_v4 }
0x1b34   :  { %13378 = vmatpush3.bf16.msra.mxu1 %v15967_v41  ;;  %v5551_v8 = vpop.f32.mrf.mxu0  ;;  %13393 = vmatprep.mubr.msk.bf16.mxu1 %vm14896_vm3, %v14895_v7 }
0x1b35   :  { %13379 = vmatprep.subr.bf16.mxu1 %v14895_v7  ;;  %v11184_v8 = vld [vmem:[%s17943_s8 + $0x44] sm:$0xf] }
0x1b36   :  { %v13370_v11 = vpop.f32.mrf.mxu0 }
0x1b37   :  { %v11185_v11 = vld [vmem:[%s17944_s9 + $0x44] sm:$0xf] }
0x1b38   :  { %13380 = vmatpush3.bf16.msra.mxu1 %v15973_v51 }
0x1b39   :  { %13381 = vmatprep.subr.bf16.mxu1 %v14895_v7 }
0x1b3c   :  { %13382 = vmatpush3.bf16.msra.mxu1 %v15983_v1 }
0x1b3d   :  { %13383 = vmatprep.subr.bf16.mxu1 %v14895_v7 }
0x1b40   :  { %13384 = vmatpush3.bf16.msra.mxu1 %v15995_v12 }
0x1b41   :  { %13385 = vmatprep.subr.bf16.mxu1 %v14895_v7 }
0x1b44   :  { %13386 = vmatpush3.bf16.msra.mxu1 %v16007_v53 }
0x1b45   :  { %13387 = vmatprep.subr.bf16.mxu1 %v14895_v7 }
0x1b48   :  { %13388 = vmatpush3.bf16.msra.mxu1 %v16015_v3 }
0x1b49   :  { %13389 = vmatprep.subr.bf16.mxu1 %v14895_v7 }
0x1b4c   :  { %13390 = vmatpush3.bf16.msra.mxu1 %v15952_v57 }
0x1b4d   :  { %13391 = vmatprep.subr.bf16.mxu1 %v14895_v7 }
0x1b50   :  { %13392 = vmatpush3.bf16.msra.mxu1 %v15950_v54 }
0x1b51   :  { %13423 = vmatprep.subr.bf16.mxu1 %v14895_v7 }
0x1b53   :  { %13394 = vmatmul.mubr.bf16.vlgmr.msra.gmra.mxu1 %v11172_v14  ;;  %v6021_v14 = vsel %vm451_vm1, %v11185_v11, 0 }
0x1b54   :  { %13425 = vmatprep.mubr.msk.bf16.mxu1 %vm14896_vm3, %v14895_v7  ;;  %13424 = vmatpush3.bf16.msra.mxu1 %v5745_v15 }
0x1b55   :  { %13429 = vmatprep.subr.bf16.mxu1 %v14895_v7 }
0x1bf3   :  { %v5597_v9 = vpop.f32.mrf.mxu1 }
0x1bf4   :  { %v5603_v20 = vadd.f32 %v5597_v9, %v5511_v50 }
0x1bf5   :  { %v13375_v44 = vpop.f32.mrf.mxu1 }
0x1bf7   :  { %v5600_v6 = vpop.f32.mrf.mxu1 }
0x1bf9   :  { %v13376_v62 = vpop.f32.mrf.mxu1 }
0x1c13   :  { %v5640_v17 = vpop.f32.mrf.mxu1 }
0x1c14   :  { %v5646_v34 = vpack.c.bf16 %v5640_v17, %v5640_v17 }
0x1c15   :  { %v13395_v21 = vpop.f32.mrf.mxu1 }
0x1c16   :  { %13400 = vmatmul.mubr.msk.bf16.vlgmr.msra.gmra.mxu0 %vm444_vm2, %v5646_v34 }
0x1c17   :  { %13404 = vmatpush3.bf16.msra.mxu0 %v15967_v41  ;;  %v5643_v58 = vpop.f32.mrf.mxu1  ;;  %13419 = vmatprep.mubr.msk.bf16.mxu0 %vm14896_vm3, %v14895_v7 }
0x1c18   :  { %13405 = vmatprep.subr.bf16.mxu0 %v14895_v7  ;;  %v11187_v58 = vld [vmem:[%s17943_s8 + $0x48] sm:$0xf] }
0x1c19   :  { %v13396_v0 = vpop.f32.mrf.mxu1 }
0x1c1a   :  { %v11188_v0 = vld [vmem:[%s17944_s9 + $0x48] sm:$0xf] }
0x1c1b   :  { %13406 = vmatpush3.bf16.msra.mxu0 %v15973_v51 }
0x1c1c   :  { %13407 = vmatprep.subr.bf16.mxu0 %v14895_v7 }
0x1c1f   :  { %13408 = vmatpush3.bf16.msra.mxu0 %v15983_v1 }
0x1c20   :  { %13409 = vmatprep.subr.bf16.mxu0 %v14895_v7 }
0x1c23   :  { %13410 = vmatpush3.bf16.msra.mxu0 %v15995_v12 }
0x1c24   :  { %13411 = vmatprep.subr.bf16.mxu0 %v14895_v7 }
0x1c27   :  { %13412 = vmatpush3.bf16.msra.mxu0 %v16007_v53 }
0x1c28   :  { %13413 = vmatprep.subr.bf16.mxu0 %v14895_v7 }
0x1c2b   :  { %13414 = vmatpush3.bf16.msra.mxu0 %v16015_v3 }
0x1c2c   :  { %13415 = vmatprep.subr.bf16.mxu0 %v14895_v7 }
0x1c2f   :  { %13416 = vmatpush3.bf16.msra.mxu0 %v15952_v57 }
0x1c30   :  { %13417 = vmatprep.subr.bf16.mxu0 %v14895_v7 }
0x1c33   :  { %13418 = vmatpush3.bf16.msra.mxu0 %v15950_v54 }
0x1c34   :  { %13449 = vmatprep.subr.bf16.mxu0 %v14895_v7 }
0x1c36   :  { %13420 = vmatmul.mubr.bf16.vlgmr.msra.gmra.mxu0 %v11175_v22  ;;  %v6113_v22 = vsel %vm451_vm1, %v11188_v0, 0 }
0x1c37   :  { %13451 = vmatprep.mubr.msk.bf16.mxu0 %vm14896_vm3, %v14895_v7  ;;  %13450 = vmatpush3.bf16.msra.mxu0 %v5837_v29 }
0x1c38   :  { %13455 = vmatprep.subr.bf16.mxu0 %v14895_v7 }
0x1cd6   :  { %v5689_v24 = vpop.f32.mrf.mxu0 }
0x1cd7   :  { %v5695_v33 = vadd.f32 %v5689_v24, %v5603_v20 }
0x1cd8   :  { %v13401_v25 = vpop.f32.mrf.mxu0 }
0x1cda   :  { %v5692_v59 = vpop.f32.mrf.mxu0 }
0x1cdc   :  { %v13402_v18 = vpop.f32.mrf.mxu0 }
0x1cf6   :  { %v5732_v38 = vpop.f32.mrf.mxu0 }
0x1cf7   :  { %v5738_v2 = vpack.c.bf16 %v5732_v38, %v5732_v38 }
0x1cf8   :  { %v13421_v26 = vpop.f32.mrf.mxu0 }
0x1cf9   :  { %13426 = vmatmul.mubr.msk.bf16.vlgmr.msra.gmra.mxu1 %vm444_vm2, %v5738_v2 }
0x1cfa   :  { %13430 = vmatpush3.bf16.msra.mxu1 %v15967_v41  ;;  %v5735_v27 = vpop.f32.mrf.mxu0  ;;  %13445 = vmatprep.mubr.msk.bf16.mxu1 %vm14896_vm3, %v14895_v7 }
0x1cfb   :  { %13431 = vmatprep.subr.bf16.mxu1 %v14895_v7  ;;  %v11190_v27 = vld [vmem:[%s17943_s8 + $0x4c] sm:$0xf] }
0x1cfc   :  { %v13422_v13 = vpop.f32.mrf.mxu0 }
0x1cfd   :  { %v11191_v13 = vld [vmem:[%s17944_s9 + $0x4c] sm:$0xf] }
0x1cfe   :  { %13432 = vmatpush3.bf16.msra.mxu1 %v15973_v51 }
0x1cff   :  { %13433 = vmatprep.subr.bf16.mxu1 %v14895_v7 }
0x1d02   :  { %13434 = vmatpush3.bf16.msra.mxu1 %v15983_v1 }
0x1d03   :  { %13435 = vmatprep.subr.bf16.mxu1 %v14895_v7 }
0x1d06   :  { %13436 = vmatpush3.bf16.msra.mxu1 %v15995_v12 }
0x1d07   :  { %13437 = vmatprep.subr.bf16.mxu1 %v14895_v7 }
0x1d0a   :  { %13438 = vmatpush3.bf16.msra.mxu1 %v16007_v53 }
0x1d0b   :  { %13439 = vmatprep.subr.bf16.mxu1 %v14895_v7 }
0x1d0e   :  { %13440 = vmatpush3.bf16.msra.mxu1 %v16015_v3 }
0x1d0f   :  { %13441 = vmatprep.subr.bf16.mxu1 %v14895_v7 }
0x1d12   :  { %13442 = vmatpush3.bf16.msra.mxu1 %v15952_v57 }
0x1d13   :  { %13443 = vmatprep.subr.bf16.mxu1 %v14895_v7 }
0x1d16   :  { %13444 = vmatpush3.bf16.msra.mxu1 %v15950_v54 }
0x1d17   :  { %13475 = vmatprep.subr.bf16.mxu1 %v14895_v7 }
0x1d19   :  { %13446 = vmatmul.mubr.bf16.vlgmr.msra.gmra.mxu1 %v11178_v23  ;;  %v6205_v23 = vsel %vm451_vm1, %v11191_v13, 0 }
0x1d1a   :  { %13477 = vmatprep.mubr.msk.bf16.mxu1 %vm14896_vm3, %v14895_v7  ;;  %13476 = vmatpush3.bf16.msra.mxu1 %v5929_v52 }
0x1d1b   :  { %13481 = vmatprep.subr.bf16.mxu1 %v14895_v7 }
0x1db9   :  { %v5781_v30 = vpop.f32.mrf.mxu1 }
0x1dba   :  { %v5787_v31 = vadd.f32 %v5781_v30, %v5695_v33 }
0x1dbb   :  { %v13427_v32 = vpop.f32.mrf.mxu1 }
0x1dbd   :  { %v5784_v35 = vpop.f32.mrf.mxu1 }
0x1dbf   :  { %v13428_v37 = vpop.f32.mrf.mxu1 }
0x1dd9   :  { %v5824_v39 = vpop.f32.mrf.mxu1 }
0x1dda   :  { %v5830_v42 = vpack.c.bf16 %v5824_v39, %v5824_v39 }
0x1ddb   :  { %v13447_v43 = vpop.f32.mrf.mxu1 }
0x1ddc   :  { %13452 = vmatmul.mubr.msk.bf16.vlgmr.msra.gmra.mxu0 %vm444_vm2, %v5830_v42 }
0x1ddd   :  { %13456 = vmatpush3.bf16.msra.mxu0 %v15967_v41  ;;  %v5827_v46 = vpop.f32.mrf.mxu1  ;;  %13471 = vmatprep.mubr.msk.bf16.mxu0 %vm14896_vm3, %v14895_v7 }
0x1dde   :  { %13457 = vmatprep.subr.bf16.mxu0 %v14895_v7  ;;  %v11193_v46 = vld [vmem:[%s17943_s8 + $0x50] sm:$0xf] }
0x1ddf   :  { %v13448_v47 = vpop.f32.mrf.mxu1 }
0x1de0   :  { %v11194_v47 = vld [vmem:[%s17944_s9 + $0x50] sm:$0xf] }
0x1de1   :  { %13458 = vmatpush3.bf16.msra.mxu0 %v15973_v51 }
0x1de2   :  { %13459 = vmatprep.subr.bf16.mxu0 %v14895_v7 }
0x1de5   :  { %13460 = vmatpush3.bf16.msra.mxu0 %v15983_v1 }
0x1de6   :  { %13461 = vmatprep.subr.bf16.mxu0 %v14895_v7 }
0x1de9   :  { %13462 = vmatpush3.bf16.msra.mxu0 %v15995_v12 }
0x1dea   :  { %13463 = vmatprep.subr.bf16.mxu0 %v14895_v7 }
0x1ded   :  { %13464 = vmatpush3.bf16.msra.mxu0 %v16007_v53 }
0x1dee   :  { %13465 = vmatprep.subr.bf16.mxu0 %v14895_v7 }
0x1df1   :  { %13466 = vmatpush3.bf16.msra.mxu0 %v16015_v3 }
0x1df2   :  { %13467 = vmatprep.subr.bf16.mxu0 %v14895_v7 }
0x1df5   :  { %13468 = vmatpush3.bf16.msra.mxu0 %v15952_v57 }
0x1df6   :  { %13469 = vmatprep.subr.bf16.mxu0 %v14895_v7 }
0x1df9   :  { %13470 = vmatpush3.bf16.msra.mxu0 %v15950_v54 }
0x1dfa   :  { %13501 = vmatprep.subr.bf16.mxu0 %v14895_v7 }
0x1dfc   :  { %13472 = vmatmul.mubr.bf16.vlgmr.msra.gmra.mxu0 %v11181_v48  ;;  %v6297_v48 = vsel %vm451_vm1, %v11194_v47, 0 }
0x1dfd   :  { %13503 = vmatprep.mubr.msk.bf16.mxu0 %vm14896_vm3, %v14895_v7  ;;  %13502 = vmatpush3.bf16.msra.mxu0 %v6021_v14 }
0x1dfe   :  { %13507 = vmatprep.subr.bf16.mxu0 %v14895_v7 }
0x1e9c   :  { %v5873_v36 = vpop.f32.mrf.mxu0 }
0x1e9d   :  { %v5879_v40 = vadd.f32 %v5873_v36, %v5787_v31 }
0x1e9e   :  { %v13453_v45 = vpop.f32.mrf.mxu0 }
0x1ea0   :  { %v5876_v50 = vpop.f32.mrf.mxu0 }
0x1ea2   :  { %v13454_v55 = vpop.f32.mrf.mxu0 }
0x1ebc   :  { %v5916_v60 = vpop.f32.mrf.mxu0 }
0x1ebd   :  { %v5922_v56 = vpack.c.bf16 %v5916_v60, %v5916_v60 }
0x1ebe   :  { %v13473_v63 = vpop.f32.mrf.mxu0 }
0x1ebf   :  { %13478 = vmatmul.mubr.msk.bf16.vlgmr.msra.gmra.mxu1 %vm444_vm2, %v5922_v56 }
0x1ec0   :  { %13482 = vmatpush3.bf16.msra.mxu1 %v15967_v41  ;;  %v5919_v4 = vpop.f32.mrf.mxu0  ;;  %13497 = vmatprep.mubr.msk.bf16.mxu1 %vm14896_vm3, %v14895_v7 }
0x1ec1   :  { %13483 = vmatprep.subr.bf16.mxu1 %v14895_v7  ;;  %v11196_v4 = vld [vmem:[%s17943_s8 + $0x54] sm:$0xf] }
0x1ec2   :  { %v13474_v5 = vpop.f32.mrf.mxu0 }
0x1ec3   :  { %v11197_v5 = vld [vmem:[%s17944_s9 + $0x54] sm:$0xf] }
0x1ec4   :  { %13484 = vmatpush3.bf16.msra.mxu1 %v15973_v51 }
0x1ec5   :  { %13485 = vmatprep.subr.bf16.mxu1 %v14895_v7 }
0x1ec8   :  { %13486 = vmatpush3.bf16.msra.mxu1 %v15983_v1 }
0x1ec9   :  { %13487 = vmatprep.subr.bf16.mxu1 %v14895_v7 }
0x1ecc   :  { %13488 = vmatpush3.bf16.msra.mxu1 %v15995_v12 }
0x1ecd   :  { %13489 = vmatprep.subr.bf16.mxu1 %v14895_v7 }
0x1ed0   :  { %13490 = vmatpush3.bf16.msra.mxu1 %v16007_v53 }
0x1ed1   :  { %13491 = vmatprep.subr.bf16.mxu1 %v14895_v7 }
0x1ed4   :  { %13492 = vmatpush3.bf16.msra.mxu1 %v16015_v3 }
0x1ed5   :  { %13493 = vmatprep.subr.bf16.mxu1 %v14895_v7 }
0x1ed8   :  { %13494 = vmatpush3.bf16.msra.mxu1 %v15952_v57 }
0x1ed9   :  { %13495 = vmatprep.subr.bf16.mxu1 %v14895_v7 }
0x1edc   :  { %13496 = vmatpush3.bf16.msra.mxu1 %v15950_v54 }
0x1edd   :  { %13527 = vmatprep.subr.bf16.mxu1 %v14895_v7 }
0x1edf   :  { %13498 = vmatmul.mubr.bf16.vlgmr.msra.gmra.mxu1 %v11184_v8  ;;  %v6389_v8 = vsel %vm451_vm1, %v11197_v5, 0 }
0x1ee0   :  { %13529 = vmatprep.mubr.msk.bf16.mxu1 %vm14896_vm3, %v14895_v7  ;;  %13528 = vmatpush3.bf16.msra.mxu1 %v6113_v22 }
0x1ee1   :  { %13533 = vmatprep.subr.bf16.mxu1 %v14895_v7 }
0x1f7f   :  { %v5965_v16 = vpop.f32.mrf.mxu1 }
0x1f80   :  { %v5971_v19 = vadd.f32 %v5965_v16, %v5879_v40 }
0x1f81   :  { %v13479_v9 = vpop.f32.mrf.mxu1 }
0x1f83   :  { %v5968_v20 = vpop.f32.mrf.mxu1 }
0x1f85   :  { %v13480_v44 = vpop.f32.mrf.mxu1 }
0x1f9f   :  { %v6008_v6 = vpop.f32.mrf.mxu1 }
0x1fa0   :  { %v6014_v62 = vpack.c.bf16 %v6008_v6, %v6008_v6 }
0x1fa1   :  { %v13499_v17 = vpop.f32.mrf.mxu1 }
0x1fa2   :  { %13504 = vmatmul.mubr.msk.bf16.vlgmr.msra.gmra.mxu0 %vm444_vm2, %v6014_v62 }
0x1fa3   :  { %13508 = vmatpush3.bf16.msra.mxu0 %v15967_v41  ;;  %v6011_v34 = vpop.f32.mrf.mxu1  ;;  %13523 = vmatprep.mubr.msk.bf16.mxu0 %vm14896_vm3, %v14895_v7 }
0x1fa4   :  { %13509 = vmatprep.subr.bf16.mxu0 %v14895_v7  ;;  %v11199_v34 = vld [vmem:[%s17943_s8 + $0x58] sm:$0xf] }
0x1fa5   :  { %v13500_v21 = vpop.f32.mrf.mxu1 }
0x1fa6   :  { %v11200_v21 = vld [vmem:[%s17944_s9 + $0x58] sm:$0xf] }
0x1fa7   :  { %13510 = vmatpush3.bf16.msra.mxu0 %v15973_v51 }
0x1fa8   :  { %13511 = vmatprep.subr.bf16.mxu0 %v14895_v7 }
0x1fab   :  { %13512 = vmatpush3.bf16.msra.mxu0 %v15983_v1 }
0x1fac   :  { %13513 = vmatprep.subr.bf16.mxu0 %v14895_v7 }
0x1faf   :  { %13514 = vmatpush3.bf16.msra.mxu0 %v15995_v12 }
0x1fb0   :  { %13515 = vmatprep.subr.bf16.mxu0 %v14895_v7 }
0x1fb3   :  { %13516 = vmatpush3.bf16.msra.mxu0 %v16007_v53 }
0x1fb4   :  { %13517 = vmatprep.subr.bf16.mxu0 %v14895_v7 }
0x1fb7   :  { %13518 = vmatpush3.bf16.msra.mxu0 %v16015_v3 }
0x1fb8   :  { %13519 = vmatprep.subr.bf16.mxu0 %v14895_v7 }
0x1fbb   :  { %13520 = vmatpush3.bf16.msra.mxu0 %v15952_v57 }
0x1fbc   :  { %13521 = vmatprep.subr.bf16.mxu0 %v14895_v7 }
0x1fbf   :  { %13522 = vmatpush3.bf16.msra.mxu0 %v15950_v54 }
0x1fc0   :  { %13553 = vmatprep.subr.bf16.mxu0 %v14895_v7 }
0x1fc2   :  { %13524 = vmatmul.mubr.bf16.vlgmr.msra.gmra.mxu0 %v11187_v58  ;;  %v6481_v58 = vsel %vm451_vm1, %v11200_v21, 0 }
0x1fc3   :  { %13555 = vmatprep.mubr.msk.bf16.mxu0 %vm14896_vm3, %v14895_v7  ;;  %13554 = vmatpush3.bf16.msra.mxu0 %v6205_v23 }
0x1fc4   :  { %13559 = vmatprep.subr.bf16.mxu0 %v14895_v7 }
0x2062   :  { %v6057_v61 = vpop.f32.mrf.mxu0 }
0x2063   :  { %v6063_v15 = vadd.f32 %v6057_v61, %v5971_v19 }
0x2064   :  { %v13505_v24 = vpop.f32.mrf.mxu0 }
0x2066   :  { %v6060_v33 = vpop.f32.mrf.mxu0 }
0x2068   :  { %v13506_v25 = vpop.f32.mrf.mxu0 }
0x2082   :  { %v6100_v59 = vpop.f32.mrf.mxu0 }
0x2083   :  { %v6106_v18 = vpack.c.bf16 %v6100_v59, %v6100_v59 }
0x2084   :  { %v13525_v38 = vpop.f32.mrf.mxu0 }
0x2085   :  { %13530 = vmatmul.mubr.msk.bf16.vlgmr.msra.gmra.mxu1 %vm444_vm2, %v6106_v18 }
0x2086   :  { %13534 = vmatpush3.bf16.msra.mxu1 %v15967_v41  ;;  %v6103_v2 = vpop.f32.mrf.mxu0  ;;  %13549 = vmatprep.mubr.msk.bf16.mxu1 %vm14896_vm3, %v14895_v7 }
0x2087   :  { %13535 = vmatprep.subr.bf16.mxu1 %v14895_v7  ;;  %v11202_v2 = vld [vmem:[%s17943_s8 + $0x5c] sm:$0xf] }
0x2088   :  { %v13526_v26 = vpop.f32.mrf.mxu0 }
0x2089   :  { %v11203_v26 = vld [vmem:[%s17944_s9 + $0x5c] sm:$0xf] }
0x208a   :  { %13536 = vmatpush3.bf16.msra.mxu1 %v15973_v51 }
0x208b   :  { %13537 = vmatprep.subr.bf16.mxu1 %v14895_v7 }
0x208e   :  { %13538 = vmatpush3.bf16.msra.mxu1 %v15983_v1 }
0x208f   :  { %13539 = vmatprep.subr.bf16.mxu1 %v14895_v7 }
0x2092   :  { %13540 = vmatpush3.bf16.msra.mxu1 %v15995_v12 }
0x2093   :  { %13541 = vmatprep.subr.bf16.mxu1 %v14895_v7 }
0x2096   :  { %13542 = vmatpush3.bf16.msra.mxu1 %v16007_v53 }
0x2097   :  { %13543 = vmatprep.subr.bf16.mxu1 %v14895_v7 }
0x209a   :  { %13544 = vmatpush3.bf16.msra.mxu1 %v16015_v3 }
0x209b   :  { %13545 = vmatprep.subr.bf16.mxu1 %v14895_v7 }
0x209e   :  { %13546 = vmatpush3.bf16.msra.mxu1 %v15952_v57 }
0x209f   :  { %13547 = vmatprep.subr.bf16.mxu1 %v14895_v7 }
0x20a2   :  { %13548 = vmatpush3.bf16.msra.mxu1 %v15950_v54 }
0x20a3   :  { %13579 = vmatprep.subr.bf16.mxu1 %v14895_v7 }
0x20a5   :  { %13550 = vmatmul.mubr.bf16.vlgmr.msra.gmra.mxu1 %v11190_v27  ;;  %v6573_v27 = vsel %vm451_vm1, %v11203_v26, 0 }
0x20a6   :  { %13581 = vmatprep.mubr.msk.bf16.mxu1 %vm14896_vm3, %v14895_v7  ;;  %13580 = vmatpush3.bf16.msra.mxu1 %v6297_v48 }
0x20a7   :  { %13585 = vmatprep.subr.bf16.mxu1 %v14895_v7 }
0x2145   :  { %v6149_v28 = vpop.f32.mrf.mxu1 }
0x2146   :  { %v6155_v29 = vadd.f32 %v6149_v28, %v6063_v15 }
0x2147   :  { %v13531_v30 = vpop.f32.mrf.mxu1 }
0x2149   :  { %v6152_v31 = vpop.f32.mrf.mxu1 }
0x214b   :  { %v13532_v32 = vpop.f32.mrf.mxu1 }
0x2165   :  { %v6192_v35 = vpop.f32.mrf.mxu1 }
0x2166   :  { %v6198_v37 = vpack.c.bf16 %v6192_v35, %v6192_v35 }
0x2167   :  { %v13551_v39 = vpop.f32.mrf.mxu1 }
0x2168   :  { %13556 = vmatmul.mubr.msk.bf16.vlgmr.msra.gmra.mxu0 %vm444_vm2, %v6198_v37 }
0x2169   :  { %13560 = vmatpush3.bf16.msra.mxu0 %v15967_v41  ;;  %v6195_v42 = vpop.f32.mrf.mxu1  ;;  %13575 = vmatprep.mubr.msk.bf16.mxu0 %vm14896_vm3, %v14895_v7 }
0x216a   :  { %13561 = vmatprep.subr.bf16.mxu0 %v14895_v7  ;;  %v11205_v42 = vld [vmem:[%s17943_s8 + $0x60] sm:$0xf] }
0x216b   :  { %v13552_v43 = vpop.f32.mrf.mxu1 }
0x216c   :  { %v11206_v43 = vld [vmem:[%s17944_s9 + $0x60] sm:$0xf] }
0x216d   :  { %13562 = vmatpush3.bf16.msra.mxu0 %v15973_v51 }
0x216e   :  { %13563 = vmatprep.subr.bf16.mxu0 %v14895_v7 }
0x2171   :  { %13564 = vmatpush3.bf16.msra.mxu0 %v15983_v1 }
0x2172   :  { %13565 = vmatprep.subr.bf16.mxu0 %v14895_v7 }
0x2175   :  { %13566 = vmatpush3.bf16.msra.mxu0 %v15995_v12 }
0x2176   :  { %13567 = vmatprep.subr.bf16.mxu0 %v14895_v7 }
0x2179   :  { %13568 = vmatpush3.bf16.msra.mxu0 %v16007_v53 }
0x217a   :  { %13569 = vmatprep.subr.bf16.mxu0 %v14895_v7 }
0x217d   :  { %13570 = vmatpush3.bf16.msra.mxu0 %v16015_v3 }
0x217e   :  { %13571 = vmatprep.subr.bf16.mxu0 %v14895_v7 }
0x2181   :  { %13572 = vmatpush3.bf16.msra.mxu0 %v15952_v57 }
0x2182   :  { %13573 = vmatprep.subr.bf16.mxu0 %v14895_v7 }
0x2185   :  { %13574 = vmatpush3.bf16.msra.mxu0 %v15950_v54 }
0x2186   :  { %13605 = vmatprep.subr.bf16.mxu0 %v14895_v7 }
0x2188   :  { %13576 = vmatmul.mubr.bf16.vlgmr.msra.gmra.mxu0 %v11193_v46  ;;  %v6665_v46 = vsel %vm451_vm1, %v11206_v43, 0 }
0x2189   :  { %13607 = vmatprep.mubr.msk.bf16.mxu0 %vm14896_vm3, %v14895_v7  ;;  %13606 = vmatpush3.bf16.msra.mxu0 %v6389_v8 }
0x218a   :  { %13611 = vmatprep.subr.bf16.mxu0 %v14895_v7 }
0x2228   :  { %v6241_v49 = vpop.f32.mrf.mxu0 }
0x2229   :  { %v6247_v52 = vadd.f32 %v6241_v49, %v6155_v29 }
0x222a   :  { %v13557_v36 = vpop.f32.mrf.mxu0 }
0x222c   :  { %v6244_v40 = vpop.f32.mrf.mxu0 }
0x222e   :  { %v13558_v45 = vpop.f32.mrf.mxu0 }
0x2248   :  { %v6284_v50 = vpop.f32.mrf.mxu0 }
0x2249   :  { %v6290_v55 = vpack.c.bf16 %v6284_v50, %v6284_v50 }
0x224a   :  { %v13577_v60 = vpop.f32.mrf.mxu0 }
0x224b   :  { %13582 = vmatmul.mubr.msk.bf16.vlgmr.msra.gmra.mxu1 %vm444_vm2, %v6290_v55 }
0x224c   :  { %13586 = vmatpush3.bf16.msra.mxu1 %v15967_v41  ;;  %v6287_v56 = vpop.f32.mrf.mxu0  ;;  %13601 = vmatprep.mubr.msk.bf16.mxu1 %vm14896_vm3, %v14895_v7 }
0x224d   :  { %13587 = vmatprep.subr.bf16.mxu1 %v14895_v7  ;;  %v11208_v56 = vld [vmem:[%s17943_s8 + $0x64] sm:$0xf] }
0x224e   :  { %v13578_v63 = vpop.f32.mrf.mxu0 }
0x224f   :  { %v11209_v63 = vld [vmem:[%s17944_s9 + $0x64] sm:$0xf] }
0x2250   :  { %13588 = vmatpush3.bf16.msra.mxu1 %v15973_v51 }
0x2251   :  { %13589 = vmatprep.subr.bf16.mxu1 %v14895_v7 }
0x2254   :  { %13590 = vmatpush3.bf16.msra.mxu1 %v15983_v1 }
0x2255   :  { %13591 = vmatprep.subr.bf16.mxu1 %v14895_v7 }
0x2258   :  { %13592 = vmatpush3.bf16.msra.mxu1 %v15995_v12 }
0x2259   :  { %13593 = vmatprep.subr.bf16.mxu1 %v14895_v7 }
0x225c   :  { %13594 = vmatpush3.bf16.msra.mxu1 %v16007_v53 }
0x225d   :  { %13595 = vmatprep.subr.bf16.mxu1 %v14895_v7 }
0x2260   :  { %13596 = vmatpush3.bf16.msra.mxu1 %v16015_v3 }
0x2261   :  { %13597 = vmatprep.subr.bf16.mxu1 %v14895_v7 }
0x2264   :  { %13598 = vmatpush3.bf16.msra.mxu1 %v15952_v57 }
0x2265   :  { %13599 = vmatprep.subr.bf16.mxu1 %v14895_v7 }
0x2268   :  { %13600 = vmatpush3.bf16.msra.mxu1 %v15950_v54 }
0x2269   :  { %13631 = vmatprep.subr.bf16.mxu1 %v14895_v7 }
0x226b   :  { %13602 = vmatmul.mubr.bf16.vlgmr.msra.gmra.mxu1 %v11196_v4  ;;  %v6757_v4 = vsel %vm451_vm1, %v11209_v63, 0 }
0x226c   :  { %13633 = vmatprep.mubr.msk.bf16.mxu1 %vm14896_vm3, %v14895_v7  ;;  %13632 = vmatpush3.bf16.msra.mxu1 %v6481_v58 }
0x226d   :  { %13637 = vmatprep.subr.bf16.mxu1 %v14895_v7 }
0x230b   :  { %v6333_v11 = vpop.f32.mrf.mxu1 }
0x230c   :  { %v6339_v14 = vadd.f32 %v6333_v11, %v6247_v52 }
0x230d   :  { %v13583_v16 = vpop.f32.mrf.mxu1 }
0x230f   :  { %v6336_v19 = vpop.f32.mrf.mxu1 }
0x2311   :  { %v13584_v9 = vpop.f32.mrf.mxu1 }
0x232b   :  { %v6376_v20 = vpop.f32.mrf.mxu1 }
0x232c   :  { %v6382_v44 = vpack.c.bf16 %v6376_v20, %v6376_v20 }
0x232d   :  { %v13603_v6 = vpop.f32.mrf.mxu1 }
0x232e   :  { %13608 = vmatmul.mubr.msk.bf16.vlgmr.msra.gmra.mxu0 %vm444_vm2, %v6382_v44 }
0x232f   :  { %13612 = vmatpush3.bf16.msra.mxu0 %v15967_v41  ;;  %v6379_v62 = vpop.f32.mrf.mxu1  ;;  %13627 = vmatprep.mubr.msk.bf16.mxu0 %vm14896_vm3, %v14895_v7 }
0x2330   :  { %13613 = vmatprep.subr.bf16.mxu0 %v14895_v7  ;;  %v11211_v62 = vld [vmem:[%s17943_s8 + $0x68] sm:$0xf] }
0x2331   :  { %v13604_v17 = vpop.f32.mrf.mxu1 }
0x2332   :  { %v11212_v17 = vld [vmem:[%s17944_s9 + $0x68] sm:$0xf] }
0x2333   :  { %13614 = vmatpush3.bf16.msra.mxu0 %v15973_v51 }
0x2334   :  { %13615 = vmatprep.subr.bf16.mxu0 %v14895_v7 }
0x2337   :  { %13616 = vmatpush3.bf16.msra.mxu0 %v15983_v1 }
0x2338   :  { %13617 = vmatprep.subr.bf16.mxu0 %v14895_v7 }
0x233b   :  { %13618 = vmatpush3.bf16.msra.mxu0 %v15995_v12 }
0x233c   :  { %13619 = vmatprep.subr.bf16.mxu0 %v14895_v7 }
0x233f   :  { %13620 = vmatpush3.bf16.msra.mxu0 %v16007_v53 }
0x2340   :  { %13621 = vmatprep.subr.bf16.mxu0 %v14895_v7 }
0x2343   :  { %13622 = vmatpush3.bf16.msra.mxu0 %v16015_v3 }
0x2344   :  { %13623 = vmatprep.subr.bf16.mxu0 %v14895_v7 }
0x2347   :  { %13624 = vmatpush3.bf16.msra.mxu0 %v15952_v57 }
0x2348   :  { %13625 = vmatprep.subr.bf16.mxu0 %v14895_v7 }
0x234b   :  { %13626 = vmatpush3.bf16.msra.mxu0 %v15950_v54 }
0x234c   :  { %13657 = vmatprep.subr.bf16.mxu0 %v14895_v7 }
0x234e   :  { %13628 = vmatmul.mubr.bf16.vlgmr.msra.gmra.mxu0 %v11199_v34  ;;  %v6849_v34 = vsel %vm451_vm1, %v11212_v17, 0 }
0x234f   :  { %13659 = vmatprep.mubr.msk.bf16.mxu0 %vm14896_vm3, %v14895_v7  ;;  %13658 = vmatpush3.bf16.msra.mxu0 %v6573_v27 }
0x2350   :  { %13663 = vmatprep.subr.bf16.mxu0 %v14895_v7 }
0x23ee   :  { %v6425_v0 = vpop.f32.mrf.mxu0 }
0x23ef   :  { %v6431_v22 = vadd.f32 %v6425_v0, %v6339_v14 }
0x23f0   :  { %v13609_v61 = vpop.f32.mrf.mxu0 }
0x23f2   :  { %v6428_v15 = vpop.f32.mrf.mxu0 }
0x23f4   :  { %v13610_v24 = vpop.f32.mrf.mxu0 }
0x240e   :  { %v6468_v33 = vpop.f32.mrf.mxu0 }
0x240f   :  { %v6474_v25 = vpack.c.bf16 %v6468_v33, %v6468_v33 }
0x2410   :  { %v13629_v59 = vpop.f32.mrf.mxu0 }
0x2411   :  { %13634 = vmatmul.mubr.msk.bf16.vlgmr.msra.gmra.mxu1 %vm444_vm2, %v6474_v25 }
0x2412   :  { %13638 = vmatpush3.bf16.msra.mxu1 %v15967_v41  ;;  %v6471_v18 = vpop.f32.mrf.mxu0  ;;  %13653 = vmatprep.mubr.msk.bf16.mxu1 %vm14896_vm3, %v14895_v7 }
0x2413   :  { %13639 = vmatprep.subr.bf16.mxu1 %v14895_v7  ;;  %v11214_v18 = vld [vmem:[%s17943_s8 + $0x6c] sm:$0xf] }
0x2414   :  { %v13630_v38 = vpop.f32.mrf.mxu0 }
0x2415   :  { %v11215_v38 = vld [vmem:[%s17944_s9 + $0x6c] sm:$0xf] }
0x2416   :  { %13640 = vmatpush3.bf16.msra.mxu1 %v15973_v51 }
0x2417   :  { %13641 = vmatprep.subr.bf16.mxu1 %v14895_v7 }
0x241a   :  { %13642 = vmatpush3.bf16.msra.mxu1 %v15983_v1 }
0x241b   :  { %13643 = vmatprep.subr.bf16.mxu1 %v14895_v7 }
0x241e   :  { %13644 = vmatpush3.bf16.msra.mxu1 %v15995_v12 }
0x241f   :  { %13645 = vmatprep.subr.bf16.mxu1 %v14895_v7 }
0x2422   :  { %13646 = vmatpush3.bf16.msra.mxu1 %v16007_v53 }
0x2423   :  { %13647 = vmatprep.subr.bf16.mxu1 %v14895_v7 }
0x2426   :  { %13648 = vmatpush3.bf16.msra.mxu1 %v16015_v3 }
0x2427   :  { %13649 = vmatprep.subr.bf16.mxu1 %v14895_v7 }
0x242a   :  { %13650 = vmatpush3.bf16.msra.mxu1 %v15952_v57 }
0x242b   :  { %13651 = vmatprep.subr.bf16.mxu1 %v14895_v7 }
0x242e   :  { %13652 = vmatpush3.bf16.msra.mxu1 %v15950_v54 }
0x242f   :  { %13683 = vmatprep.subr.bf16.mxu1 %v14895_v7 }
0x2431   :  { %13654 = vmatmul.mubr.bf16.vlgmr.msra.gmra.mxu1 %v11202_v2  ;;  %v6941_v2 = vsel %vm451_vm1, %v11215_v38, 0 }
0x2432   :  { %13685 = vmatprep.mubr.msk.bf16.mxu1 %vm14896_vm3, %v14895_v7  ;;  %13684 = vmatpush3.bf16.msra.mxu1 %v6665_v46 }
0x2433   :  { %13689 = vmatprep.subr.bf16.mxu1 %v14895_v7 }
0x24d1   :  { %v6517_v13 = vpop.f32.mrf.mxu1 }
0x24d2   :  { %v6523_v23 = vadd.f32 %v6517_v13, %v6431_v22 }
0x24d3   :  { %v13635_v28 = vpop.f32.mrf.mxu1 }
0x24d5   :  { %v6520_v29 = vpop.f32.mrf.mxu1 }
0x24d7   :  { %v13636_v30 = vpop.f32.mrf.mxu1 }
0x24f1   :  { %v6560_v31 = vpop.f32.mrf.mxu1 }
0x24f2   :  { %v6566_v32 = vpack.c.bf16 %v6560_v31, %v6560_v31 }
0x24f3   :  { %v13655_v35 = vpop.f32.mrf.mxu1 }
0x24f4   :  { %13660 = vmatmul.mubr.msk.bf16.vlgmr.msra.gmra.mxu0 %vm444_vm2, %v6566_v32 }
0x24f5   :  { %13664 = vmatpush3.bf16.msra.mxu0 %v15967_v41  ;;  %v6563_v37 = vpop.f32.mrf.mxu1  ;;  %13679 = vmatprep.mubr.msk.bf16.mxu0 %vm14896_vm3, %v14895_v7 }
0x24f6   :  { %13665 = vmatprep.subr.bf16.mxu0 %v14895_v7  ;;  %v11217_v37 = vld [vmem:[%s17943_s8 + $0x70] sm:$0xf] }
0x24f7   :  { %v13656_v39 = vpop.f32.mrf.mxu1 }
0x24f8   :  { %v11218_v39 = vld [vmem:[%s17944_s9 + $0x70] sm:$0xf] }
0x24f9   :  { %13666 = vmatpush3.bf16.msra.mxu0 %v15973_v51 }
0x24fa   :  { %13667 = vmatprep.subr.bf16.mxu0 %v14895_v7 }
0x24fd   :  { %13668 = vmatpush3.bf16.msra.mxu0 %v15983_v1 }
0x24fe   :  { %13669 = vmatprep.subr.bf16.mxu0 %v14895_v7 }
0x2501   :  { %13670 = vmatpush3.bf16.msra.mxu0 %v15995_v12 }
0x2502   :  { %13671 = vmatprep.subr.bf16.mxu0 %v14895_v7 }
0x2505   :  { %13672 = vmatpush3.bf16.msra.mxu0 %v16007_v53 }
0x2506   :  { %13673 = vmatprep.subr.bf16.mxu0 %v14895_v7 }
0x2509   :  { %13674 = vmatpush3.bf16.msra.mxu0 %v16015_v3 }
0x250a   :  { %13675 = vmatprep.subr.bf16.mxu0 %v14895_v7 }
0x250d   :  { %13676 = vmatpush3.bf16.msra.mxu0 %v15952_v57 }
0x250e   :  { %13677 = vmatprep.subr.bf16.mxu0 %v14895_v7 }
0x2511   :  { %13678 = vmatpush3.bf16.msra.mxu0 %v15950_v54 }
0x2512   :  { %13709 = vmatprep.subr.bf16.mxu0 %v14895_v7 }
0x2514   :  { %13680 = vmatmul.mubr.bf16.vlgmr.msra.gmra.mxu0 %v11205_v42  ;;  %v7033_v42 = vsel %vm451_vm1, %v11218_v39, 0 }
0x2515   :  { %13711 = vmatprep.mubr.msk.bf16.mxu0 %vm14896_vm3, %v14895_v7  ;;  %13710 = vmatpush3.bf16.msra.mxu0 %v6757_v4 }
0x2516   :  { %13715 = vmatprep.subr.bf16.mxu0 %v14895_v7 }
0x25b4   :  { %v6609_v47 = vpop.f32.mrf.mxu0 }
0x25b5   :  { %v6615_v48 = vadd.f32 %v6609_v47, %v6523_v23 }
0x25b6   :  { %v13661_v49 = vpop.f32.mrf.mxu0 }
0x25b8   :  { %v6612_v52 = vpop.f32.mrf.mxu0 }
0x25ba   :  { %v13662_v36 = vpop.f32.mrf.mxu0 }
0x25d4   :  { %v6652_v40 = vpop.f32.mrf.mxu0 }
0x25d5   :  { %v6658_v45 = vpack.c.bf16 %v6652_v40, %v6652_v40 }
0x25d6   :  { %v13681_v50 = vpop.f32.mrf.mxu0 }
0x25d7   :  { %13686 = vmatmul.mubr.msk.bf16.vlgmr.msra.gmra.mxu1 %vm444_vm2, %v6658_v45 }
0x25d8   :  { %13690 = vmatpush3.bf16.msra.mxu1 %v15967_v41  ;;  %v6655_v55 = vpop.f32.mrf.mxu0  ;;  %13705 = vmatprep.mubr.msk.bf16.mxu1 %vm14896_vm3, %v14895_v7 }
0x25d9   :  { %13691 = vmatprep.subr.bf16.mxu1 %v14895_v7  ;;  %v11220_v55 = vld [vmem:[%s17943_s8 + $0x74] sm:$0xf] }
0x25da   :  { %v13682_v60 = vpop.f32.mrf.mxu0 }
0x25db   :  { %v11221_v60 = vld [vmem:[%s17944_s9 + $0x74] sm:$0xf] }
0x25dc   :  { %13692 = vmatpush3.bf16.msra.mxu1 %v15973_v51 }
0x25dd   :  { %13693 = vmatprep.subr.bf16.mxu1 %v14895_v7 }
0x25e0   :  { %13694 = vmatpush3.bf16.msra.mxu1 %v15983_v1 }
0x25e1   :  { %13695 = vmatprep.subr.bf16.mxu1 %v14895_v7 }
0x25e4   :  { %13696 = vmatpush3.bf16.msra.mxu1 %v15995_v12 }
0x25e5   :  { %13697 = vmatprep.subr.bf16.mxu1 %v14895_v7 }
0x25e8   :  { %13698 = vmatpush3.bf16.msra.mxu1 %v16007_v53 }
0x25e9   :  { %13699 = vmatprep.subr.bf16.mxu1 %v14895_v7 }
0x25ec   :  { %13700 = vmatpush3.bf16.msra.mxu1 %v16015_v3 }
0x25ed   :  { %13701 = vmatprep.subr.bf16.mxu1 %v14895_v7 }
0x25f0   :  { %13702 = vmatpush3.bf16.msra.mxu1 %v15952_v57 }
0x25f1   :  { %13703 = vmatprep.subr.bf16.mxu1 %v14895_v7 }
0x25f4   :  { %13704 = vmatpush3.bf16.msra.mxu1 %v15950_v54 }
0x25f5   :  { %13735 = vmatprep.subr.bf16.mxu1 %v14895_v7 }
0x25f7   :  { %13706 = vmatmul.mubr.bf16.vlgmr.msra.gmra.mxu1 %v11208_v56  ;;  %v7125_v56 = vsel %vm451_vm1, %v11221_v60, 0 }
0x25f8   :  { %13737 = vmatprep.mubr.msk.bf16.mxu1 %vm14896_vm3, %v14895_v7  ;;  %13736 = vmatpush3.bf16.msra.mxu1 %v6849_v34 }
0x25f9   :  { %13741 = vmatprep.subr.bf16.mxu1 %v14895_v7 }
0x2697   :  { %v6701_v5 = vpop.f32.mrf.mxu1 }
0x2698   :  { %v6707_v8 = vadd.f32 %v6701_v5, %v6615_v48 }
0x2699   :  { %v13687_v11 = vpop.f32.mrf.mxu1 }
0x269b   :  { %v6704_v14 = vpop.f32.mrf.mxu1 }
0x269d   :  { %v13688_v16 = vpop.f32.mrf.mxu1 }
0x26b7   :  { %v6744_v19 = vpop.f32.mrf.mxu1 }
0x26b8   :  { %v6750_v9 = vpack.c.bf16 %v6744_v19, %v6744_v19 }
0x26b9   :  { %v13707_v20 = vpop.f32.mrf.mxu1 }
0x26ba   :  { %13712 = vmatmul.mubr.msk.bf16.vlgmr.msra.gmra.mxu0 %vm444_vm2, %v6750_v9 }
0x26bb   :  { %13716 = vmatpush3.bf16.msra.mxu0 %v15967_v41  ;;  %v6747_v44 = vpop.f32.mrf.mxu1  ;;  %13731 = vmatprep.mubr.msk.bf16.mxu0 %vm14896_vm3, %v14895_v7 }
0x26bc   :  { %13717 = vmatprep.subr.bf16.mxu0 %v14895_v7  ;;  %v11223_v44 = vld [vmem:[%s17943_s8 + $0x78] sm:$0xf] }
0x26bd   :  { %v13708_v6 = vpop.f32.mrf.mxu1 }
0x26be   :  { %v11224_v6 = vld [vmem:[%s17944_s9 + $0x78] sm:$0xf] }
0x26bf   :  { %13718 = vmatpush3.bf16.msra.mxu0 %v15973_v51 }
0x26c0   :  { %13719 = vmatprep.subr.bf16.mxu0 %v14895_v7 }
0x26c3   :  { %13720 = vmatpush3.bf16.msra.mxu0 %v15983_v1 }
0x26c4   :  { %13721 = vmatprep.subr.bf16.mxu0 %v14895_v7 }
0x26c7   :  { %13722 = vmatpush3.bf16.msra.mxu0 %v15995_v12 }
0x26c8   :  { %13723 = vmatprep.subr.bf16.mxu0 %v14895_v7 }
0x26cb   :  { %13724 = vmatpush3.bf16.msra.mxu0 %v16007_v53 }
0x26cc   :  { %13725 = vmatprep.subr.bf16.mxu0 %v14895_v7 }
0x26cf   :  { %13726 = vmatpush3.bf16.msra.mxu0 %v16015_v3 }
0x26d0   :  { %13727 = vmatprep.subr.bf16.mxu0 %v14895_v7 }
0x26d3   :  { %13728 = vmatpush3.bf16.msra.mxu0 %v15952_v57 }
0x26d4   :  { %13729 = vmatprep.subr.bf16.mxu0 %v14895_v7 }
0x26d7   :  { %13730 = vmatpush3.bf16.msra.mxu0 %v15950_v54 }
0x26d8   :  { %13761 = vmatprep.subr.bf16.mxu0 %v14895_v7 }
0x26da   :  { %13732 = vmatmul.mubr.bf16.vlgmr.msra.gmra.mxu0 %v11211_v62  ;;  %v7217_v62 = vsel %vm451_vm1, %v11224_v6, 0 }
0x26db   :  { %13763 = vmatprep.mubr.msk.bf16.mxu0 %vm14896_vm3, %v14895_v7  ;;  %13762 = vmatpush3.bf16.msra.mxu0 %v6941_v2 }
0x26dc   :  { %13767 = vmatprep.subr.bf16.mxu0 %v14895_v7 }
0x277a   :  { %v6793_v21 = vpop.f32.mrf.mxu0 }
0x277b   :  { %v6799_v58 = vadd.f32 %v6793_v21, %v6707_v8 }
0x277c   :  { %v13713_v0 = vpop.f32.mrf.mxu0 }
0x277e   :  { %v6796_v22 = vpop.f32.mrf.mxu0 }
0x2780   :  { %v13714_v61 = vpop.f32.mrf.mxu0 }
0x279a   :  { %v6836_v15 = vpop.f32.mrf.mxu0 }
0x279b   :  { %v6842_v24 = vpack.c.bf16 %v6836_v15, %v6836_v15 }
0x279c   :  { %v13733_v33 = vpop.f32.mrf.mxu0 }
0x279d   :  { %13738 = vmatmul.mubr.msk.bf16.vlgmr.msra.gmra.mxu1 %vm444_vm2, %v6842_v24 }
0x279e   :  { %13742 = vmatpush3.bf16.msra.mxu1 %v15967_v41  ;;  %v6839_v25 = vpop.f32.mrf.mxu0  ;;  %13757 = vmatprep.mubr.msk.bf16.mxu1 %vm14896_vm3, %v14895_v7 }
0x279f   :  { %13743 = vmatprep.subr.bf16.mxu1 %v14895_v7  ;;  %v11226_v25 = vld [vmem:[%s17943_s8 + $0x7c] sm:$0xf] }
0x27a0   :  { %v13734_v59 = vpop.f32.mrf.mxu0 }
0x27a1   :  { %v11227_v59 = vld [vmem:[%s17944_s9 + $0x7c] sm:$0xf] }
0x27a2   :  { %13744 = vmatpush3.bf16.msra.mxu1 %v15973_v51 }
0x27a3   :  { %13745 = vmatprep.subr.bf16.mxu1 %v14895_v7 }
0x27a6   :  { %13746 = vmatpush3.bf16.msra.mxu1 %v15983_v1 }
0x27a7   :  { %13747 = vmatprep.subr.bf16.mxu1 %v14895_v7 }
0x27aa   :  { %13748 = vmatpush3.bf16.msra.mxu1 %v15995_v12 }
0x27ab   :  { %13749 = vmatprep.subr.bf16.mxu1 %v14895_v7 }
0x27ae   :  { %13750 = vmatpush3.bf16.msra.mxu1 %v16007_v53 }
0x27af   :  { %13751 = vmatprep.subr.bf16.mxu1 %v14895_v7 }
0x27b2   :  { %13752 = vmatpush3.bf16.msra.mxu1 %v16015_v3 }
0x27b3   :  { %13753 = vmatprep.subr.bf16.mxu1 %v14895_v7 }
0x27b6   :  { %13754 = vmatpush3.bf16.msra.mxu1 %v15952_v57 }
0x27b7   :  { %13755 = vmatprep.subr.bf16.mxu1 %v14895_v7 }
0x27ba   :  { %13756 = vmatpush3.bf16.msra.mxu1 %v15950_v54 }
0x27bb   :  { %13787 = vmatprep.subr.bf16.mxu1 %v14895_v7 }
0x27bd   :  { %13758 = vmatmul.mubr.bf16.vlgmr.msra.gmra.mxu1 %v11214_v18  ;;  %v7309_v18 = vsel %vm451_vm1, %v11227_v59, 0 }
0x27be   :  { %13789 = vmatprep.mubr.msk.bf16.mxu1 %vm14896_vm3, %v14895_v7  ;;  %13788 = vmatpush3.bf16.msra.mxu1 %v7033_v42 }
0x27bf   :  { %13793 = vmatprep.subr.bf16.mxu1 %v14895_v7 }
0x285d   :  { %v6885_v26 = vpop.f32.mrf.mxu1 }
0x285e   :  { %v6891_v27 = vadd.f32 %v6885_v26, %v6799_v58 }
0x285f   :  { %v13739_v13 = vpop.f32.mrf.mxu1 }
0x2861   :  { %v6888_v23 = vpop.f32.mrf.mxu1 }
0x2863   :  { %v13740_v28 = vpop.f32.mrf.mxu1 }
0x287d   :  { %v6928_v29 = vpop.f32.mrf.mxu1 }
0x287e   :  { %v6934_v30 = vpack.c.bf16 %v6928_v29, %v6928_v29 }
0x287f   :  { %v13759_v31 = vpop.f32.mrf.mxu1 }
0x2880   :  { %13764 = vmatmul.mubr.msk.bf16.vlgmr.msra.gmra.mxu0 %vm444_vm2, %v6934_v30 }
0x2881   :  { %13768 = vmatpush3.bf16.msra.mxu0 %v15967_v41  ;;  %v6931_v32 = vpop.f32.mrf.mxu1  ;;  %13783 = vmatprep.mubr.msk.bf16.mxu0 %vm14896_vm3, %v14895_v7 }
0x2882   :  { %13769 = vmatprep.subr.bf16.mxu0 %v14895_v7  ;;  %v11229_v32 = vld [vmem:[%s17943_s8 + $0x80] sm:$0xf] }
0x2883   :  { %v13760_v35 = vpop.f32.mrf.mxu1 }
0x2884   :  { %v11230_v35 = vld [vmem:[%s17944_s9 + $0x80] sm:$0xf] }
0x2885   :  { %13770 = vmatpush3.bf16.msra.mxu0 %v15973_v51 }
0x2886   :  { %13771 = vmatprep.subr.bf16.mxu0 %v14895_v7 }
0x2889   :  { %13772 = vmatpush3.bf16.msra.mxu0 %v15983_v1 }
0x288a   :  { %13773 = vmatprep.subr.bf16.mxu0 %v14895_v7 }
0x288d   :  { %13774 = vmatpush3.bf16.msra.mxu0 %v15995_v12 }
0x288e   :  { %13775 = vmatprep.subr.bf16.mxu0 %v14895_v7 }
0x2891   :  { %13776 = vmatpush3.bf16.msra.mxu0 %v16007_v53 }
0x2892   :  { %13777 = vmatprep.subr.bf16.mxu0 %v14895_v7 }
0x2895   :  { %13778 = vmatpush3.bf16.msra.mxu0 %v16015_v3 }
0x2896   :  { %13779 = vmatprep.subr.bf16.mxu0 %v14895_v7 }
0x2899   :  { %13780 = vmatpush3.bf16.msra.mxu0 %v15952_v57 }
0x289a   :  { %13781 = vmatprep.subr.bf16.mxu0 %v14895_v7 }
0x289d   :  { %13782 = vmatpush3.bf16.msra.mxu0 %v15950_v54 }
0x289e   :  { %13813 = vmatprep.subr.bf16.mxu0 %v14895_v7 }
0x28a0   :  { %13784 = vmatmul.mubr.bf16.vlgmr.msra.gmra.mxu0 %v11217_v37  ;;  %v7401_v37 = vsel %vm451_vm1, %v11230_v35, 0 }
0x28a1   :  { %13815 = vmatprep.mubr.msk.bf16.mxu0 %vm14896_vm3, %v14895_v7  ;;  %13814 = vmatpush3.bf16.msra.mxu0 %v7125_v56 }
0x28a2   :  { %13819 = vmatprep.subr.bf16.mxu0 %v14895_v7 }
0x2940   :  { %v6977_v43 = vpop.f32.mrf.mxu0 }
0x2941   :  { %v6983_v46 = vadd.f32 %v6977_v43, %v6891_v27 }
0x2942   :  { %v13765_v47 = vpop.f32.mrf.mxu0 }
0x2944   :  { %v6980_v48 = vpop.f32.mrf.mxu0 }
0x2946   :  { %v13766_v49 = vpop.f32.mrf.mxu0 }
0x2960   :  { %v7020_v52 = vpop.f32.mrf.mxu0 }
0x2961   :  { %v7026_v36 = vpack.c.bf16 %v7020_v52, %v7020_v52 }
0x2962   :  { %v13785_v40 = vpop.f32.mrf.mxu0 }
0x2963   :  { %13790 = vmatmul.mubr.msk.bf16.vlgmr.msra.gmra.mxu1 %vm444_vm2, %v7026_v36 }
0x2964   :  { %13794 = vmatpush3.bf16.msra.mxu1 %v15967_v41  ;;  %v7023_v45 = vpop.f32.mrf.mxu0  ;;  %13809 = vmatprep.mubr.msk.bf16.mxu1 %vm14896_vm3, %v14895_v7 }
0x2965   :  { %13795 = vmatprep.subr.bf16.mxu1 %v14895_v7  ;;  %v11232_v45 = vld [vmem:[%s17943_s8 + $0x84] sm:$0xf] }
0x2966   :  { %v13786_v50 = vpop.f32.mrf.mxu0 }
0x2967   :  { %v11233_v50 = vld [vmem:[%s17944_s9 + $0x84] sm:$0xf] }
0x2968   :  { %13796 = vmatpush3.bf16.msra.mxu1 %v15973_v51 }
0x2969   :  { %13797 = vmatprep.subr.bf16.mxu1 %v14895_v7 }
0x296c   :  { %13798 = vmatpush3.bf16.msra.mxu1 %v15983_v1 }
0x296d   :  { %13799 = vmatprep.subr.bf16.mxu1 %v14895_v7 }
0x2970   :  { %13800 = vmatpush3.bf16.msra.mxu1 %v15995_v12 }
0x2971   :  { %13801 = vmatprep.subr.bf16.mxu1 %v14895_v7 }
0x2974   :  { %13802 = vmatpush3.bf16.msra.mxu1 %v16007_v53 }
0x2975   :  { %13803 = vmatprep.subr.bf16.mxu1 %v14895_v7 }
0x2978   :  { %13804 = vmatpush3.bf16.msra.mxu1 %v16015_v3 }
0x2979   :  { %13805 = vmatprep.subr.bf16.mxu1 %v14895_v7 }
0x297c   :  { %13806 = vmatpush3.bf16.msra.mxu1 %v15952_v57 }
0x297d   :  { %13807 = vmatprep.subr.bf16.mxu1 %v14895_v7 }
0x2980   :  { %13808 = vmatpush3.bf16.msra.mxu1 %v15950_v54 }
0x2981   :  { %13839 = vmatprep.subr.bf16.mxu1 %v14895_v7 }
0x2983   :  { %13810 = vmatmul.mubr.bf16.vlgmr.msra.gmra.mxu1 %v11220_v55  ;;  %v7493_v55 = vsel %vm451_vm1, %v11233_v50, 0 }
0x2984   :  { %13841 = vmatprep.mubr.msk.bf16.mxu1 %vm14896_vm3, %v14895_v7  ;;  %13840 = vmatpush3.bf16.msra.mxu1 %v7217_v62 }
0x2985   :  { %13845 = vmatprep.subr.bf16.mxu1 %v14895_v7 }
0x2a23   :  { %v7069_v63 = vpop.f32.mrf.mxu1 }
0x2a24   :  { %v7075_v4 = vadd.f32 %v7069_v63, %v6983_v46 }
0x2a25   :  { %v13791_v5 = vpop.f32.mrf.mxu1 }
0x2a27   :  { %v7072_v8 = vpop.f32.mrf.mxu1 }
0x2a29   :  { %v13792_v11 = vpop.f32.mrf.mxu1 }
0x2a43   :  { %v7112_v14 = vpop.f32.mrf.mxu1 }
0x2a44   :  { %v7118_v16 = vpack.c.bf16 %v7112_v14, %v7112_v14 }
0x2a45   :  { %v13811_v19 = vpop.f32.mrf.mxu1 }
0x2a46   :  { %13816 = vmatmul.mubr.msk.bf16.vlgmr.msra.gmra.mxu0 %vm444_vm2, %v7118_v16 }
0x2a47   :  { %13820 = vmatpush3.bf16.msra.mxu0 %v15967_v41  ;;  %v7115_v9 = vpop.f32.mrf.mxu1  ;;  %13835 = vmatprep.mubr.msk.bf16.mxu0 %vm14896_vm3, %v14895_v7 }
0x2a48   :  { %13821 = vmatprep.subr.bf16.mxu0 %v14895_v7  ;;  %v11235_v9 = vld [vmem:[%s17943_s8 + $0x88] sm:$0xf] }
0x2a49   :  { %v13812_v20 = vpop.f32.mrf.mxu1 }
0x2a4a   :  { %v11236_v20 = vld [vmem:[%s17944_s9 + $0x88] sm:$0xf] }
0x2a4b   :  { %13822 = vmatpush3.bf16.msra.mxu0 %v15973_v51 }
0x2a4c   :  { %13823 = vmatprep.subr.bf16.mxu0 %v14895_v7 }
0x2a4f   :  { %13824 = vmatpush3.bf16.msra.mxu0 %v15983_v1 }
0x2a50   :  { %13825 = vmatprep.subr.bf16.mxu0 %v14895_v7 }
0x2a53   :  { %13826 = vmatpush3.bf16.msra.mxu0 %v15995_v12 }
0x2a54   :  { %13827 = vmatprep.subr.bf16.mxu0 %v14895_v7 }
0x2a57   :  { %13828 = vmatpush3.bf16.msra.mxu0 %v16007_v53 }
0x2a58   :  { %13829 = vmatprep.subr.bf16.mxu0 %v14895_v7 }
0x2a5b   :  { %13830 = vmatpush3.bf16.msra.mxu0 %v16015_v3 }
0x2a5c   :  { %13831 = vmatprep.subr.bf16.mxu0 %v14895_v7 }
0x2a5f   :  { %13832 = vmatpush3.bf16.msra.mxu0 %v15952_v57 }
0x2a60   :  { %13833 = vmatprep.subr.bf16.mxu0 %v14895_v7 }
0x2a63   :  { %13834 = vmatpush3.bf16.msra.mxu0 %v15950_v54 }
0x2a64   :  { %13865 = vmatprep.subr.bf16.mxu0 %v14895_v7 }
0x2a66   :  { %13836 = vmatmul.mubr.bf16.vlgmr.msra.gmra.mxu0 %v11223_v44  ;;  %v7585_v44 = vsel %vm451_vm1, %v11236_v20, 0 }
0x2a67   :  { %13867 = vmatprep.mubr.msk.bf16.mxu0 %vm14896_vm3, %v14895_v7  ;;  %13866 = vmatpush3.bf16.msra.mxu0 %v7309_v18 }
0x2a68   :  { %13871 = vmatprep.subr.bf16.mxu0 %v14895_v7 }
0x2b06   :  { %v7161_v17 = vpop.f32.mrf.mxu0 }
0x2b07   :  { %v7167_v34 = vadd.f32 %v7161_v17, %v7075_v4 }
0x2b08   :  { %v13817_v21 = vpop.f32.mrf.mxu0 }
0x2b0a   :  { %v7164_v58 = vpop.f32.mrf.mxu0 }
0x2b0c   :  { %v13818_v0 = vpop.f32.mrf.mxu0 }
0x2b26   :  { %v7204_v22 = vpop.f32.mrf.mxu0 }
0x2b27   :  { %v7210_v61 = vpack.c.bf16 %v7204_v22, %v7204_v22 }
0x2b28   :  { %v13837_v15 = vpop.f32.mrf.mxu0 }
0x2b29   :  { %13842 = vmatmul.mubr.msk.bf16.vlgmr.msra.gmra.mxu1 %vm444_vm2, %v7210_v61 }
0x2b2a   :  { %13846 = vmatpush3.bf16.msra.mxu1 %v15967_v41  ;;  %v7207_v24 = vpop.f32.mrf.mxu0  ;;  %13861 = vmatprep.mubr.msk.bf16.mxu1 %vm14896_vm3, %v14895_v7 }
0x2b2b   :  { %13847 = vmatprep.subr.bf16.mxu1 %v14895_v7  ;;  %v11238_v24 = vld [vmem:[%s17943_s8 + $0x8c] sm:$0xf] }
0x2b2c   :  { %v13838_v33 = vpop.f32.mrf.mxu0 }
0x2b2d   :  { %v11239_v33 = vld [vmem:[%s17944_s9 + $0x8c] sm:$0xf] }
0x2b2e   :  { %13848 = vmatpush3.bf16.msra.mxu1 %v15973_v51 }
0x2b2f   :  { %13849 = vmatprep.subr.bf16.mxu1 %v14895_v7 }
0x2b32   :  { %13850 = vmatpush3.bf16.msra.mxu1 %v15983_v1 }
0x2b33   :  { %13851 = vmatprep.subr.bf16.mxu1 %v14895_v7 }
0x2b36   :  { %13852 = vmatpush3.bf16.msra.mxu1 %v15995_v12 }
0x2b37   :  { %13853 = vmatprep.subr.bf16.mxu1 %v14895_v7 }
0x2b3a   :  { %13854 = vmatpush3.bf16.msra.mxu1 %v16007_v53 }
0x2b3b   :  { %13855 = vmatprep.subr.bf16.mxu1 %v14895_v7 }
0x2b3e   :  { %13856 = vmatpush3.bf16.msra.mxu1 %v16015_v3 }
0x2b3f   :  { %13857 = vmatprep.subr.bf16.mxu1 %v14895_v7 }
0x2b42   :  { %13858 = vmatpush3.bf16.msra.mxu1 %v15952_v57 }
0x2b43   :  { %13859 = vmatprep.subr.bf16.mxu1 %v14895_v7 }
0x2b46   :  { %13860 = vmatpush3.bf16.msra.mxu1 %v15950_v54 }
0x2b47   :  { %13891 = vmatprep.subr.bf16.mxu1 %v14895_v7 }
0x2b49   :  { %13862 = vmatmul.mubr.bf16.vlgmr.msra.gmra.mxu1 %v11226_v25  ;;  %v7677_v25 = vsel %vm451_vm1, %v11239_v33, 0 }
0x2b4a   :  { %13893 = vmatprep.mubr.msk.bf16.mxu1 %vm14896_vm3, %v14895_v7  ;;  %13892 = vmatpush3.bf16.msra.mxu1 %v7401_v37 }
0x2b4b   :  { %13897 = vmatprep.subr.bf16.mxu1 %v14895_v7 }
0x2be9   :  { %v7253_v38 = vpop.f32.mrf.mxu1 }
0x2bea   :  { %v7259_v2 = vadd.f32 %v7253_v38, %v7167_v34 }
0x2beb   :  { %v13843_v26 = vpop.f32.mrf.mxu1 }
0x2bed   :  { %v7256_v27 = vpop.f32.mrf.mxu1 }
0x2bef   :  { %v13844_v13 = vpop.f32.mrf.mxu1 }
0x2c09   :  { %v7296_v23 = vpop.f32.mrf.mxu1 }
0x2c0a   :  { %v7302_v28 = vpack.c.bf16 %v7296_v23, %v7296_v23 }
0x2c0b   :  { %v13863_v29 = vpop.f32.mrf.mxu1 }
0x2c0c   :  { %13868 = vmatmul.mubr.msk.bf16.vlgmr.msra.gmra.mxu0 %vm444_vm2, %v7302_v28 }
0x2c0d   :  { %13872 = vmatpush3.bf16.msra.mxu0 %v15967_v41  ;;  %v7299_v30 = vpop.f32.mrf.mxu1  ;;  %13887 = vmatprep.mubr.msk.bf16.mxu0 %vm14896_vm3, %v14895_v7 }
0x2c0e   :  { %13873 = vmatprep.subr.bf16.mxu0 %v14895_v7  ;;  %v11241_v30 = vld [vmem:[%s17943_s8 + $0x90] sm:$0xf] }
0x2c0f   :  { %v13864_v31 = vpop.f32.mrf.mxu1 }
0x2c10   :  { %v11242_v31 = vld [vmem:[%s17944_s9 + $0x90] sm:$0xf] }
0x2c11   :  { %13874 = vmatpush3.bf16.msra.mxu0 %v15973_v51 }
0x2c12   :  { %13875 = vmatprep.subr.bf16.mxu0 %v14895_v7 }
0x2c15   :  { %13876 = vmatpush3.bf16.msra.mxu0 %v15983_v1 }
0x2c16   :  { %13877 = vmatprep.subr.bf16.mxu0 %v14895_v7 }
0x2c19   :  { %13878 = vmatpush3.bf16.msra.mxu0 %v15995_v12 }
0x2c1a   :  { %13879 = vmatprep.subr.bf16.mxu0 %v14895_v7 }
0x2c1d   :  { %13880 = vmatpush3.bf16.msra.mxu0 %v16007_v53 }
0x2c1e   :  { %13881 = vmatprep.subr.bf16.mxu0 %v14895_v7 }
0x2c21   :  { %13882 = vmatpush3.bf16.msra.mxu0 %v16015_v3 }
0x2c22   :  { %13883 = vmatprep.subr.bf16.mxu0 %v14895_v7 }
0x2c25   :  { %13884 = vmatpush3.bf16.msra.mxu0 %v15952_v57 }
0x2c26   :  { %13885 = vmatprep.subr.bf16.mxu0 %v14895_v7 }
0x2c29   :  { %13886 = vmatpush3.bf16.msra.mxu0 %v15950_v54 }
0x2c2a   :  { %13917 = vmatprep.subr.bf16.mxu0 %v14895_v7 }
0x2c2c   :  { %13888 = vmatmul.mubr.bf16.vlgmr.msra.gmra.mxu0 %v11229_v32  ;;  %v7769_v32 = vsel %vm451_vm1, %v11242_v31, 0 }
0x2c2d   :  { %13919 = vmatprep.mubr.msk.bf16.mxu0 %vm14896_vm3, %v14895_v7  ;;  %13918 = vmatpush3.bf16.msra.mxu0 %v7493_v55 }
0x2c2e   :  { %13923 = vmatprep.subr.bf16.mxu0 %v14895_v7 }
0x2ccc   :  { %v7345_v39 = vpop.f32.mrf.mxu0 }
0x2ccd   :  { %v7351_v42 = vadd.f32 %v7345_v39, %v7259_v2 }
0x2cce   :  { %v13869_v43 = vpop.f32.mrf.mxu0 }
0x2cd0   :  { %v7348_v46 = vpop.f32.mrf.mxu0 }
0x2cd2   :  { %v13870_v47 = vpop.f32.mrf.mxu0 }
0x2cec   :  { %v7388_v48 = vpop.f32.mrf.mxu0 }
0x2ced   :  { %v7394_v49 = vpack.c.bf16 %v7388_v48, %v7388_v48 }
0x2cee   :  { %v13889_v52 = vpop.f32.mrf.mxu0 }
0x2cef   :  { %13894 = vmatmul.mubr.msk.bf16.vlgmr.msra.gmra.mxu1 %vm444_vm2, %v7394_v49 }
0x2cf0   :  { %13898 = vmatpush3.bf16.msra.mxu1 %v15967_v41  ;;  %v7391_v36 = vpop.f32.mrf.mxu0  ;;  %13913 = vmatprep.mubr.msk.bf16.mxu1 %vm14896_vm3, %v14895_v7 }
0x2cf1   :  { %13899 = vmatprep.subr.bf16.mxu1 %v14895_v7  ;;  %v11244_v36 = vld [vmem:[%s17943_s8 + $0x94] sm:$0xf] }
0x2cf2   :  { %v13890_v40 = vpop.f32.mrf.mxu0 }
0x2cf3   :  { %v11245_v40 = vld [vmem:[%s17944_s9 + $0x94] sm:$0xf] }
0x2cf4   :  { %13900 = vmatpush3.bf16.msra.mxu1 %v15973_v51 }
0x2cf5   :  { %13901 = vmatprep.subr.bf16.mxu1 %v14895_v7 }
0x2cf8   :  { %13902 = vmatpush3.bf16.msra.mxu1 %v15983_v1 }
0x2cf9   :  { %13903 = vmatprep.subr.bf16.mxu1 %v14895_v7 }
0x2cfc   :  { %13904 = vmatpush3.bf16.msra.mxu1 %v15995_v12 }
0x2cfd   :  { %13905 = vmatprep.subr.bf16.mxu1 %v14895_v7 }
0x2d00   :  { %13906 = vmatpush3.bf16.msra.mxu1 %v16007_v53 }
0x2d01   :  { %13907 = vmatprep.subr.bf16.mxu1 %v14895_v7 }
0x2d04   :  { %13908 = vmatpush3.bf16.msra.mxu1 %v16015_v3 }
0x2d05   :  { %13909 = vmatprep.subr.bf16.mxu1 %v14895_v7 }
0x2d08   :  { %13910 = vmatpush3.bf16.msra.mxu1 %v15952_v57 }
0x2d09   :  { %13911 = vmatprep.subr.bf16.mxu1 %v14895_v7 }
0x2d0c   :  { %13912 = vmatpush3.bf16.msra.mxu1 %v15950_v54 }
0x2d0d   :  { %13943 = vmatprep.subr.bf16.mxu1 %v14895_v7 }
0x2d0f   :  { %13914 = vmatmul.mubr.bf16.vlgmr.msra.gmra.mxu1 %v11232_v45  ;;  %v7861_v45 = vsel %vm451_vm1, %v11245_v40, 0 }
0x2d10   :  { %13945 = vmatprep.mubr.msk.bf16.mxu1 %vm14896_vm3, %v14895_v7  ;;  %13944 = vmatpush3.bf16.msra.mxu1 %v7585_v44 }
0x2d11   :  { %13949 = vmatprep.subr.bf16.mxu1 %v14895_v7 }
0x2daf   :  { %v7437_v60 = vpop.f32.mrf.mxu1 }
0x2db0   :  { %v7443_v56 = vadd.f32 %v7437_v60, %v7351_v42 }
0x2db1   :  { %v13895_v63 = vpop.f32.mrf.mxu1 }
0x2db3   :  { %v7440_v4 = vpop.f32.mrf.mxu1 }
0x2db5   :  { %v13896_v5 = vpop.f32.mrf.mxu1 }
0x2dcf   :  { %v7480_v8 = vpop.f32.mrf.mxu1 }
0x2dd0   :  { %v7486_v11 = vpack.c.bf16 %v7480_v8, %v7480_v8 }
0x2dd1   :  { %v13915_v14 = vpop.f32.mrf.mxu1 }
0x2dd2   :  { %13920 = vmatmul.mubr.msk.bf16.vlgmr.msra.gmra.mxu0 %vm444_vm2, %v7486_v11 }
0x2dd3   :  { %13924 = vmatpush3.bf16.msra.mxu0 %v15967_v41  ;;  %v7483_v16 = vpop.f32.mrf.mxu1  ;;  %13939 = vmatprep.mubr.msk.bf16.mxu0 %vm14896_vm3, %v14895_v7 }
0x2dd4   :  { %13925 = vmatprep.subr.bf16.mxu0 %v14895_v7  ;;  %v11247_v16 = vld [vmem:[%s17943_s8 + $0x98] sm:$0xf] }
0x2dd5   :  { %v13916_v19 = vpop.f32.mrf.mxu1 }
0x2dd6   :  { %v11248_v19 = vld [vmem:[%s17944_s9 + $0x98] sm:$0xf] }
0x2dd7   :  { %13926 = vmatpush3.bf16.msra.mxu0 %v15973_v51 }
0x2dd8   :  { %13927 = vmatprep.subr.bf16.mxu0 %v14895_v7 }
0x2ddb   :  { %13928 = vmatpush3.bf16.msra.mxu0 %v15983_v1 }
0x2ddc   :  { %13929 = vmatprep.subr.bf16.mxu0 %v14895_v7 }
0x2ddf   :  { %13930 = vmatpush3.bf16.msra.mxu0 %v15995_v12 }
0x2de0   :  { %13931 = vmatprep.subr.bf16.mxu0 %v14895_v7 }
0x2de3   :  { %13932 = vmatpush3.bf16.msra.mxu0 %v16007_v53 }
0x2de4   :  { %13933 = vmatprep.subr.bf16.mxu0 %v14895_v7 }
0x2de7   :  { %13934 = vmatpush3.bf16.msra.mxu0 %v16015_v3 }
0x2de8   :  { %13935 = vmatprep.subr.bf16.mxu0 %v14895_v7 }
0x2deb   :  { %13936 = vmatpush3.bf16.msra.mxu0 %v15952_v57 }
0x2dec   :  { %13937 = vmatprep.subr.bf16.mxu0 %v14895_v7 }
0x2def   :  { %13938 = vmatpush3.bf16.msra.mxu0 %v15950_v54 }
0x2df0   :  { %13969 = vmatprep.subr.bf16.mxu0 %v14895_v7 }
0x2df2   :  { %13940 = vmatmul.mubr.bf16.vlgmr.msra.gmra.mxu0 %v11235_v9  ;;  %v7953_v9 = vsel %vm451_vm1, %v11248_v19, 0 }
0x2df3   :  { %13971 = vmatprep.mubr.msk.bf16.mxu0 %vm14896_vm3, %v14895_v7  ;;  %13970 = vmatpush3.bf16.msra.mxu0 %v7677_v25 }
0x2df4   :  { %13975 = vmatprep.subr.bf16.mxu0 %v14895_v7 }
0x2e92   :  { %v7529_v6 = vpop.f32.mrf.mxu0 }
0x2e93   :  { %v7535_v62 = vadd.f32 %v7529_v6, %v7443_v56 }
0x2e94   :  { %v13921_v17 = vpop.f32.mrf.mxu0 }
0x2e96   :  { %v7532_v34 = vpop.f32.mrf.mxu0 }
0x2e98   :  { %v13922_v21 = vpop.f32.mrf.mxu0 }
0x2eb2   :  { %v7572_v58 = vpop.f32.mrf.mxu0 }
0x2eb3   :  { %v7578_v0 = vpack.c.bf16 %v7572_v58, %v7572_v58 }
0x2eb4   :  { %v13941_v22 = vpop.f32.mrf.mxu0 }
0x2eb5   :  { %13946 = vmatmul.mubr.msk.bf16.vlgmr.msra.gmra.mxu1 %vm444_vm2, %v7578_v0 }
0x2eb6   :  { %13950 = vmatpush3.bf16.msra.mxu1 %v15967_v41  ;;  %v7575_v61 = vpop.f32.mrf.mxu0  ;;  %13965 = vmatprep.mubr.msk.bf16.mxu1 %vm14896_vm3, %v14895_v7 }
0x2eb7   :  { %13951 = vmatprep.subr.bf16.mxu1 %v14895_v7  ;;  %v11250_v61 = vld [vmem:[%s17943_s8 + $0x9c] sm:$0xf] }
0x2eb8   :  { %v13942_v15 = vpop.f32.mrf.mxu0 }
0x2eb9   :  { %v11251_v15 = vld [vmem:[%s17944_s9 + $0x9c] sm:$0xf] }
0x2eba   :  { %13952 = vmatpush3.bf16.msra.mxu1 %v15973_v51 }
0x2ebb   :  { %13953 = vmatprep.subr.bf16.mxu1 %v14895_v7 }
0x2ebe   :  { %13954 = vmatpush3.bf16.msra.mxu1 %v15983_v1 }
0x2ebf   :  { %13955 = vmatprep.subr.bf16.mxu1 %v14895_v7 }
0x2ec2   :  { %13956 = vmatpush3.bf16.msra.mxu1 %v15995_v12 }
0x2ec3   :  { %13957 = vmatprep.subr.bf16.mxu1 %v14895_v7 }
0x2ec6   :  { %13958 = vmatpush3.bf16.msra.mxu1 %v16007_v53 }
0x2ec7   :  { %13959 = vmatprep.subr.bf16.mxu1 %v14895_v7 }
0x2eca   :  { %13960 = vmatpush3.bf16.msra.mxu1 %v16015_v3 }
0x2ecb   :  { %13961 = vmatprep.subr.bf16.mxu1 %v14895_v7 }
0x2ece   :  { %13962 = vmatpush3.bf16.msra.mxu1 %v15952_v57 }
0x2ecf   :  { %13963 = vmatprep.subr.bf16.mxu1 %v14895_v7 }
0x2ed2   :  { %13964 = vmatpush3.bf16.msra.mxu1 %v15950_v54 }
0x2ed3   :  { %13995 = vmatprep.subr.bf16.mxu1 %v14895_v7 }
0x2ed5   :  { %13966 = vmatmul.mubr.bf16.vlgmr.msra.gmra.mxu1 %v11238_v24  ;;  %v8045_v24 = vsel %vm451_vm1, %v11251_v15, 0 }
0x2ed6   :  { %13997 = vmatprep.mubr.msk.bf16.mxu1 %vm14896_vm3, %v14895_v7  ;;  %13996 = vmatpush3.bf16.msra.mxu1 %v7769_v32 }
0x2ed7   :  { %14001 = vmatprep.subr.bf16.mxu1 %v14895_v7 }
0x2f75   :  { %v7621_v59 = vpop.f32.mrf.mxu1 }
0x2f76   :  { %v7627_v18 = vadd.f32 %v7621_v59, %v7535_v62 }
0x2f77   :  { %v13947_v38 = vpop.f32.mrf.mxu1 }
0x2f79   :  { %v7624_v2 = vpop.f32.mrf.mxu1 }
0x2f7b   :  { %v13948_v26 = vpop.f32.mrf.mxu1 }
0x2f95   :  { %v7664_v27 = vpop.f32.mrf.mxu1 }
0x2f96   :  { %v7670_v13 = vpack.c.bf16 %v7664_v27, %v7664_v27 }
0x2f97   :  { %v13967_v23 = vpop.f32.mrf.mxu1 }
0x2f98   :  { %13972 = vmatmul.mubr.msk.bf16.vlgmr.msra.gmra.mxu0 %vm444_vm2, %v7670_v13 }
0x2f99   :  { %13976 = vmatpush3.bf16.msra.mxu0 %v15967_v41  ;;  %v7667_v28 = vpop.f32.mrf.mxu1  ;;  %13991 = vmatprep.mubr.msk.bf16.mxu0 %vm14896_vm3, %v14895_v7 }
0x2f9a   :  { %13977 = vmatprep.subr.bf16.mxu0 %v14895_v7  ;;  %v11253_v28 = vld [vmem:[%s17943_s8 + $0xa0] sm:$0xf] }
0x2f9b   :  { %v13968_v29 = vpop.f32.mrf.mxu1 }
0x2f9c   :  { %v11254_v29 = vld [vmem:[%s17944_s9 + $0xa0] sm:$0xf] }
0x2f9d   :  { %13978 = vmatpush3.bf16.msra.mxu0 %v15973_v51 }
0x2f9e   :  { %13979 = vmatprep.subr.bf16.mxu0 %v14895_v7 }
0x2fa1   :  { %13980 = vmatpush3.bf16.msra.mxu0 %v15983_v1 }
0x2fa2   :  { %13981 = vmatprep.subr.bf16.mxu0 %v14895_v7 }
0x2fa5   :  { %13982 = vmatpush3.bf16.msra.mxu0 %v15995_v12 }
0x2fa6   :  { %13983 = vmatprep.subr.bf16.mxu0 %v14895_v7 }
0x2fa9   :  { %13984 = vmatpush3.bf16.msra.mxu0 %v16007_v53 }
0x2faa   :  { %13985 = vmatprep.subr.bf16.mxu0 %v14895_v7 }
0x2fad   :  { %13986 = vmatpush3.bf16.msra.mxu0 %v16015_v3 }
0x2fae   :  { %13987 = vmatprep.subr.bf16.mxu0 %v14895_v7 }
0x2fb1   :  { %13988 = vmatpush3.bf16.msra.mxu0 %v15952_v57 }
0x2fb2   :  { %13989 = vmatprep.subr.bf16.mxu0 %v14895_v7 }
0x2fb5   :  { %13990 = vmatpush3.bf16.msra.mxu0 %v15950_v54 }
0x2fb6   :  { %14021 = vmatprep.subr.bf16.mxu0 %v14895_v7 }
0x2fb8   :  { %13992 = vmatmul.mubr.bf16.vlgmr.msra.gmra.mxu0 %v11241_v30  ;;  %v8137_v30 = vsel %vm451_vm1, %v11254_v29, 0 }
0x2fb9   :  { %14023 = vmatprep.mubr.msk.bf16.mxu0 %vm14896_vm3, %v14895_v7  ;;  %14022 = vmatpush3.bf16.msra.mxu0 %v7861_v45 }
0x2fba   :  { %14027 = vmatprep.subr.bf16.mxu0 %v14895_v7 }
0x3058   :  { %v7713_v35 = vpop.f32.mrf.mxu0 }
0x3059   :  { %v7719_v37 = vadd.f32 %v7713_v35, %v7627_v18 }
0x305a   :  { %v13973_v39 = vpop.f32.mrf.mxu0 }
0x305c   :  { %v7716_v42 = vpop.f32.mrf.mxu0 }
0x305e   :  { %v13974_v43 = vpop.f32.mrf.mxu0 }
0x3078   :  { %v7756_v46 = vpop.f32.mrf.mxu0 }
0x3079   :  { %v7762_v47 = vpack.c.bf16 %v7756_v46, %v7756_v46 }
0x307a   :  { %v13993_v48 = vpop.f32.mrf.mxu0 }
0x307b   :  { %13998 = vmatmul.mubr.msk.bf16.vlgmr.msra.gmra.mxu1 %vm444_vm2, %v7762_v47 }
0x307c   :  { %14002 = vmatpush3.bf16.msra.mxu1 %v15967_v41  ;;  %v7759_v49 = vpop.f32.mrf.mxu0  ;;  %14017 = vmatprep.mubr.msk.bf16.mxu1 %vm14896_vm3, %v14895_v7 }
0x307d   :  { %14003 = vmatprep.subr.bf16.mxu1 %v14895_v7  ;;  %v11256_v49 = vld [vmem:[%s17943_s8 + $0xa4] sm:$0xf] }
0x307e   :  { %v13994_v52 = vpop.f32.mrf.mxu0 }
0x307f   :  { %v11257_v52 = vld [vmem:[%s17944_s9 + $0xa4] sm:$0xf] }
0x3080   :  { %14004 = vmatpush3.bf16.msra.mxu1 %v15973_v51 }
0x3081   :  { %14005 = vmatprep.subr.bf16.mxu1 %v14895_v7 }
0x3084   :  { %14006 = vmatpush3.bf16.msra.mxu1 %v15983_v1 }
0x3085   :  { %14007 = vmatprep.subr.bf16.mxu1 %v14895_v7 }
0x3088   :  { %14008 = vmatpush3.bf16.msra.mxu1 %v15995_v12 }
0x3089   :  { %14009 = vmatprep.subr.bf16.mxu1 %v14895_v7 }
0x308c   :  { %14010 = vmatpush3.bf16.msra.mxu1 %v16007_v53 }
0x308d   :  { %14011 = vmatprep.subr.bf16.mxu1 %v14895_v7 }
0x3090   :  { %14012 = vmatpush3.bf16.msra.mxu1 %v16015_v3 }
0x3091   :  { %14013 = vmatprep.subr.bf16.mxu1 %v14895_v7 }
0x3094   :  { %14014 = vmatpush3.bf16.msra.mxu1 %v15952_v57 }
0x3095   :  { %14015 = vmatprep.subr.bf16.mxu1 %v14895_v7 }
0x3098   :  { %14016 = vmatpush3.bf16.msra.mxu1 %v15950_v54 }
0x3099   :  { %14047 = vmatprep.subr.bf16.mxu1 %v14895_v7 }
0x309b   :  { %14018 = vmatmul.mubr.bf16.vlgmr.msra.gmra.mxu1 %v11244_v36  ;;  %v8229_v36 = vsel %vm451_vm1, %v11257_v52, 0 }
0x309c   :  { %14049 = vmatprep.mubr.msk.bf16.mxu1 %vm14896_vm3, %v14895_v7  ;;  %14048 = vmatpush3.bf16.msra.mxu1 %v7953_v9 }
0x309d   :  { %14053 = vmatprep.subr.bf16.mxu1 %v14895_v7 }
0x313b   :  { %v7805_v50 = vpop.f32.mrf.mxu1 }
0x313c   :  { %v7811_v55 = vadd.f32 %v7805_v50, %v7719_v37 }
0x313d   :  { %v13999_v60 = vpop.f32.mrf.mxu1 }
0x313f   :  { %v7808_v56 = vpop.f32.mrf.mxu1 }
0x3141   :  { %v14000_v63 = vpop.f32.mrf.mxu1 }
0x315b   :  { %v7848_v4 = vpop.f32.mrf.mxu1 }
0x315c   :  { %v7854_v5 = vpack.c.bf16 %v7848_v4, %v7848_v4 }
0x315d   :  { %v14019_v8 = vpop.f32.mrf.mxu1 }
0x315e   :  { %14024 = vmatmul.mubr.msk.bf16.vlgmr.msra.gmra.mxu0 %vm444_vm2, %v7854_v5 }
0x315f   :  { %14028 = vmatpush3.bf16.msra.mxu0 %v15967_v41  ;;  %v7851_v11 = vpop.f32.mrf.mxu1  ;;  %14043 = vmatprep.mubr.msk.bf16.mxu0 %vm14896_vm3, %v14895_v7 }
0x3160   :  { %14029 = vmatprep.subr.bf16.mxu0 %v14895_v7  ;;  %v11259_v11 = vld [vmem:[%s17943_s8 + $0xa8] sm:$0xf] }
0x3161   :  { %v14020_v14 = vpop.f32.mrf.mxu1 }
0x3162   :  { %v11260_v14 = vld [vmem:[%s17944_s9 + $0xa8] sm:$0xf] }
0x3163   :  { %14030 = vmatpush3.bf16.msra.mxu0 %v15973_v51 }
0x3164   :  { %14031 = vmatprep.subr.bf16.mxu0 %v14895_v7 }
0x3167   :  { %14032 = vmatpush3.bf16.msra.mxu0 %v15983_v1 }
0x3168   :  { %14033 = vmatprep.subr.bf16.mxu0 %v14895_v7 }
0x316b   :  { %14034 = vmatpush3.bf16.msra.mxu0 %v15995_v12 }
0x316c   :  { %14035 = vmatprep.subr.bf16.mxu0 %v14895_v7 }
0x316f   :  { %14036 = vmatpush3.bf16.msra.mxu0 %v16007_v53 }
0x3170   :  { %14037 = vmatprep.subr.bf16.mxu0 %v14895_v7 }
0x3173   :  { %14038 = vmatpush3.bf16.msra.mxu0 %v16015_v3 }
0x3174   :  { %14039 = vmatprep.subr.bf16.mxu0 %v14895_v7 }
0x3177   :  { %14040 = vmatpush3.bf16.msra.mxu0 %v15952_v57 }
0x3178   :  { %14041 = vmatprep.subr.bf16.mxu0 %v14895_v7 }
0x317b   :  { %14042 = vmatpush3.bf16.msra.mxu0 %v15950_v54 }
0x317c   :  { %14073 = vmatprep.subr.bf16.mxu0 %v14895_v7 }
0x317e   :  { %14044 = vmatmul.mubr.bf16.vlgmr.msra.gmra.mxu0 %v11247_v16  ;;  %v8321_v16 = vsel %vm451_vm1, %v11260_v14, 0 }
0x317f   :  { %14075 = vmatprep.mubr.msk.bf16.mxu0 %vm14896_vm3, %v14895_v7  ;;  %14074 = vmatpush3.bf16.msra.mxu0 %v8045_v24 }
0x3180   :  { %14079 = vmatprep.subr.bf16.mxu0 %v14895_v7 }
0x321e   :  { %v7897_v20 = vpop.f32.mrf.mxu0 }
0x321f   :  { %v7903_v44 = vadd.f32 %v7897_v20, %v7811_v55 }
0x3220   :  { %v14025_v6 = vpop.f32.mrf.mxu0 }
0x3222   :  { %v7900_v62 = vpop.f32.mrf.mxu0 }
0x3224   :  { %v14026_v17 = vpop.f32.mrf.mxu0 }
0x323e   :  { %v7940_v34 = vpop.f32.mrf.mxu0 }
0x323f   :  { %v7946_v21 = vpack.c.bf16 %v7940_v34, %v7940_v34 }
0x3240   :  { %v14045_v58 = vpop.f32.mrf.mxu0 }
0x3241   :  { %14050 = vmatmul.mubr.msk.bf16.vlgmr.msra.gmra.mxu1 %vm444_vm2, %v7946_v21 }
0x3242   :  { %14054 = vmatpush3.bf16.msra.mxu1 %v15967_v41  ;;  %v7943_v0 = vpop.f32.mrf.mxu0  ;;  %14069 = vmatprep.mubr.msk.bf16.mxu1 %vm14896_vm3, %v14895_v7 }
0x3243   :  { %14055 = vmatprep.subr.bf16.mxu1 %v14895_v7  ;;  %v11262_v0 = vld [vmem:[%s17943_s8 + $0xac] sm:$0xf] }
0x3244   :  { %v14046_v22 = vpop.f32.mrf.mxu0 }
0x3245   :  { %v11263_v22 = vld [vmem:[%s17944_s9 + $0xac] sm:$0xf] }
0x3246   :  { %14056 = vmatpush3.bf16.msra.mxu1 %v15973_v51 }
0x3247   :  { %14057 = vmatprep.subr.bf16.mxu1 %v14895_v7 }
0x324a   :  { %14058 = vmatpush3.bf16.msra.mxu1 %v15983_v1 }
0x324b   :  { %14059 = vmatprep.subr.bf16.mxu1 %v14895_v7 }
0x324e   :  { %14060 = vmatpush3.bf16.msra.mxu1 %v15995_v12 }
0x324f   :  { %14061 = vmatprep.subr.bf16.mxu1 %v14895_v7 }
0x3252   :  { %14062 = vmatpush3.bf16.msra.mxu1 %v16007_v53 }
0x3253   :  { %14063 = vmatprep.subr.bf16.mxu1 %v14895_v7 }
0x3256   :  { %14064 = vmatpush3.bf16.msra.mxu1 %v16015_v3 }
0x3257   :  { %14065 = vmatprep.subr.bf16.mxu1 %v14895_v7 }
0x325a   :  { %14066 = vmatpush3.bf16.msra.mxu1 %v15952_v57 }
0x325b   :  { %14067 = vmatprep.subr.bf16.mxu1 %v14895_v7 }
0x325e   :  { %14068 = vmatpush3.bf16.msra.mxu1 %v15950_v54 }
0x325f   :  { %14099 = vmatprep.subr.bf16.mxu1 %v14895_v7 }
0x3261   :  { %14070 = vmatmul.mubr.bf16.vlgmr.msra.gmra.mxu1 %v11250_v61  ;;  %v8413_v61 = vsel %vm451_vm1, %v11263_v22, 0 }
0x3262   :  { %14101 = vmatprep.mubr.msk.bf16.mxu1 %vm14896_vm3, %v14895_v7  ;;  %14100 = vmatpush3.bf16.msra.mxu1 %v8137_v30 }
0x3263   :  { %14105 = vmatprep.subr.bf16.mxu1 %v14895_v7 }
0x3301   :  { %v7989_v33 = vpop.f32.mrf.mxu1 }
0x3302   :  { %v7995_v25 = vadd.f32 %v7989_v33, %v7903_v44 }
0x3303   :  { %v14051_v59 = vpop.f32.mrf.mxu1 }
0x3305   :  { %v7992_v18 = vpop.f32.mrf.mxu1 }
0x3307   :  { %v14052_v38 = vpop.f32.mrf.mxu1 }
0x3321   :  { %v8032_v2 = vpop.f32.mrf.mxu1 }
0x3322   :  { %v8038_v26 = vpack.c.bf16 %v8032_v2, %v8032_v2 }
0x3323   :  { %v14071_v27 = vpop.f32.mrf.mxu1 }
0x3324   :  { %14076 = vmatmul.mubr.msk.bf16.vlgmr.msra.gmra.mxu0 %vm444_vm2, %v8038_v26 }
0x3325   :  { %14080 = vmatpush3.bf16.msra.mxu0 %v15967_v41  ;;  %v8035_v13 = vpop.f32.mrf.mxu1  ;;  %14095 = vmatprep.mubr.msk.bf16.mxu0 %vm14896_vm3, %v14895_v7 }
0x3326   :  { %14081 = vmatprep.subr.bf16.mxu0 %v14895_v7  ;;  %v11265_v13 = vld [vmem:[%s17943_s8 + $0xb0] sm:$0xf] }
0x3327   :  { %v14072_v23 = vpop.f32.mrf.mxu1 }
0x3328   :  { %v11266_v23 = vld [vmem:[%s17944_s9 + $0xb0] sm:$0xf] }
0x3329   :  { %14082 = vmatpush3.bf16.msra.mxu0 %v15973_v51 }
0x332a   :  { %14083 = vmatprep.subr.bf16.mxu0 %v14895_v7 }
0x332d   :  { %14084 = vmatpush3.bf16.msra.mxu0 %v15983_v1 }
0x332e   :  { %14085 = vmatprep.subr.bf16.mxu0 %v14895_v7 }
0x3331   :  { %14086 = vmatpush3.bf16.msra.mxu0 %v15995_v12 }
0x3332   :  { %14087 = vmatprep.subr.bf16.mxu0 %v14895_v7 }
0x3335   :  { %14088 = vmatpush3.bf16.msra.mxu0 %v16007_v53 }
0x3336   :  { %14089 = vmatprep.subr.bf16.mxu0 %v14895_v7 }
0x3339   :  { %14090 = vmatpush3.bf16.msra.mxu0 %v16015_v3 }
0x333a   :  { %14091 = vmatprep.subr.bf16.mxu0 %v14895_v7 }
0x333d   :  { %14092 = vmatpush3.bf16.msra.mxu0 %v15952_v57 }
0x333e   :  { %14093 = vmatprep.subr.bf16.mxu0 %v14895_v7 }
0x3341   :  { %14094 = vmatpush3.bf16.msra.mxu0 %v15950_v54 }
0x3342   :  { %14125 = vmatprep.subr.bf16.mxu0 %v14895_v7 }
0x3344   :  { %14096 = vmatmul.mubr.bf16.vlgmr.msra.gmra.mxu0 %v11253_v28  ;;  %v8505_v28 = vsel %vm451_vm1, %v11266_v23, 0 }
0x3345   :  { %14127 = vmatprep.mubr.msk.bf16.mxu0 %vm14896_vm3, %v14895_v7  ;;  %14126 = vmatpush3.bf16.msra.mxu0 %v8229_v36 }
0x3346   :  { %14131 = vmatprep.subr.bf16.mxu0 %v14895_v7 }
0x33e4   :  { %v8081_v31 = vpop.f32.mrf.mxu0 }
0x33e5   :  { %v8087_v32 = vadd.f32 %v8081_v31, %v7995_v25 }
0x33e6   :  { %v14077_v35 = vpop.f32.mrf.mxu0 }
0x33e8   :  { %v8084_v37 = vpop.f32.mrf.mxu0 }
0x33ea   :  { %v14078_v39 = vpop.f32.mrf.mxu0 }
0x3404   :  { %v8124_v42 = vpop.f32.mrf.mxu0 }
0x3405   :  { %v8130_v43 = vpack.c.bf16 %v8124_v42, %v8124_v42 }
0x3406   :  { %v14097_v46 = vpop.f32.mrf.mxu0 }
0x3407   :  { %14102 = vmatmul.mubr.msk.bf16.vlgmr.msra.gmra.mxu1 %vm444_vm2, %v8130_v43 }
0x3408   :  { %14106 = vmatpush3.bf16.msra.mxu1 %v15967_v41  ;;  %v8127_v47 = vpop.f32.mrf.mxu0  ;;  %14121 = vmatprep.mubr.msk.bf16.mxu1 %vm14896_vm3, %v14895_v7 }
0x3409   :  { %14107 = vmatprep.subr.bf16.mxu1 %v14895_v7  ;;  %v11268_v47 = vld [vmem:[%s17943_s8 + $0xb4] sm:$0xf] }
0x340a   :  { %v14098_v48 = vpop.f32.mrf.mxu0 }
0x340b   :  { %v11269_v48 = vld [vmem:[%s17944_s9 + $0xb4] sm:$0xf] }
0x340c   :  { %14108 = vmatpush3.bf16.msra.mxu1 %v15973_v51 }
0x340d   :  { %14109 = vmatprep.subr.bf16.mxu1 %v14895_v7 }
0x3410   :  { %14110 = vmatpush3.bf16.msra.mxu1 %v15983_v1 }
0x3411   :  { %14111 = vmatprep.subr.bf16.mxu1 %v14895_v7 }
0x3414   :  { %14112 = vmatpush3.bf16.msra.mxu1 %v15995_v12 }
0x3415   :  { %14113 = vmatprep.subr.bf16.mxu1 %v14895_v7 }
0x3418   :  { %14114 = vmatpush3.bf16.msra.mxu1 %v16007_v53 }
0x3419   :  { %14115 = vmatprep.subr.bf16.mxu1 %v14895_v7 }
0x341c   :  { %14116 = vmatpush3.bf16.msra.mxu1 %v16015_v3 }
0x341d   :  { %14117 = vmatprep.subr.bf16.mxu1 %v14895_v7 }
0x3420   :  { %14118 = vmatpush3.bf16.msra.mxu1 %v15952_v57 }
0x3421   :  { %14119 = vmatprep.subr.bf16.mxu1 %v14895_v7 }
0x3424   :  { %14120 = vmatpush3.bf16.msra.mxu1 %v15950_v54 }
0x3425   :  { %14151 = vmatprep.subr.bf16.mxu1 %v14895_v7 }
0x3427   :  { %14122 = vmatmul.mubr.bf16.vlgmr.msra.gmra.mxu1 %v11256_v49  ;;  %v8597_v49 = vsel %vm451_vm1, %v11269_v48, 0 }
0x3428   :  { %14153 = vmatprep.mubr.msk.bf16.mxu1 %vm14896_vm3, %v14895_v7  ;;  %14152 = vmatpush3.bf16.msra.mxu1 %v8321_v16 }
0x3429   :  { %14157 = vmatprep.subr.bf16.mxu1 %v14895_v7 }
0x34c7   :  { %v8173_v40 = vpop.f32.mrf.mxu1 }
0x34c8   :  { %v8179_v45 = vadd.f32 %v8173_v40, %v8087_v32 }
0x34c9   :  { %v14103_v50 = vpop.f32.mrf.mxu1 }
0x34cb   :  { %v8176_v55 = vpop.f32.mrf.mxu1 }
0x34cd   :  { %v14104_v60 = vpop.f32.mrf.mxu1 }
0x34e7   :  { %v8216_v56 = vpop.f32.mrf.mxu1 }
0x34e8   :  { %v8222_v63 = vpack.c.bf16 %v8216_v56, %v8216_v56 }
0x34e9   :  { %v14123_v4 = vpop.f32.mrf.mxu1 }
0x34ea   :  { %14128 = vmatmul.mubr.msk.bf16.vlgmr.msra.gmra.mxu0 %vm444_vm2, %v8222_v63 }
0x34eb   :  { %14132 = vmatpush3.bf16.msra.mxu0 %v15967_v41  ;;  %v8219_v5 = vpop.f32.mrf.mxu1  ;;  %14147 = vmatprep.mubr.msk.bf16.mxu0 %vm14896_vm3, %v14895_v7 }
0x34ec   :  { %14133 = vmatprep.subr.bf16.mxu0 %v14895_v7  ;;  %v11271_v5 = vld [vmem:[%s17943_s8 + $0xb8] sm:$0xf] }
0x34ed   :  { %v14124_v8 = vpop.f32.mrf.mxu1 }
0x34ee   :  { %v11272_v8 = vld [vmem:[%s17944_s9 + $0xb8] sm:$0xf] }
0x34ef   :  { %14134 = vmatpush3.bf16.msra.mxu0 %v15973_v51 }
0x34f0   :  { %14135 = vmatprep.subr.bf16.mxu0 %v14895_v7 }
0x34f3   :  { %14136 = vmatpush3.bf16.msra.mxu0 %v15983_v1 }
0x34f4   :  { %14137 = vmatprep.subr.bf16.mxu0 %v14895_v7 }
0x34f7   :  { %14138 = vmatpush3.bf16.msra.mxu0 %v15995_v12 }
0x34f8   :  { %14139 = vmatprep.subr.bf16.mxu0 %v14895_v7 }
0x34fb   :  { %14140 = vmatpush3.bf16.msra.mxu0 %v16007_v53 }
0x34fc   :  { %14141 = vmatprep.subr.bf16.mxu0 %v14895_v7 }
0x34ff   :  { %14142 = vmatpush3.bf16.msra.mxu0 %v16015_v3 }
0x3500   :  { %14143 = vmatprep.subr.bf16.mxu0 %v14895_v7 }
0x3503   :  { %14144 = vmatpush3.bf16.msra.mxu0 %v15952_v57 }
0x3504   :  { %14145 = vmatprep.subr.bf16.mxu0 %v14895_v7 }
0x3507   :  { %14146 = vmatpush3.bf16.msra.mxu0 %v15950_v54 }
0x3508   :  { %14177 = vmatprep.subr.bf16.mxu0 %v14895_v7 }
0x350a   :  { %14148 = vmatmul.mubr.bf16.vlgmr.msra.gmra.mxu0 %v11259_v11  ;;  %v8689_v11 = vsel %vm451_vm1, %v11272_v8, 0 }
0x350b   :  { %14179 = vmatprep.mubr.msk.bf16.mxu0 %vm14896_vm3, %v14895_v7  ;;  %14178 = vmatpush3.bf16.msra.mxu0 %v8413_v61 }
0x350c   :  { %14183 = vmatprep.subr.bf16.mxu0 %v14895_v7 }
0x35aa   :  { %v8265_v19 = vpop.f32.mrf.mxu0 }
0x35ab   :  { %v8271_v9 = vadd.f32 %v8265_v19, %v8179_v45 }
0x35ac   :  { %v14129_v20 = vpop.f32.mrf.mxu0 }
0x35ae   :  { %v8268_v44 = vpop.f32.mrf.mxu0 }
0x35b0   :  { %v14130_v6 = vpop.f32.mrf.mxu0 }
0x35ca   :  { %v8308_v62 = vpop.f32.mrf.mxu0 }
0x35cb   :  { %v8314_v17 = vpack.c.bf16 %v8308_v62, %v8308_v62 }
0x35cc   :  { %v14149_v34 = vpop.f32.mrf.mxu0 }
0x35cd   :  { %14154 = vmatmul.mubr.msk.bf16.vlgmr.msra.gmra.mxu1 %vm444_vm2, %v8314_v17 }
0x35ce   :  { %14158 = vmatpush3.bf16.msra.mxu1 %v15967_v41  ;;  %v8311_v21 = vpop.f32.mrf.mxu0  ;;  %14173 = vmatprep.mubr.msk.bf16.mxu1 %vm14896_vm3, %v14895_v7 }
0x35cf   :  { %14159 = vmatprep.subr.bf16.mxu1 %v14895_v7  ;;  %v11274_v21 = vld [vmem:[%s17943_s8 + $0xbc] sm:$0xf] }
0x35d0   :  { %v14150_v58 = vpop.f32.mrf.mxu0 }
0x35d1   :  { %v11275_v58 = vld [vmem:[%s17944_s9 + $0xbc] sm:$0xf] }
0x35d2   :  { %14160 = vmatpush3.bf16.msra.mxu1 %v15973_v51 }
0x35d3   :  { %14161 = vmatprep.subr.bf16.mxu1 %v14895_v7 }
0x35d6   :  { %14162 = vmatpush3.bf16.msra.mxu1 %v15983_v1 }
0x35d7   :  { %14163 = vmatprep.subr.bf16.mxu1 %v14895_v7 }
0x35da   :  { %14164 = vmatpush3.bf16.msra.mxu1 %v15995_v12 }
0x35db   :  { %14165 = vmatprep.subr.bf16.mxu1 %v14895_v7 }
0x35de   :  { %14166 = vmatpush3.bf16.msra.mxu1 %v16007_v53 }
0x35df   :  { %14167 = vmatprep.subr.bf16.mxu1 %v14895_v7 }
0x35e2   :  { %14168 = vmatpush3.bf16.msra.mxu1 %v16015_v3 }
0x35e3   :  { %14169 = vmatprep.subr.bf16.mxu1 %v14895_v7 }
0x35e6   :  { %14170 = vmatpush3.bf16.msra.mxu1 %v15952_v57 }
0x35e7   :  { %14171 = vmatprep.subr.bf16.mxu1 %v14895_v7 }
0x35ea   :  { %14172 = vmatpush3.bf16.msra.mxu1 %v15950_v54 }
0x35eb   :  { %14203 = vmatprep.subr.bf16.mxu1 %v14895_v7 }
0x35ed   :  { %14174 = vmatmul.mubr.bf16.vlgmr.msra.gmra.mxu1 %v11262_v0  ;;  %v8781_v0 = vsel %vm451_vm1, %v11275_v58, 0 }
0x35ee   :  { %14205 = vmatprep.mubr.msk.bf16.mxu1 %vm14896_vm3, %v14895_v7  ;;  %14204 = vmatpush3.bf16.msra.mxu1 %v8505_v28 }
0x35ef   :  { %14209 = vmatprep.subr.bf16.mxu1 %v14895_v7 }
0x368d   :  { %v8357_v15 = vpop.f32.mrf.mxu1 }
0x368e   :  { %v8363_v24 = vadd.f32 %v8357_v15, %v8271_v9 }
0x368f   :  { %v14155_v33 = vpop.f32.mrf.mxu1 }
0x3691   :  { %v8360_v25 = vpop.f32.mrf.mxu1 }
0x3693   :  { %v14156_v59 = vpop.f32.mrf.mxu1 }
0x36ad   :  { %v8400_v18 = vpop.f32.mrf.mxu1 }
0x36ae   :  { %v8406_v38 = vpack.c.bf16 %v8400_v18, %v8400_v18 }
0x36af   :  { %v14175_v2 = vpop.f32.mrf.mxu1 }
0x36b0   :  { %14180 = vmatmul.mubr.msk.bf16.vlgmr.msra.gmra.mxu0 %vm444_vm2, %v8406_v38 }
0x36b1   :  { %14184 = vmatpush3.bf16.msra.mxu0 %v15967_v41  ;;  %v8403_v26 = vpop.f32.mrf.mxu1  ;;  %14199 = vmatprep.mubr.msk.bf16.mxu0 %vm14896_vm3, %v14895_v7 }
0x36b2   :  { %14185 = vmatprep.subr.bf16.mxu0 %v14895_v7  ;;  %v11277_v26 = vld [vmem:[%s17943_s8 + $0xc0] sm:$0xf] }
0x36b3   :  { %v14176_v27 = vpop.f32.mrf.mxu1 }
0x36b4   :  { %v11278_v27 = vld [vmem:[%s17944_s9 + $0xc0] sm:$0xf] }
0x36b5   :  { %14186 = vmatpush3.bf16.msra.mxu0 %v15973_v51 }
0x36b6   :  { %14187 = vmatprep.subr.bf16.mxu0 %v14895_v7 }
0x36b9   :  { %14188 = vmatpush3.bf16.msra.mxu0 %v15983_v1 }
0x36ba   :  { %14189 = vmatprep.subr.bf16.mxu0 %v14895_v7 }
0x36bd   :  { %14190 = vmatpush3.bf16.msra.mxu0 %v15995_v12 }
0x36be   :  { %14191 = vmatprep.subr.bf16.mxu0 %v14895_v7 }
0x36c1   :  { %14192 = vmatpush3.bf16.msra.mxu0 %v16007_v53 }
0x36c2   :  { %14193 = vmatprep.subr.bf16.mxu0 %v14895_v7 }
0x36c5   :  { %14194 = vmatpush3.bf16.msra.mxu0 %v16015_v3 }
0x36c6   :  { %14195 = vmatprep.subr.bf16.mxu0 %v14895_v7 }
0x36c9   :  { %14196 = vmatpush3.bf16.msra.mxu0 %v15952_v57 }
0x36ca   :  { %14197 = vmatprep.subr.bf16.mxu0 %v14895_v7 }
0x36cd   :  { %14198 = vmatpush3.bf16.msra.mxu0 %v15950_v54 }
0x36ce   :  { %14229 = vmatprep.subr.bf16.mxu0 %v14895_v7 }
0x36d0   :  { %14200 = vmatmul.mubr.bf16.vlgmr.msra.gmra.mxu0 %v11265_v13  ;;  %v8873_v13 = vsel %vm451_vm1, %v11278_v27, 0 }
0x36d1   :  { %14231 = vmatprep.mubr.msk.bf16.mxu0 %vm14896_vm3, %v14895_v7  ;;  %14230 = vmatpush3.bf16.msra.mxu0 %v8597_v49 }
0x36d2   :  { %14235 = vmatprep.subr.bf16.mxu0 %v14895_v7 }
0x3770   :  { %v8449_v29 = vpop.f32.mrf.mxu0 }
0x3771   :  { %v8455_v30 = vadd.f32 %v8449_v29, %v8363_v24 }
0x3772   :  { %v14181_v31 = vpop.f32.mrf.mxu0 }
0x3774   :  { %v8452_v32 = vpop.f32.mrf.mxu0 }
0x3776   :  { %v14182_v35 = vpop.f32.mrf.mxu0 }
0x3790   :  { %v8492_v37 = vpop.f32.mrf.mxu0 }
0x3791   :  { %v8498_v39 = vpack.c.bf16 %v8492_v37, %v8492_v37 }
0x3792   :  { %v14201_v42 = vpop.f32.mrf.mxu0 }
0x3793   :  { %14206 = vmatmul.mubr.msk.bf16.vlgmr.msra.gmra.mxu1 %vm444_vm2, %v8498_v39 }
0x3794   :  { %14210 = vmatpush3.bf16.msra.mxu1 %v15967_v41  ;;  %v8495_v43 = vpop.f32.mrf.mxu0  ;;  %14225 = vmatprep.mubr.msk.bf16.mxu1 %vm14896_vm3, %v14895_v7 }
0x3795   :  { %14211 = vmatprep.subr.bf16.mxu1 %v14895_v7  ;;  %v11280_v43 = vld [vmem:[%s17943_s8 + $0xc4] sm:$0xf] }
0x3796   :  { %v14202_v46 = vpop.f32.mrf.mxu0 }
0x3797   :  { %v11281_v46 = vld [vmem:[%s17944_s9 + $0xc4] sm:$0xf] }
0x3798   :  { %14212 = vmatpush3.bf16.msra.mxu1 %v15973_v51 }
0x3799   :  { %14213 = vmatprep.subr.bf16.mxu1 %v14895_v7 }
0x379c   :  { %14214 = vmatpush3.bf16.msra.mxu1 %v15983_v1 }
0x379d   :  { %14215 = vmatprep.subr.bf16.mxu1 %v14895_v7 }
0x37a0   :  { %14216 = vmatpush3.bf16.msra.mxu1 %v15995_v12 }
0x37a1   :  { %14217 = vmatprep.subr.bf16.mxu1 %v14895_v7 }
0x37a4   :  { %14218 = vmatpush3.bf16.msra.mxu1 %v16007_v53 }
0x37a5   :  { %14219 = vmatprep.subr.bf16.mxu1 %v14895_v7 }
0x37a8   :  { %14220 = vmatpush3.bf16.msra.mxu1 %v16015_v3 }
0x37a9   :  { %14221 = vmatprep.subr.bf16.mxu1 %v14895_v7 }
0x37ac   :  { %14222 = vmatpush3.bf16.msra.mxu1 %v15952_v57 }
0x37ad   :  { %14223 = vmatprep.subr.bf16.mxu1 %v14895_v7 }
0x37b0   :  { %14224 = vmatpush3.bf16.msra.mxu1 %v15950_v54 }
0x37b1   :  { %14255 = vmatprep.subr.bf16.mxu1 %v14895_v7 }
0x37b3   :  { %14226 = vmatmul.mubr.bf16.vlgmr.msra.gmra.mxu1 %v11268_v47  ;;  %v8965_v47 = vsel %vm451_vm1, %v11281_v46, 0 }
0x37b4   :  { %14257 = vmatprep.mubr.msk.bf16.mxu1 %vm14896_vm3, %v14895_v7  ;;  %14256 = vmatpush3.bf16.msra.mxu1 %v8689_v11 }
0x37b5   :  { %14261 = vmatprep.subr.bf16.mxu1 %v14895_v7 }
0x3853   :  { %v8541_v52 = vpop.f32.mrf.mxu1 }
0x3854   :  { %v8547_v36 = vadd.f32 %v8541_v52, %v8455_v30 }
0x3855   :  { %v14207_v40 = vpop.f32.mrf.mxu1 }
0x3857   :  { %v8544_v45 = vpop.f32.mrf.mxu1 }
0x3859   :  { %v14208_v50 = vpop.f32.mrf.mxu1 }
0x3873   :  { %v8584_v55 = vpop.f32.mrf.mxu1 }
0x3874   :  { %v8590_v60 = vpack.c.bf16 %v8584_v55, %v8584_v55 }
0x3875   :  { %v14227_v56 = vpop.f32.mrf.mxu1 }
0x3876   :  { %14232 = vmatmul.mubr.msk.bf16.vlgmr.msra.gmra.mxu0 %vm444_vm2, %v8590_v60 }
0x3877   :  { %14236 = vmatpush3.bf16.msra.mxu0 %v15967_v41  ;;  %v8587_v63 = vpop.f32.mrf.mxu1  ;;  %14251 = vmatprep.mubr.msk.bf16.mxu0 %vm14896_vm3, %v14895_v7 }
0x3878   :  { %14237 = vmatprep.subr.bf16.mxu0 %v14895_v7  ;;  %v11283_v63 = vld [vmem:[%s17943_s8 + $0xc8] sm:$0xf] }
0x3879   :  { %v14228_v4 = vpop.f32.mrf.mxu1 }
0x387a   :  { %v11284_v4 = vld [vmem:[%s17944_s9 + $0xc8] sm:$0xf] }
0x387b   :  { %14238 = vmatpush3.bf16.msra.mxu0 %v15973_v51 }
0x387c   :  { %14239 = vmatprep.subr.bf16.mxu0 %v14895_v7 }
0x387f   :  { %14240 = vmatpush3.bf16.msra.mxu0 %v15983_v1 }
0x3880   :  { %14241 = vmatprep.subr.bf16.mxu0 %v14895_v7 }
0x3883   :  { %14242 = vmatpush3.bf16.msra.mxu0 %v15995_v12 }
0x3884   :  { %14243 = vmatprep.subr.bf16.mxu0 %v14895_v7 }
0x3887   :  { %14244 = vmatpush3.bf16.msra.mxu0 %v16007_v53 }
0x3888   :  { %14245 = vmatprep.subr.bf16.mxu0 %v14895_v7 }
0x388b   :  { %14246 = vmatpush3.bf16.msra.mxu0 %v16015_v3 }
0x388c   :  { %14247 = vmatprep.subr.bf16.mxu0 %v14895_v7 }
0x388f   :  { %14248 = vmatpush3.bf16.msra.mxu0 %v15952_v57 }
0x3890   :  { %14249 = vmatprep.subr.bf16.mxu0 %v14895_v7 }
0x3893   :  { %14250 = vmatpush3.bf16.msra.mxu0 %v15950_v54 }
0x3894   :  { %14281 = vmatprep.subr.bf16.mxu0 %v14895_v7 }
0x3896   :  { %14252 = vmatmul.mubr.bf16.vlgmr.msra.gmra.mxu0 %v11271_v5  ;;  %v9057_v5 = vsel %vm451_vm1, %v11284_v4, 0 }
0x3897   :  { %14283 = vmatprep.mubr.msk.bf16.mxu0 %vm14896_vm3, %v14895_v7  ;;  %14282 = vmatpush3.bf16.msra.mxu0 %v8781_v0 }
0x3898   :  { %14287 = vmatprep.subr.bf16.mxu0 %v14895_v7 }
0x3936   :  { %v8633_v14 = vpop.f32.mrf.mxu0 }
0x3937   :  { %v8639_v16 = vadd.f32 %v8633_v14, %v8547_v36 }
0x3938   :  { %v14233_v19 = vpop.f32.mrf.mxu0 }
0x393a   :  { %v8636_v9 = vpop.f32.mrf.mxu0 }
0x393c   :  { %v14234_v20 = vpop.f32.mrf.mxu0 }
0x3956   :  { %v8676_v44 = vpop.f32.mrf.mxu0 }
0x3957   :  { %v8682_v6 = vpack.c.bf16 %v8676_v44, %v8676_v44 }
0x3958   :  { %v14253_v62 = vpop.f32.mrf.mxu0 }
0x3959   :  { %14258 = vmatmul.mubr.msk.bf16.vlgmr.msra.gmra.mxu1 %vm444_vm2, %v8682_v6 }
0x395a   :  { %14262 = vmatpush3.bf16.msra.mxu1 %v15967_v41  ;;  %v8679_v17 = vpop.f32.mrf.mxu0  ;;  %14277 = vmatprep.mubr.msk.bf16.mxu1 %vm14896_vm3, %v14895_v7 }
0x395b   :  { %14263 = vmatprep.subr.bf16.mxu1 %v14895_v7  ;;  %v11286_v17 = vld [vmem:[%s17943_s8 + $0xcc] sm:$0xf] }
0x395c   :  { %v14254_v34 = vpop.f32.mrf.mxu0 }
0x395d   :  { %v11287_v34 = vld [vmem:[%s17944_s9 + $0xcc] sm:$0xf] }
0x395e   :  { %14264 = vmatpush3.bf16.msra.mxu1 %v15973_v51 }
0x395f   :  { %14265 = vmatprep.subr.bf16.mxu1 %v14895_v7 }
0x3962   :  { %14266 = vmatpush3.bf16.msra.mxu1 %v15983_v1 }
0x3963   :  { %14267 = vmatprep.subr.bf16.mxu1 %v14895_v7 }
0x3966   :  { %14268 = vmatpush3.bf16.msra.mxu1 %v15995_v12 }
0x3967   :  { %14269 = vmatprep.subr.bf16.mxu1 %v14895_v7 }
0x396a   :  { %14270 = vmatpush3.bf16.msra.mxu1 %v16007_v53 }
0x396b   :  { %14271 = vmatprep.subr.bf16.mxu1 %v14895_v7 }
0x396e   :  { %14272 = vmatpush3.bf16.msra.mxu1 %v16015_v3 }
0x396f   :  { %14273 = vmatprep.subr.bf16.mxu1 %v14895_v7 }
0x3972   :  { %14274 = vmatpush3.bf16.msra.mxu1 %v15952_v57 }
0x3973   :  { %14275 = vmatprep.subr.bf16.mxu1 %v14895_v7 }
0x3976   :  { %14276 = vmatpush3.bf16.msra.mxu1 %v15950_v54 }
0x3977   :  { %14307 = vmatprep.subr.bf16.mxu1 %v14895_v7 }
0x3979   :  { %14278 = vmatmul.mubr.bf16.vlgmr.msra.gmra.mxu1 %v11274_v21  ;;  %v9149_v21 = vsel %vm451_vm1, %v11287_v34, 0 }
0x397a   :  { %14309 = vmatprep.mubr.msk.bf16.mxu1 %vm14896_vm3, %v14895_v7  ;;  %14308 = vmatpush3.bf16.msra.mxu1 %v8873_v13 }
0x397b   :  { %14313 = vmatprep.subr.bf16.mxu1 %v14895_v7 }
0x3a19   :  { %v8725_v22 = vpop.f32.mrf.mxu1 }
0x3a1a   :  { %v8731_v61 = vadd.f32 %v8725_v22, %v8639_v16 }
0x3a1b   :  { %v14259_v15 = vpop.f32.mrf.mxu1 }
0x3a1d   :  { %v8728_v24 = vpop.f32.mrf.mxu1 }
0x3a1f   :  { %v14260_v33 = vpop.f32.mrf.mxu1 }
0x3a39   :  { %v8768_v25 = vpop.f32.mrf.mxu1 }
0x3a3a   :  { %v8774_v59 = vpack.c.bf16 %v8768_v25, %v8768_v25 }
0x3a3b   :  { %v14279_v18 = vpop.f32.mrf.mxu1 }
0x3a3c   :  { %14284 = vmatmul.mubr.msk.bf16.vlgmr.msra.gmra.mxu0 %vm444_vm2, %v8774_v59 }
0x3a3d   :  { %14288 = vmatpush3.bf16.msra.mxu0 %v15967_v41  ;;  %v8771_v38 = vpop.f32.mrf.mxu1  ;;  %14303 = vmatprep.mubr.msk.bf16.mxu0 %vm14896_vm3, %v14895_v7 }
0x3a3e   :  { %14289 = vmatprep.subr.bf16.mxu0 %v14895_v7  ;;  %v11289_v38 = vld [vmem:[%s17943_s8 + $0xd0] sm:$0xf] }
0x3a3f   :  { %v14280_v2 = vpop.f32.mrf.mxu1 }
0x3a40   :  { %v11290_v2 = vld [vmem:[%s17944_s9 + $0xd0] sm:$0xf] }
0x3a41   :  { %14290 = vmatpush3.bf16.msra.mxu0 %v15973_v51 }
0x3a42   :  { %14291 = vmatprep.subr.bf16.mxu0 %v14895_v7 }
0x3a45   :  { %14292 = vmatpush3.bf16.msra.mxu0 %v15983_v1 }
0x3a46   :  { %14293 = vmatprep.subr.bf16.mxu0 %v14895_v7 }
0x3a49   :  { %14294 = vmatpush3.bf16.msra.mxu0 %v15995_v12 }
0x3a4a   :  { %14295 = vmatprep.subr.bf16.mxu0 %v14895_v7 }
0x3a4d   :  { %14296 = vmatpush3.bf16.msra.mxu0 %v16007_v53 }
0x3a4e   :  { %14297 = vmatprep.subr.bf16.mxu0 %v14895_v7 }
0x3a51   :  { %14298 = vmatpush3.bf16.msra.mxu0 %v16015_v3 }
0x3a52   :  { %14299 = vmatprep.subr.bf16.mxu0 %v14895_v7 }
0x3a55   :  { %14300 = vmatpush3.bf16.msra.mxu0 %v15952_v57 }
0x3a56   :  { %14301 = vmatprep.subr.bf16.mxu0 %v14895_v7 }
0x3a59   :  { %14302 = vmatpush3.bf16.msra.mxu0 %v15950_v54 }
0x3a5a   :  { %14333 = vmatprep.subr.bf16.mxu0 %v14895_v7 }
0x3a5c   :  { %14304 = vmatmul.mubr.bf16.vlgmr.msra.gmra.mxu0 %v11277_v26  ;;  %v9241_v26 = vsel %vm451_vm1, %v11290_v2, 0 }
0x3a5d   :  { %14335 = vmatprep.mubr.msk.bf16.mxu0 %vm14896_vm3, %v14895_v7  ;;  %14334 = vmatpush3.bf16.msra.mxu0 %v8965_v47 }
0x3a5e   :  { %14339 = vmatprep.subr.bf16.mxu0 %v14895_v7 }
0x3afc   :  { %v8817_v23 = vpop.f32.mrf.mxu0 }
0x3afd   :  { %v8823_v28 = vadd.f32 %v8817_v23, %v8731_v61 }
0x3afe   :  { %v14285_v29 = vpop.f32.mrf.mxu0 }
0x3b00   :  { %v8820_v30 = vpop.f32.mrf.mxu0 }
0x3b02   :  { %v14286_v31 = vpop.f32.mrf.mxu0 }
0x3b1c   :  { %v8860_v32 = vpop.f32.mrf.mxu0 }
0x3b1d   :  { %v8866_v35 = vpack.c.bf16 %v8860_v32, %v8860_v32 }
0x3b1e   :  { %v14305_v37 = vpop.f32.mrf.mxu0 }
0x3b1f   :  { %14310 = vmatmul.mubr.msk.bf16.vlgmr.msra.gmra.mxu1 %vm444_vm2, %v8866_v35 }
0x3b20   :  { %14314 = vmatpush3.bf16.msra.mxu1 %v15967_v41  ;;  %v8863_v39 = vpop.f32.mrf.mxu0  ;;  %14329 = vmatprep.mubr.msk.bf16.mxu1 %vm14896_vm3, %v14895_v7 }
0x3b21   :  { %14315 = vmatprep.subr.bf16.mxu1 %v14895_v7  ;;  %v11292_v39 = vld [vmem:[%s17943_s8 + $0xd4] sm:$0xf] }
0x3b22   :  { %v14306_v42 = vpop.f32.mrf.mxu0 }
0x3b23   :  { %v11293_v42 = vld [vmem:[%s17944_s9 + $0xd4] sm:$0xf] }
0x3b24   :  { %14316 = vmatpush3.bf16.msra.mxu1 %v15973_v51 }
0x3b25   :  { %14317 = vmatprep.subr.bf16.mxu1 %v14895_v7 }
0x3b28   :  { %14318 = vmatpush3.bf16.msra.mxu1 %v15983_v1 }
0x3b29   :  { %14319 = vmatprep.subr.bf16.mxu1 %v14895_v7 }
0x3b2c   :  { %14320 = vmatpush3.bf16.msra.mxu1 %v15995_v12 }
0x3b2d   :  { %14321 = vmatprep.subr.bf16.mxu1 %v14895_v7 }
0x3b30   :  { %14322 = vmatpush3.bf16.msra.mxu1 %v16007_v53 }
0x3b31   :  { %14323 = vmatprep.subr.bf16.mxu1 %v14895_v7 }
0x3b34   :  { %14324 = vmatpush3.bf16.msra.mxu1 %v16015_v3 }
0x3b35   :  { %14325 = vmatprep.subr.bf16.mxu1 %v14895_v7 }
0x3b38   :  { %14326 = vmatpush3.bf16.msra.mxu1 %v15952_v57 }
0x3b39   :  { %14327 = vmatprep.subr.bf16.mxu1 %v14895_v7 }
0x3b3c   :  { %14328 = vmatpush3.bf16.msra.mxu1 %v15950_v54 }
0x3b3d   :  { %14359 = vmatprep.subr.bf16.mxu1 %v14895_v7 }
0x3b3f   :  { %14330 = vmatmul.mubr.bf16.vlgmr.msra.gmra.mxu1 %v11280_v43  ;;  %v9333_v43 = vsel %vm451_vm1, %v11293_v42, 0 }
0x3b40   :  { %14361 = vmatprep.mubr.msk.bf16.mxu1 %vm14896_vm3, %v14895_v7  ;;  %14360 = vmatpush3.bf16.msra.mxu1 %v9057_v5 }
0x3b41   :  { %14365 = vmatprep.subr.bf16.mxu1 %v14895_v7 }
0x3bdf   :  { %v8909_v48 = vpop.f32.mrf.mxu1 }
0x3be0   :  { %v8915_v49 = vadd.f32 %v8909_v48, %v8823_v28 }
0x3be1   :  { %v14311_v52 = vpop.f32.mrf.mxu1 }
0x3be3   :  { %v8912_v36 = vpop.f32.mrf.mxu1 }
0x3be5   :  { %v14312_v40 = vpop.f32.mrf.mxu1 }
0x3bff   :  { %v8952_v45 = vpop.f32.mrf.mxu1 }
0x3c00   :  { %v8958_v50 = vpack.c.bf16 %v8952_v45, %v8952_v45 }
0x3c01   :  { %v14331_v55 = vpop.f32.mrf.mxu1 }
0x3c02   :  { %14336 = vmatmul.mubr.msk.bf16.vlgmr.msra.gmra.mxu0 %vm444_vm2, %v8958_v50 }
0x3c03   :  { %14340 = vmatpush3.bf16.msra.mxu0 %v15967_v41  ;;  %v8955_v60 = vpop.f32.mrf.mxu1  ;;  %14355 = vmatprep.mubr.msk.bf16.mxu0 %vm14896_vm3, %v14895_v7 }
0x3c04   :  { %14341 = vmatprep.subr.bf16.mxu0 %v14895_v7  ;;  %v11295_v60 = vld [vmem:[%s17943_s8 + $0xd8] sm:$0xf] }
0x3c05   :  { %v14332_v56 = vpop.f32.mrf.mxu1 }
0x3c06   :  { %v11296_v56 = vld [vmem:[%s17944_s9 + $0xd8] sm:$0xf] }
0x3c07   :  { %14342 = vmatpush3.bf16.msra.mxu0 %v15973_v51 }
0x3c08   :  { %14343 = vmatprep.subr.bf16.mxu0 %v14895_v7 }
0x3c0b   :  { %14344 = vmatpush3.bf16.msra.mxu0 %v15983_v1 }
0x3c0c   :  { %14345 = vmatprep.subr.bf16.mxu0 %v14895_v7 }
0x3c0f   :  { %14346 = vmatpush3.bf16.msra.mxu0 %v15995_v12 }
0x3c10   :  { %14347 = vmatprep.subr.bf16.mxu0 %v14895_v7 }
0x3c13   :  { %14348 = vmatpush3.bf16.msra.mxu0 %v16007_v53 }
0x3c14   :  { %14349 = vmatprep.subr.bf16.mxu0 %v14895_v7 }
0x3c17   :  { %14350 = vmatpush3.bf16.msra.mxu0 %v16015_v3 }
0x3c18   :  { %14351 = vmatprep.subr.bf16.mxu0 %v14895_v7 }
0x3c1b   :  { %14352 = vmatpush3.bf16.msra.mxu0 %v15952_v57 }
0x3c1c   :  { %14353 = vmatprep.subr.bf16.mxu0 %v14895_v7 }
0x3c1f   :  { %14354 = vmatpush3.bf16.msra.mxu0 %v15950_v54 }
0x3c20   :  { %14385 = vmatprep.subr.bf16.mxu0 %v14895_v7 }
0x3c22   :  { %14356 = vmatmul.mubr.bf16.vlgmr.msra.gmra.mxu0 %v11283_v63  ;;  %v9425_v63 = vsel %vm451_vm1, %v11296_v56, 0 }
0x3c23   :  { %14387 = vmatprep.mubr.msk.bf16.mxu0 %vm14896_vm3, %v14895_v7  ;;  %14386 = vmatpush3.bf16.msra.mxu0 %v9149_v21 }
0x3c24   :  { %14391 = vmatprep.subr.bf16.mxu0 %v14895_v7 }
0x3cc2   :  { %v9001_v8 = vpop.f32.mrf.mxu0 }
0x3cc3   :  { %v9007_v11 = vadd.f32 %v9001_v8, %v8915_v49 }
0x3cc4   :  { %v14337_v14 = vpop.f32.mrf.mxu0 }
0x3cc6   :  { %v9004_v16 = vpop.f32.mrf.mxu0 }
0x3cc8   :  { %v14338_v19 = vpop.f32.mrf.mxu0 }
0x3ce2   :  { %v9044_v9 = vpop.f32.mrf.mxu0 }
0x3ce3   :  { %v9050_v20 = vpack.c.bf16 %v9044_v9, %v9044_v9 }
0x3ce4   :  { %v14357_v44 = vpop.f32.mrf.mxu0 }
0x3ce5   :  { %14362 = vmatmul.mubr.msk.bf16.vlgmr.msra.gmra.mxu1 %vm444_vm2, %v9050_v20 }
0x3ce6   :  { %14366 = vmatpush3.bf16.msra.mxu1 %v15967_v41  ;;  %v9047_v6 = vpop.f32.mrf.mxu0  ;;  %14381 = vmatprep.mubr.msk.bf16.mxu1 %vm14896_vm3, %v14895_v7 }
0x3ce7   :  { %14367 = vmatprep.subr.bf16.mxu1 %v14895_v7  ;;  %v11298_v6 = vld [vmem:[%s17943_s8 + $0xdc] sm:$0xf] }
0x3ce8   :  { %v14358_v62 = vpop.f32.mrf.mxu0 }
0x3ce9   :  { %v11299_v62 = vld [vmem:[%s17944_s9 + $0xdc] sm:$0xf] }
0x3cea   :  { %14368 = vmatpush3.bf16.msra.mxu1 %v15973_v51 }
0x3ceb   :  { %14369 = vmatprep.subr.bf16.mxu1 %v14895_v7 }
0x3cee   :  { %14370 = vmatpush3.bf16.msra.mxu1 %v15983_v1 }
0x3cef   :  { %14371 = vmatprep.subr.bf16.mxu1 %v14895_v7 }
0x3cf2   :  { %14372 = vmatpush3.bf16.msra.mxu1 %v15995_v12 }
0x3cf3   :  { %14373 = vmatprep.subr.bf16.mxu1 %v14895_v7 }
0x3cf6   :  { %14374 = vmatpush3.bf16.msra.mxu1 %v16007_v53 }
0x3cf7   :  { %14375 = vmatprep.subr.bf16.mxu1 %v14895_v7 }
0x3cfa   :  { %14376 = vmatpush3.bf16.msra.mxu1 %v16015_v3 }
0x3cfb   :  { %14377 = vmatprep.subr.bf16.mxu1 %v14895_v7 }
0x3cfe   :  { %14378 = vmatpush3.bf16.msra.mxu1 %v15952_v57 }
0x3cff   :  { %14379 = vmatprep.subr.bf16.mxu1 %v14895_v7 }
0x3d02   :  { %14380 = vmatpush3.bf16.msra.mxu1 %v15950_v54 }
0x3d03   :  { %14411 = vmatprep.subr.bf16.mxu1 %v14895_v7 }
0x3d05   :  { %14382 = vmatmul.mubr.bf16.vlgmr.msra.gmra.mxu1 %v11286_v17  ;;  %v9517_v17 = vsel %vm451_vm1, %v11299_v62, 0 }
0x3d06   :  { %14413 = vmatprep.mubr.msk.bf16.mxu1 %vm14896_vm3, %v14895_v7  ;;  %14412 = vmatpush3.bf16.msra.mxu1 %v9241_v26 }
0x3d07   :  { %14417 = vmatprep.subr.bf16.mxu1 %v14895_v7 }
0x3da5   :  { %v9093_v58 = vpop.f32.mrf.mxu1 }
0x3da6   :  { %v9099_v0 = vadd.f32 %v9093_v58, %v9007_v11 }
0x3da7   :  { %v14363_v22 = vpop.f32.mrf.mxu1 }
0x3da9   :  { %v9096_v61 = vpop.f32.mrf.mxu1 }
0x3dab   :  { %v14364_v15 = vpop.f32.mrf.mxu1 }
0x3dc5   :  { %v9136_v24 = vpop.f32.mrf.mxu1 }
0x3dc6   :  { %v9142_v33 = vpack.c.bf16 %v9136_v24, %v9136_v24 }
0x3dc7   :  { %v14383_v25 = vpop.f32.mrf.mxu1 }
0x3dc8   :  { %14388 = vmatmul.mubr.msk.bf16.vlgmr.msra.gmra.mxu0 %vm444_vm2, %v9142_v33 }
0x3dc9   :  { %14392 = vmatpush3.bf16.msra.mxu0 %v15967_v41  ;;  %v9139_v59 = vpop.f32.mrf.mxu1  ;;  %14407 = vmatprep.mubr.msk.bf16.mxu0 %vm14896_vm3, %v14895_v7 }
0x3dca   :  { %14393 = vmatprep.subr.bf16.mxu0 %v14895_v7  ;;  %v11301_v59 = vld [vmem:[%s17943_s8 + $0xe0] sm:$0xf] }
0x3dcb   :  { %v14384_v18 = vpop.f32.mrf.mxu1 }
0x3dcc   :  { %v11302_v18 = vld [vmem:[%s17944_s9 + $0xe0] sm:$0xf] }
0x3dcd   :  { %14394 = vmatpush3.bf16.msra.mxu0 %v15973_v51 }
0x3dce   :  { %14395 = vmatprep.subr.bf16.mxu0 %v14895_v7 }
0x3dd1   :  { %14396 = vmatpush3.bf16.msra.mxu0 %v15983_v1 }
0x3dd2   :  { %14397 = vmatprep.subr.bf16.mxu0 %v14895_v7 }
0x3dd5   :  { %14398 = vmatpush3.bf16.msra.mxu0 %v15995_v12 }
0x3dd6   :  { %14399 = vmatprep.subr.bf16.mxu0 %v14895_v7 }
0x3dd9   :  { %14400 = vmatpush3.bf16.msra.mxu0 %v16007_v53 }
0x3dda   :  { %14401 = vmatprep.subr.bf16.mxu0 %v14895_v7 }
0x3ddd   :  { %14402 = vmatpush3.bf16.msra.mxu0 %v16015_v3 }
0x3dde   :  { %14403 = vmatprep.subr.bf16.mxu0 %v14895_v7 }
0x3de1   :  { %14404 = vmatpush3.bf16.msra.mxu0 %v15952_v57 }
0x3de2   :  { %14405 = vmatprep.subr.bf16.mxu0 %v14895_v7 }
0x3de5   :  { %14406 = vmatpush3.bf16.msra.mxu0 %v15950_v54 }
0x3de6   :  { %14437 = vmatprep.subr.bf16.mxu0 %v14895_v7 }
0x3de8   :  { %14408 = vmatmul.mubr.bf16.vlgmr.msra.gmra.mxu0 %v11289_v38  ;;  %v9609_v38 = vsel %vm451_vm1, %v11302_v18, 0 }
0x3de9   :  { %14439 = vmatprep.mubr.msk.bf16.mxu0 %vm14896_vm3, %v14895_v7  ;;  %14438 = vmatpush3.bf16.msra.mxu0 %v9333_v43 }
0x3dea   :  { %14443 = vmatprep.subr.bf16.mxu0 %v14895_v7 }
0x3e88   :  { %v9185_v27 = vpop.f32.mrf.mxu0 }
0x3e89   :  { %v9191_v13 = vadd.f32 %v9185_v27, %v9099_v0 }
0x3e8a   :  { %v14389_v23 = vpop.f32.mrf.mxu0 }
0x3e8c   :  { %v9188_v28 = vpop.f32.mrf.mxu0 }
0x3e8e   :  { %v14390_v29 = vpop.f32.mrf.mxu0 }
0x3ea8   :  { %v9228_v30 = vpop.f32.mrf.mxu0 }
0x3ea9   :  { %v9234_v31 = vpack.c.bf16 %v9228_v30, %v9228_v30 }
0x3eaa   :  { %v14409_v32 = vpop.f32.mrf.mxu0 }
0x3eab   :  { %14414 = vmatmul.mubr.msk.bf16.vlgmr.msra.gmra.mxu1 %vm444_vm2, %v9234_v31 }
0x3eac   :  { %14418 = vmatpush3.bf16.msra.mxu1 %v15967_v41  ;;  %v9231_v35 = vpop.f32.mrf.mxu0  ;;  %14433 = vmatprep.mubr.msk.bf16.mxu1 %vm14896_vm3, %v14895_v7 }
0x3ead   :  { %14419 = vmatprep.subr.bf16.mxu1 %v14895_v7  ;;  %v11304_v35 = vld [vmem:[%s17943_s8 + $0xe4] sm:$0xf] }
0x3eae   :  { %v14410_v37 = vpop.f32.mrf.mxu0 }
0x3eaf   :  { %v11305_v37 = vld [vmem:[%s17944_s9 + $0xe4] sm:$0xf] }
0x3eb0   :  { %14420 = vmatpush3.bf16.msra.mxu1 %v15973_v51 }
0x3eb1   :  { %14421 = vmatprep.subr.bf16.mxu1 %v14895_v7 }
0x3eb4   :  { %14422 = vmatpush3.bf16.msra.mxu1 %v15983_v1 }
0x3eb5   :  { %14423 = vmatprep.subr.bf16.mxu1 %v14895_v7 }
0x3eb8   :  { %14424 = vmatpush3.bf16.msra.mxu1 %v15995_v12 }
0x3eb9   :  { %14425 = vmatprep.subr.bf16.mxu1 %v14895_v7 }
0x3ebc   :  { %14426 = vmatpush3.bf16.msra.mxu1 %v16007_v53 }
0x3ebd   :  { %14427 = vmatprep.subr.bf16.mxu1 %v14895_v7 }
0x3ec0   :  { %14428 = vmatpush3.bf16.msra.mxu1 %v16015_v3 }
0x3ec1   :  { %14429 = vmatprep.subr.bf16.mxu1 %v14895_v7 }
0x3ec4   :  { %14430 = vmatpush3.bf16.msra.mxu1 %v15952_v57 }
0x3ec5   :  { %14431 = vmatprep.subr.bf16.mxu1 %v14895_v7 }
0x3ec8   :  { %14432 = vmatpush3.bf16.msra.mxu1 %v15950_v54 }
0x3ec9   :  { %14463 = vmatprep.subr.bf16.mxu1 %v14895_v7 }
0x3ecb   :  { %14434 = vmatmul.mubr.bf16.vlgmr.msra.gmra.mxu1 %v11292_v39  ;;  %v9701_v39 = vsel %vm451_vm1, %v11305_v37, 0 }
0x3ecc   :  { %14465 = vmatprep.mubr.msk.bf16.mxu1 %vm14896_vm3, %v14895_v7  ;;  %14464 = vmatpush3.bf16.msra.mxu1 %v9425_v63 }
0x3ecd   :  { %14469 = vmatprep.subr.bf16.mxu1 %v14895_v7 }
0x3f6b   :  { %v9277_v46 = vpop.f32.mrf.mxu1 }
0x3f6c   :  { %v9283_v47 = vadd.f32 %v9277_v46, %v9191_v13 }
0x3f6d   :  { %v14415_v48 = vpop.f32.mrf.mxu1 }
0x3f6f   :  { %v9280_v49 = vpop.f32.mrf.mxu1 }
0x3f71   :  { %v14416_v52 = vpop.f32.mrf.mxu1 }
0x3f8b   :  { %v9320_v36 = vpop.f32.mrf.mxu1 }
0x3f8c   :  { %v9326_v40 = vpack.c.bf16 %v9320_v36, %v9320_v36 }
0x3f8d   :  { %v14435_v45 = vpop.f32.mrf.mxu1 }
0x3f8e   :  { %14440 = vmatmul.mubr.msk.bf16.vlgmr.msra.gmra.mxu0 %vm444_vm2, %v9326_v40 }
0x3f8f   :  { %14444 = vmatpush3.bf16.msra.mxu0 %v15967_v41  ;;  %v9323_v50 = vpop.f32.mrf.mxu1  ;;  %14459 = vmatprep.mubr.msk.bf16.mxu0 %vm14896_vm3, %v14895_v7 }
0x3f90   :  { %14445 = vmatprep.subr.bf16.mxu0 %v14895_v7  ;;  %v11307_v50 = vld [vmem:[%s17943_s8 + $0xe8] sm:$0xf] }
0x3f91   :  { %v14436_v55 = vpop.f32.mrf.mxu1 }
0x3f92   :  { %v11308_v55 = vld [vmem:[%s17944_s9 + $0xe8] sm:$0xf] }
0x3f93   :  { %14446 = vmatpush3.bf16.msra.mxu0 %v15973_v51 }
0x3f94   :  { %14447 = vmatprep.subr.bf16.mxu0 %v14895_v7 }
0x3f97   :  { %14448 = vmatpush3.bf16.msra.mxu0 %v15983_v1 }
0x3f98   :  { %14449 = vmatprep.subr.bf16.mxu0 %v14895_v7 }
0x3f9b   :  { %14450 = vmatpush3.bf16.msra.mxu0 %v15995_v12 }
0x3f9c   :  { %14451 = vmatprep.subr.bf16.mxu0 %v14895_v7 }
0x3f9f   :  { %14452 = vmatpush3.bf16.msra.mxu0 %v16007_v53 }
0x3fa0   :  { %14453 = vmatprep.subr.bf16.mxu0 %v14895_v7 }
0x3fa3   :  { %14454 = vmatpush3.bf16.msra.mxu0 %v16015_v3 }
0x3fa4   :  { %14455 = vmatprep.subr.bf16.mxu0 %v14895_v7 }
0x3fa7   :  { %14456 = vmatpush3.bf16.msra.mxu0 %v15952_v57 }
0x3fa8   :  { %14457 = vmatprep.subr.bf16.mxu0 %v14895_v7 }
0x3fab   :  { %14458 = vmatpush3.bf16.msra.mxu0 %v15950_v54 }
0x3fac   :  { %14489 = vmatprep.subr.bf16.mxu0 %v14895_v7 }
0x3fae   :  { %14460 = vmatmul.mubr.bf16.vlgmr.msra.gmra.mxu0 %v11295_v60  ;;  %v9793_v60 = vsel %vm451_vm1, %v11308_v55, 0 }
0x3faf   :  { %14491 = vmatprep.mubr.msk.bf16.mxu0 %vm14896_vm3, %v14895_v7  ;;  %14490 = vmatpush3.bf16.msra.mxu0 %v9517_v17 }
0x3fb0   :  { %14495 = vmatprep.subr.bf16.mxu0 %v14895_v7 }
0x404e   :  { %v9369_v4 = vpop.f32.mrf.mxu0 }
0x404f   :  { %v9375_v5 = vadd.f32 %v9369_v4, %v9283_v47 }
0x4050   :  { %v14441_v8 = vpop.f32.mrf.mxu0 }
0x4052   :  { %v9372_v11 = vpop.f32.mrf.mxu0 }
0x4054   :  { %v14442_v14 = vpop.f32.mrf.mxu0 }
0x406e   :  { %v9412_v16 = vpop.f32.mrf.mxu0 }
0x406f   :  { %v9418_v19 = vpack.c.bf16 %v9412_v16, %v9412_v16 }
0x4070   :  { %v14461_v9 = vpop.f32.mrf.mxu0 }
0x4071   :  { %14466 = vmatmul.mubr.msk.bf16.vlgmr.msra.gmra.mxu1 %vm444_vm2, %v9418_v19 }
0x4072   :  { %14470 = vmatpush3.bf16.msra.mxu1 %v15967_v41  ;;  %v9415_v20 = vpop.f32.mrf.mxu0  ;;  %14485 = vmatprep.mubr.msk.bf16.mxu1 %vm14896_vm3, %v14895_v7 }
0x4073   :  { %14471 = vmatprep.subr.bf16.mxu1 %v14895_v7  ;;  %v11310_v20 = vld [vmem:[%s17943_s8 + $0xec] sm:$0xf] }
0x4074   :  { %v14462_v44 = vpop.f32.mrf.mxu0 }
0x4075   :  { %v11311_v44 = vld [vmem:[%s17944_s9 + $0xec] sm:$0xf] }
0x4076   :  { %14472 = vmatpush3.bf16.msra.mxu1 %v15973_v51 }
0x4077   :  { %14473 = vmatprep.subr.bf16.mxu1 %v14895_v7 }
0x407a   :  { %14474 = vmatpush3.bf16.msra.mxu1 %v15983_v1 }
0x407b   :  { %14475 = vmatprep.subr.bf16.mxu1 %v14895_v7 }
0x407e   :  { %14476 = vmatpush3.bf16.msra.mxu1 %v15995_v12 }
0x407f   :  { %14477 = vmatprep.subr.bf16.mxu1 %v14895_v7 }
0x4082   :  { %14478 = vmatpush3.bf16.msra.mxu1 %v16007_v53 }
0x4083   :  { %14479 = vmatprep.subr.bf16.mxu1 %v14895_v7 }
0x4086   :  { %14480 = vmatpush3.bf16.msra.mxu1 %v16015_v3 }
0x4087   :  { %14481 = vmatprep.subr.bf16.mxu1 %v14895_v7 }
0x408a   :  { %14482 = vmatpush3.bf16.msra.mxu1 %v15952_v57 }
0x408b   :  { %14483 = vmatprep.subr.bf16.mxu1 %v14895_v7 }
0x408e   :  { %14484 = vmatpush3.bf16.msra.mxu1 %v15950_v54 }
0x408f   :  { %14515 = vmatprep.subr.bf16.mxu1 %v14895_v7 }
0x4091   :  { %14486 = vmatmul.mubr.bf16.vlgmr.msra.gmra.mxu1 %v11298_v6  ;;  %v9885_v6 = vsel %vm451_vm1, %v11311_v44, 0 }
0x4092   :  { %14517 = vmatprep.mubr.msk.bf16.mxu1 %vm14896_vm3, %v14895_v7  ;;  %14516 = vmatpush3.bf16.msra.mxu1 %v9609_v38 }
0x4093   :  { %14521 = vmatprep.subr.bf16.mxu1 %v14895_v7 }
0x4131   :  { %v9461_v34 = vpop.f32.mrf.mxu1 }
0x4132   :  { %v9467_v21 = vadd.f32 %v9461_v34, %v9375_v5 }
0x4133   :  { %v14467_v58 = vpop.f32.mrf.mxu1 }
0x4135   :  { %v9464_v0 = vpop.f32.mrf.mxu1 }
0x4137   :  { %v14468_v22 = vpop.f32.mrf.mxu1 }
0x4151   :  { %v9504_v61 = vpop.f32.mrf.mxu1 }
0x4152   :  { %v9510_v15 = vpack.c.bf16 %v9504_v61, %v9504_v61 }
0x4153   :  { %v14487_v24 = vpop.f32.mrf.mxu1 }
0x4154   :  { %14492 = vmatmul.mubr.msk.bf16.vlgmr.msra.gmra.mxu0 %vm444_vm2, %v9510_v15 }
0x4155   :  { %14496 = vmatpush3.bf16.msra.mxu0 %v15967_v41  ;;  %v9507_v33 = vpop.f32.mrf.mxu1  ;;  %14511 = vmatprep.mubr.msk.bf16.mxu0 %vm14896_vm3, %v14895_v7 }
0x4156   :  { %14497 = vmatprep.subr.bf16.mxu0 %v14895_v7  ;;  %v11313_v33 = vld [vmem:[%s17943_s8 + $0xf0] sm:$0xf] }
0x4157   :  { %v14488_v25 = vpop.f32.mrf.mxu1 }
0x4158   :  { %v11314_v25 = vld [vmem:[%s17944_s9 + $0xf0] sm:$0xf] }
0x4159   :  { %14498 = vmatpush3.bf16.msra.mxu0 %v15973_v51 }
0x415a   :  { %14499 = vmatprep.subr.bf16.mxu0 %v14895_v7 }
0x415d   :  { %14500 = vmatpush3.bf16.msra.mxu0 %v15983_v1 }
0x415e   :  { %14501 = vmatprep.subr.bf16.mxu0 %v14895_v7 }
0x4161   :  { %14502 = vmatpush3.bf16.msra.mxu0 %v15995_v12 }
0x4162   :  { %14503 = vmatprep.subr.bf16.mxu0 %v14895_v7 }
0x4165   :  { %14504 = vmatpush3.bf16.msra.mxu0 %v16007_v53 }
0x4166   :  { %14505 = vmatprep.subr.bf16.mxu0 %v14895_v7 }
0x4169   :  { %14506 = vmatpush3.bf16.msra.mxu0 %v16015_v3 }
0x416a   :  { %14507 = vmatprep.subr.bf16.mxu0 %v14895_v7 }
0x416d   :  { %14508 = vmatpush3.bf16.msra.mxu0 %v15952_v57 }
0x416e   :  { %14509 = vmatprep.subr.bf16.mxu0 %v14895_v7 }
0x4171   :  { %14510 = vmatpush3.bf16.msra.mxu0 %v15950_v54 }
0x4172   :  { %14541 = vmatprep.subr.bf16.mxu0 %v14895_v7 }
0x4174   :  { %14512 = vmatmul.mubr.bf16.vlgmr.msra.gmra.mxu0 %v11301_v59  ;;  %v9977_v59 = vsel %vm451_vm1, %v11314_v25, 0 }
0x4175   :  { %14543 = vmatprep.mubr.msk.bf16.mxu0 %vm14896_vm3, %v14895_v7  ;;  %14542 = vmatpush3.bf16.msra.mxu0 %v9701_v39 }
0x4176   :  { %14547 = vmatprep.subr.bf16.mxu0 %v14895_v7 }
0x4214   :  { %v9553_v2 = vpop.f32.mrf.mxu0 }
0x4215   :  { %v9559_v26 = vadd.f32 %v9553_v2, %v9467_v21 }
0x4216   :  { %v14493_v27 = vpop.f32.mrf.mxu0 }
0x4218   :  { %v9556_v13 = vpop.f32.mrf.mxu0 }
0x421a   :  { %v14494_v23 = vpop.f32.mrf.mxu0 }
0x4234   :  { %v9596_v28 = vpop.f32.mrf.mxu0 }
0x4235   :  { %v9602_v29 = vpack.c.bf16 %v9596_v28, %v9596_v28 }
0x4236   :  { %v14513_v30 = vpop.f32.mrf.mxu0 }
0x4237   :  { %14518 = vmatmul.mubr.msk.bf16.vlgmr.msra.gmra.mxu1 %vm444_vm2, %v9602_v29 }
0x4238   :  { %14522 = vmatpush3.bf16.msra.mxu1 %v15967_v41  ;;  %v9599_v31 = vpop.f32.mrf.mxu0  ;;  %14537 = vmatprep.mubr.msk.bf16.mxu1 %vm14896_vm3, %v14895_v7 }
0x4239   :  { %14523 = vmatprep.subr.bf16.mxu1 %v14895_v7  ;;  %v11316_v31 = vld [vmem:[%s17943_s8 + $0xf4] sm:$0xf] }
0x423a   :  { %v14514_v32 = vpop.f32.mrf.mxu0 }
0x423b   :  { %v11317_v32 = vld [vmem:[%s17944_s9 + $0xf4] sm:$0xf] }
0x423c   :  { %14524 = vmatpush3.bf16.msra.mxu1 %v15973_v51 }
0x423d   :  { %14525 = vmatprep.subr.bf16.mxu1 %v14895_v7 }
0x4240   :  { %14526 = vmatpush3.bf16.msra.mxu1 %v15983_v1 }
0x4241   :  { %14527 = vmatprep.subr.bf16.mxu1 %v14895_v7 }
0x4244   :  { %14528 = vmatpush3.bf16.msra.mxu1 %v15995_v12 }
0x4245   :  { %14529 = vmatprep.subr.bf16.mxu1 %v14895_v7 }
0x4248   :  { %14530 = vmatpush3.bf16.msra.mxu1 %v16007_v53 }
0x4249   :  { %14531 = vmatprep.subr.bf16.mxu1 %v14895_v7 }
0x424c   :  { %14532 = vmatpush3.bf16.msra.mxu1 %v16015_v3 }
0x424d   :  { %14533 = vmatprep.subr.bf16.mxu1 %v14895_v7 }
0x4250   :  { %14534 = vmatpush3.bf16.msra.mxu1 %v15952_v57 }
0x4251   :  { %14535 = vmatprep.subr.bf16.mxu1 %v14895_v7 }
0x4254   :  { %14536 = vmatpush3.bf16.msra.mxu1 %v15950_v54 }
0x4255   :  { %14567 = vmatprep.subr.bf16.mxu1 %v14895_v7 }
0x4257   :  { %14538 = vmatmul.mubr.bf16.vlgmr.msra.gmra.mxu1 %v11304_v35  ;;  %v10069_v35 = vsel %vm451_vm1, %v11317_v32, 0 }
0x4258   :  { %14569 = vmatprep.mubr.msk.bf16.mxu1 %vm14896_vm3, %v14895_v7  ;;  %14568 = vmatpush3.bf16.msra.mxu1 %v9793_v60 }
0x4259   :  { %14573 = vmatprep.subr.bf16.mxu1 %v14895_v7 }
0x42f7   :  { %v9645_v42 = vpop.f32.mrf.mxu1 }
0x42f8   :  { %v9651_v43 = vadd.f32 %v9645_v42, %v9559_v26 }
0x42f9   :  { %v14519_v46 = vpop.f32.mrf.mxu1 }
0x42fb   :  { %v9648_v47 = vpop.f32.mrf.mxu1 }
0x42fd   :  { %v14520_v48 = vpop.f32.mrf.mxu1 }
0x4317   :  { %v9688_v49 = vpop.f32.mrf.mxu1 }
0x4318   :  { %v9694_v52 = vpack.c.bf16 %v9688_v49, %v9688_v49 }
0x4319   :  { %v14539_v36 = vpop.f32.mrf.mxu1 }
0x431a   :  { %14544 = vmatmul.mubr.msk.bf16.vlgmr.msra.gmra.mxu0 %vm444_vm2, %v9694_v52 }
0x431b   :  { %14548 = vmatpush3.bf16.msra.mxu0 %v15967_v41  ;;  %v9691_v40 = vpop.f32.mrf.mxu1  ;;  %14563 = vmatprep.mubr.msk.bf16.mxu0 %vm14896_vm3, %v14895_v7 }
0x431c   :  { %14549 = vmatprep.subr.bf16.mxu0 %v14895_v7  ;;  %v11319_v40 = vld [vmem:[%s17943_s8 + $0xf8] sm:$0xf] }
0x431d   :  { %v14540_v45 = vpop.f32.mrf.mxu1 }
0x431e   :  { %v11320_v45 = vld [vmem:[%s17944_s9 + $0xf8] sm:$0xf] }
0x431f   :  { %14550 = vmatpush3.bf16.msra.mxu0 %v15973_v51 }
0x4320   :  { %14551 = vmatprep.subr.bf16.mxu0 %v14895_v7 }
0x4323   :  { %14552 = vmatpush3.bf16.msra.mxu0 %v15983_v1 }
0x4324   :  { %14553 = vmatprep.subr.bf16.mxu0 %v14895_v7 }
0x4327   :  { %14554 = vmatpush3.bf16.msra.mxu0 %v15995_v12 }
0x4328   :  { %14555 = vmatprep.subr.bf16.mxu0 %v14895_v7 }
0x432b   :  { %14556 = vmatpush3.bf16.msra.mxu0 %v16007_v53 }
0x432c   :  { %14557 = vmatprep.subr.bf16.mxu0 %v14895_v7 }
0x432f   :  { %14558 = vmatpush3.bf16.msra.mxu0 %v16015_v3 }
0x4330   :  { %14559 = vmatprep.subr.bf16.mxu0 %v14895_v7 }
0x4333   :  { %14560 = vmatpush3.bf16.msra.mxu0 %v15952_v57 }
0x4334   :  { %14561 = vmatprep.subr.bf16.mxu0 %v14895_v7 }
0x4337   :  { %14562 = vmatpush3.bf16.msra.mxu0 %v15950_v54 }
0x4338   :  { %14593 = vmatprep.subr.bf16.mxu0 %v14895_v7 }
0x433a   :  { %14564 = vmatmul.mubr.bf16.vlgmr.msra.gmra.mxu0 %v11307_v50  ;;  %v10161_v50 = vsel %vm451_vm1, %v11320_v45, 0 }
0x433b   :  { %14595 = vmatprep.mubr.msk.bf16.mxu0 %vm14896_vm3, %v14895_v7  ;;  %14594 = vmatpush3.bf16.msra.mxu0 %v9885_v6 }
0x433c   :  { %14599 = vmatprep.subr.bf16.mxu0 %v14895_v7 }
0x43da   :  { %v9737_v56 = vpop.f32.mrf.mxu0 }
0x43db   :  { %v9743_v63 = vadd.f32 %v9737_v56, %v9651_v43 }
0x43dc   :  { %v14545_v4 = vpop.f32.mrf.mxu0 }
0x43de   :  { %v9740_v5 = vpop.f32.mrf.mxu0 }
0x43e0   :  { %v14546_v8 = vpop.f32.mrf.mxu0 }
0x43fa   :  { %v9780_v11 = vpop.f32.mrf.mxu0 }
0x43fb   :  { %v9786_v14 = vpack.c.bf16 %v9780_v11, %v9780_v11 }
0x43fc   :  { %v14565_v16 = vpop.f32.mrf.mxu0 }
0x43fd   :  { %14570 = vmatmul.mubr.msk.bf16.vlgmr.msra.gmra.mxu1 %vm444_vm2, %v9786_v14 }
0x43fe   :  { %14574 = vmatpush3.bf16.msra.mxu1 %v15967_v41  ;;  %v9783_v19 = vpop.f32.mrf.mxu0  ;;  %14589 = vmatprep.mubr.msk.bf16.mxu1 %vm14896_vm3, %v14895_v7 }
0x43ff   :  { %14575 = vmatprep.subr.bf16.mxu1 %v14895_v7 }
0x4400   :  { %v14566_v9 = vpop.f32.mrf.mxu0 }
0x4402   :  { %14576 = vmatpush3.bf16.msra.mxu1 %v15973_v51 }
0x4403   :  { %14577 = vmatprep.subr.bf16.mxu1 %v14895_v7 }
0x4406   :  { %14578 = vmatpush3.bf16.msra.mxu1 %v15983_v1 }
0x4407   :  { %14579 = vmatprep.subr.bf16.mxu1 %v14895_v7 }
0x440a   :  { %14580 = vmatpush3.bf16.msra.mxu1 %v15995_v12 }
0x440b   :  { %14581 = vmatprep.subr.bf16.mxu1 %v14895_v7 }
0x440e   :  { %14582 = vmatpush3.bf16.msra.mxu1 %v16007_v53 }
0x440f   :  { %14583 = vmatprep.subr.bf16.mxu1 %v14895_v7 }
0x4412   :  { %14584 = vmatpush3.bf16.msra.mxu1 %v16015_v3 }
0x4413   :  { %14585 = vmatprep.subr.bf16.mxu1 %v14895_v7 }
0x4416   :  { %14586 = vmatpush3.bf16.msra.mxu1 %v15952_v57 }
0x4417   :  { %14587 = vmatprep.subr.bf16.mxu1 %v14895_v7 }
0x441a   :  { %14588 = vmatpush3.bf16.msra.mxu1 %v15950_v54 }
0x441b   :  { %14619 = vmatprep.subr.bf16.mxu1 %v14895_v7 }
0x441d   :  { %14590 = vmatmul.mubr.bf16.vlgmr.msra.gmra.mxu1 %v11310_v20 }
0x441e   :  { %14621 = vmatprep.mubr.msk.bf16.mxu1 %vm14896_vm3, %v14895_v7  ;;  %14620 = vmatpush3.bf16.msra.mxu1 %v9977_v59 }
0x441f   :  { %14625 = vmatprep.subr.bf16.mxu1 %v14895_v7 }
0x44bd   :  { %v9829_v62 = vpop.f32.mrf.mxu1 }
0x44be   :  { %v9835_v17 = vadd.f32 %v9829_v62, %v9743_v63 }
0x44bf   :  { %v14571_v34 = vpop.f32.mrf.mxu1 }
0x44c1   :  { %v9832_v21 = vpop.f32.mrf.mxu1 }
0x44c3   :  { %v14572_v58 = vpop.f32.mrf.mxu1 }
0x44dd   :  { %v9872_v0 = vpop.f32.mrf.mxu1 }
0x44de   :  { %v9878_v22 = vpack.c.bf16 %v9872_v0, %v9872_v0 }
0x44df   :  { %v14591_v61 = vpop.f32.mrf.mxu1 }
0x44e0   :  { %14596 = vmatmul.mubr.msk.bf16.vlgmr.msra.gmra.mxu0 %vm444_vm2, %v9878_v22 }
0x44e1   :  { %14600 = vmatpush3.bf16.msra.mxu0 %v15967_v41  ;;  %v9875_v15 = vpop.f32.mrf.mxu1  ;;  %14615 = vmatprep.mubr.msk.bf16.mxu0 %vm14896_vm3, %v14895_v7 }
0x44e2   :  { %14601 = vmatprep.subr.bf16.mxu0 %v14895_v7 }
0x44e3   :  { %v14592_v24 = vpop.f32.mrf.mxu1 }
0x44e5   :  { %14602 = vmatpush3.bf16.msra.mxu0 %v15973_v51 }
0x44e6   :  { %14603 = vmatprep.subr.bf16.mxu0 %v14895_v7 }
0x44e9   :  { %14604 = vmatpush3.bf16.msra.mxu0 %v15983_v1 }
0x44ea   :  { %14605 = vmatprep.subr.bf16.mxu0 %v14895_v7 }
0x44ed   :  { %14606 = vmatpush3.bf16.msra.mxu0 %v15995_v12 }
0x44ee   :  { %14607 = vmatprep.subr.bf16.mxu0 %v14895_v7 }
0x44f1   :  { %14608 = vmatpush3.bf16.msra.mxu0 %v16007_v53 }
0x44f2   :  { %14609 = vmatprep.subr.bf16.mxu0 %v14895_v7 }
0x44f5   :  { %14610 = vmatpush3.bf16.msra.mxu0 %v16015_v3 }
0x44f6   :  { %14611 = vmatprep.subr.bf16.mxu0 %v14895_v7 }
0x44f9   :  { %14612 = vmatpush3.bf16.msra.mxu0 %v15952_v57 }
0x44fa   :  { %14613 = vmatprep.subr.bf16.mxu0 %v14895_v7 }
0x44fd   :  { %14614 = vmatpush3.bf16.msra.mxu0 %v15950_v54 }
0x44fe   :  { %14645 = vmatprep.subr.bf16.mxu0 %v14895_v7 }
0x4500   :  { %14616 = vmatmul.mubr.bf16.vlgmr.msra.gmra.mxu0 %v11313_v33 }
0x4501   :  { %14647 = vmatprep.mubr.msk.bf16.mxu0 %vm14896_vm3, %v14895_v7  ;;  %14646 = vmatpush3.bf16.msra.mxu0 %v10069_v35 }
0x4502   :  { %14651 = vmatprep.subr.bf16.mxu0 %v14895_v7 }
0x45a0   :  { %v9921_v18 = vpop.f32.mrf.mxu0 }
0x45a1   :  { %v9927_v38 = vadd.f32 %v9921_v18, %v9835_v17 }
0x45a2   :  { %v14597_v2 = vpop.f32.mrf.mxu0 }
0x45a4   :  { %v9924_v26 = vpop.f32.mrf.mxu0 }
0x45a6   :  { %v14598_v27 = vpop.f32.mrf.mxu0 }
0x45c0   :  { %v9964_v13 = vpop.f32.mrf.mxu0 }
0x45c1   :  { %v9970_v23 = vpack.c.bf16 %v9964_v13, %v9964_v13 }
0x45c2   :  { %v14617_v28 = vpop.f32.mrf.mxu0 }
0x45c3   :  { %14622 = vmatmul.mubr.msk.bf16.vlgmr.msra.gmra.mxu1 %vm444_vm2, %v9970_v23 }
0x45c4   :  { %14626 = vmatpush3.bf16.msra.mxu1 %v15967_v41  ;;  %v9967_v29 = vpop.f32.mrf.mxu0  ;;  %14641 = vmatprep.mubr.msk.bf16.mxu1 %vm14896_vm3, %v14895_v7 }
0x45c5   :  { %14627 = vmatprep.subr.bf16.mxu1 %v14895_v7 }
0x45c6   :  { %v14618_v30 = vpop.f32.mrf.mxu0 }
0x45c8   :  { %14628 = vmatpush3.bf16.msra.mxu1 %v15973_v51 }
0x45c9   :  { %14629 = vmatprep.subr.bf16.mxu1 %v14895_v7 }
0x45cc   :  { %14630 = vmatpush3.bf16.msra.mxu1 %v15983_v1 }
0x45cd   :  { %14631 = vmatprep.subr.bf16.mxu1 %v14895_v7 }
0x45d0   :  { %14632 = vmatpush3.bf16.msra.mxu1 %v15995_v12 }
0x45d1   :  { %14633 = vmatprep.subr.bf16.mxu1 %v14895_v7 }
0x45d4   :  { %14634 = vmatpush3.bf16.msra.mxu1 %v16007_v53 }
0x45d5   :  { %14635 = vmatprep.subr.bf16.mxu1 %v14895_v7 }
0x45d8   :  { %14636 = vmatpush3.bf16.msra.mxu1 %v16015_v3 }
0x45d9   :  { %14637 = vmatprep.subr.bf16.mxu1 %v14895_v7 }
0x45dc   :  { %14638 = vmatpush3.bf16.msra.mxu1 %v15952_v57 }
0x45dd   :  { %14639 = vmatprep.subr.bf16.mxu1 %v14895_v7 }
0x45e0   :  { %14640 = vmatpush3.bf16.msra.mxu1 %v15950_v54 }
0x45e1   :  { %14671 = vmatprep.subr.bf16.mxu1 %v14895_v7 }
0x45e3   :  { %14642 = vmatmul.mubr.bf16.vlgmr.msra.gmra.mxu1 %v11316_v31 }
0x45e4   :  { %14673 = vmatprep.mubr.msk.bf16.mxu1 %vm14896_vm3, %v14895_v7  ;;  %14672 = vmatpush3.bf16.msra.mxu1 %v10161_v50 }
0x45e5   :  { %14677 = vmatprep.subr.bf16.mxu1 %v14895_v7 }
0x4683   :  { %v10013_v37 = vpop.f32.mrf.mxu1 }
0x4684   :  { %v10019_v39 = vadd.f32 %v10013_v37, %v9927_v38 }
0x4685   :  { %v14623_v42 = vpop.f32.mrf.mxu1 }
0x4687   :  { %v10016_v43 = vpop.f32.mrf.mxu1 }
0x4689   :  { %v14624_v46 = vpop.f32.mrf.mxu1 }
0x46a3   :  { %v10056_v47 = vpop.f32.mrf.mxu1 }
0x46a4   :  { %v10062_v48 = vpack.c.bf16 %v10056_v47, %v10056_v47 }
0x46a5   :  { %v14643_v49 = vpop.f32.mrf.mxu1 }
0x46a6   :  { %14648 = vmatmul.mubr.msk.bf16.vlgmr.msra.gmra.mxu0 %vm444_vm2, %v10062_v48  ;;  %v11326_v48 = vld [vmem:[%s17946_s10 + $0x1] sm:$0x1]  ;;  %v10323_v49 = vld [vmem:[%s17946_s10] sm:$0x1] }
0x46a7   :  { %14652 = vmatpush3.bf16.msra.mxu0 %v15967_v41  ;;  %v10059_v52 = vpop.f32.mrf.mxu1  ;;  %14667 = vmatprep.mubr.msk.bf16.mxu0 %vm14896_vm3, %v14895_v7 }
0x46a8   :  { %14653 = vmatprep.subr.bf16.mxu0 %v14895_v7  ;;  %v14881_v52 = vld [vmem:[%s17945_s11 + $0x8] sm:$0xff]  }
0x46a9   :  { %v14644_v36 = vpop.f32.mrf.mxu1 }
0x46aa   :  { %v14882_v36 = vld [vmem:[%s17945_s11] sm:$0xff]  }
0x46ab   :  { %14654 = vmatpush3.bf16.msra.mxu0 %v15973_v51 }
0x46ac   :  { %14655 = vmatprep.subr.bf16.mxu0 %v14895_v7 }
0x46af   :  { %14656 = vmatpush3.bf16.msra.mxu0 %v15983_v1 }
0x46b0   :  { %14657 = vmatprep.subr.bf16.mxu0 %v14895_v7 }
0x46b3   :  { %14658 = vmatpush3.bf16.msra.mxu0 %v15995_v12 }
0x46b4   :  { %14659 = vmatprep.subr.bf16.mxu0 %v14895_v7 }
0x46b7   :  { %14660 = vmatpush3.bf16.msra.mxu0 %v16007_v53 }
0x46b8   :  { %14661 = vmatprep.subr.bf16.mxu0 %v14895_v7 }
0x46bb   :  { %14662 = vmatpush3.bf16.msra.mxu0 %v16015_v3 }
0x46bc   :  { %14663 = vmatprep.subr.bf16.mxu0 %v14895_v7 }
0x46bf   :  { %14664 = vmatpush3.bf16.msra.mxu0 %v15952_v57 }
0x46c0   :  { %14665 = vmatprep.subr.bf16.mxu0 %v14895_v7 }
0x46c3   :  { %14666 = vmatpush3.bf16.msra.mxu0 %v15950_v54 }
0x46c4   :  { %14697 = vmatprep.subr.bf16.mxu0 %v14895_v7 }
0x46c6   :  { %14668 = vmatmul.mubr.bf16.vlgmr.msra.gmra.mxu0 %v11319_v40 }
0x46c7   :  { %14699 = vmatprep.mubr.msk.bf16.mxu0 %vm14896_vm3, %v14895_v7 }
0x4766   :  { %v10105_v55 = vpop.f32.mrf.mxu0 }
0x4767   :  { %v10111_v60 = vadd.f32 %v10105_v55, %v10019_v39 }
0x4768   :  { %v14649_v56 = vpop.f32.mrf.mxu0 }
0x476a   :  { %v10108_v63 = vpop.f32.mrf.mxu0 }
0x476c   :  { %v14650_v4 = vpop.f32.mrf.mxu0 }
0x4786   :  { %v10148_v5 = vpop.f32.mrf.mxu0 }
0x4787   :  { %v10154_v8 = vpack.c.bf16 %v10148_v5, %v10148_v5 }
0x4788   :  { %v14669_v11 = vpop.f32.mrf.mxu0 }
0x4789   :  { %14674 = vmatmul.mubr.msk.bf16.vlgmr.msra.gmra.mxu1 %vm444_vm2, %v10154_v8  ;;  %v11334_v11 = vld [vmem:[%s17946_s10 + $0x2] sm:$0x1] }
0x478a   :  { %14678 = vmatpush3.bf16.msra.mxu1 %v15967_v41  ;;  %v10151_v14 = vpop.f32.mrf.mxu0  ;;  %14693 = vmatprep.mubr.msk.bf16.mxu1 %vm14896_vm3, %v14895_v7  ;;  %v11322_v41 = vld [vmem:[%s17943_s8 + $0xfc] sm:$0xf] }
0x478b   :  { %14679 = vmatprep.subr.bf16.mxu1 %v14895_v7  ;;  %v11340_v14 = vld [vmem:[%s17946_s10 + $0x3] sm:$0x1] }
0x478c   :  { %v14670_v16 = vpop.f32.mrf.mxu0 }
0x478d   :  { %v14883_v16 = vld [vmem:[%s17947_s13 + $0x8] sm:$0xff]  }
0x478e   :  { %14680 = vmatpush3.bf16.msra.mxu1 %v15973_v51  ;;  %v11323_v51 = vld [vmem:[%s17944_s9 + $0xfc] sm:$0xf] }
0x478f   :  { %14681 = vmatprep.subr.bf16.mxu1 %v14895_v7 }
0x4792   :  { %14682 = vmatpush3.bf16.msra.mxu1 %v15983_v1 }
0x4793   :  { %14683 = vmatprep.subr.bf16.mxu1 %v14895_v7 }
0x4796   :  { %14684 = vmatpush3.bf16.msra.mxu1 %v15995_v12 }
0x4797   :  { %14685 = vmatprep.subr.bf16.mxu1 %v14895_v7 }
0x479a   :  { %14686 = vmatpush3.bf16.msra.mxu1 %v16007_v53 }
0x479b   :  { %14687 = vmatprep.subr.bf16.mxu1 %v14895_v7 }
0x479e   :  { %14688 = vmatpush3.bf16.msra.mxu1 %v16015_v3 }
0x479f   :  { %14689 = vmatprep.subr.bf16.mxu1 %v14895_v7 }
0x47a2   :  { %14690 = vmatpush3.bf16.msra.mxu1 %v15952_v57  ;;  %v10253_v57 = vsel %vm451_vm1, %v11323_v51, 0  ;;  %v10723_v51 = vpack.c.bf16 %v16060_v10, %v16060_v10  ;;  %v14886_v10 = vld [vmem:[%s17945_s11 + $0x18] sm:$0xff]  }
0x47a3   :  { %14691 = vmatprep.subr.bf16.mxu1 %v14895_v7  ;;  %14698 = vmatpush3.bf16.msra.mxu0 %v10253_v57  ;;  %v14885_v57 = vld [vmem:[%s17945_s11 + $0x10] sm:$0xff]  }
0x47a4   :  { %14703 = vmatprep.subr.bf16.mxu0 %v14895_v7 }
0x47a6   :  { %14692 = vmatpush3.bf16.msra.mxu1 %v15950_v54 }
0x47a7   :  { %14709 = vmatprep.subr.bf16.mxu1 %v14895_v7 }
0x47a9   :  { %14694 = vmatmul.mubr.bf16.vlgmr.msra.gmra.mxu1 %v11322_v41  ;;  %v14884_v41 = vld [vmem:[%s17947_s13] sm:$0xff]  }
0x47aa   :  { %14711 = vmatprep.mubr.msk.bf16.mxu1 %vm14896_vm3, %v14895_v7 }
0x4849   :  { %v10197_v54 = vpop.f32.mrf.mxu1 }
0x484a   :  { %v10203_v1 = vadd.f32 %v10197_v54, %v10111_v60 }
0x484b   :  { %v14675_v12 = vpop.f32.mrf.mxu1 }
0x484d   :  { %v10200_v53 = vpop.f32.mrf.mxu1 }
0x484f   :  { %v14676_v3 = vpop.f32.mrf.mxu1 }
0x4869   :  { %v10240_v19 = vpop.f32.mrf.mxu1 }
0x486a   :  { %v10246_v9 = vpack.c.bf16 %v10240_v19, %v10240_v19 }
0x486b   :  { %v14695_v20 = vpop.f32.mrf.mxu1 }
0x486c   :  { %14700 = vmatmul.mubr.msk.bf16.vlgmr.msra.gmra.mxu0 %vm444_vm2, %v10246_v9 }
0x486d   :  { %v10243_v44 = vpop.f32.mrf.mxu1  ;;  %14705 = vmatprep.mubr.msk.bf16.mxu0 %vm14896_vm3, %v14895_v7 }
0x486f   :  { %v14696_v6 = vpop.f32.mrf.mxu1 }
0x492c   :  { %v10289_v62 = vpop.f32.mrf.mxu0 }
0x492d   :  { %v10295_v17 = vadd.f32 %v10289_v62, %v10203_v1 }
0x492e   :  { %v14701_v34 = vpop.f32.mrf.mxu0 }
0x492f   :  { %v10296_v21 = vsel %vm2410_vm4, %v10295_v17, 0.0  ;;  %v10304_v58 = vmul.f32 %v10295_v17, %v10295_v17 }
0x4930   :  { %v10297_v0 = vrot.slane %v10296_v21, 4  ;;  %v10292_v22 = vpop.f32.mrf.mxu0 }
0x4931   :  { %v10305_v61 = vsel %vm2410_vm4, %v10304_v58, 0.0 }
0x4932   :  { %v10298_v15 = vadd.f32 %v10297_v0, %v10296_v21  ;;  %v10306_v24 = vrot.slane %v10305_v61, 4  ;;  %v14702_v33 = vpop.f32.mrf.mxu0 }
0x4934   :  { %v10299_v25 = vrot.slane %v10298_v15, 2  ;;  %v10307_v59 = vadd.f32 %v10306_v24, %v10305_v61 }
0x4936   :  { %v10300_v18 = vadd.f32 %v10299_v25, %v10298_v15  ;;  %v10308_v38 = vrot.slane %v10307_v59, 2 }
0x4938   :  { %v10301_v2 = vrot.slane %v10300_v18, 1  ;;  %v10309_v26 = vadd.f32 %v10308_v38, %v10307_v59  ;;  %v14888_v38 = vld [vmem:[%s17948_s12] sm:$0xff]  }
0x493a   :  { %v10302_v27 = vadd.f32 %v10301_v2, %v10300_v18  ;;  %v10310_v13 = vrot.slane %v10309_v26, 1  ;;  %v14887_v18 = vld [vmem:[%s17948_s12 + $0x8] sm:$0xff]  }
0x493c   :  { %v10303_v23 = vmul.f32 0.125, %v10302_v27  ;;  %v10311_v28 = vadd.f32 %v10310_v13, %v10309_v26 }
0x493e   :  { %v10312_v29 = vmul.f32 0.125, %v10311_v28  ;;  %v10313_v30 = vmul.f32 %v10303_v23, %v10303_v23  ;;  %v10315_v35 = vsub.f32 %v10295_v17, %v10303_v23 }
0x4940   :  { %v10314_v31 = vsub.f32 %v10312_v29, %v10313_v30 }
0x4942   :  { %v10316_v32 = vadd.f32 1e-05, %v10314_v31 }
0x4944   :  { %14891 = vrsqrt.f32 %v10316_v32 }
0x4951   :  { %v14892_v37 = vpop.eup %14891 }
0x4952   :  { %v10318_v39 = vmul.f32 %v14892_v37, %v10315_v35 }
0x4954   :  { %vm10319_vm0 = vcmp.gt.f32.partialorder %v10318_v39, 0.0  ;;  %v10320_v42 = vmul.f32 0.2, %v10318_v39 }
0x4956   :  { %v10321_v43 = vsel %vm10319_vm0, %v10318_v39, %v10320_v42 }
0x4957   :  { %v10322_v46 = vpack.c.bf16 %v10321_v43, %v10321_v43 }
0x4959   :  { %v10328_v47 = vsel %vm451_vm1, %v10322_v46, 0  ;;  %vm10842_vm1 = vcmask 1024  }
0x495a   :  { %14704 = vmatpush3.bf16.msra.mxu0 %v10328_v47  ;;  %14710 = vmatpush3.bf16.msra.mxu1 %v10328_v47 }
0x495b   :  { %14715 = vmatprep.subr.bf16.mxu0 %v14895_v7  ;;  %14721 = vmatprep.subr.bf16.mxu1 %v14895_v7 }
0x495d   :  { %14712 = vmatmul.mubr.msk.bf16.vlgmr.msra.gmra.mxu1 %vm444_vm2, %v11326_v48  ;;  %14706 = vmatmul.mubr.msk.bf16.vlgmr.msra.gmra.mxu0 %vm444_vm2, %v10323_v49 }
0x495e   :  { %14716 = vmatpush3.bf16.msra.mxu0 %v14881_v52  ;;  %14717 = vmatprep.mubr.msk.bf16.mxu0 %vm14896_vm3, %v14895_v7 }
0x495f   :  { %14727 = vmatprep.subr.bf16.mxu0 %v14895_v7  ;;  %14723 = vmatprep.mubr.msk.bf16.mxu1 %vm14896_vm3, %v14895_v7 }
0x4960   :  { %14722 = vmatpush3.bf16.msra.mxu1 %v14882_v36 }
0x4961   :  { %14733 = vmatprep.subr.bf16.mxu1 %v14895_v7 }
0x4a1d   :  { %v10412_v40 = vpop.f32.mrf.mxu1  ;;  %v10364_v45 = vpop.f32.mrf.mxu0 }
0x4a1e   :  { %v10418_v50 = vpack.c.bf16 %v10412_v40, %v10412_v40  ;;  %v10370_v55 = vpack.c.bf16 %v10364_v45, %v10364_v45 }
0x4a1f   :  { %v14713_v60 = vpop.f32.mrf.mxu1  ;;  %v14707_v56 = vpop.f32.mrf.mxu0 }
0x4a20   :  { %14718 = vmatmul.mubr.msk.bf16.vlgmr.msra.gmra.mxu0 %vm2410_vm4, %v10418_v50  ;;  %14724 = vmatmul.mubr.msk.bf16.vlgmr.msra.gmra.mxu1 %vm2410_vm4, %v10370_v55 }
0x4a21   :  { %14728 = vmatpush3.bf16.msra.mxu0 %v10328_v47  ;;  %v10415_v63 = vpop.f32.mrf.mxu1  ;;  %14729 = vmatprep.mubr.msk.bf16.mxu0 %vm14896_vm3, %v14895_v7  ;;  %v10367_v4 = vpop.f32.mrf.mxu0 }
0x4a22   :  { %14739 = vmatprep.subr.bf16.mxu0 %v14895_v7  ;;  %14735 = vmatprep.mubr.msk.bf16.mxu1 %vm14896_vm3, %v14895_v7 }
0x4a23   :  { %v14714_v5 = vpop.f32.mrf.mxu1  ;;  %v14708_v8 = vpop.f32.mrf.mxu0  ;;  %14734 = vmatpush3.bf16.msra.mxu1 %v14885_v57 }
0x4a24   :  { %14745 = vmatprep.subr.bf16.mxu1 %v14895_v7 }
0x4a28   :  { %14730 = vmatmul.mubr.msk.bf16.vlgmr.msra.gmra.mxu0 %vm444_vm2, %v11334_v11 }
0x4a29   :  { %14740 = vmatpush3.bf16.msra.mxu0 %v10328_v47  ;;  %14741 = vmatprep.mubr.msk.bf16.mxu0 %vm14896_vm3, %v14895_v7 }
0x4a2a   :  { %14751 = vmatprep.subr.bf16.mxu0 %v14895_v7 }
0x4a30   :  { %14742 = vmatmul.mubr.msk.bf16.vlgmr.msra.gmra.mxu0 %vm444_vm2, %v11340_v14 }
0x4a31   :  { %14752 = vmatpush3.bf16.msra.mxu0 %v14883_v16  ;;  %14755 = vmatprep.mubr.msk.bf16.mxu0 %vm14896_vm3, %v14895_v7 }
0x4a32   :  { %14753 = vmatprep.subr.bf16.mxu0 %v14895_v7 }
0x4a35   :  { %14754 = vmatpush3.bf16.msra.mxu0 %v14884_v41 }
0x4a38   :  { %14756 = vmatmul.mubr.msk.bf16.vlgmr.msra.gmra.mxu0 %vm2470_vm9, %v10723_v51 }
0x4ae0   :  { %v10465_v54 = vpop.f32.mrf.mxu0  ;;  %v10514_v1 = vpop.f32.mrf.mxu1 }
0x4ae1   :  { %v10515_v12 = vadd.f32 %v10514_v1, %v10465_v54 }
0x4ae2   :  { %v14719_v53 = vpop.f32.mrf.mxu0  ;;  %v14725_v3 = vpop.f32.mrf.mxu1 }
0x4ae4   :  { %v10468_v19 = vpop.f32.mrf.mxu0  ;;  %v10517_v9 = vpop.f32.mrf.mxu1 }
0x4ae6   :  { %v14720_v20 = vpop.f32.mrf.mxu0  ;;  %v14726_v44 = vpop.f32.mrf.mxu1 }
0x4ae8   :  { %v10559_v6 = vpop.f32.mrf.mxu0 }
0x4ae9   :  { %v10565_v62 = vpack.c.bf16 %v10559_v6, %v10559_v6 }
0x4aea   :  { %v14731_v17 = vpop.f32.mrf.mxu0 }
0x4aeb   :  { %14736 = vmatmul.mubr.msk.bf16.vlgmr.msra.gmra.mxu1 %vm2410_vm4, %v10565_v62 }
0x4aec   :  { %v10562_v34 = vpop.f32.mrf.mxu0  ;;  %14746 = vmatpush3.bf16.msra.mxu1 %v14886_v10  ;;  %14747 = vmatprep.mubr.msk.bf16.mxu1 %vm14896_vm3, %v14895_v7 }
0x4aed   :  { %14759 = vmatprep.subr.bf16.mxu1 %v14895_v7 }
0x4aee   :  { %v14732_v21 = vpop.f32.mrf.mxu0 }
0x4af0   :  { %v10658_v58 = vpop.f32.mrf.mxu0 }
0x4af1   :  { %v10664_v0 = vpack.c.bf16 %v10658_v58, %v10658_v58 }
0x4af2   :  { %v14743_v22 = vpop.f32.mrf.mxu0 }
0x4af3   :  { %14748 = vmatmul.mubr.msk.bf16.vlgmr.msra.gmra.mxu1 %vm2410_vm4, %v10664_v0 }
0x4af4   :  { %v10661_v61 = vpop.f32.mrf.mxu0  ;;  %14763 = vmatprep.mubr.msk.bf16.mxu1 %vm14896_vm3, %v14895_v7  ;;  %14760 = vmatpush3.bf16.msra.mxu1 %v14887_v18 }
0x4af5   :  { %14761 = vmatprep.subr.bf16.mxu1 %v14895_v7 }
0x4af6   :  { %v14744_v15 = vpop.f32.mrf.mxu0 }
0x4af8   :  { %v10777_v24 = vpop.f32.mrf.mxu0  ;;  %14762 = vmatpush3.bf16.msra.mxu1 %v14888_v38 }
0x4afa   :  { %v14757_v33 = vpop.f32.mrf.mxu0 }
0x4afc   :  { %v10780_v25 = vpop.f32.mrf.mxu0 }
0x4afe   :  { %v14758_v59 = vpop.f32.mrf.mxu0 }
0x4bab   :  { %v10612_v2 = vpop.f32.mrf.mxu1 }
0x4bac   :  { %v10618_v23 = vadd.f32 %v10612_v2, %v10515_v12 }
0x4bad   :  { %v14737_v26 = vpop.f32.mrf.mxu1 }
0x4baf   :  { %v10615_v27 = vpop.f32.mrf.mxu1 }
0x4bb1   :  { %v14738_v13 = vpop.f32.mrf.mxu1 }
0x4bb3   :  { %v10711_v28 = vpop.f32.mrf.mxu1 }
0x4bb4   :  { %v10717_v29 = vadd.f32 %v10711_v28, %v10618_v23 }
0x4bb5   :  { %v14749_v30 = vpop.f32.mrf.mxu1 }
0x4bb6   :  { %v10718_v31 = vpack.c.bf16 %v10717_v29, %v10717_v29 }
0x4bb7   :  { %v10714_v32 = vpop.f32.mrf.mxu1 }
0x4bb8   :  { %14764 = vmatmul.mubr.msk.bf16.vlgmr.msra.gmra.mxu1 %vm2470_vm9, %v10718_v31 }
0x4bb9   :  { %v14750_v35 = vpop.f32.mrf.mxu1 }
0x4c78   :  { %v10832_v37 = vpop.f32.mrf.mxu1 }
0x4c79   :  { %v10833_v7 = vadd.f32 %v10832_v37, %v10777_v24 }
0x4c7a   :  { %v14765_v39 = vpop.f32.mrf.mxu1 }
0x4c7b   :  { %v10838_v42 = vmul.f32 0.5, %v10833_v7 }
0x4c7c   :  { %v10835_v43 = vpop.f32.mrf.mxu1 }
0x4c7d   :  { %14893 = vtanh.f32 %v10838_v42 }
0x4c7e   :  { %v14766_v46 = vpop.f32.mrf.mxu1 }
0x4c8a   :  { %v14894_v47 = vpop.eup %14893 }
0x4c8b   :  { %v10840_v48 = vadd.f32 1.0, %v14894_v47 }
0x4c8d   :  { %v10841_v49 = vmul.f32 0.5, %v10840_v48 }
0x4c8f   :  { %10843 = vst.msk [vmem:[%s17949_s14] sm:$0x3] %vm10842_vm1, %v10841_v49 }

</bundles_post_ra>
